<compile_context>
chip_gen: v7x
topology: tpu7x:2x2x1
jax: 0.10.0
libtpu: 0.0.40
codegen_flags: <defaults>
</compile_context>

<pallas_src>
import numpy as np
import jax
import jax.numpy as jnp
from jax.experimental import pallas as pl
from jax.experimental.pallas import tpu as pltpu

LANE = 128     # TPU lane width; channel dims are zero-padded to a multiple
_EPS = 1e-5    # BatchNorm eps (PyTorch default)


def _round_up(v, m):
    return (v + m - 1) // m * m


def _interp_matrix(n_in, n_out):
    """1-D linear interpolation matrix (n_out, n_in), align_corners=True."""
    m = np.zeros((n_out, n_in), dtype=np.float32)
    if n_in == 1:
        m[:, 0] = 1.0
        return m
    if n_out == 1:
        m[0, 0] = 1.0
        return m
    scale = (n_in - 1) / (n_out - 1)
    for o in range(n_out):
        src = o * scale
        lo = min(int(np.floor(src)), n_in - 2)
        frac = src - lo
        m[o, lo] += 1.0 - frac
        m[o, lo + 1] += frac
    return m


# ---------------------------------------------------------------------------
# Stage 1 (grid over batch, parallel): separable bilinear upsample of x & skip,
# lane-aligned channel concat into a zero-halo buffer, conv1 (3x3, pad 1) and
# per-sample partial sums for train-mode BN1 statistics.
# ---------------------------------------------------------------------------
def _upsample_conv1_kernel(x_ref, s_ref, mwx_ref, mhx_ref, mws_ref, mhs_ref,
                           w1_ref, cat_ref, a1_ref, s1_ref, q1_ref):
    Hi, CXP = x_ref.shape[1], x_ref.shape[3]
    Hs, CSP = s_ref.shape[1], s_ref.shape[3]
    Hp, Wp, C2 = cat_ref.shape[1], cat_ref.shape[2], cat_ref.shape[3]
    _, Ho, Wo, Co = a1_ref.shape
    R = Ho * Wo

    # ---- x branch: W-resize as a batched MXU matmul over input rows ----
    xw = jnp.einsum('hqw,hwc->hqc', mwx_ref[...], x_ref[0],
                    preferred_element_type=jnp.float32)        # (Hi, Wo, CXP)
    # H-resize: accumulate the Hi rows with broadcast weights (VPU).
    xu = jnp.zeros((Ho, Wo, CXP), jnp.float32)
    for h in range(Hi):
        xu = xu + mhx_ref[h] * xw[h]                           # (Ho,1,C)*(Wo,C)

    # ---- skip branch ----
    sw = jnp.einsum('hqw,hwc->hqc', mws_ref[...], s_ref[0],
                    preferred_element_type=jnp.float32)        # (Hs, Wo, CSP)
    su = jnp.zeros((Ho, Wo, CSP), jnp.float32)
    for h in range(Hs):
        su = su + mhs_ref[h] * sw[h]

    # ---- channel concat straight into the zero-halo conv input buffer ----
    # Only the 1-pixel border is zeroed; interior is fully overwritten.
    # Channel offsets 0 / CXP are multiples of 128 -> full-width stores.
    cat_ref[0, 0:1, :, :] = jnp.zeros((1, Wp, C2), jnp.float32)
    cat_ref[0, Hp - 1:Hp, :, :] = jnp.zeros((1, Wp, C2), jnp.float32)
    cat_ref[0, :, 0:1, :] = jnp.zeros((Hp, 1, C2), jnp.float32)
    cat_ref[0, :, Wp - 1:Wp, :] = jnp.zeros((Hp, 1, C2), jnp.float32)
    cat_ref[0, 1:Ho + 1, 1:Wo + 1, 0:CXP] = xu
    cat_ref[0, 1:Ho + 1, 1:Wo + 1, CXP:C2] = su

    # ---- conv1: 3x3, pad 1, stride 1 as 9 shifted full-K (=C2) matmuls ----
    acc = jnp.zeros((R, Co), jnp.float32)
    for kh in range(3):
        for kw in range(3):
            win = cat_ref[0, kh:kh + Ho, kw:kw + Wo, :].reshape(R, C2)
            acc = acc + jnp.dot(win, w1_ref[kh * 3 + kw],
                                preferred_element_type=jnp.float32)
    # conv1 bias omitted: train-mode BN subtracts the batch mean right after,
    # which cancels any per-channel constant exactly.
    a1_ref[0] = acc.reshape(Ho, Wo, Co)
    s1_ref[...] = jnp.sum(acc, axis=0, keepdims=True).reshape(1, 1, Co)
    q1_ref[...] = jnp.sum(acc * acc, axis=0, keepdims=True).reshape(1, 1, Co)


# ---------------------------------------------------------------------------
# Stage 2 (grid over batch, parallel): BN1 (global stats from stage-1 partial
# sums) + ReLU, conv2 (3x3, pad 1) and partial sums for BN2.
# ---------------------------------------------------------------------------
def _bn1_conv2_kernel(a1_ref, s1_ref, q1_ref, g1_ref, bt1_ref, w2_ref,
                      a2_ref, s2_ref, q2_ref, pad_ref):
    _, Ho, Wo, Co = a1_ref.shape
    Nb = s1_ref.shape[0]
    R = Ho * Wo
    cnt = float(Nb * Ho * Wo)
    Hp, Wp = Ho + 2, Wo + 2

    mean = jnp.sum(s1_ref[...], axis=0) / cnt                  # (1, Co)
    var = jnp.sum(q1_ref[...], axis=0) / cnt - mean * mean     # biased variance
    scale = jax.lax.rsqrt(var + _EPS) * g1_ref[...]

    y = a1_ref[0].reshape(R, Co)
    y = jnp.maximum((y - mean) * scale + bt1_ref[...], 0.0)

    # zero-halo buffer for conv2: border only, interior overwritten.
    pad_ref[0:1, :, :] = jnp.zeros((1, Wp, Co), jnp.float32)
    pad_ref[Hp - 1:Hp, :, :] = jnp.zeros((1, Wp, Co), jnp.float32)
    pad_ref[:, 0:1, :] = jnp.zeros((Hp, 1, Co), jnp.float32)
    pad_ref[:, Wp - 1:Wp, :] = jnp.zeros((Hp, 1, Co), jnp.float32)
    pad_ref[1:Ho + 1, 1:Wo + 1, :] = y.reshape(Ho, Wo, Co)

    acc = jnp.zeros((R, Co), jnp.float32)
    for kh in range(3):
        for kw in range(3):
            win = pad_ref[kh:kh + Ho, kw:kw + Wo, :].reshape(R, Co)
            acc = acc + jnp.dot(win, w2_ref[kh * 3 + kw],
                                preferred_element_type=jnp.float32)
    # conv2 bias omitted (cancelled by BN2, as above).
    a2_ref[0] = acc.reshape(Ho, Wo, Co)
    s2_ref[...] = jnp.sum(acc, axis=0, keepdims=True).reshape(1, 1, Co)
    q2_ref[...] = jnp.sum(acc * acc, axis=0, keepdims=True).reshape(1, 1, Co)


# ---------------------------------------------------------------------------
# Stage 3 (grid over batch, parallel): BN2, late identity (1x1 conv + bias over
# the concatenated input), residual add, ReLU.
# ---------------------------------------------------------------------------
def _bn2_residual_kernel(a2_ref, s2_ref, q2_ref, g2_ref, bt2_ref,
                         cat_ref, ws_ref, bs_ref, out_ref):
    _, Ho, Wo, Co = out_ref.shape
    C2 = cat_ref.shape[3]
    Nb = s2_ref.shape[0]
    R = Ho * Wo
    cnt = float(Nb * Ho * Wo)

    mean = jnp.sum(s2_ref[...], axis=0) / cnt
    var = jnp.sum(q2_ref[...], axis=0) / cnt - mean * mean
    scale = jax.lax.rsqrt(var + _EPS) * g2_ref[...]

    z = (a2_ref[0].reshape(R, Co) - mean) * scale + bt2_ref[...]

    # identity path = skip_other: 1x1 conv + bias (computed late -> short live range)
    cat_in = cat_ref[0, 1:Ho + 1, 1:Wo + 1, :].reshape(R, C2)
    identity = jnp.dot(cat_in, ws_ref[...],
                       preferred_element_type=jnp.float32) + bs_ref[...]

    out_ref[0] = jnp.maximum(z + identity, 0.0).reshape(Ho, Wo, Co)


# ---------------------------------------------------------------------------
# Parameter packing: PyTorch layouts -> lane-padded kernel layouts.
# ---------------------------------------------------------------------------
def pack_params(p, c_x, c_s, c_xp, c_sp, c_op):
    c_out, c_in = p['conv1_w'].shape[0], p['conv1_w'].shape[1]
    c2 = c_xp + c_sp

    w1 = jnp.transpose(p['conv1_w'], (2, 3, 1, 0)).reshape(9, c_in, c_out)
    w1p = jnp.zeros((9, c2, c_op), jnp.float32)
    w1p = w1p.at[:, :c_x, :c_out].set(w1[:, :c_x, :])
    w1p = w1p.at[:, c_xp:c_xp + c_s, :c_out].set(w1[:, c_x:, :])

    w2 = jnp.transpose(p['conv2_w'], (2, 3, 1, 0)).reshape(9, c_out, c_out)
    w2p = jnp.zeros((9, c_op, c_op), jnp.float32).at[:, :c_out, :c_out].set(w2)

    ws = jnp.transpose(p['skip_w'][:, :, 0, 0], (1, 0))          # (Cin, Cout)
    wsp = jnp.zeros((c2, c_op), jnp.float32)
    wsp = wsp.at[:c_x, :c_out].set(ws[:c_x])
    wsp = wsp.at[c_xp:c_xp + c_s, :c_out].set(ws[c_x:])

    vec = lambda v: jnp.zeros((1, c_op), jnp.float32).at[0, :c_out].set(v)
    return {'w1': w1p, 'w2': w2p, 'ws': wsp, 'bs': vec(p['skip_b']),
            'g1': vec(p['bn1_g']), 'beta1': vec(p['bn1_b']),
            'g2': vec(p['bn2_g']), 'beta2': vec(p['bn2_b'])}


# ---------------------------------------------------------------------------
# Wrapper: layout plumbing (NCHW -> lane-padded NHWC) + three pallas_calls.
# ---------------------------------------------------------------------------
def decoder_forward(x_nchw, skip_nchw, params, output_size):
    Ho, Wo = output_size
    N, Cx, Hi, Wi = x_nchw.shape
    _, Cs, Hs, Ws = skip_nchw.shape
    Cout = params['conv1_w'].shape[0]

    CXP = _round_up(Cx, LANE)
    CSP = _round_up(Cs, LANE)
    C2 = CXP + CSP
    CoP = _round_up(Cout, LANE)
    Hp, Wp = Ho + 2, Wo + 2

    # NCHW -> NHWC, channels zero-padded to the lane width (layout plumbing).
    xp = jnp.zeros((N, Hi, Wi, CXP), jnp.float32).at[..., :Cx].set(
        jnp.transpose(x_nchw, (0, 2, 3, 1)).astype(jnp.float32))
    sp = jnp.zeros((N, Hs, Ws, CSP), jnp.float32).at[..., :Cs].set(
        jnp.transpose(skip_nchw, (0, 2, 3, 1)).astype(jnp.float32))

    # Separable align_corners=True bilinear operands (no Kron matrix).
    mh_x, mw_x = _interp_matrix(Hi, Ho), _interp_matrix(Wi, Wo)
    mh_s, mw_s = _interp_matrix(Hs, Ho), _interp_matrix(Ws, Wo)
    mwx_b = jnp.asarray(np.broadcast_to(mw_x[None], (Hi, Wo, Wi)).copy())
    mws_b = jnp.asarray(np.broadcast_to(mw_s[None], (Hs, Wo, Ws)).copy())
    mhx_b = jnp.asarray(np.broadcast_to(mh_x.T[:, :, None, None],
                                        (Hi, Ho, 1, CXP)).copy())
    mhs_b = jnp.asarray(np.broadcast_to(mh_s.T[:, :, None, None],
                                        (Hs, Ho, 1, CSP)).copy())

    kp = pack_params(params, Cx, Cs, CXP, CSP, CoP)

    cparams = pltpu.CompilerParams(dimension_semantics=("parallel",),
                                   vmem_limit_bytes=32 * 1024 * 1024)

    def blk(*shape):                       # per-sample block over leading N
        zeros = (0,) * len(shape)
        return pl.BlockSpec((1,) + tuple(shape), lambda i: (i,) + zeros)

    def rep(*shape):                       # replicated full-array operand
        zeros = (0,) * len(shape)
        return pl.BlockSpec(tuple(shape), lambda i: zeros)

    # --- Stage 1: upsample + concat + conv1 (+ BN1 partial sums) ---
    cat_pad, a1, s1, q1 = pl.pallas_call(
        _upsample_conv1_kernel,
        grid=(N,),
        in_specs=[blk(Hi, Wi, CXP), blk(Hs, Ws, CSP),
                  rep(Hi, Wo, Wi), rep(Hi, Ho, 1, CXP),
                  rep(Hs, Wo, Ws), rep(Hs, Ho, 1, CSP),
                  rep(9, C2, CoP)],
        out_specs=(blk(Hp, Wp, C2), blk(Ho, Wo, CoP),
                   blk(1, CoP), blk(1, CoP)),
        out_shape=(jax.ShapeDtypeStruct((N, Hp, Wp, C2), jnp.float32),
                   jax.ShapeDtypeStruct((N, Ho, Wo, CoP), jnp.float32),
                   jax.ShapeDtypeStruct((N, 1, CoP), jnp.float32),
                   jax.ShapeDtypeStruct((N, 1, CoP), jnp.float32)),
        compiler_params=cparams,
    )(xp, sp, mwx_b, mhx_b, mws_b, mhs_b, kp['w1'])

    # --- Stage 2: BN1 + ReLU + conv2 (+ BN2 partial sums) ---
    a2, s2, q2 = pl.pallas_call(
        _bn1_conv2_kernel,
        grid=(N,),
        in_specs=[blk(Ho, Wo, CoP), rep(N, 1, CoP), rep(N, 1, CoP),
                  rep(1, CoP), rep(1, CoP), rep(9, CoP, CoP)],
        out_specs=(blk(Ho, Wo, CoP), blk(1, CoP), blk(1, CoP)),
        out_shape=(jax.ShapeDtypeStruct((N, Ho, Wo, CoP), jnp.float32),
                   jax.ShapeDtypeStruct((N, 1, CoP), jnp.float32),
                   jax.ShapeDtypeStruct((N, 1, CoP), jnp.float32)),
        scratch_shapes=[pltpu.VMEM((Hp, Wp, CoP), jnp.float32)],
        compiler_params=cparams,
    )(a1, s1, q1, kp['g1'], kp['beta1'], kp['w2'])

    # --- Stage 3: BN2 + identity (1x1 conv) + residual + ReLU ---
    out_pad = pl.pallas_call(
        _bn2_residual_kernel,
        grid=(N,),
        in_specs=[blk(Ho, Wo, CoP), rep(N, 1, CoP), rep(N, 1, CoP),
                  rep(1, CoP), rep(1, CoP),
                  blk(Hp, Wp, C2), rep(C2, CoP), rep(1, CoP)],
        out_specs=blk(Ho, Wo, CoP),
        out_shape=jax.ShapeDtypeStruct((N, Ho, Wo, CoP), jnp.float32),
        compiler_params=cparams,
    )(a2, s2, q2, kp['g2'], kp['beta2'], cat_pad, kp['ws'], kp['bs'])

    # Drop lane padding, NHWC -> NCHW (PyTorch convention).
    return jnp.transpose(out_pad[..., :Cout], (0, 3, 1, 2))


# ---------------------------------------------------------------------------
# Deterministic synthetic parameters (PyTorch layouts) and pure-JAX reference.
# ---------------------------------------------------------------------------
def init_params(key, c_in, c_out):
    ks = jax.random.split(key, 8)
    s = 0.05
    return {
        'conv1_w': s * jax.random.normal(ks[0], (c_out, c_in, 3, 3), jnp.float32),
        'conv1_b': s * jax.random.normal(ks[1], (c_out,), jnp.float32),
        'bn1_g': 1.0 + 0.1 * jax.random.normal(ks[2], (c_out,), jnp.float32),
        'bn1_b': 0.1 * jax.random.normal(ks[3], (c_out,), jnp.float32),
        'conv2_w': s * jax.random.normal(ks[4], (c_out, c_out, 3, 3), jnp.float32),
        'conv2_b': s * jax.random.normal(ks[5], (c_out,), jnp.float32),
        'bn2_g': 1.0 + 0.1 * jax.random.normal(ks[6], (c_out,), jnp.float32),
        'bn2_b': 0.1 * jax.random.normal(ks[7], (c_out,), jnp.float32),
        'skip_w': s * jax.random.normal(ks[0], (c_out, c_in, 1, 1), jnp.float32),
        'skip_b': s * jax.random.normal(ks[1], (c_out,), jnp.float32),
    }


def decoder_reference(x, skip, p, output_size):
    """Pure-JAX (XLA) reference of Decoder.forward, NCHW, f32, train-mode BN."""
    Ho, Wo = output_size
    _, _, Hi, Wi = x.shape
    _, _, Hs, Ws = skip.shape
    hp = jax.lax.Precision.HIGHEST
    mhx, mwx = jnp.asarray(_interp_matrix(Hi, Ho)), jnp.asarray(_interp_matrix(Wi, Wo))
    mhs, mws = jnp.asarray(_interp_matrix(Hs, Ho)), jnp.asarray(_interp_matrix(Ws, Wo))
    xu = jnp.einsum('oh,qw,nchw->ncoq', mhx, mwx, x, precision=hp)
    su = jnp.einsum('oh,qw,nchw->ncoq', mhs, mws, skip, precision=hp)
    cat = jnp.concatenate([xu, su], axis=1)

    dn = ('NCHW', 'OIHW', 'NCHW')

    def conv(t, w, b, pad):
        o = jax.lax.conv_general_dilated(t, w, (1, 1), ((pad, pad), (pad, pad)),
                                         dimension_numbers=dn, precision=hp)
        return o + b[None, :, None, None]

    def bn(t, g, bt):
        mu = jnp.mean(t, axis=(0, 2, 3), keepdims=True)
        var = jnp.mean((t - mu) ** 2, axis=(0, 2, 3), keepdims=True)
        return (t - mu) * jax.lax.rsqrt(var + _EPS) * g[None, :, None, None] \
            + bt[None, :, None, None]

    identity = conv(cat, p['skip_w'], p['skip_b'], 0)
    y = jnp.maximum(bn(conv(cat, p['conv1_w'], p['conv1_b'], 1),
                       p['bn1_g'], p['bn1_b']), 0.0)
    z = bn(conv(y, p['conv2_w'], p['conv2_b'], 1), p['bn2_g'], p['bn2_b'])
    return jnp.maximum(z + identity, 0.0)


if __name__ == "__main__":
    key = jax.random.PRNGKey(0)
    k_x, k_s, k_p = jax.random.split(key, 3)

    in_channels, out_channels = 4, 8        # Decoder(in_channels, out_channels, output_size)
    output_size = (16, 16)

    x = jax.random.normal(k_x, (2, in_channels, 8, 8), jnp.float32)        # NCHW
    skip = jax.random.normal(k_s, (2, out_channels, 12, 12), jnp.float32)  # NCHW (resized)

    params = init_params(k_p, in_channels + out_channels, out_channels)

    out = decoder_forward(x, skip, params, output_size)
    out = jax.block_until_ready(out)

    assert out.shape == (2, out_channels, output_size[0], output_size[1]), out.shape
    assert bool(jnp.all(jnp.isfinite(out)))

    ref = decoder_reference(x, skip, params, output_size)
    err = float(jnp.max(jnp.abs(out - ref)))
    assert err < 5e-2, f"max abs error vs pure-JAX reference: {err}"

    print("KERNEL_OK")
</pallas_src>

<mosaic_0001>
module attributes {stable_mosaic.version = 11 : i64} {
  func.func @_upsample_conv1_kernel(%arg0: i32, %arg1: memref<1x8x8x128xf32, #tpu.memory_space<vmem>>, %arg2: memref<1x12x12x128xf32, #tpu.memory_space<vmem>>, %arg3: memref<8x16x8xf32, #tpu.memory_space<vmem>>, %arg4: memref<8x16x1x128xf32, #tpu.memory_space<vmem>>, %arg5: memref<12x16x12xf32, #tpu.memory_space<vmem>>, %arg6: memref<12x16x1x128xf32, #tpu.memory_space<vmem>>, %arg7: memref<9x256x128xf32, #tpu.memory_space<vmem>>, %arg8: memref<1x18x18x256xf32, #tpu.memory_space<vmem>>, %arg9: memref<1x16x16x128xf32, #tpu.memory_space<vmem>>, %arg10: memref<1x1x128xf32, #tpu.memory_space<vmem>>, %arg11: memref<1x1x128xf32, #tpu.memory_space<vmem>>) attributes {dimension_semantics = [#tpu.dimension_semantics<parallel>], iteration_bounds = array<i64: 2>, scalar_prefetch = 0 : i64, scratch_operands = 0 : i64, tpu.core_type = #tpu.core_type<tc>, window_params = [{transform_indices = @transform_0, window_bounds = array<i64: 1, 8, 8, 128>}, {transform_indices = @transform_1, window_bounds = array<i64: 1, 12, 12, 128>}, {pipeline_mode = #tpu.pipeline_mode<synchronous>, transform_indices = @transform_2, window_bounds = array<i64: 8, 16, 8>}, {pipeline_mode = #tpu.pipeline_mode<synchronous>, transform_indices = @transform_3, window_bounds = array<i64: 8, 16, 1, 128>}, {pipeline_mode = #tpu.pipeline_mode<synchronous>, transform_indices = @transform_4, window_bounds = array<i64: 12, 16, 12>}, {pipeline_mode = #tpu.pipeline_mode<synchronous>, transform_indices = @transform_5, window_bounds = array<i64: 12, 16, 1, 128>}, {pipeline_mode = #tpu.pipeline_mode<synchronous>, transform_indices = @transform_6, window_bounds = array<i64: 9, 256, 128>}, {transform_indices = @transform_7, window_bounds = array<i64: 1, 18, 18, 256>}, {transform_indices = @transform_8, window_bounds = array<i64: 1, 16, 16, 128>}, {transform_indices = @transform_9, window_bounds = array<i64: 1, 1, 128>}, {transform_indices = @transform_10, window_bounds = array<i64: 1, 1, 128>}]} {
    %c0 = arith.constant 0 : index
    %c0_0 = arith.constant 0 : index
    %c0_1 = arith.constant 0 : index
    %0 = vector.load %arg3[%c0, %c0_0, %c0_1] : memref<8x16x8xf32, #tpu.memory_space<vmem>>, vector<8x16x8xf32>
    %c0_2 = arith.constant 0 : index
    %c0_3 = arith.constant 0 : index
    %c0_4 = arith.constant 0 : index
    %c0_5 = arith.constant 0 : index
    %1 = vector.load %arg1[%c0_2, %c0_3, %c0_4, %c0_5] : memref<1x8x8x128xf32, #tpu.memory_space<vmem>>, vector<1x8x8x128xf32>
    %2 = vector.shape_cast %1 : vector<1x8x8x128xf32> to vector<8x8x128xf32>
    "tpu.trace_start"() <{level = 10 : i32, message = "hqw,hwc->hqc"}> : () -> ()
    %cst = arith.constant dense<0.000000e+00> : vector<8x16x128xf32>
    %3 = tpu.matmul %0, %2, %cst {dimension_numbers = #tpu.dot_dimension_numbers<[2], [1], [1], [2], [0, 0, 0, 1, 1, 2], [0], [0]>} : vector<8x16x8xf32>, vector<8x8x128xf32>, vector<8x16x128xf32> -> vector<8x16x128xf32>
    %cst_6 = arith.constant 0.000000e+00 : f32
    "tpu.trace_stop"() : () -> ()
    %4 = vector.broadcast %cst_6 : f32 to vector<16x16x128xf32>
    %c0_7 = arith.constant 0 : index
    %c0_8 = arith.constant 0 : index
    %c0_9 = arith.constant 0 : index
    %c0_10 = arith.constant 0 : index
    %5 = vector.load %arg4[%c0_7, %c0_8, %c0_9, %c0_10] : memref<8x16x1x128xf32, #tpu.memory_space<vmem>>, vector<1x16x1x128xf32>
    %6 = vector.shape_cast %5 : vector<1x16x1x128xf32> to vector<16x1x128xf32>
    %7 = vector.extract_strided_slice %3 {offsets = [0, 0, 0], sizes = [1, 16, 128], strides = [1, 1, 1]} : vector<8x16x128xf32> to vector<1x16x128xf32>
    %8 = vector.shape_cast %7 : vector<1x16x128xf32> to vector<16x128xf32>
    %9 = vector.shape_cast %8 : vector<16x128xf32> to vector<1x16x128xf32>
    %10 = vector.broadcast %6 : vector<16x1x128xf32> to vector<16x16x128xf32>
    %11 = vector.broadcast %9 : vector<1x16x128xf32> to vector<16x16x128xf32>
    %12 = arith.mulf %10, %11 : vector<16x16x128xf32>
    %13 = arith.addf %4, %12 : vector<16x16x128xf32>
    %c1 = arith.constant 1 : index
    %c0_11 = arith.constant 0 : index
    %c0_12 = arith.constant 0 : index
    %c0_13 = arith.constant 0 : index
    %14 = vector.load %arg4[%c1, %c0_11, %c0_12, %c0_13] : memref<8x16x1x128xf32, #tpu.memory_space<vmem>>, vector<1x16x1x128xf32>
    %15 = vector.shape_cast %14 : vector<1x16x1x128xf32> to vector<16x1x128xf32>
    %16 = vector.extract_strided_slice %3 {offsets = [1, 0, 0], sizes = [1, 16, 128], strides = [1, 1, 1]} : vector<8x16x128xf32> to vector<1x16x128xf32>
    %17 = vector.shape_cast %16 : vector<1x16x128xf32> to vector<16x128xf32>
    %18 = vector.shape_cast %17 : vector<16x128xf32> to vector<1x16x128xf32>
    %19 = vector.broadcast %15 : vector<16x1x128xf32> to vector<16x16x128xf32>
    %20 = vector.broadcast %18 : vector<1x16x128xf32> to vector<16x16x128xf32>
    %21 = arith.mulf %19, %20 : vector<16x16x128xf32>
    %22 = arith.addf %13, %21 : vector<16x16x128xf32>
    %c2 = arith.constant 2 : index
    %c0_14 = arith.constant 0 : index
    %c0_15 = arith.constant 0 : index
    %c0_16 = arith.constant 0 : index
    %23 = vector.load %arg4[%c2, %c0_14, %c0_15, %c0_16] : memref<8x16x1x128xf32, #tpu.memory_space<vmem>>, vector<1x16x1x128xf32>
    %24 = vector.shape_cast %23 : vector<1x16x1x128xf32> to vector<16x1x128xf32>
    %25 = vector.extract_strided_slice %3 {offsets = [2, 0, 0], sizes = [1, 16, 128], strides = [1, 1, 1]} : vector<8x16x128xf32> to vector<1x16x128xf32>
    %26 = vector.shape_cast %25 : vector<1x16x128xf32> to vector<16x128xf32>
    %27 = vector.shape_cast %26 : vector<16x128xf32> to vector<1x16x128xf32>
    %28 = vector.broadcast %24 : vector<16x1x128xf32> to vector<16x16x128xf32>
    %29 = vector.broadcast %27 : vector<1x16x128xf32> to vector<16x16x128xf32>
    %30 = arith.mulf %28, %29 : vector<16x16x128xf32>
    %31 = arith.addf %22, %30 : vector<16x16x128xf32>
    %c3 = arith.constant 3 : index
    %c0_17 = arith.constant 0 : index
    %c0_18 = arith.constant 0 : index
    %c0_19 = arith.constant 0 : index
    %32 = vector.load %arg4[%c3, %c0_17, %c0_18, %c0_19] : memref<8x16x1x128xf32, #tpu.memory_space<vmem>>, vector<1x16x1x128xf32>
    %33 = vector.shape_cast %32 : vector<1x16x1x128xf32> to vector<16x1x128xf32>
    %34 = vector.extract_strided_slice %3 {offsets = [3, 0, 0], sizes = [1, 16, 128], strides = [1, 1, 1]} : vector<8x16x128xf32> to vector<1x16x128xf32>
    %35 = vector.shape_cast %34 : vector<1x16x128xf32> to vector<16x128xf32>
    %36 = vector.shape_cast %35 : vector<16x128xf32> to vector<1x16x128xf32>
    %37 = vector.broadcast %33 : vector<16x1x128xf32> to vector<16x16x128xf32>
    %38 = vector.broadcast %36 : vector<1x16x128xf32> to vector<16x16x128xf32>
    %39 = arith.mulf %37, %38 : vector<16x16x128xf32>
    %40 = arith.addf %31, %39 : vector<16x16x128xf32>
    %c4 = arith.constant 4 : index
    %c0_20 = arith.constant 0 : index
    %c0_21 = arith.constant 0 : index
    %c0_22 = arith.constant 0 : index
    %41 = vector.load %arg4[%c4, %c0_20, %c0_21, %c0_22] : memref<8x16x1x128xf32, #tpu.memory_space<vmem>>, vector<1x16x1x128xf32>
    %42 = vector.shape_cast %41 : vector<1x16x1x128xf32> to vector<16x1x128xf32>
    %43 = vector.extract_strided_slice %3 {offsets = [4, 0, 0], sizes = [1, 16, 128], strides = [1, 1, 1]} : vector<8x16x128xf32> to vector<1x16x128xf32>
    %44 = vector.shape_cast %43 : vector<1x16x128xf32> to vector<16x128xf32>
    %45 = vector.shape_cast %44 : vector<16x128xf32> to vector<1x16x128xf32>
    %46 = vector.broadcast %42 : vector<16x1x128xf32> to vector<16x16x128xf32>
    %47 = vector.broadcast %45 : vector<1x16x128xf32> to vector<16x16x128xf32>
    %48 = arith.mulf %46, %47 : vector<16x16x128xf32>
    %49 = arith.addf %40, %48 : vector<16x16x128xf32>
    %c5 = arith.constant 5 : index
    %c0_23 = arith.constant 0 : index
    %c0_24 = arith.constant 0 : index
    %c0_25 = arith.constant 0 : index
    %50 = vector.load %arg4[%c5, %c0_23, %c0_24, %c0_25] : memref<8x16x1x128xf32, #tpu.memory_space<vmem>>, vector<1x16x1x128xf32>
    %51 = vector.shape_cast %50 : vector<1x16x1x128xf32> to vector<16x1x128xf32>
    %52 = vector.extract_strided_slice %3 {offsets = [5, 0, 0], sizes = [1, 16, 128], strides = [1, 1, 1]} : vector<8x16x128xf32> to vector<1x16x128xf32>
    %53 = vector.shape_cast %52 : vector<1x16x128xf32> to vector<16x128xf32>
    %54 = vector.shape_cast %53 : vector<16x128xf32> to vector<1x16x128xf32>
    %55 = vector.broadcast %51 : vector<16x1x128xf32> to vector<16x16x128xf32>
    %56 = vector.broadcast %54 : vector<1x16x128xf32> to vector<16x16x128xf32>
    %57 = arith.mulf %55, %56 : vector<16x16x128xf32>
    %58 = arith.addf %49, %57 : vector<16x16x128xf32>
    %c6 = arith.constant 6 : index
    %c0_26 = arith.constant 0 : index
    %c0_27 = arith.constant 0 : index
    %c0_28 = arith.constant 0 : index
    %59 = vector.load %arg4[%c6, %c0_26, %c0_27, %c0_28] : memref<8x16x1x128xf32, #tpu.memory_space<vmem>>, vector<1x16x1x128xf32>
    %60 = vector.shape_cast %59 : vector<1x16x1x128xf32> to vector<16x1x128xf32>
    %61 = vector.extract_strided_slice %3 {offsets = [6, 0, 0], sizes = [1, 16, 128], strides = [1, 1, 1]} : vector<8x16x128xf32> to vector<1x16x128xf32>
    %62 = vector.shape_cast %61 : vector<1x16x128xf32> to vector<16x128xf32>
    %63 = vector.shape_cast %62 : vector<16x128xf32> to vector<1x16x128xf32>
    %64 = vector.broadcast %60 : vector<16x1x128xf32> to vector<16x16x128xf32>
    %65 = vector.broadcast %63 : vector<1x16x128xf32> to vector<16x16x128xf32>
    %66 = arith.mulf %64, %65 : vector<16x16x128xf32>
    %67 = arith.addf %58, %66 : vector<16x16x128xf32>
    %c7 = arith.constant 7 : index
    %c0_29 = arith.constant 0 : index
    %c0_30 = arith.constant 0 : index
    %c0_31 = arith.constant 0 : index
    %68 = vector.load %arg4[%c7, %c0_29, %c0_30, %c0_31] : memref<8x16x1x128xf32, #tpu.memory_space<vmem>>, vector<1x16x1x128xf32>
    %69 = vector.shape_cast %68 : vector<1x16x1x128xf32> to vector<16x1x128xf32>
    %70 = vector.extract_strided_slice %3 {offsets = [7, 0, 0], sizes = [1, 16, 128], strides = [1, 1, 1]} : vector<8x16x128xf32> to vector<1x16x128xf32>
    %71 = vector.shape_cast %70 : vector<1x16x128xf32> to vector<16x128xf32>
    %72 = vector.shape_cast %71 : vector<16x128xf32> to vector<1x16x128xf32>
    %73 = vector.broadcast %69 : vector<16x1x128xf32> to vector<16x16x128xf32>
    %74 = vector.broadcast %72 : vector<1x16x128xf32> to vector<16x16x128xf32>
    %75 = arith.mulf %73, %74 : vector<16x16x128xf32>
    %76 = arith.addf %67, %75 : vector<16x16x128xf32>
    %c0_32 = arith.constant 0 : index
    %c0_33 = arith.constant 0 : index
    %c0_34 = arith.constant 0 : index
    %77 = vector.load %arg5[%c0_32, %c0_33, %c0_34] : memref<12x16x12xf32, #tpu.memory_space<vmem>>, vector<12x16x12xf32>
    %c0_35 = arith.constant 0 : index
    %c0_36 = arith.constant 0 : index
    %c0_37 = arith.constant 0 : index
    %c0_38 = arith.constant 0 : index
    %78 = vector.load %arg2[%c0_35, %c0_36, %c0_37, %c0_38] : memref<1x12x12x128xf32, #tpu.memory_space<vmem>>, vector<1x12x12x128xf32>
    %79 = vector.shape_cast %78 : vector<1x12x12x128xf32> to vector<12x12x128xf32>
    "tpu.trace_start"() <{level = 10 : i32, message = "hqw,hwc->hqc"}> : () -> ()
    %cst_39 = arith.constant dense<0.000000e+00> : vector<12x16x128xf32>
    %80 = tpu.matmul %77, %79, %cst_39 {dimension_numbers = #tpu.dot_dimension_numbers<[2], [1], [1], [2], [0, 0, 0, 1, 1, 2], [0], [0]>} : vector<12x16x12xf32>, vector<12x12x128xf32>, vector<12x16x128xf32> -> vector<12x16x128xf32>
    %cst_40 = arith.constant 0.000000e+00 : f32
    "tpu.trace_stop"() : () -> ()
    %81 = vector.broadcast %cst_40 : f32 to vector<16x16x128xf32>
    %c0_41 = arith.constant 0 : index
    %c0_42 = arith.constant 0 : index
    %c0_43 = arith.constant 0 : index
    %c0_44 = arith.constant 0 : index
    %82 = vector.load %arg6[%c0_41, %c0_42, %c0_43, %c0_44] : memref<12x16x1x128xf32, #tpu.memory_space<vmem>>, vector<1x16x1x128xf32>
    %83 = vector.shape_cast %82 : vector<1x16x1x128xf32> to vector<16x1x128xf32>
    %84 = vector.extract_strided_slice %80 {offsets = [0, 0, 0], sizes = [1, 16, 128], strides = [1, 1, 1]} : vector<12x16x128xf32> to vector<1x16x128xf32>
    %85 = vector.shape_cast %84 : vector<1x16x128xf32> to vector<16x128xf32>
    %86 = vector.shape_cast %85 : vector<16x128xf32> to vector<1x16x128xf32>
    %87 = vector.broadcast %83 : vector<16x1x128xf32> to vector<16x16x128xf32>
    %88 = vector.broadcast %86 : vector<1x16x128xf32> to vector<16x16x128xf32>
    %89 = arith.mulf %87, %88 : vector<16x16x128xf32>
    %90 = arith.addf %81, %89 : vector<16x16x128xf32>
    %c1_45 = arith.constant 1 : index
    %c0_46 = arith.constant 0 : index
    %c0_47 = arith.constant 0 : index
    %c0_48 = arith.constant 0 : index
    %91 = vector.load %arg6[%c1_45, %c0_46, %c0_47, %c0_48] : memref<12x16x1x128xf32, #tpu.memory_space<vmem>>, vector<1x16x1x128xf32>
    %92 = vector.shape_cast %91 : vector<1x16x1x128xf32> to vector<16x1x128xf32>
    %93 = vector.extract_strided_slice %80 {offsets = [1, 0, 0], sizes = [1, 16, 128], strides = [1, 1, 1]} : vector<12x16x128xf32> to vector<1x16x128xf32>
    %94 = vector.shape_cast %93 : vector<1x16x128xf32> to vector<16x128xf32>
    %95 = vector.shape_cast %94 : vector<16x128xf32> to vector<1x16x128xf32>
    %96 = vector.broadcast %92 : vector<16x1x128xf32> to vector<16x16x128xf32>
    %97 = vector.broadcast %95 : vector<1x16x128xf32> to vector<16x16x128xf32>
    %98 = arith.mulf %96, %97 : vector<16x16x128xf32>
    %99 = arith.addf %90, %98 : vector<16x16x128xf32>
    %c2_49 = arith.constant 2 : index
    %c0_50 = arith.constant 0 : index
    %c0_51 = arith.constant 0 : index
    %c0_52 = arith.constant 0 : index
    %100 = vector.load %arg6[%c2_49, %c0_50, %c0_51, %c0_52] : memref<12x16x1x128xf32, #tpu.memory_space<vmem>>, vector<1x16x1x128xf32>
    %101 = vector.shape_cast %100 : vector<1x16x1x128xf32> to vector<16x1x128xf32>
    %102 = vector.extract_strided_slice %80 {offsets = [2, 0, 0], sizes = [1, 16, 128], strides = [1, 1, 1]} : vector<12x16x128xf32> to vector<1x16x128xf32>
    %103 = vector.shape_cast %102 : vector<1x16x128xf32> to vector<16x128xf32>
    %104 = vector.shape_cast %103 : vector<16x128xf32> to vector<1x16x128xf32>
    %105 = vector.broadcast %101 : vector<16x1x128xf32> to vector<16x16x128xf32>
    %106 = vector.broadcast %104 : vector<1x16x128xf32> to vector<16x16x128xf32>
    %107 = arith.mulf %105, %106 : vector<16x16x128xf32>
    %108 = arith.addf %99, %107 : vector<16x16x128xf32>
    %c3_53 = arith.constant 3 : index
    %c0_54 = arith.constant 0 : index
    %c0_55 = arith.constant 0 : index
    %c0_56 = arith.constant 0 : index
    %109 = vector.load %arg6[%c3_53, %c0_54, %c0_55, %c0_56] : memref<12x16x1x128xf32, #tpu.memory_space<vmem>>, vector<1x16x1x128xf32>
    %110 = vector.shape_cast %109 : vector<1x16x1x128xf32> to vector<16x1x128xf32>
    %111 = vector.extract_strided_slice %80 {offsets = [3, 0, 0], sizes = [1, 16, 128], strides = [1, 1, 1]} : vector<12x16x128xf32> to vector<1x16x128xf32>
    %112 = vector.shape_cast %111 : vector<1x16x128xf32> to vector<16x128xf32>
    %113 = vector.shape_cast %112 : vector<16x128xf32> to vector<1x16x128xf32>
    %114 = vector.broadcast %110 : vector<16x1x128xf32> to vector<16x16x128xf32>
    %115 = vector.broadcast %113 : vector<1x16x128xf32> to vector<16x16x128xf32>
    %116 = arith.mulf %114, %115 : vector<16x16x128xf32>
    %117 = arith.addf %108, %116 : vector<16x16x128xf32>
    %c4_57 = arith.constant 4 : index
    %c0_58 = arith.constant 0 : index
    %c0_59 = arith.constant 0 : index
    %c0_60 = arith.constant 0 : index
    %118 = vector.load %arg6[%c4_57, %c0_58, %c0_59, %c0_60] : memref<12x16x1x128xf32, #tpu.memory_space<vmem>>, vector<1x16x1x128xf32>
    %119 = vector.shape_cast %118 : vector<1x16x1x128xf32> to vector<16x1x128xf32>
    %120 = vector.extract_strided_slice %80 {offsets = [4, 0, 0], sizes = [1, 16, 128], strides = [1, 1, 1]} : vector<12x16x128xf32> to vector<1x16x128xf32>
    %121 = vector.shape_cast %120 : vector<1x16x128xf32> to vector<16x128xf32>
    %122 = vector.shape_cast %121 : vector<16x128xf32> to vector<1x16x128xf32>
    %123 = vector.broadcast %119 : vector<16x1x128xf32> to vector<16x16x128xf32>
    %124 = vector.broadcast %122 : vector<1x16x128xf32> to vector<16x16x128xf32>
    %125 = arith.mulf %123, %124 : vector<16x16x128xf32>
    %126 = arith.addf %117, %125 : vector<16x16x128xf32>
    %c5_61 = arith.constant 5 : index
    %c0_62 = arith.constant 0 : index
    %c0_63 = arith.constant 0 : index
    %c0_64 = arith.constant 0 : index
    %127 = vector.load %arg6[%c5_61, %c0_62, %c0_63, %c0_64] : memref<12x16x1x128xf32, #tpu.memory_space<vmem>>, vector<1x16x1x128xf32>
    %128 = vector.shape_cast %127 : vector<1x16x1x128xf32> to vector<16x1x128xf32>
    %129 = vector.extract_strided_slice %80 {offsets = [5, 0, 0], sizes = [1, 16, 128], strides = [1, 1, 1]} : vector<12x16x128xf32> to vector<1x16x128xf32>
    %130 = vector.shape_cast %129 : vector<1x16x128xf32> to vector<16x128xf32>
    %131 = vector.shape_cast %130 : vector<16x128xf32> to vector<1x16x128xf32>
    %132 = vector.broadcast %128 : vector<16x1x128xf32> to vector<16x16x128xf32>
    %133 = vector.broadcast %131 : vector<1x16x128xf32> to vector<16x16x128xf32>
    %134 = arith.mulf %132, %133 : vector<16x16x128xf32>
    %135 = arith.addf %126, %134 : vector<16x16x128xf32>
    %c6_65 = arith.constant 6 : index
    %c0_66 = arith.constant 0 : index
    %c0_67 = arith.constant 0 : index
    %c0_68 = arith.constant 0 : index
    %136 = vector.load %arg6[%c6_65, %c0_66, %c0_67, %c0_68] : memref<12x16x1x128xf32, #tpu.memory_space<vmem>>, vector<1x16x1x128xf32>
    %137 = vector.shape_cast %136 : vector<1x16x1x128xf32> to vector<16x1x128xf32>
    %138 = vector.extract_strided_slice %80 {offsets = [6, 0, 0], sizes = [1, 16, 128], strides = [1, 1, 1]} : vector<12x16x128xf32> to vector<1x16x128xf32>
    %139 = vector.shape_cast %138 : vector<1x16x128xf32> to vector<16x128xf32>
    %140 = vector.shape_cast %139 : vector<16x128xf32> to vector<1x16x128xf32>
    %141 = vector.broadcast %137 : vector<16x1x128xf32> to vector<16x16x128xf32>
    %142 = vector.broadcast %140 : vector<1x16x128xf32> to vector<16x16x128xf32>
    %143 = arith.mulf %141, %142 : vector<16x16x128xf32>
    %144 = arith.addf %135, %143 : vector<16x16x128xf32>
    %c7_69 = arith.constant 7 : index
    %c0_70 = arith.constant 0 : index
    %c0_71 = arith.constant 0 : index
    %c0_72 = arith.constant 0 : index
    %145 = vector.load %arg6[%c7_69, %c0_70, %c0_71, %c0_72] : memref<12x16x1x128xf32, #tpu.memory_space<vmem>>, vector<1x16x1x128xf32>
    %146 = vector.shape_cast %145 : vector<1x16x1x128xf32> to vector<16x1x128xf32>
    %147 = vector.extract_strided_slice %80 {offsets = [7, 0, 0], sizes = [1, 16, 128], strides = [1, 1, 1]} : vector<12x16x128xf32> to vector<1x16x128xf32>
    %148 = vector.shape_cast %147 : vector<1x16x128xf32> to vector<16x128xf32>
    %149 = vector.shape_cast %148 : vector<16x128xf32> to vector<1x16x128xf32>
    %150 = vector.broadcast %146 : vector<16x1x128xf32> to vector<16x16x128xf32>
    %151 = vector.broadcast %149 : vector<1x16x128xf32> to vector<16x16x128xf32>
    %152 = arith.mulf %150, %151 : vector<16x16x128xf32>
    %153 = arith.addf %144, %152 : vector<16x16x128xf32>
    %c8 = arith.constant 8 : index
    %c0_73 = arith.constant 0 : index
    %c0_74 = arith.constant 0 : index
    %c0_75 = arith.constant 0 : index
    %154 = vector.load %arg6[%c8, %c0_73, %c0_74, %c0_75] : memref<12x16x1x128xf32, #tpu.memory_space<vmem>>, vector<1x16x1x128xf32>
    %155 = vector.shape_cast %154 : vector<1x16x1x128xf32> to vector<16x1x128xf32>
    %156 = vector.extract_strided_slice %80 {offsets = [8, 0, 0], sizes = [1, 16, 128], strides = [1, 1, 1]} : vector<12x16x128xf32> to vector<1x16x128xf32>
    %157 = vector.shape_cast %156 : vector<1x16x128xf32> to vector<16x128xf32>
    %158 = vector.shape_cast %157 : vector<16x128xf32> to vector<1x16x128xf32>
    %159 = vector.broadcast %155 : vector<16x1x128xf32> to vector<16x16x128xf32>
    %160 = vector.broadcast %158 : vector<1x16x128xf32> to vector<16x16x128xf32>
    %161 = arith.mulf %159, %160 : vector<16x16x128xf32>
    %162 = arith.addf %153, %161 : vector<16x16x128xf32>
    %c9 = arith.constant 9 : index
    %c0_76 = arith.constant 0 : index
    %c0_77 = arith.constant 0 : index
    %c0_78 = arith.constant 0 : index
    %163 = vector.load %arg6[%c9, %c0_76, %c0_77, %c0_78] : memref<12x16x1x128xf32, #tpu.memory_space<vmem>>, vector<1x16x1x128xf32>
    %164 = vector.shape_cast %163 : vector<1x16x1x128xf32> to vector<16x1x128xf32>
    %165 = vector.extract_strided_slice %80 {offsets = [9, 0, 0], sizes = [1, 16, 128], strides = [1, 1, 1]} : vector<12x16x128xf32> to vector<1x16x128xf32>
    %166 = vector.shape_cast %165 : vector<1x16x128xf32> to vector<16x128xf32>
    %167 = vector.shape_cast %166 : vector<16x128xf32> to vector<1x16x128xf32>
    %168 = vector.broadcast %164 : vector<16x1x128xf32> to vector<16x16x128xf32>
    %169 = vector.broadcast %167 : vector<1x16x128xf32> to vector<16x16x128xf32>
    %170 = arith.mulf %168, %169 : vector<16x16x128xf32>
    %171 = arith.addf %162, %170 : vector<16x16x128xf32>
    %c10 = arith.constant 10 : index
    %c0_79 = arith.constant 0 : index
    %c0_80 = arith.constant 0 : index
    %c0_81 = arith.constant 0 : index
    %172 = vector.load %arg6[%c10, %c0_79, %c0_80, %c0_81] : memref<12x16x1x128xf32, #tpu.memory_space<vmem>>, vector<1x16x1x128xf32>
    %173 = vector.shape_cast %172 : vector<1x16x1x128xf32> to vector<16x1x128xf32>
    %174 = vector.extract_strided_slice %80 {offsets = [10, 0, 0], sizes = [1, 16, 128], strides = [1, 1, 1]} : vector<12x16x128xf32> to vector<1x16x128xf32>
    %175 = vector.shape_cast %174 : vector<1x16x128xf32> to vector<16x128xf32>
    %176 = vector.shape_cast %175 : vector<16x128xf32> to vector<1x16x128xf32>
    %177 = vector.broadcast %173 : vector<16x1x128xf32> to vector<16x16x128xf32>
    %178 = vector.broadcast %176 : vector<1x16x128xf32> to vector<16x16x128xf32>
    %179 = arith.mulf %177, %178 : vector<16x16x128xf32>
    %180 = arith.addf %171, %179 : vector<16x16x128xf32>
    %c11 = arith.constant 11 : index
    %c0_82 = arith.constant 0 : index
    %c0_83 = arith.constant 0 : index
    %c0_84 = arith.constant 0 : index
    %181 = vector.load %arg6[%c11, %c0_82, %c0_83, %c0_84] : memref<12x16x1x128xf32, #tpu.memory_space<vmem>>, vector<1x16x1x128xf32>
    %182 = vector.shape_cast %181 : vector<1x16x1x128xf32> to vector<16x1x128xf32>
    %183 = vector.extract_strided_slice %80 {offsets = [11, 0, 0], sizes = [1, 16, 128], strides = [1, 1, 1]} : vector<12x16x128xf32> to vector<1x16x128xf32>
    %184 = vector.shape_cast %183 : vector<1x16x128xf32> to vector<16x128xf32>
    %185 = vector.shape_cast %184 : vector<16x128xf32> to vector<1x16x128xf32>
    %186 = vector.broadcast %182 : vector<16x1x128xf32> to vector<16x16x128xf32>
    %187 = vector.broadcast %185 : vector<1x16x128xf32> to vector<16x16x128xf32>
    %188 = arith.mulf %186, %187 : vector<16x16x128xf32>
    %189 = arith.addf %180, %188 : vector<16x16x128xf32>
    %cst_85 = arith.constant 0.000000e+00 : f32
    %190 = vector.broadcast %cst_85 : f32 to vector<1x18x256xf32>
    %c0_86 = arith.constant 0 : index
    %c0_87 = arith.constant 0 : index
    %c0_88 = arith.constant 0 : index
    %c0_89 = arith.constant 0 : index
    %191 = vector.load %arg8[%c0_86, %c0_87, %c0_88, %c0_89] : memref<1x18x18x256xf32, #tpu.memory_space<vmem>>, vector<1x1x18x256xf32>
    %192 = vector.shape_cast %191 : vector<1x1x18x256xf32> to vector<1x18x256xf32>
    %193 = vector.shape_cast %190 : vector<1x18x256xf32> to vector<1x1x18x256xf32>
    tpu.vector_store %arg8[%c0_86, %c0_87, %c0_88, %c0_89], %193 {strides = array<i32>} : memref<1x18x18x256xf32, #tpu.memory_space<vmem>>, vector<1x1x18x256xf32>,
    %cst_90 = arith.constant 0.000000e+00 : f32
    %194 = vector.broadcast %cst_90 : f32 to vector<1x18x256xf32>
    %c0_91 = arith.constant 0 : index
    %c17 = arith.constant 17 : index
    %c0_92 = arith.constant 0 : index
    %c0_93 = arith.constant 0 : index
    %195 = vector.load %arg8[%c0_91, %c17, %c0_92, %c0_93] : memref<1x18x18x256xf32, #tpu.memory_space<vmem>>, vector<1x1x18x256xf32>
    %196 = vector.shape_cast %195 : vector<1x1x18x256xf32> to vector<1x18x256xf32>
    %197 = vector.shape_cast %194 : vector<1x18x256xf32> to vector<1x1x18x256xf32>
    tpu.vector_store %arg8[%c0_91, %c17, %c0_92, %c0_93], %197 {strides = array<i32>} : memref<1x18x18x256xf32, #tpu.memory_space<vmem>>, vector<1x1x18x256xf32>,
    %cst_94 = arith.constant 0.000000e+00 : f32
    %198 = vector.broadcast %cst_94 : f32 to vector<18x1x256xf32>
    %c0_95 = arith.constant 0 : index
    %c0_96 = arith.constant 0 : index
    %c0_97 = arith.constant 0 : index
    %c0_98 = arith.constant 0 : index
    %199 = vector.load %arg8[%c0_95, %c0_96, %c0_97, %c0_98] : memref<1x18x18x256xf32, #tpu.memory_space<vmem>>, vector<1x18x1x256xf32>
    %200 = vector.shape_cast %199 : vector<1x18x1x256xf32> to vector<18x1x256xf32>
    %201 = vector.shape_cast %198 : vector<18x1x256xf32> to vector<1x18x1x256xf32>
    tpu.vector_store %arg8[%c0_95, %c0_96, %c0_97, %c0_98], %201 {strides = array<i32>} : memref<1x18x18x256xf32, #tpu.memory_space<vmem>>, vector<1x18x1x256xf32>,
    %cst_99 = arith.constant 0.000000e+00 : f32
    %202 = vector.broadcast %cst_99 : f32 to vector<18x1x256xf32>
    %c0_100 = arith.constant 0 : index
    %c0_101 = arith.constant 0 : index
    %c17_102 = arith.constant 17 : index
    %c0_103 = arith.constant 0 : index
    %203 = vector.load %arg8[%c0_100, %c0_101, %c17_102, %c0_103] : memref<1x18x18x256xf32, #tpu.memory_space<vmem>>, vector<1x18x1x256xf32>
    %204 = vector.shape_cast %203 : vector<1x18x1x256xf32> to vector<18x1x256xf32>
    %205 = vector.shape_cast %202 : vector<18x1x256xf32> to vector<1x18x1x256xf32>
    tpu.vector_store %arg8[%c0_100, %c0_101, %c17_102, %c0_103], %205 {strides = array<i32>} : memref<1x18x18x256xf32, #tpu.memory_space<vmem>>, vector<1x18x1x256xf32>,
    %c0_104 = arith.constant 0 : index
    %c1_105 = arith.constant 1 : index
    %c1_106 = arith.constant 1 : index
    %c0_107 = arith.constant 0 : index
    %206 = vector.load %arg8[%c0_104, %c1_105, %c1_106, %c0_107] : memref<1x18x18x256xf32, #tpu.memory_space<vmem>>, vector<1x16x16x128xf32>
    %207 = vector.shape_cast %206 : vector<1x16x16x128xf32> to vector<16x16x128xf32>
    %208 = vector.shape_cast %76 : vector<16x16x128xf32> to vector<1x16x16x128xf32>
    tpu.vector_store %arg8[%c0_104, %c1_105, %c1_106, %c0_107], %208 {strides = array<i32>} : memref<1x18x18x256xf32, #tpu.memory_space<vmem>>, vector<1x16x16x128xf32>,
    %c0_108 = arith.constant 0 : index
    %c1_109 = arith.constant 1 : index
    %c1_110 = arith.constant 1 : index
    %c128 = arith.constant 128 : index
    %209 = vector.load %arg8[%c0_108, %c1_109, %c1_110, %c128] : memref<1x18x18x256xf32, #tpu.memory_space<vmem>>, vector<1x16x16x128xf32>
    %210 = vector.shape_cast %209 : vector<1x16x16x128xf32> to vector<16x16x128xf32>
    %211 = vector.shape_cast %189 : vector<16x16x128xf32> to vector<1x16x16x128xf32>
    tpu.vector_store %arg8[%c0_108, %c1_109, %c1_110, %c128], %211 {strides = array<i32>} : memref<1x18x18x256xf32, #tpu.memory_space<vmem>>, vector<1x16x16x128xf32>,
    %cst_111 = arith.constant 0.000000e+00 : f32
    %212 = vector.broadcast %cst_111 : f32 to vector<256x128xf32>
    %c0_112 = arith.constant 0 : index
    %c0_113 = arith.constant 0 : index
    %c0_114 = arith.constant 0 : index
    %c0_115 = arith.constant 0 : index
    %213 = vector.load %arg8[%c0_112, %c0_113, %c0_114, %c0_115] : memref<1x18x18x256xf32, #tpu.memory_space<vmem>>, vector<1x16x16x256xf32>
    %214 = vector.shape_cast %213 : vector<1x16x16x256xf32> to vector<16x16x256xf32>
    %215 = vector.shape_cast %214 : vector<16x16x256xf32> to vector<256x256xf32>
    %c0_116 = arith.constant 0 : index
    %c0_117 = arith.constant 0 : index
    %c0_118 = arith.constant 0 : index
    %216 = vector.load %arg7[%c0_116, %c0_117, %c0_118] : memref<9x256x128xf32, #tpu.memory_space<vmem>>, vector<1x256x128xf32>
    %217 = vector.shape_cast %216 : vector<1x256x128xf32> to vector<256x128xf32>
    %cst_119 = arith.constant dense<0.000000e+00> : vector<256x128xf32>
    %218 = tpu.matmul %215, %217, %cst_119 {dimension_numbers = #tpu.dot_dimension_numbers<[1], [0], [0], [1], [0, 0, 1, 1], [], []>} : vector<256x256xf32>, vector<256x128xf32>, vector<256x128xf32> -> vector<256x128xf32>
    %219 = arith.addf %212, %218 : vector<256x128xf32>
    %c0_120 = arith.constant 0 : index
    %c0_121 = arith.constant 0 : index
    %c1_122 = arith.constant 1 : index
    %c0_123 = arith.constant 0 : index
    %220 = vector.load %arg8[%c0_120, %c0_121, %c1_122, %c0_123] : memref<1x18x18x256xf32, #tpu.memory_space<vmem>>, vector<1x16x16x256xf32>
    %221 = vector.shape_cast %220 : vector<1x16x16x256xf32> to vector<16x16x256xf32>
    %222 = vector.shape_cast %221 : vector<16x16x256xf32> to vector<256x256xf32>
    %c1_124 = arith.constant 1 : index
    %c0_125 = arith.constant 0 : index
    %c0_126 = arith.constant 0 : index
    %223 = vector.load %arg7[%c1_124, %c0_125, %c0_126] : memref<9x256x128xf32, #tpu.memory_space<vmem>>, vector<1x256x128xf32>
    %224 = vector.shape_cast %223 : vector<1x256x128xf32> to vector<256x128xf32>
    %cst_127 = arith.constant dense<0.000000e+00> : vector<256x128xf32>
    %225 = tpu.matmul %222, %224, %cst_127 {dimension_numbers = #tpu.dot_dimension_numbers<[1], [0], [0], [1], [0, 0, 1, 1], [], []>} : vector<256x256xf32>, vector<256x128xf32>, vector<256x128xf32> -> vector<256x128xf32>
    %226 = arith.addf %219, %225 : vector<256x128xf32>
    %c0_128 = arith.constant 0 : index
    %c0_129 = arith.constant 0 : index
    %c2_130 = arith.constant 2 : index
    %c0_131 = arith.constant 0 : index
    %227 = vector.load %arg8[%c0_128, %c0_129, %c2_130, %c0_131] : memref<1x18x18x256xf32, #tpu.memory_space<vmem>>, vector<1x16x16x256xf32>
    %228 = vector.shape_cast %227 : vector<1x16x16x256xf32> to vector<16x16x256xf32>
    %229 = vector.shape_cast %228 : vector<16x16x256xf32> to vector<256x256xf32>
    %c2_132 = arith.constant 2 : index
    %c0_133 = arith.constant 0 : index
    %c0_134 = arith.constant 0 : index
    %230 = vector.load %arg7[%c2_132, %c0_133, %c0_134] : memref<9x256x128xf32, #tpu.memory_space<vmem>>, vector<1x256x128xf32>
    %231 = vector.shape_cast %230 : vector<1x256x128xf32> to vector<256x128xf32>
    %cst_135 = arith.constant dense<0.000000e+00> : vector<256x128xf32>
    %232 = tpu.matmul %229, %231, %cst_135 {dimension_numbers = #tpu.dot_dimension_numbers<[1], [0], [0], [1], [0, 0, 1, 1], [], []>} : vector<256x256xf32>, vector<256x128xf32>, vector<256x128xf32> -> vector<256x128xf32>
    %233 = arith.addf %226, %232 : vector<256x128xf32>
    %c0_136 = arith.constant 0 : index
    %c1_137 = arith.constant 1 : index
    %c0_138 = arith.constant 0 : index
    %c0_139 = arith.constant 0 : index
    %234 = vector.load %arg8[%c0_136, %c1_137, %c0_138, %c0_139] : memref<1x18x18x256xf32, #tpu.memory_space<vmem>>, vector<1x16x16x256xf32>
    %235 = vector.shape_cast %234 : vector<1x16x16x256xf32> to vector<16x16x256xf32>
    %236 = vector.shape_cast %235 : vector<16x16x256xf32> to vector<256x256xf32>
    %c3_140 = arith.constant 3 : index
    %c0_141 = arith.constant 0 : index
    %c0_142 = arith.constant 0 : index
    %237 = vector.load %arg7[%c3_140, %c0_141, %c0_142] : memref<9x256x128xf32, #tpu.memory_space<vmem>>, vector<1x256x128xf32>
    %238 = vector.shape_cast %237 : vector<1x256x128xf32> to vector<256x128xf32>
    %cst_143 = arith.constant dense<0.000000e+00> : vector<256x128xf32>
    %239 = tpu.matmul %236, %238, %cst_143 {dimension_numbers = #tpu.dot_dimension_numbers<[1], [0], [0], [1], [0, 0, 1, 1], [], []>} : vector<256x256xf32>, vector<256x128xf32>, vector<256x128xf32> -> vector<256x128xf32>
    %240 = arith.addf %233, %239 : vector<256x128xf32>
    %c0_144 = arith.constant 0 : index
    %c1_145 = arith.constant 1 : index
    %c1_146 = arith.constant 1 : index
    %c0_147 = arith.constant 0 : index
    %241 = vector.load %arg8[%c0_144, %c1_145, %c1_146, %c0_147] : memref<1x18x18x256xf32, #tpu.memory_space<vmem>>, vector<1x16x16x256xf32>
    %242 = vector.shape_cast %241 : vector<1x16x16x256xf32> to vector<16x16x256xf32>
    %243 = vector.shape_cast %242 : vector<16x16x256xf32> to vector<256x256xf32>
    %c4_148 = arith.constant 4 : index
    %c0_149 = arith.constant 0 : index
    %c0_150 = arith.constant 0 : index
    %244 = vector.load %arg7[%c4_148, %c0_149, %c0_150] : memref<9x256x128xf32, #tpu.memory_space<vmem>>, vector<1x256x128xf32>
    %245 = vector.shape_cast %244 : vector<1x256x128xf32> to vector<256x128xf32>
    %cst_151 = arith.constant dense<0.000000e+00> : vector<256x128xf32>
    %246 = tpu.matmul %243, %245, %cst_151 {dimension_numbers = #tpu.dot_dimension_numbers<[1], [0], [0], [1], [0, 0, 1, 1], [], []>} : vector<256x256xf32>, vector<256x128xf32>, vector<256x128xf32> -> vector<256x128xf32>
    %247 = arith.addf %240, %246 : vector<256x128xf32>
    %c0_152 = arith.constant 0 : index
    %c1_153 = arith.constant 1 : index
    %c2_154 = arith.constant 2 : index
    %c0_155 = arith.constant 0 : index
    %248 = vector.load %arg8[%c0_152, %c1_153, %c2_154, %c0_155] : memref<1x18x18x256xf32, #tpu.memory_space<vmem>>, vector<1x16x16x256xf32>
    %249 = vector.shape_cast %248 : vector<1x16x16x256xf32> to vector<16x16x256xf32>
    %250 = vector.shape_cast %249 : vector<16x16x256xf32> to vector<256x256xf32>
    %c5_156 = arith.constant 5 : index
    %c0_157 = arith.constant 0 : index
    %c0_158 = arith.constant 0 : index
    %251 = vector.load %arg7[%c5_156, %c0_157, %c0_158] : memref<9x256x128xf32, #tpu.memory_space<vmem>>, vector<1x256x128xf32>
    %252 = vector.shape_cast %251 : vector<1x256x128xf32> to vector<256x128xf32>
    %cst_159 = arith.constant dense<0.000000e+00> : vector<256x128xf32>
    %253 = tpu.matmul %250, %252, %cst_159 {dimension_numbers = #tpu.dot_dimension_numbers<[1], [0], [0], [1], [0, 0, 1, 1], [], []>} : vector<256x256xf32>, vector<256x128xf32>, vector<256x128xf32> -> vector<256x128xf32>
    %254 = arith.addf %247, %253 : vector<256x128xf32>
    %c0_160 = arith.constant 0 : index
    %c2_161 = arith.constant 2 : index
    %c0_162 = arith.constant 0 : index
    %c0_163 = arith.constant 0 : index
    %255 = vector.load %arg8[%c0_160, %c2_161, %c0_162, %c0_163] : memref<1x18x18x256xf32, #tpu.memory_space<vmem>>, vector<1x16x16x256xf32>
    %256 = vector.shape_cast %255 : vector<1x16x16x256xf32> to vector<16x16x256xf32>
    %257 = vector.shape_cast %256 : vector<16x16x256xf32> to vector<256x256xf32>
    %c6_164 = arith.constant 6 : index
    %c0_165 = arith.constant 0 : index
    %c0_166 = arith.constant 0 : index
    %258 = vector.load %arg7[%c6_164, %c0_165, %c0_166] : memref<9x256x128xf32, #tpu.memory_space<vmem>>, vector<1x256x128xf32>
    %259 = vector.shape_cast %258 : vector<1x256x128xf32> to vector<256x128xf32>
    %cst_167 = arith.constant dense<0.000000e+00> : vector<256x128xf32>
    %260 = tpu.matmul %257, %259, %cst_167 {dimension_numbers = #tpu.dot_dimension_numbers<[1], [0], [0], [1], [0, 0, 1, 1], [], []>} : vector<256x256xf32>, vector<256x128xf32>, vector<256x128xf32> -> vector<256x128xf32>
    %261 = arith.addf %254, %260 : vector<256x128xf32>
    %c0_168 = arith.constant 0 : index
    %c2_169 = arith.constant 2 : index
    %c1_170 = arith.constant 1 : index
    %c0_171 = arith.constant 0 : index
    %262 = vector.load %arg8[%c0_168, %c2_169, %c1_170, %c0_171] : memref<1x18x18x256xf32, #tpu.memory_space<vmem>>, vector<1x16x16x256xf32>
    %263 = vector.shape_cast %262 : vector<1x16x16x256xf32> to vector<16x16x256xf32>
    %264 = vector.shape_cast %263 : vector<16x16x256xf32> to vector<256x256xf32>
    %c7_172 = arith.constant 7 : index
    %c0_173 = arith.constant 0 : index
    %c0_174 = arith.constant 0 : index
    %265 = vector.load %arg7[%c7_172, %c0_173, %c0_174] : memref<9x256x128xf32, #tpu.memory_space<vmem>>, vector<1x256x128xf32>
    %266 = vector.shape_cast %265 : vector<1x256x128xf32> to vector<256x128xf32>
    %cst_175 = arith.constant dense<0.000000e+00> : vector<256x128xf32>
    %267 = tpu.matmul %264, %266, %cst_175 {dimension_numbers = #tpu.dot_dimension_numbers<[1], [0], [0], [1], [0, 0, 1, 1], [], []>} : vector<256x256xf32>, vector<256x128xf32>, vector<256x128xf32> -> vector<256x128xf32>
    %268 = arith.addf %261, %267 : vector<256x128xf32>
    %c0_176 = arith.constant 0 : index
    %c2_177 = arith.constant 2 : index
    %c2_178 = arith.constant 2 : index
    %c0_179 = arith.constant 0 : index
    %269 = vector.load %arg8[%c0_176, %c2_177, %c2_178, %c0_179] : memref<1x18x18x256xf32, #tpu.memory_space<vmem>>, vector<1x16x16x256xf32>
    %270 = vector.shape_cast %269 : vector<1x16x16x256xf32> to vector<16x16x256xf32>
    %271 = vector.shape_cast %270 : vector<16x16x256xf32> to vector<256x256xf32>
    %c8_180 = arith.constant 8 : index
    %c0_181 = arith.constant 0 : index
    %c0_182 = arith.constant 0 : index
    %272 = vector.load %arg7[%c8_180, %c0_181, %c0_182] : memref<9x256x128xf32, #tpu.memory_space<vmem>>, vector<1x256x128xf32>
    %273 = vector.shape_cast %272 : vector<1x256x128xf32> to vector<256x128xf32>
    %cst_183 = arith.constant dense<0.000000e+00> : vector<256x128xf32>
    %274 = tpu.matmul %271, %273, %cst_183 {dimension_numbers = #tpu.dot_dimension_numbers<[1], [0], [0], [1], [0, 0, 1, 1], [], []>} : vector<256x256xf32>, vector<256x128xf32>, vector<256x128xf32> -> vector<256x128xf32>
    %275 = arith.addf %268, %274 : vector<256x128xf32>
    %276 = vector.shape_cast %275 : vector<256x128xf32> to vector<16x16x128xf32>
    %c0_184 = arith.constant 0 : index
    %c0_185 = arith.constant 0 : index
    %c0_186 = arith.constant 0 : index
    %c0_187 = arith.constant 0 : index
    %277 = vector.load %arg9[%c0_184, %c0_185, %c0_186, %c0_187] : memref<1x16x16x128xf32, #tpu.memory_space<vmem>>, vector<1x16x16x128xf32>
    %278 = vector.shape_cast %277 : vector<1x16x16x128xf32> to vector<16x16x128xf32>
    %279 = vector.shape_cast %276 : vector<16x16x128xf32> to vector<1x16x16x128xf32>
    tpu.vector_store %arg9[%c0_184, %c0_185, %c0_186, %c0_187], %279 {strides = array<i32>} : memref<1x16x16x128xf32, #tpu.memory_space<vmem>>, vector<1x16x16x128xf32>,
    %cst_188 = arith.constant dense<0.000000e+00> : vector<128xf32>
    %280 = vector.multi_reduction <add>, %275, %cst_188 [0] : vector<256x128xf32> to vector<128xf32>
    %281 = vector.shape_cast %280 : vector<128xf32> to vector<1x128xf32>
    %282 = vector.shape_cast %281 : vector<1x128xf32> to vector<1x1x128xf32>
    %c0_189 = arith.constant 0 : index
    %c0_190 = arith.constant 0 : index
    %c0_191 = arith.constant 0 : index
    %283 = vector.load %arg10[%c0_189, %c0_190, %c0_191] : memref<1x1x128xf32, #tpu.memory_space<vmem>>, vector<1x1x128xf32>
    tpu.vector_store %arg10[%c0_189, %c0_190, %c0_191], %282 {strides = array<i32>} : memref<1x1x128xf32, #tpu.memory_space<vmem>>, vector<1x1x128xf32>,
    %284 = arith.mulf %275, %275 : vector<256x128xf32>
    %cst_192 = arith.constant dense<0.000000e+00> : vector<128xf32>
    %285 = vector.multi_reduction <add>, %284, %cst_192 [0] : vector<256x128xf32> to vector<128xf32>
    %286 = vector.shape_cast %285 : vector<128xf32> to vector<1x128xf32>
    %287 = vector.shape_cast %286 : vector<1x128xf32> to vector<1x1x128xf32>
    %c0_193 = arith.constant 0 : index
    %c0_194 = arith.constant 0 : index
    %c0_195 = arith.constant 0 : index
    %288 = vector.load %arg11[%c0_193, %c0_194, %c0_195] : memref<1x1x128xf32, #tpu.memory_space<vmem>>, vector<1x1x128xf32>
    tpu.vector_store %arg11[%c0_193, %c0_194, %c0_195], %287 {strides = array<i32>} : memref<1x1x128xf32, #tpu.memory_space<vmem>>, vector<1x1x128xf32>,
    return
  }
  func.func @transform_0(%arg0: i32) -> (i32, i32, i32, i32) {
    %c0_i32 = arith.constant 0 : i32
    %c0_i32_0 = arith.constant 0 : i32
    %c0_i32_1 = arith.constant 0 : i32
    %c0_i32_2 = arith.constant 0 : i32
    return %arg0, %c0_i32, %c0_i32_0, %c0_i32_1 : i32, i32, i32, i32
  }
  func.func @transform_1(%arg0: i32) -> (i32, i32, i32, i32) {
    %c0_i32 = arith.constant 0 : i32
    %c0_i32_0 = arith.constant 0 : i32
    %c0_i32_1 = arith.constant 0 : i32
    %c0_i32_2 = arith.constant 0 : i32
    return %arg0, %c0_i32, %c0_i32_0, %c0_i32_1 : i32, i32, i32, i32
  }
  func.func @transform_2(%arg0: i32) -> (i32, i32, i32) {
    %c0_i32 = arith.constant 0 : i32
    %c0_i32_0 = arith.constant 0 : i32
    %c0_i32_1 = arith.constant 0 : i32
    %c0_i32_2 = arith.constant 0 : i32
    return %c0_i32, %c0_i32_0, %c0_i32_1 : i32, i32, i32
  }
  func.func @transform_3(%arg0: i32) -> (i32, i32, i32, i32) {
    %c0_i32 = arith.constant 0 : i32
    %c0_i32_0 = arith.constant 0 : i32
    %c0_i32_1 = arith.constant 0 : i32
    %c0_i32_2 = arith.constant 0 : i32
    %c0_i32_3 = arith.constant 0 : i32
    return %c0_i32, %c0_i32_0, %c0_i32_1, %c0_i32_2 : i32, i32, i32, i32
  }
  func.func @transform_4(%arg0: i32) -> (i32, i32, i32) {
    %c0_i32 = arith.constant 0 : i32
    %c0_i32_0 = arith.constant 0 : i32
    %c0_i32_1 = arith.constant 0 : i32
    %c0_i32_2 = arith.constant 0 : i32
    return %c0_i32, %c0_i32_0, %c0_i32_1 : i32, i32, i32
  }
  func.func @transform_5(%arg0: i32) -> (i32, i32, i32, i32) {
    %c0_i32 = arith.constant 0 : i32
    %c0_i32_0 = arith.constant 0 : i32
    %c0_i32_1 = arith.constant 0 : i32
    %c0_i32_2 = arith.constant 0 : i32
    %c0_i32_3 = arith.constant 0 : i32
    return %c0_i32, %c0_i32_0, %c0_i32_1, %c0_i32_2 : i32, i32, i32, i32
  }
  func.func @transform_6(%arg0: i32) -> (i32, i32, i32) {
    %c0_i32 = arith.constant 0 : i32
    %c0_i32_0 = arith.constant 0 : i32
    %c0_i32_1 = arith.constant 0 : i32
    %c0_i32_2 = arith.constant 0 : i32
    return %c0_i32, %c0_i32_0, %c0_i32_1 : i32, i32, i32
  }
  func.func @transform_7(%arg0: i32) -> (i32, i32, i32, i32) {
    %c0_i32 = arith.constant 0 : i32
    %c0_i32_0 = arith.constant 0 : i32
    %c0_i32_1 = arith.constant 0 : i32
    %c0_i32_2 = arith.constant 0 : i32
    return %arg0, %c0_i32, %c0_i32_0, %c0_i32_1 : i32, i32, i32, i32
  }
  func.func @transform_8(%arg0: i32) -> (i32, i32, i32, i32) {
    %c0_i32 = arith.constant 0 : i32
    %c0_i32_0 = arith.constant 0 : i32
    %c0_i32_1 = arith.constant 0 : i32
    %c0_i32_2 = arith.constant 0 : i32
    return %arg0, %c0_i32, %c0_i32_0, %c0_i32_1 : i32, i32, i32, i32
  }
  func.func @transform_9(%arg0: i32) -> (i32, i32, i32) {
    %c0_i32 = arith.constant 0 : i32
    %c0_i32_0 = arith.constant 0 : i32
    %c0_i32_1 = arith.constant 0 : i32
    return %arg0, %c0_i32, %c0_i32_0 : i32, i32, i32
  }
  func.func @transform_10(%arg0: i32) -> (i32, i32, i32) {
    %c0_i32 = arith.constant 0 : i32
    %c0_i32_0 = arith.constant 0 : i32
    %c0_i32_1 = arith.constant 0 : i32
    return %arg0, %c0_i32, %c0_i32_0 : i32, i32, i32
  }
}

</mosaic_0001>

<bundles_post_ra>
// kernel: tpu_custom_call.1
= control target key start
LH: loop header
LB: loop body
LE: loop exit
PB: predicated region body
PF: predicated region fallthrough
CT: control target
= control target key end

     0   :  { %s18086_s0 = inlined_call_operand.hbm [shape: f32[2,8,8,128], index: 0, kind: input, shape index: {}]   ;;  %s18087_s1 = inlined_call_operand.vmem [shape: f32[2,12,12,128], index: 1, kind: input, shape index: {}]   ;;  %s18088_s2 = inlined_call_operand.vmem [shape: f32[8,16,8], index: 2, kind: input, shape index: {}]   ;;  %s18089_s3 = inlined_call_operand.hbm [shape: f32[8,16,1,128], index: 3, kind: input, shape index: {}]   ;;  %s18090_s4 = inlined_call_operand.hbm [shape: f32[12,16,12], index: 4, kind: input, shape index: {}]   ;;  %s18091_s5 = inlined_call_operand.hbm [shape: f32[12,16,1,128], index: 5, kind: input, shape index: {}]   ;;  %s18092_s6 = inlined_call_operand.hbm [shape: f32[9,256,128], index: 6, kind: input, shape index: {}]   ;;  %s18093_s7 = inlined_call_operand.vmem [shape: f32[2,18,18,256], index: 7, kind: output, shape index: {0}]   ;;  %s18094_s8 = inlined_call_operand.hbm [shape: f32[2,16,16,128], index: 8, kind: output, shape index: {1}]   ;;  %s18095_s9 = inlined_call_operand.hbm [shape: f32[2,1,128], index: 9, kind: output, shape index: {2}]   ;;  %s18096_s10 = inlined_call_operand.hbm [shape: f32[2,1,128], index: 10, kind: output, shape index: {3}]  }
   0x1   :  { %18273 = sst [smem:[#allocation84_spill]] %s18086_s0 }
   0x2   :  { %18274 = sst [smem:[#allocation85_spill]] %s18095_s9 }
   0x3   :  { %18275 = sst [smem:[#allocation86_spill]] %s18096_s10 }
   0x4   :  { %16 = vsyncpa [#allocation3], 0 }
   0x5   :  { %18 = vsyncpa [#allocation3 + $0x1], 0 }
   0x6   :  { %19 = vsyncpa [#allocation6], 0 }
   0x7   :  { %20 = vsyncpa [#allocation9], 0 }
   0x8   :  { %21 = vsyncpa [#allocation4], 0 }
   0x9   :  { %23 = vsyncpa [#allocation4 + $0x1], 0 }
   0xa   :  { %24 = vsyncpa [#allocation13], 0 }
   0xb   :  { %26 = vsyncpa [#allocation13 + $0x1], 0  ;;  %s14383_s13 = smov 0   ;;  %s14385_s14 = smov 0  }
   0xc   :  { %s14387_s15 = smov 0   ;;  %s14389_s16 = smov 0  }
   0xd LB: > { %18276 = sst [smem:[#allocation20_spill]] %s14297_s13  ;;  %s14404_s17 = sadd.s32 4294967295, %s14309_s16   ;;  %s14309_s16 = sphi %s14389_s16, %s18694_s16   ;;  %s14305_s15 = sphi %s14387_s15, %s18693_s15   ;;  %s14301_s14 = sphi %s14385_s14, %s18692_s14   ;;  %s14297_s13 = sphi %s14383_s13, %s18691_s13  }
   0xe   : > { %s18097_s18 = sadd.s32 4294967294, %s14309_s16   ;;  %p52_p0 = scmp.ne.s32.totalorder %s14301_s14, %s14297_s13 }
   0xf   : > { %p18098_p1 = scmp.eq.s32.totalorder %s14404_s17, 0  ;;  %p239_p3 = scmp.eq.s32.totalorder %s18097_s18, 1 }
  0x10   : > { %p11641_p5 = scmp.ge.s32.totalorder %s14309_s16, 1  ;;  %p298_p7 = scmp.lt.s32.totalorder %s14309_s16, 3 }
  0x11   : > { %p14415_p4 = por %p18098_p1, %p52_p0  ;;  %p14420_p6 = por %p239_p3, %p52_p0 }
  0x12   : > { %p14425_p8 = pnand %p11641_p5, %p298_p7  ;;  %s14311_s22 = smov [#allocation5]  }
  0x13   : > { %s18277_s19 = scalar_select %p14415_p4, 1, 0 }
  0x14   : > { %s18278_s20 = scalar_select %p14420_p6, 1, 0 }
  0x15   : > { %s18280_s21 = scalar_select %p14425_p8, 1, 0 }
  0x16   : > { %18279 = sst [smem:[#allocation21_spill]] %s18278_s20  ;;  %s313_s23 = sshll.u32 %s14311_s22, 4  ;;  %s14429_s23 = int_to_ptr.vmem [resolvable:$true] %s313_s23 }
  0x17   : > { %p13863_p9 = pneg %p14425_p8  ;;  %s14312_s25 = smov [#allocation8]  }
  0x18   : > { %s339_s26 = sshll.u32 %s14312_s25, 4  ;;  %s14313_s27 = smov [#allocation7]   ;;  %s14440_s26 = int_to_ptr.vmem [resolvable:$true] %s339_s26 }
  0x19   : > { %p14436_p11 = pnand %p13863_p9, %p18098_p1  ;;  %s14442_s28 = sshll.u32 %s14313_s27, 4  ;;  %s327_s28 = int_to_ptr.vmem [resolvable:$true] %s14442_s28 }
  0x1a   : > { %s14033_s11 = scalar_lea.hbm %s18089_s3, 2048 }
  0x1b   : > { %p14034_p12 = scmp.ne.s32.totalorder %s18089_s3, %s14033_s11  ;;  %p14452_p13 = pneg %p14436_p11 }
  0x1c   : > { %p14040_p5 = scmp.lt.u32.totalorder %s14033_s11, %s18089_s3 }
  0x1d   : > { %p14036_p0 = pnand %p14452_p13, %p14034_p12 }
  0x1f   : > { %p14037_p3 = pneg %p14036_p0 }
  0x21   : > { %p14042_p7 = pnand %p14040_p5, %p14037_p3 }
  0x23   : > { %14045 = shalt.err (!%p14042_p7)
}
  0x24   : > { %s14046_s29 = scalar_lea.vmem %s14429_s23, 2048  ;;  %p14054_p2 = scmp.lt.s32.totalorder %s14429_s23, %s14429_s23 }
  0x25   : > { %p14047_p9 = scmp.ne.s32.totalorder %s14429_s23, %s14046_s29  ;;  %p14055_p6 = scmp.lt.s32.totalorder %s14046_s29, %s14046_s29 }
  0x27   : > { %p14049_p10 = pnand %p14047_p9, %p14452_p13  ;;  %p14056_p12 = por %p14055_p6, %p14054_p2 }
  0x29   : > { %p14050_p1 = pneg %p14049_p10 }
  0x2b   : > { %p14057_p0 = pnand %p14056_p12, %p14050_p1 }
  0x2d   : > { %14060 = shalt.err (!%p14057_p0)
}
  0x2e   : > { %s14314_s30 = smov 16   ;;  %s14315_s11 = smov 1  }
  0x2f   : > { %13866 = dma.hbm_to_vmem [thread:$0]  (!%p14436_p11), %s18089_s3, 2048, %s14429_s23, [#allocation6], %s14314_s30, %s14314_s30, %s14315_s11  }
  0x30   : > { %s14061_s20 = scalar_lea.hbm %s18091_s5, 3072 }
  0x31   : > { %p14062_p2 = scmp.ne.s32.totalorder %s18091_s5, %s14061_s20  ;;  %p14068_p10 = scmp.lt.u32.totalorder %s14061_s20, %s18091_s5 }
  0x33   : > { %p14064_p1 = pnand %p14062_p2, %p14452_p13 }
  0x35   : > { %p14065_p6 = pneg %p14064_p1 }
  0x37   : > { %p14070_p3 = pnand %p14068_p10, %p14065_p6 }
  0x39   : > { %14073 = shalt.err (!%p14070_p3)
}
  0x3a   : > { %s14074_s23 = scalar_lea.vmem %s14440_s26, 3072  ;;  %p14082_p12 = scmp.lt.s32.totalorder %s14440_s26, %s14440_s26 }
  0x3b   : > { %p14075_p5 = scmp.ne.s32.totalorder %s14440_s26, %s14074_s23  ;;  %p14083_p0 = scmp.lt.s32.totalorder %s14074_s23, %s14074_s23 }
  0x3d   : > { %p14077_p7 = pnand %p14075_p5, %p14452_p13  ;;  %p14084_p2 = por %p14083_p0, %p14082_p12 }
  0x3f   : > { %p14078_p9 = pneg %p14077_p7 }
  0x41   : > { %p14085_p1 = pnand %p14084_p2, %p14078_p9 }
  0x43   : > { %14088 = shalt.err (!%p14085_p1)
}
  0x44   : > { %13872 = dma.hbm_to_vmem [thread:$0]  (!%p14436_p11), %s18091_s5, 3072, %s14440_s26, [#allocation9], %s14314_s30, %s14314_s30, %s14315_s11  }
  0x45   : > { %s14089_s12 = scalar_lea.hbm %s18090_s4, 3072 }
  0x46   : > { %p14090_p6 = scmp.ne.s32.totalorder %s18090_s4, %s14089_s12  ;;  %p14096_p5 = scmp.lt.u32.totalorder %s14089_s12, %s18090_s4 }
  0x48   : > { %p14092_p10 = pnand %p14090_p6, %p14452_p13 }
  0x4a   : > { %p14093_p3 = pneg %p14092_p10 }
  0x4c   : > { %p14098_p7 = pnand %p14096_p5, %p14093_p3 }
  0x4e   : > { %14101 = shalt.err (!%p14098_p7)
}
  0x4f   : > { %s14102_s23 = scalar_lea.vmem %s327_s28, 3072  ;;  %p14110_p2 = scmp.lt.s32.totalorder %s327_s28, %s327_s28 }
  0x50   : > { %p14103_p9 = scmp.ne.s32.totalorder %s327_s28, %s14102_s23  ;;  %p14111_p1 = scmp.lt.s32.totalorder %s14102_s23, %s14102_s23 }
  0x52   : > { %p14105_p12 = pnand %p14103_p9, %p14452_p13  ;;  %p14112_p4 = por %p14111_p1, %p14110_p2 }
  0x54   : > { %p14106_p0 = pneg %p14105_p12 }
  0x56   : > { %p14113_p8 = pnand %p14112_p4, %p14106_p0 }
  0x58   : > { %14116 = shalt.err (!%p14113_p8)
}
  0x59   : > { %s14316_s26 = smov 128   ;;  %s14317_s30 = smov 8  }
  0x5a   : > { %13869 = dma.hbm_to_vmem [thread:$0]  (!%p14436_p11), %s18090_s4, 3072, %s327_s28, [#allocation6], %s14316_s26, %s14316_s26, %s14317_s30  }
  0x5b   : > { %s14318_s10 = smov [#allocation10]   ;;  %s14117_s22 = scalar_lea.hbm %s18092_s6, 36864 }
  0x5c   : > { %s352_s13 = sshll.u32 %s14318_s10, 4  ;;  %p14118_p4 = scmp.ne.s32.totalorder %s18092_s6, %s14117_s22  ;;  %s353_s13 = int_to_ptr.vmem [resolvable:$true] %s352_s13 }
  0x5d   : > { %p14124_p10 = scmp.lt.u32.totalorder %s14117_s22, %s18092_s6 }
  0x5e   : > { %p14120_p8 = pnand %p14118_p4, %p14452_p13 }
  0x60   : > { %p14121_p6 = pneg %p14120_p8 }
  0x62   : > { %p14126_p3 = pnand %p14124_p10, %p14121_p6 }
  0x64   : > { %14129 = shalt.err (!%p14126_p3)
}
  0x65   : > { %s14130_s28 = scalar_lea.vmem %s353_s13, 36864  ;;  %p14138_p12 = scmp.lt.s32.totalorder %s353_s13, %s353_s13 }
  0x66   : > { %p14131_p5 = scmp.ne.s32.totalorder %s353_s13, %s14130_s28  ;;  %p14139_p0 = scmp.lt.s32.totalorder %s14130_s28, %s14130_s28 }
  0x68   : > { %p14133_p7 = pnand %p14131_p5, %p14452_p13  ;;  %p14140_p2 = por %p14139_p0, %p14138_p12 }
  0x6a   : > { %p14134_p9 = pneg %p14133_p7 }
  0x6c   : > { %p14141_p1 = pnand %p14140_p2, %p14134_p9 }
  0x6e   : > { %14144 = shalt.err (!%p14141_p1)
}
  0x6f   : > { %13875 = dma.hbm_to_vmem [thread:$0]  (!%p14436_p11), %s18092_s6, 36864, %s353_s13, [#allocation9], %s14316_s26, %s14316_s26, %s14317_s30  }
  0x70   : > { %s14540_s18 = sadd.s32 1, %s14309_s16   ;;  %s39_s24 = sadd.s32 1, %s14305_s15 }
  0x71   : > { %s36_s10 = ssub.s32 %s14309_s16, %s14540_s18  ;;  %p46_p13 = scmp.ne.s32.totalorder %s14305_s15, %s14301_s14 }
  0x72   : > { %p37_p4 = scmp.eq.s32.totalorder %s36_s10, 0  ;;  %p47_p8 = scmp.eq.s32.totalorder %s14309_s16, 0 }
  0x73   : > { %p18283_p6 = scmp.eq.s32.totalorder %s14404_s17, 1  ;;  %p13894_p3 = scmp.lt.s32.totalorder %s14309_s16, 2 }
  0x74   : > { %s14556_s12 = scalar_select %p37_p4, %s14305_s15, %s39_s24  }
  0x75   : > { %p14550_p10 = por %p18283_p6, %p46_p13  ;;  %p48_p5 = por %p47_p8, %p46_p13 }
  0x76   : > { %s366_s22 = sand.u32 1, %s14305_s15   ;;  %s12623_s13 = sshll.u32 %s14309_s16, 10 }
  0x77   : > { %s11647_s25 = sshll.u32 %s366_s22, 6  ;;  %s18285_s0 = sld [smem:[#allocation84_spill]] }
  0x78   : > { %s370_s28 = scalar_lea.vmem [#allocation2], %s11647_s25  ;;  %p14567_p11 = pnand %p13894_p3, %p48_p5 }
  0x79   : > { %s377_s11 = sshll.u32 %s370_s28, 4  ;;  %s14571_s24 = scalar_lea.sflag [#allocation3], %s366_s22  ;;  %s14565_s11 = int_to_ptr.vmem [resolvable:$true] %s377_s11 }
  0x7a   : > { %p14147_p9 = pneg %p14567_p11 }
  0x7d   : > { %s14563_s23 = scalar_lea.hbm %s18285_s0, %s12623_s13  ;;  %s14150_s27 = scalar_lea.hbm %s18285_s0, 2048 }
  0x7e   : > { %s14145_s10 = scalar_lea.hbm %s14563_s23, 1024  ;;  %p14151_p2 = scmp.lt.u32.totalorder %s14563_s23, %s18285_s0 }
  0x7f   : > { %p14146_p7 = scmp.ne.s32.totalorder %s14563_s23, %s14145_s10  ;;  %p14152_p1 = scmp.lt.u32.totalorder %s14150_s27, %s14145_s10 }
  0x80   : > { %p14154_p4 = scmp.lt.u32.totalorder %s14145_s10, %s14563_s23 }
  0x81   : > { %p14148_p12 = pnand %p14147_p9, %p14146_p7  ;;  %p14153_p13 = por %p14152_p1, %p14151_p2 }
  0x83   : > { %p14149_p0 = pneg %p14148_p12  ;;  %p14155_p8 = por %p14154_p4, %p14153_p13 }
  0x85   : > { %p14156_p6 = pnand %p14155_p8, %p14149_p0 }
  0x87   : > { %14159 = shalt.err (!%p14156_p6)
}
  0x88   : > { %s14160_s22 = scalar_lea.vmem %s14565_s11, 1024  ;;  %s14319_s25 = smov [#allocation2]  }
  0x89   : > { %p14161_p3 = scmp.ne.s32.totalorder %s14565_s11, %s14160_s22  ;;  %s14165_s13 = sshll.u32 %s14319_s25, 4  ;;  %s14166_s13 = int_to_ptr.vmem [resolvable:$false] %s14165_s13 }
  0x8a   : > { %s14167_s29 = scalar_lea.vmem %s14166_s13, 2048  ;;  %p14168_p12 = scmp.lt.s32.totalorder %s14565_s11, %s14166_s13 }
  0x8b   : > { %p14163_p5 = pnand %p14161_p3, %p14147_p9  ;;  %p14169_p2 = scmp.lt.s32.totalorder %s14167_s29, %s14160_s22 }
  0x8d   : > { %p14164_p7 = pneg %p14163_p5  ;;  %p14170_p1 = por %p14169_p2, %p14168_p12 }
  0x8f   : > { %p14171_p13 = pnand %p14170_p1, %p14164_p7 }
  0x91   : > { %14174 = shalt.err (!%p14171_p13)
}
  0x92   : > { %13879 = dma.hbm_to_vmem [thread:$0]  (!%p14567_p11), %s14563_s23, 1024, %s14565_s11, %s14571_s24, %s14316_s26, %s14316_s26, %s14317_s30  }
  0x93   : > { %p18287_p9 = scmp.ne.s32.totalorder %s18280_s21, 0 }
  0x95   : > { %397 = sbr.rel (%p18287_p9) target bundleno = 1546 (0x60a), region = 48 }
  0x9c   : > { %s14605_s10 = sand.u32 1, %s14301_s14   ;;  %p18288_p0 = scmp.ne.s32.totalorder %s18277_s19, 0 }
  0x9d   : > { %s11651_s27 = sshll.u32 %s14605_s10, 6  ;;  %s400_s28 = scalar_lea.sflag [#allocation3], %s14605_s10 }
  0x9e   : > { %s14609_s22 = scalar_lea.vmem [#allocation2], %s11651_s27 }
  0x9f   : > { %14276 = dma.done.wait (%p18288_p0), %s400_s28, 1024  }
  0xa0   : > { %14278 = vsyncadd (%p18288_p0), %s400_s28, 4294966272  ;;  %p18289_p11 = scmp.eq.s32.totalorder %s14404_s17, 0 }
  0xa2   : > { %14280 = dma.done.wait (%p18289_p11), [#allocation6], 5120   ;;  %p18290_p4 = pmov %p18289_p11 }
  0xa4   : > { %14282 = vsyncadd (%p18290_p4), [#allocation6], 4294962176  ;;  %p18291_p8 = pmov %p18290_p4 }
  0xa5   : > { %p18292_p6 = pmov %p18290_p4 }
  0xa6   : > { %14284 = dma.done.wait (%p18291_p8), [#allocation9], 39936  }
  0xa7   : > { %14286 = vsyncadd (%p18292_p6), [#allocation9], 4294927360  ;;  %p474_p3 = scmp.lt.s32.totalorder %s14404_s17, 1  ;;  %vm508_vm0 = vcmask 64512   ;;  %v500_v0 = vld [vmem:[%s14609_s22] sm:$0xff]  ;;  %v501_v1 = vld [vmem:[%s14609_s22 + $0x8] sm:$0xff] }
  0xa8   : > { %v484_v2 = vld [vmem:[%s18088_s2] sm:$0xff]  ;;  %12697 = vmatprep.subr.mxu0 %v500_v0  ;;  %12702 = vmatprep.subr.mxu1 %v501_v1  ;;  %v486_v3 = vld [vmem:[%s18088_s2 + $0x10] sm:$0xff]  ;;  %v485_v4 = vld [vmem:[%s18088_s2 + $0x8] sm:$0xff]  ;;  %vm2627_vm1 = vcmask 1043456   ;;  %vm14320_vm2 = vmmov 1   ;;  %vm2620_vm4 = vcmask 97280  }
  0xa9   : > { %s14625_s19 = scalar_select %p474_p3, %s14404_s17, 1  ;;  %v487_v5 = vld [vmem:[%s18088_s2 + $0x18] sm:$0xff]  ;;  %12698 = vmatpush3.msra.mxu0 %v500_v0  ;;  %12699 = vmatprep.mubr.msk.f32.mxu0 %vm508_vm0, %v484_v2  ;;  %v502_v6 = vld [vmem:[%s14609_s22 + $0x10] sm:$0xff]  ;;  %v488_v8 = vld [vmem:[%s18088_s2 + $0x20] sm:$0xff]  ;;  %vm6487_vm5 = vcmask 1046528   ;;  %vm5909_vm6 = vcmask 1040384  }
  0xaa   : > { %v503_v7 = vld [vmem:[%s14609_s22 + $0x18] sm:$0xff]  ;;  %12703 = vmatpush3.msra.mxu1 %v501_v1  ;;  %12704 = vmatprep.mubr.msk.f32.mxu1 %vm508_vm0, %v486_v3  ;;  %v490_v9 = vld [vmem:[%s18088_s2 + $0x30] sm:$0xff]  ;;  %v489_v10 = vld [vmem:[%s18088_s2 + $0x28] sm:$0xff]  ;;  %vm7323_vm8 = vcmask 1045504   ;;  %s12624_s11 = sshll.u32 %s14404_s17, 12  ;;  %s11389_s27 = scalar_lea.sflag [#allocation4], %s14605_s10 }
  0xab   : > { %s13837_s13 = smul.u32 192, %s14625_s19  ;;  %12700 = vmatmul.mubr.msk.f32.vlgmr.msra.gmra.mrb[0].mxu0 %vm508_vm0, %v485_v4  ;;  %12705 = vmatmul.mubr.msk.f32.vlgmr.msra.gmra.mrb[0].mxu1 %vm508_vm0, %v487_v5  ;;  %v491_v11 = vld [vmem:[%s18088_s2 + $0x38] sm:$0xff]  ;;  %v504_v12 = vld [vmem:[%s14609_s22 + $0x20] sm:$0xff]  ;;  %v505_v13 = vld [vmem:[%s14609_s22 + $0x28] sm:$0xff]  ;;  %s17969_s29 = scalar_lea.hbm %s18094_s8, %s12624_s11 }
  0xac   : > { %12707 = vmatprep.subr.mxu0 %v502_v6  ;;  %12712 = vmatprep.subr.mxu1 %v503_v7  ;;  %v492_v14 = vld [vmem:[%s18088_s2 + $0x40] sm:$0xff]  ;;  %v494_v15 = vld [vmem:[%s18088_s2 + $0x50] sm:$0xff]  ;;  %v493_v16 = vld [vmem:[%s18088_s2 + $0x48] sm:$0xff]  ;;  %s14323_s21 = smov [#allocation11]  }
  0xad   : > { %12708 = vmatpush3.msra.mxu0 %v502_v6  ;;  %12709 = vmatprep.mubr.msk.f32.mxu0 %vm508_vm0, %v488_v8  ;;  %s14666_s25 = scalar_lea.vmem %s18087_s1, %s13837_s13  ;;  %v495_v17 = vld [vmem:[%s18088_s2 + $0x58] sm:$0xff]  ;;  %v506_v18 = vld [vmem:[%s14609_s22 + $0x30] sm:$0xff]  ;;  %v496_v24 = vld [vmem:[%s18088_s2 + $0x60] sm:$0xff] }
  0xae   : > { %12713 = vmatpush3.msra.mxu1 %v503_v7  ;;  %12714 = vmatprep.mubr.msk.f32.mxu1 %vm508_vm0, %v490_v9  ;;  %v507_v19 = vld [vmem:[%s14609_s22 + $0x38] sm:$0xff]  ;;  %v2596_v20 = vld [vmem:[%s14666_s25] sm:$0xff]  ;;  %v2597_v21 = vld [vmem:[%s14666_s25 + $0x8] sm:$0xf] }
  0xaf   : > { %12710 = vmatmul.mubr.msk.f32.vlgmr.msra.gmra.mrb[2].mxu0 %vm508_vm0, %v489_v10  ;;  %12715 = vmatmul.mubr.msk.f32.vlgmr.msra.gmra.mrb[2].mxu1 %vm508_vm0, %v491_v11  ;;  %v2598_v22 = vld [vmem:[%s14666_s25 + $0x10] sm:$0xff]  ;;  %v2599_v23 = vld [vmem:[%s14666_s25 + $0x18] sm:$0xf]  ;;  %v497_v26 = vld [vmem:[%s18088_s2 + $0x68] sm:$0xff]  ;;  %v12821_v29 = vpack.c.bf16 %v2597_v21, %v2596_v20 }
  0xb0   : > { %12717 = vmatprep.subr.mxu0 %v504_v12  ;;  %12722 = vmatprep.subr.mxu1 %v505_v13  ;;  %v498_v25 = vld [vmem:[%s18088_s2 + $0x70] sm:$0xff]  ;;  %v499_v27 = vld [vmem:[%s18088_s2 + $0x78] sm:$0xff]  ;;  %v2600_v28 = vld [vmem:[%s14666_s25 + $0x20] sm:$0xff]  ;;  %v12827_v30 = vpack.c.bf16 %v2599_v23, %v2598_v22 }
  0xb1   : > { %12718 = vmatpush3.msra.mxu0 %v504_v12  ;;  %12719 = vmatprep.mubr.msk.f32.mxu0 %vm508_vm0, %v492_v14  ;;  %v2601_v31 = vld [vmem:[%s14666_s25 + $0x28] sm:$0xf]  ;;  %v2602_v32 = vld [vmem:[%s14666_s25 + $0x30] sm:$0xff]  ;;  %v2603_v33 = vld [vmem:[%s14666_s25 + $0x38] sm:$0xf] }
  0xb2   : > { %12723 = vmatpush3.msra.mxu1 %v505_v13  ;;  %12724 = vmatprep.mubr.msk.f32.mxu1 %vm508_vm0, %v494_v15  ;;  %vm14711_vm3 = vmpackc.low %vm2627_vm1, %vm14320_vm2  ;;  %v2572_v35 = vld [vmem:[#allocation7] sm:$0xff]  ;;  %v2574_v36 = vld [vmem:[#allocation7 + $0x10] sm:$0xff]  ;;  %v12833_v37 = vpack.c.bf16 %v2601_v31, %v2600_v28  ;;  %v12839_v38 = vpack.c.bf16 %v2603_v33, %v2602_v32 }
  0xb3   : > { %12720 = vmatmul.mubr.msk.f32.vlgmr.msra.gmra.mrb[4].mxu0 %vm508_vm0, %v493_v16  ;;  %12725 = vmatmul.mubr.msk.f32.vlgmr.msra.gmra.mrb[4].mxu1 %vm508_vm0, %v495_v17  ;;  %v2604_v39 = vld [vmem:[%s14666_s25 + $0x40] sm:$0xff]  ;;  %v2605_v40 = vld [vmem:[%s14666_s25 + $0x48] sm:$0xf]  ;;  %v2606_v41 = vld [vmem:[%s14666_s25 + $0x50] sm:$0xff] }
  0xb4   : > { %12727 = vmatprep.subr.mxu0 %v506_v18  ;;  %12732 = vmatprep.subr.mxu1 %v507_v19  ;;  %v2607_v42 = vld [vmem:[%s14666_s25 + $0x58] sm:$0xf]  ;;  %v2573_v43 = vld [vmem:[#allocation7 + $0x8] sm:$0xff]  ;;  %v2576_v45 = vld [vmem:[#allocation7 + $0x20] sm:$0xff]  ;;  %v12845_v46 = vpack.c.bf16 %v2605_v40, %v2604_v39 }
  0xb5   : > { %12728 = vmatpush3.msra.mxu0 %v506_v18  ;;  %12729 = vmatprep.mubr.msk.f32.mxu0 %vm508_vm0, %v496_v24  ;;  %v2575_v44 = vld [vmem:[#allocation7 + $0x18] sm:$0xff]  ;;  %v12851_v47 = vpack.c.bf16 %v2607_v42, %v2606_v41  ;;  %v2578_v48 = vld [vmem:[#allocation7 + $0x30] sm:$0xff]  ;;  %v2608_v49 = vld [vmem:[%s14666_s25 + $0x60] sm:$0xff] }
  0xb6   : > { %12733 = vmatpush3.msra.mxu1 %v507_v19  ;;  %12734 = vmatprep.mubr.msk.f32.mxu1 %vm508_vm0, %v498_v25  ;;  %v2609_v50 = vld [vmem:[%s14666_s25 + $0x68] sm:$0xf]  ;;  %v2610_v52 = vld [vmem:[%s14666_s25 + $0x70] sm:$0xff]  ;;  %v2611_v53 = vld [vmem:[%s14666_s25 + $0x78] sm:$0xf] }
  0xb7   : > { %12730 = vmatmul.mubr.msk.f32.vlgmr.msra.gmra.mrb[6].mxu0 %vm508_vm0, %v497_v26  ;;  %12735 = vmatmul.mubr.msk.f32.vlgmr.msra.gmra.mrb[6].mxu1 %vm508_vm0, %v499_v27  ;;  %v2577_v51 = vld [vmem:[#allocation7 + $0x28] sm:$0xff]  ;;  %v2579_v54 = vld [vmem:[#allocation7 + $0x38] sm:$0xff]  ;;  %v2580_v55 = vld [vmem:[#allocation7 + $0x40] sm:$0xff]  ;;  %v12857_v56 = vpack.c.bf16 %v2609_v50, %v2608_v49  ;;  %v12863_v58 = vpack.c.bf16 %v2611_v53, %v2610_v52  ;;  %v18105_v27 = vmov 0.0|0.0  }
  0xb8   : > { %12823 = vmatprep.subr.msk.bf16.mxu0 %vm14711_vm3, %v12821_v29  ;;  %12829 = vmatprep.subr.msk.bf16.mxu1 %vm14711_vm3, %v12827_v30  ;;  %v2582_v57 = vld [vmem:[#allocation7 + $0x50] sm:$0xff]  ;;  %v2612_v59 = vld [vmem:[%s14666_s25 + $0x80] sm:$0xff]  ;;  %v2613_v60 = vld [vmem:[%s14666_s25 + $0x88] sm:$0xf] }
  0xb9   : > { %12826 = vmatpush3.bf16.msk.msra.mxu0 %vm14711_vm3, %v12821_v29  ;;  %12832 = vmatpush3.bf16.msk.msra.mxu1 %vm14711_vm3, %v12827_v30  ;;  %v2581_v61 = vld [vmem:[#allocation7 + $0x48] sm:$0xff]  ;;  %v2614_v62 = vld [vmem:[%s14666_s25 + $0x90] sm:$0xff]  ;;  %v2615_v63 = vld [vmem:[%s14666_s25 + $0x98] sm:$0xf]  ;;  %v12869_v2 = vpack.c.bf16 %v2613_v60, %v2612_v59 }
  0xba   : > { %12741 = vmatprep.mubr.msk.f32.mxu0 %vm2620_vm4, %v2572_v35  ;;  %12748 = vmatprep.mubr.msk.f32.mxu1 %vm2620_vm4, %v2574_v36  ;;  %v2583_v0 = vld [vmem:[#allocation7 + $0x58] sm:$0xff]  ;;  %v2584_v1 = vld [vmem:[#allocation7 + $0x60] sm:$0xff]  ;;  %v2586_v3 = vld [vmem:[#allocation7 + $0x70] sm:$0xff]  ;;  %v12875_v4 = vpack.c.bf16 %v2615_v63, %v2614_v62 }
  0xbb   : > { %12835 = vmatprep.subr.msk.bf16.mxu0 %vm14711_vm3, %v12833_v37  ;;  %12841 = vmatprep.subr.msk.bf16.mxu1 %vm14711_vm3, %v12839_v38  ;;  %v2616_v5 = vld [vmem:[%s14666_s25 + $0xa0] sm:$0xff]  ;;  %v2617_v6 = vld [vmem:[%s14666_s25 + $0xa8] sm:$0xf]  ;;  %v2618_v8 = vld [vmem:[%s14666_s25 + $0xb0] sm:$0xff] }
  0xbc   : > { %12742 = vmatmul.mubr.msk.f32.vlgmr.msra.gmra.mrb[8].mxu0 %vm2620_vm4, %v2573_v43  ;;  %12749 = vmatmul.mubr.msk.f32.vlgmr.msra.gmra.mrb[8].mxu1 %vm2620_vm4, %v2575_v44  ;;  %v2585_v7 = vld [vmem:[#allocation7 + $0x68] sm:$0xff]  ;;  %v2619_v9 = vld [vmem:[%s14666_s25 + $0xb8] sm:$0xf]  ;;  %v2588_v11 = vld [vmem:[#allocation7 + $0x80] sm:$0xff]  ;;  %v12881_v12 = vpack.c.bf16 %v2617_v6, %v2616_v5  ;;  %s13838_s25 = smul.u32 864, %s14625_s19  ;;  %s11656_s19 = sshll.u32 %s14605_s10, 8 }
  0xbd   : > { %12838 = vmatpush3.bf16.msk.msra.mxu0 %vm14711_vm3, %v12833_v37  ;;  %12755 = vmatprep.mubr.msk.f32.mxu0 %vm2620_vm4, %v2576_v45  ;;  %v2587_v10 = vld [vmem:[#allocation7 + $0x78] sm:$0xff]  ;;  %v2590_v13 = vld [vmem:[#allocation7 + $0x90] sm:$0xff]  ;;  %v12887_v14 = vpack.c.bf16 %v2619_v9, %v2618_v8  ;;  %v2589_v15 = vld [vmem:[#allocation7 + $0x88] sm:$0xff]  ;;  %s17919_s23 = scalar_lea.vmem [#allocation11], %s11656_s19 }
  0xbe   : > { %12844 = vmatpush3.bf16.msk.msra.mxu1 %vm14711_vm3, %v12839_v38  ;;  %12847 = vmatprep.subr.msk.bf16.mxu0 %vm14711_vm3, %v12845_v46  ;;  %v2591_v16 = vld [vmem:[#allocation7 + $0x98] sm:$0xff]  ;;  %v8609_v17 = vld [vmem:[#allocation10 + $0x400] sm:$0xff]  ;;  %v8610_v18 = vld [vmem:[#allocation10 + $0x408] sm:$0xff]  ;;  %s14846_s30 = scalar_lea.vmem %s18093_s7, %s13838_s25  ;;  %s11413_s9 = sshll.u32 %s17919_s23, 4  ;;  %s17971_s9 = int_to_ptr.vmem [resolvable:$true] %s11413_s9 }
  0xbf   : > { %12762 = vmatprep.mubr.msk.f32.mxu1 %vm2620_vm4, %v2578_v48  ;;  %12853 = vmatprep.subr.msk.bf16.mxu1 %vm14711_vm3, %v12851_v47  ;;  %v2592_v19 = vld [vmem:[#allocation7 + $0xa0] sm:$0xff]  ;;  %v6714_v21 = vld [vmem:[#allocation10 + $0x108] sm:$0xff]  ;;  %v2594_v22 = vld [vmem:[#allocation7 + $0xb0] sm:$0xff]  ;;  %v14800_v24 = vpack.c.bf16 %v8610_v18, %v8609_v17  ;;  %s14175_s28 = scalar_lea.vmem %s17971_s9, 4096  ;;  %s14179_s25 = sshll.u32 %s14323_s21, 4  ;;  %s14180_s25 = int_to_ptr.vmem [resolvable:$false] %s14179_s25 }
  0xc0   : > { %12756 = vmatmul.mubr.msk.f32.vlgmr.msra.gmra.mrb[10].mxu0 %vm2620_vm4, %v2577_v51  ;;  %v6713_v20 = vld [vmem:[#allocation10 + $0x100] sm:$0xff]  ;;  %v2593_v23 = vld [vmem:[#allocation7 + $0xa8] sm:$0xff]  ;;  %v2595_v25 = vld [vmem:[#allocation7 + $0xb8] sm:$0xff]  ;;  %p14176_p5 = scmp.ne.s32.totalorder %s17971_s9, %s14175_s28  ;;  %s14181_s13 = scalar_lea.vmem %s14180_s25, 8192 }
  0xc1   : > { %12850 = vmatpush3.bf16.msk.msra.mxu0 %vm14711_vm3, %v12845_v46  ;;  %12763 = vmatmul.mubr.msk.f32.vlgmr.msra.gmra.mrb[10].mxu1 %vm2620_vm4, %v2579_v54  ;;  %18295 = vst [vmem:[#allocation22_spill] sm:$0xff] %v14800_v24  ;;  %v12894_v26 = vpack.c.bf16 %v6714_v21, %v6713_v20  ;;  %v6715_v28 = vld [vmem:[#allocation10 + $0x110] sm:$0xff]  ;;  %v6716_v29 = vld [vmem:[#allocation10 + $0x118] sm:$0xff]  ;;  %v6717_v31 = vld [vmem:[#allocation10 + $0x120] sm:$0xff]  ;;  %p14182_p2 = scmp.lt.s32.totalorder %s17971_s9, %s14180_s25  ;;  %p14183_p1 = scmp.lt.s32.totalorder %s14181_s13, %s14175_s28 }
  0xc2   : > { %12769 = vmatprep.mubr.msk.f32.mxu0 %vm2620_vm4, %v2580_v55  ;;  %12856 = vmatpush3.bf16.msk.msra.mxu1 %vm14711_vm3, %v12851_v47  ;;  %v12897_v30 = vpack.c.bf16 %v6716_v29, %v6715_v28  ;;  %v6718_v32 = vld [vmem:[#allocation10 + $0x128] sm:$0xff]  ;;  %v6719_v34 = vld [vmem:[#allocation10 + $0x130] sm:$0xff]  ;;  %v6720_v35 = vld [vmem:[#allocation10 + $0x138] sm:$0xff]  ;;  %p14177_p7 = pnand %p14176_p5, %p14550_p10 }
  0xc3   : > { %12859 = vmatprep.subr.msk.bf16.mxu0 %vm14711_vm3, %v12857_v56  ;;  %12776 = vmatprep.mubr.msk.f32.mxu1 %vm2620_vm4, %v2582_v57  ;;  %v12900_v33 = vpack.c.bf16 %v6718_v32, %v6717_v31  ;;  %v8611_v36 = vld [vmem:[#allocation10 + $0x410] sm:$0xff]  ;;  %v12903_v37 = vpack.c.bf16 %v6720_v35, %v6719_v34  ;;  %v8612_v38 = vld [vmem:[#allocation10 + $0x418] sm:$0xff]  ;;  %v6721_v40 = vld [vmem:[#allocation10 + $0x140] sm:$0xff]  ;;  %p14184_p13 = por %p14183_p1, %p14182_p2 }
  0xc4   : > { %12770 = vmatmul.mubr.msk.f32.vlgmr.msra.gmra.mrb[12].mxu0 %vm2620_vm4, %v2581_v61  ;;  %12865 = vmatprep.subr.msk.bf16.mxu1 %vm14711_vm3, %v12863_v58  ;;  %v14815_v39 = vpack.c.bf16 %v8612_v38, %v8611_v36  ;;  %v6722_v41 = vld [vmem:[#allocation10 + $0x148] sm:$0xff]  ;;  %v8613_v42 = vld [vmem:[#allocation10 + $0x420] sm:$0xff]  ;;  %v6723_v46 = vld [vmem:[#allocation10 + $0x150] sm:$0xff]  ;;  %p14178_p12 = pneg %p14177_p7 }
  0xc5   : > { %12862 = vmatpush3.bf16.msk.msra.mxu0 %vm14711_vm3, %v12857_v56  ;;  %12777 = vmatmul.mubr.msk.f32.vlgmr.msra.gmra.mrb[12].mxu1 %vm2620_vm4, %v2583_v0  ;;  %v12906_v43 = vpack.c.bf16 %v6722_v41, %v6721_v40  ;;  %v8614_v44 = vld [vmem:[#allocation10 + $0x428] sm:$0xff]  ;;  %v6724_v47 = vld [vmem:[#allocation10 + $0x158] sm:$0xff]  ;;  %v8615_v48 = vld [vmem:[#allocation10 + $0x430] sm:$0xff] }
  0xc6   : > { %12783 = vmatprep.mubr.msk.f32.mxu0 %vm2620_vm4, %v2584_v1  ;;  %12868 = vmatpush3.bf16.msk.msra.mxu1 %vm14711_vm3, %v12863_v58  ;;  %18296 = vst [vmem:[#allocation23_spill] sm:$0xff] %v14815_v39  ;;  %v14820_v45 = vpack.c.bf16 %v8614_v44, %v8613_v42  ;;  %v12909_v49 = vpack.c.bf16 %v6724_v47, %v6723_v46  ;;  %v8616_v50 = vld [vmem:[#allocation10 + $0x438] sm:$0xff]  ;;  %v6725_v52 = vld [vmem:[#allocation10 + $0x160] sm:$0xff]  ;;  %v6726_v53 = vld [vmem:[#allocation10 + $0x168] sm:$0xff]  ;;  %p14185_p9 = pnand %p14184_p13, %p14178_p12 }
  0xc7   : > { %12871 = vmatprep.subr.msk.bf16.mxu0 %vm14711_vm3, %v12869_v2  ;;  %12790 = vmatprep.mubr.msk.f32.mxu1 %vm2620_vm4, %v2586_v3  ;;  %v14825_v51 = vpack.c.bf16 %v8616_v50, %v8615_v48  ;;  %v8617_v54 = vld [vmem:[#allocation10 + $0x440] sm:$0xff]  ;;  %v12912_v55 = vpack.c.bf16 %v6726_v53, %v6725_v52  ;;  %v8618_v56 = vld [vmem:[#allocation10 + $0x448] sm:$0xff]  ;;  %v6727_v58 = vld [vmem:[#allocation10 + $0x170] sm:$0xff] }
  0xc8   : > { %12784 = vmatmul.mubr.msk.f32.vlgmr.msra.gmra.mrb[14].mxu0 %vm2620_vm4, %v2585_v7  ;;  %12877 = vmatprep.subr.msk.bf16.mxu1 %vm14711_vm3, %v12875_v4  ;;  %18297 = vst [vmem:[#allocation24_spill] sm:$0xff] %v14820_v45  ;;  %v14830_v57 = vpack.c.bf16 %v8618_v56, %v8617_v54  ;;  %v6728_v59 = vld [vmem:[#allocation10 + $0x178] sm:$0xff]  ;;  %v8619_v60 = vld [vmem:[#allocation10 + $0x450] sm:$0xff]  ;;  %v6729_v0 = vld [vmem:[#allocation10 + $0x180] sm:$0xff] }
  0xc9   : > { %12874 = vmatpush3.bf16.msk.msra.mxu0 %vm14711_vm3, %v12869_v2  ;;  %12791 = vmatmul.mubr.msk.f32.vlgmr.msra.gmra.mrb[14].mxu1 %vm2620_vm4, %v2587_v10  ;;  %18298 = vst [vmem:[#allocation25_spill] sm:$0xff] %v14825_v51  ;;  %v12915_v61 = vpack.c.bf16 %v6728_v59, %v6727_v58  ;;  %v8620_v62 = vld [vmem:[#allocation10 + $0x458] sm:$0xff]  ;;  %v6730_v1 = vld [vmem:[#allocation10 + $0x188] sm:$0xff]  ;;  %v8621_v2 = vld [vmem:[#allocation10 + $0x460] sm:$0xff] }
  0xca   : > { %12797 = vmatprep.mubr.msk.f32.mxu0 %vm2620_vm4, %v2588_v11  ;;  %12880 = vmatpush3.bf16.msk.msra.mxu1 %vm14711_vm3, %v12875_v4  ;;  %18299 = vst [vmem:[#allocation26_spill] sm:$0xff] %v14830_v57  ;;  %v14835_v63 = vpack.c.bf16 %v8620_v62, %v8619_v60  ;;  %v12918_v3 = vpack.c.bf16 %v6730_v1, %v6729_v0  ;;  %v8622_v4 = vld [vmem:[#allocation10 + $0x468] sm:$0xff]  ;;  %v6731_v6 = vld [vmem:[#allocation10 + $0x190] sm:$0xff]  ;;  %v6732_v7 = vld [vmem:[#allocation10 + $0x198] sm:$0xff]  ;;  %v14322_v11 = vmov 0.0  }
  0xcb   : > { %12883 = vmatprep.subr.msk.bf16.mxu0 %vm14711_vm3, %v12881_v12  ;;  %12804 = vmatprep.mubr.msk.f32.mxu1 %vm2620_vm4, %v2590_v13  ;;  %v14841_v5 = vpack.c.bf16 %v8622_v4, %v8621_v2  ;;  %v8623_v8 = vld [vmem:[#allocation10 + $0x470] sm:$0xff]  ;;  %v12921_v9 = vpack.c.bf16 %v6732_v7, %v6731_v6  ;;  %v8624_v10 = vld [vmem:[#allocation10 + $0x478] sm:$0xff]  ;;  %5754 = vst [vmem:[%s14846_s30 + $0x8] sm:$0xff] %v14322_v11  ;;  %5756 = vst [vmem:[%s14846_s30 + $0x18] sm:$0xff] %v14322_v11  ;;  %v6492_v46 = vrot.slane %v14322_v11, 1 }
  0xcc   : > { %12798 = vmatmul.mubr.msk.f32.vlgmr.msra.gmra.mrb[16].mxu0 %vm2620_vm4, %v2589_v15  ;;  %12889 = vmatprep.subr.msk.bf16.mxu1 %vm14711_vm3, %v12887_v14  ;;  %18300 = vst [vmem:[#allocation27_spill] sm:$0xff] %v14835_v63  ;;  %5753 = vst [vmem:[%s14846_s30] sm:$0xff] %v14322_v11  ;;  %v6733_v13 = vld [vmem:[#allocation10 + $0x1a0] sm:$0xff]  ;;  %v8626_v17 = vld [vmem:[#allocation10 + $0x488] sm:$0xff] }
  0xcd   : > { %12886 = vmatpush3.bf16.msk.msra.mxu0 %vm14711_vm3, %v12881_v12  ;;  %12805 = vmatmul.mubr.msk.f32.vlgmr.msra.gmra.mrb[16].mxu1 %vm2620_vm4, %v2591_v16  ;;  %18301 = vst [vmem:[#allocation28_spill] sm:$0xff] %v14841_v5  ;;  %5755 = vst [vmem:[%s14846_s30 + $0x10] sm:$0xff] %v14322_v11  ;;  %v14863_v12 = vpack.c.bf16 %v8624_v10, %v8623_v8  ;;  %v8625_v15 = vld [vmem:[#allocation10 + $0x480] sm:$0xff]  ;;  %v6736_v20 = vld [vmem:[#allocation10 + $0x1b8] sm:$0xff] }
  0xce   : > { %12811 = vmatprep.mubr.msk.f32.mxu0 %vm2620_vm4, %v2592_v19  ;;  %12892 = vmatpush3.bf16.msk.msra.mxu1 %vm14711_vm3, %v12887_v14  ;;  %5757 = vst [vmem:[%s14846_s30 + $0x20] sm:$0x3] %v14322_v11  ;;  %5758 = vst [vmem:[%s14846_s30 + $0x28] sm:$0x3] %v14322_v11  ;;  %v6734_v14 = vld [vmem:[#allocation10 + $0x1a8] sm:$0xff]  ;;  %v14868_v18 = vpack.c.bf16 %v8626_v17, %v8625_v15  ;;  %v6735_v19 = vld [vmem:[#allocation10 + $0x1b0] sm:$0xff] }
  0xcf   : > { %12818 = vmatprep.mubr.msk.f32.mxu1 %vm2620_vm4, %v2594_v22  ;;  %12893 = vmatprep.subr.bf16.mxu1 %v18105_v27  ;;  %12031 = vst [vmem:[%s14846_s30 + $0x330] sm:$0xff] %v14322_v11  ;;  %12032 = vst [vmem:[%s14846_s30 + $0x338] sm:$0xff] %v14322_v11  ;;  %v12924_v16 = vpack.c.bf16 %v6734_v14, %v6733_v13  ;;  %v8627_v21 = vld [vmem:[#allocation10 + $0x490] sm:$0xff]  ;;  %v12927_v22 = vpack.c.bf16 %v6736_v20, %v6735_v19  ;;  %v6738_v28 = vld [vmem:[#allocation10 + $0x1c8] sm:$0xff] }
  0xd0   : > { %12812 = vmatmul.mubr.msk.f32.vlgmr.msra.gmra.mrb[18].mxu0 %vm2620_vm4, %v2593_v23  ;;  %13085 = vmatprep.subr.bf16.mxu0 %v18105_v27  ;;  %12033 = vst [vmem:[%s14846_s30 + $0x340] sm:$0xff] %v14322_v11  ;;  %12034 = vst [vmem:[%s14846_s30 + $0x348] sm:$0xff] %v14322_v11  ;;  %v8628_v23 = vld [vmem:[#allocation10 + $0x498] sm:$0xff]  ;;  %v8629_v29 = vld [vmem:[#allocation10 + $0x4a0] sm:$0xff] }
  0xd1   : > { %12819 = vmatmul.mubr.msk.f32.vlgmr.msra.gmra.mrb[18].mxu1 %vm2620_vm4, %v2595_v25  ;;  %13087 = vmatpush1.bf16.msra.mxu0 %v14800_v24  ;;  %12035 = vst [vmem:[%s14846_s30 + $0x350] sm:$0x3] %v14322_v11  ;;  %12036 = vst [vmem:[%s14846_s30 + $0x358] sm:$0x3] %v14322_v11  ;;  %v14873_v25 = vpack.c.bf16 %v8628_v23, %v8627_v21  ;;  %v8630_v31 = vld [vmem:[#allocation10 + $0x4a8] sm:$0xff]  ;;  %v6740_v34 = vld [vmem:[#allocation10 + $0x1d8] sm:$0xff] }
  0xd2   : > { %12895 = vmatpush1.bf16.msra.mxu1 %v12894_v26  ;;  %13088 = vmatprep.subr.bf16.mxu0 %v18105_v27  ;;  %18302 = vst [vmem:[#allocation29_spill] sm:$0xff] %v14863_v12  ;;  %18303 = vst [vmem:[#allocation30_spill] sm:$0xff] %v14868_v18  ;;  %v6737_v26 = vld [vmem:[#allocation10 + $0x1c0] sm:$0xff]  ;;  %v14878_v32 = vpack.c.bf16 %v8630_v31, %v8629_v29  ;;  %v8631_v35 = vld [vmem:[#allocation10 + $0x4b0] sm:$0xff] }
  0xd3   : > { %12896 = vmatprep.subr.bf16.mxu1 %v18105_v27  ;;  %18304 = vst [vmem:[#allocation31_spill] sm:$0xff] %v14873_v25  ;;  %v6741_v40 = vld [vmem:[#allocation10 + $0x1e0] sm:$0xff]  ;;  %v6742_v41 = vld [vmem:[#allocation10 + $0x1e8] sm:$0xff]  ;;  %v6743_v48 = vld [vmem:[#allocation10 + $0x1f0] sm:$0xff] }
  0xd4   : > { %18305 = vst [vmem:[#allocation32_spill] sm:$0xff] %v14878_v32  ;;  %v8633_v42 = vld [vmem:[#allocation10 + $0x4c0] sm:$0xff]  ;;  %v8634_v44 = vld [vmem:[#allocation10 + $0x4c8] sm:$0xff]  ;;  %v8635_v52 = vld [vmem:[#allocation10 + $0x4d0] sm:$0xff] }
  0xd5   : > { %13090 = vmatpush1.bf16.msra.mxu0 %v14815_v39  ;;  %v14887_v47 = vpack.c.bf16 %v8634_v44, %v8633_v42  ;;  %v6328_v50 = vld [vmem:[%s14846_s30 + $0x8] sm:$0xfe]  ;;  %v8636_v53 = vld [vmem:[#allocation10 + $0x4d8] sm:$0xff]  ;;  %v6330_v56 = vld [vmem:[%s14846_s30 + $0x28] sm:$0x1] }
  0xd6   : > { %12898 = vmatpush1.bf16.msra.mxu1 %v12897_v30  ;;  %13091 = vmatprep.subr.bf16.mxu0 %v18105_v27  ;;  %v12930_v30 = vpack.c.bf16 %v6738_v28, %v6737_v26  ;;  %v6491_v54 = vrot.slane %v6328_v50, 1  ;;  %v6496_v62 = vrot.slane %v6330_v56, 1  ;;  %v6329_v0 = vld [vmem:[%s14846_s30 + $0x20] sm:$0x1]  ;;  %v8638_v2 = vld [vmem:[#allocation10 + $0x4e8] sm:$0xff]  ;;  %v8639_v8 = vld [vmem:[#allocation10 + $0x4f0] sm:$0xff] }
  0xd7   : > { %12899 = vmatprep.subr.bf16.mxu1 %v18105_v27  ;;  %18307 = vst [vmem:[#allocation34_spill] sm:$0xff] %v14887_v47  ;;  %v8637_v1 = vld [vmem:[#allocation10 + $0x4e0] sm:$0xff]  ;;  %v6494_v4 = vrot.slane %v6329_v0, 1  ;;  %v6296_v14 = vld [vmem:[#allocation10 + $0x8] sm:$0xff]  ;;  %v6298_v17 = vld [vmem:[#allocation10 + $0x18] sm:$0xff] }
  0xd8   : > { %v6493_v59 = vsel %vm6487_vm5, %v6491_v54, %v6492_v46  ;;  %v14902_v6 = vpack.c.bf16 %v8638_v2, %v8637_v1  ;;  %v6497_v7 = vsel %vm6487_vm5, %v6492_v46, %v6496_v62  ;;  %v6295_v13 = vld [vmem:[#allocation10] sm:$0xff]  ;;  %v6300_v21 = vld [vmem:[#allocation10 + $0x28] sm:$0xff]  ;;  %v6301_v23 = vld [vmem:[#allocation10 + $0x30] sm:$0xff] }
  0xd9   : > { %13093 = vmatpush1.bf16.msra.mxu0 %v14820_v45  ;;  %6809 = vmatprep.mubr.f32.mxu1 %v6493_v59  ;;  %v6495_v10 = vsel %vm6487_vm5, %v6492_v46, %v6494_v4  ;;  %v12942_v15 = vpack.c.bf16 %v6296_v14, %v6295_v13  ;;  %v6299_v20 = vld [vmem:[#allocation10 + $0x20] sm:$0xff]  ;;  %v6302_v26 = vld [vmem:[#allocation10 + $0x38] sm:$0xff]  ;;  %v11693_v0 = vld [vmem:[#allocation5 + $0x12] ss:$0 sm:$0xff] }
  0xda   : > { %12901 = vmatpush1.bf16.msra.mxu1 %v12900_v33  ;;  %13094 = vmatprep.subr.bf16.mxu0 %v18105_v27  ;;  %v6739_v33 = vld [vmem:[#allocation10 + $0x1d0] sm:$0xff]  ;;  %18309 = vst [vmem:[#allocation36_spill] sm:$0xff] %v14902_v6  ;;  %v12951_v28 = vpack.c.bf16 %v6302_v26, %v6301_v23  ;;  %v14918_v29 = vld [vmem:[#allocation10 + $0x500] sm:$0xff] }
  0xdb   : > { %12902 = vmatprep.subr.bf16.mxu1 %v18105_v27  ;;  %v12933_v36 = vpack.c.bf16 %v6740_v34, %v6739_v33  ;;  %v11675_v31 = vld [vmem:[#allocation5] ss:$0 sm:$0xff]  ;;  %v14922_v33 = vld [vmem:[#allocation10 + $0x510] sm:$0xff]  ;;  %v14924_v34 = vld [vmem:[#allocation10 + $0x518] sm:$0xff] }
  0xdc   : > { %v11676_v42 = vld [vmem:[#allocation5 + $0x1] ss:$0 sm:$0xff]  ;;  %v11707_v59 = vld [vmem:[#allocation5 + $0x20] ss:$0 sm:$0xff]  ;;  %v11888_v39 = vld [vmem:[#allocation8 + $0x31] ss:$0 sm:$0xff] }
  0xdd   : > { %13096 = vmatpush1.bf16.msra.mxu0 %v14825_v51 }
  0xde   : > { %12904 = vmatpush1.bf16.msra.mxu1 %v12903_v37  ;;  %13097 = vmatprep.subr.bf16.mxu0 %v18105_v27  ;;  %v8632_v37 = vld [vmem:[#allocation10 + $0x4b8] sm:$0xff] }
  0xdf   : > { %12905 = vmatprep.subr.bf16.mxu1 %v18105_v27  ;;  %v14883_v38 = vpack.c.bf16 %v8632_v37, %v8631_v35  ;;  %v14926_v35 = vld [vmem:[#allocation10 + $0x520] sm:$0xff]  ;;  %v14930_v37 = vld [vmem:[#allocation10 + $0x530] sm:$0xff] }
  0xe0   : > { %18311 = vst [vmem:[#allocation38_spill] sm:$0xff] %v14926_v35  ;;  %18313 = vst [vmem:[#allocation40_spill] sm:$0xff] %v14930_v37  ;;  %v11936_v37 = vld [vmem:[#allocation8 + $0x61] ss:$0 sm:$0xff] }
  0xe1   : > { %13099 = vmatpush1.bf16.msra.mxu0 %v14830_v57  ;;  %18306 = vst [vmem:[#allocation33_spill] sm:$0xff] %v14883_v38 }
  0xe2   : > { %12907 = vmatpush1.bf16.msra.mxu1 %v12906_v43  ;;  %13100 = vmatprep.subr.bf16.mxu0 %v18105_v27  ;;  %v12936_v43 = vpack.c.bf16 %v6742_v41, %v6741_v40  ;;  %v14932_v40 = vld [vmem:[#allocation10 + $0x538] sm:$0xff]  ;;  %v11691_v41 = vld [vmem:[#allocation5 + $0x10] ss:$0 sm:$0xff] }
  0xe3   : > { %12908 = vmatprep.subr.bf16.mxu1 %v18105_v27  ;;  %18314 = vst [vmem:[#allocation41_spill] sm:$0xff] %v14932_v40 }
  0xe5   : > { %13102 = vmatpush1.bf16.msra.mxu0 %v14835_v63 }
  0xe6   : > { %12910 = vmatpush1.bf16.msra.mxu1 %v12909_v49  ;;  %13103 = vmatprep.subr.bf16.mxu0 %v18105_v27  ;;  %v6744_v49 = vld [vmem:[#allocation10 + $0x1f8] sm:$0xff] }
  0xe7   : > { %12911 = vmatprep.subr.bf16.mxu1 %v18105_v27  ;;  %v12939_v58 = vpack.c.bf16 %v6744_v49, %v6743_v48  ;;  %v11740_v48 = vld [vmem:[#allocation5 + $0x41] ss:$0 sm:$0xff] }
  0xe9   : > { %13105 = vmatpush1.bf16.msra.mxu0 %v14841_v5  ;;  %v11887_v5 = vld [vmem:[#allocation8 + $0x30] ss:$0 sm:$0xff] }
  0xea   : > { %12913 = vmatpush1.bf16.msra.mxu1 %v12912_v55  ;;  %13106 = vmatprep.subr.bf16.mxu0 %v18105_v27  ;;  %v6327_v55 = vld [vmem:[%s14846_s30] sm:$0xfe] }
  0xeb   : > { %12914 = vmatprep.subr.bf16.mxu1 %v18105_v27  ;;  %v6488_v60 = vrot.slane %v6327_v55, 1 }
  0xed   : > { %13108 = vmatpush1.bf16.msra.mxu0 %v14863_v12 }
  0xee   : > { %12916 = vmatpush1.bf16.msra.mxu1 %v12915_v61  ;;  %13109 = vmatprep.subr.bf16.mxu0 %v18105_v27  ;;  %v14896_v61 = vpack.c.bf16 %v8636_v53, %v8635_v52  ;;  %v11677_v53 = vld [vmem:[#allocation5 + $0x2] ss:$0 sm:$0xff] }
  0xef   : > { %12917 = vmatprep.subr.bf16.mxu1 %v18105_v27 }
  0xf0   : > { %18308 = vst [vmem:[#allocation35_spill] sm:$0xff] %v14896_v61 }
  0xf1   : > { %13111 = vmatpush1.bf16.msra.mxu0 %v14868_v18 }
  0xf2   : > { %12919 = vmatpush1.bf16.msra.mxu1 %v12918_v3  ;;  %13112 = vmatprep.subr.bf16.mxu0 %v18105_v27  ;;  %v6490_v3 = vsel %vm6487_vm5, %v6488_v60, %v6492_v46 }
  0xf3   : > { %12920 = vmatprep.subr.bf16.mxu1 %v18105_v27 }
  0xf5   : > { %13114 = vmatpush1.bf16.msra.mxu0 %v14873_v25 }
  0xf6   : > { %12922 = vmatpush1.bf16.msra.mxu1 %v12921_v9  ;;  %13115 = vmatprep.subr.bf16.mxu0 %v18105_v27  ;;  %v8640_v9 = vld [vmem:[#allocation10 + $0x4f8] sm:$0xff] }
  0xf7   : > { %12923 = vmatprep.subr.bf16.mxu1 %v18105_v27  ;;  %v14909_v11 = vpack.c.bf16 %v8640_v9, %v8639_v8  ;;  %v11708_v8 = vld [vmem:[#allocation5 + $0x21] ss:$0 sm:$0xff]  ;;  %v11724_v9 = vld [vmem:[#allocation5 + $0x31] ss:$0 sm:$0xff] }
  0xf9   : > { %13117 = vmatpush1.bf16.msra.mxu0 %v14878_v32  ;;  %18310 = vst [vmem:[#allocation37_spill] sm:$0xff] %v14909_v11  ;;  %v11855_v32 = vld [vmem:[#allocation8 + $0x10] ss:$0 sm:$0xff] }
  0xfa   : > { %12925 = vmatpush1.bf16.msra.mxu1 %v12924_v16  ;;  %13118 = vmatprep.subr.bf16.mxu0 %v18105_v27  ;;  %v6297_v16 = vld [vmem:[#allocation10 + $0x10] sm:$0xff] }
  0xfb   : > { %12926 = vmatprep.subr.bf16.mxu1 %v18105_v27  ;;  %v12945_v19 = vpack.c.bf16 %v6298_v17, %v6297_v16 }
  0xfd   : > { %13120 = vmatpush1.bf16.msra.mxu0 %v14883_v38  ;;  %v11839_v38 = vld [vmem:[#allocation8] ss:$0 sm:$0xff] }
  0xfe   : > { %12928 = vmatpush1.bf16.msra.mxu1 %v12927_v22  ;;  %13121 = vmatprep.subr.bf16.mxu0 %v18105_v27  ;;  %v12948_v22 = vpack.c.bf16 %v6300_v21, %v6299_v20 }
  0xff   : > { %12929 = vmatprep.subr.bf16.mxu1 %v18105_v27 }
 0x101   : > { %13123 = vmatpush1.bf16.msra.mxu0 %v14887_v47  ;;  %v11788_v47 = vld [vmem:[#allocation5 + $0x71] ss:$0 sm:$0xff] }
 0x102   : > { %12931 = vmatpush1.bf16.msra.mxu1 %v12930_v30  ;;  %13124 = vmatprep.subr.bf16.mxu0 %v18105_v27  ;;  %v14920_v30 = vld [vmem:[#allocation10 + $0x508] sm:$0xff] }
 0x103   : > { %12932 = vmatprep.subr.bf16.mxu1 %v18105_v27 }
 0x105   : > { %13126 = vmatpush1.bf16.msra.mxu0 %v14896_v61 }
 0x106   : > { %12934 = vmatpush1.bf16.msra.mxu1 %v12933_v36  ;;  %13127 = vmatprep.subr.bf16.mxu0 %v18105_v27  ;;  %v14928_v36 = vld [vmem:[#allocation10 + $0x528] sm:$0xff] }
 0x107   : > { %12935 = vmatprep.subr.bf16.mxu1 %v18105_v27  ;;  %18312 = vst [vmem:[#allocation39_spill] sm:$0xff] %v14928_v36  ;;  %v11952_v36 = vld [vmem:[#allocation8 + $0x71] ss:$0 sm:$0xff] }
 0x109   : > { %13129 = vmatpush1.bf16.msra.mxu0 %v14902_v6 }
 0x10a   : > { %12937 = vmatpush1.bf16.msra.mxu1 %v12936_v43  ;;  %13130 = vmatprep.subr.bf16.mxu0 %v18105_v27  ;;  %v11692_v43 = vld [vmem:[#allocation5 + $0x11] ss:$0 sm:$0xff] }
 0x10b   : > { %12938 = vmatprep.subr.bf16.mxu1 %v18105_v27 }
 0x10d   : > { %13132 = vmatpush1.bf16.msra.mxu0 %v14909_v11 }
 0x10e   : > { %12940 = vmatpush1.bf16.msra.mxu1 %v12939_v58  ;;  %13133 = vmatprep.subr.bf16.mxu0 %v18105_v27 }
 0x10f   : > { %12941 = vmatprep.subr.bf16.mxu1 %v18105_v27 }
 0x111   : > { %6810 = vmatmul.mubr.f32.vlgmr.msra.gmra.mrb[20].mxu1 %v6490_v3  ;;  %v11723_v3 = vld [vmem:[#allocation5 + $0x30] ss:$0 sm:$0xff] }
 0x112   : > { %6814 = vmatprep.mubr.f32.mxu1 %v6497_v7  ;;  %12943 = vmatpush1.bf16.msra.mxu1 %v12942_v15 }
 0x113   : > { %12944 = vmatprep.subr.bf16.mxu1 %v18105_v27 }
 0x115   : > { %6815 = vmatmul.mubr.f32.gmra.mrb[22].mxu1 %v6495_v10 }
 0x116   : > { %12946 = vmatpush1.bf16.msra.mxu1 %v12945_v19 }
 0x117   : > { %12947 = vmatprep.subr.bf16.mxu1 %v18105_v27 }
 0x11a   : > { %12949 = vmatpush1.bf16.msra.mxu1 %v12948_v22 }
 0x11b   : > { %12950 = vmatprep.subr.bf16.mxu1 %v18105_v27 }
 0x11e   : > { %12952 = vmatpush1.bf16.msra.mxu1 %v12951_v28 }
 0x11f   : > { %12953 = vmatprep.subr.bf16.mxu1 %v18105_v27 }
 0x17e   : > { %v14934_v44 = vpop.f32.mrb[0].mxu0  ;;  %v14936_v46 = vpop.f32.mrb[0].mxu1 }
 0x17f   : > { %18315 = vst [vmem:[#allocation42_spill] sm:$0xff] %v14934_v44  ;;  %18316 = vst [vmem:[#allocation43_spill] sm:$0xff] %v14936_v46  ;;  %v14946_v54 = vpop.f32.mrb[1].mxu0  ;;  %v14948_v55 = vpop.f32.mrb[1].mxu1  ;;  %v1270_v56 = vmul.f32 %v14934_v44, %v11675_v31  ;;  %v1447_v58 = vmul.f32 %v14936_v46, %v11691_v41  ;;  %v1272_v60 = vmul.f32 %v14934_v44, %v11676_v42 }
 0x180   : > { %18317 = vst [vmem:[#allocation44_spill] sm:$0xff] %v14946_v54  ;;  %18318 = vst [vmem:[#allocation45_spill] sm:$0xff] %v14948_v55  ;;  %v1449_v62 = vmul.f32 %v14936_v46, %v11692_v43  ;;  %v1269_v1 = vmul.f32 %v11675_v31, %v14946_v54  ;;  %v1446_v2 = vmul.f32 %v11691_v41, %v14948_v55 }
 0x181   : > { %v1271_v4 = vmul.f32 %v11676_v42, %v14946_v54  ;;  %v1448_v7 = vmul.f32 %v11692_v43, %v14948_v55  ;;  %v1479_v10 = vadd.f32 %v1447_v58, %v1270_v56  ;;  %v1273_v14 = vmul.f32 %v11677_v53, %v14946_v54  ;;  %v11709_v43 = vld [vmem:[#allocation5 + $0x22] ss:$0 sm:$0xff]  ;;  %v11739_v58 = vld [vmem:[#allocation5 + $0x40] ss:$0 sm:$0xff] }
 0x182   : > { %v1481_v13 = vadd.f32 %v1449_v62, %v1272_v60  ;;  %v1274_v15 = vmul.f32 %v14934_v44, %v11677_v53  ;;  %v14960_v16 = vpop.f32.mrb[2].mxu0  ;;  %v14962_v17 = vpop.f32.mrb[2].mxu1  ;;  %v1478_v19 = vadd.f32 %v1446_v2, %v1269_v1  ;;  %v1450_v21 = vmul.f32 %v11693_v0, %v14948_v55  ;;  %v11755_v60 = vld [vmem:[#allocation5 + $0x50] ss:$0 sm:$0xff] }
 0x183   : > { %18319 = vst [vmem:[#allocation46_spill] sm:$0xff] %v14960_v16  ;;  %18320 = vst [vmem:[#allocation47_spill] sm:$0xff] %v14962_v17  ;;  %v1480_v20 = vadd.f32 %v1448_v7, %v1271_v4  ;;  %v1451_v22 = vmul.f32 %v14936_v46, %v11693_v0  ;;  %v14966_v23 = vpop.f32.mrb[3].mxu0  ;;  %v14968_v26 = vpop.f32.mrb[3].mxu1  ;;  %v1624_v28 = vmul.f32 %v14960_v16, %v11707_v59 }
 0x184   : > { %18321 = vst [vmem:[#allocation48_spill] sm:$0xff] %v14966_v23  ;;  %18322 = vst [vmem:[#allocation49_spill] sm:$0xff] %v14968_v26  ;;  %v1801_v31 = vmul.f32 %v14962_v17, %v11723_v3  ;;  %v1626_v41 = vmul.f32 %v14960_v16, %v11708_v8  ;;  %v1803_v42 = vmul.f32 %v14962_v17, %v11724_v9 }
 0x185   : > { %v1623_v53 = vmul.f32 %v11707_v59, %v14966_v23  ;;  %v1800_v56 = vmul.f32 %v11723_v3, %v14968_v26  ;;  %v1625_v62 = vmul.f32 %v11708_v8, %v14966_v23  ;;  %v1802_v0 = vmul.f32 %v11724_v9, %v14968_v26  ;;  %v11756_v59 = vld [vmem:[#allocation5 + $0x51] ss:$0 sm:$0xff] }
 0x186   : > { %v1656_v1 = vadd.f32 %v1624_v28, %v1479_v10  ;;  %v1658_v2 = vadd.f32 %v1626_v41, %v1481_v13  ;;  %v1482_v4 = vadd.f32 %v1450_v21, %v1273_v14  ;;  %v1483_v7 = vadd.f32 %v1451_v22, %v1274_v15  ;;  %v14978_v52 = vpop.f32.mrb[4].mxu0  ;;  %v14980_v50 = vpop.f32.mrb[4].mxu1  ;;  %v11771_v21 = vld [vmem:[#allocation5 + $0x60] ss:$0 sm:$0xff]  ;;  %v11787_v22 = vld [vmem:[#allocation5 + $0x70] ss:$0 sm:$0xff] }
 0x187   : > { %18323 = vst [vmem:[#allocation50_spill] sm:$0xff] %v14978_v52  ;;  %18324 = vst [vmem:[#allocation51_spill] sm:$0xff] %v14980_v50  ;;  %v1655_v49 = vadd.f32 %v1623_v53, %v1478_v19  ;;  %v1657_v27 = vadd.f32 %v1625_v62, %v1480_v20  ;;  %v1627_v3 = vmul.f32 %v11709_v43, %v14966_v23  ;;  %v14984_v6 = vpop.f32.mrb[5].mxu0  ;;  %v14986_v8 = vpop.f32.mrb[5].mxu1 }
 0x188   : > { %v1628_v11 = vmul.f32 %v14960_v16, %v11709_v43  ;;  %18325 = vst [vmem:[#allocation52_spill] sm:$0xff] %v14984_v6  ;;  %18326 = vst [vmem:[#allocation53_spill] sm:$0xff] %v14986_v8  ;;  %v1833_v9 = vadd.f32 %v1801_v31, %v1656_v1  ;;  %v1978_v10 = vmul.f32 %v14978_v52, %v11739_v58 }
 0x189   : > { %v2155_v13 = vmul.f32 %v14980_v50, %v11755_v60  ;;  %v1835_v14 = vadd.f32 %v1803_v42, %v1658_v2  ;;  %v1832_v15 = vadd.f32 %v1800_v56, %v1655_v49  ;;  %v1977_v19 = vmul.f32 %v11739_v58, %v14984_v6  ;;  %v11772_v56 = vld [vmem:[#allocation5 + $0x61] ss:$0 sm:$0xff] }
 0x18a   : > { %v2154_v20 = vmul.f32 %v11755_v60, %v14986_v8  ;;  %v1834_v28 = vadd.f32 %v1802_v0, %v1657_v27  ;;  %v2010_v41 = vadd.f32 %v1978_v10, %v1833_v9  ;;  %v1979_v43 = vmul.f32 %v11740_v48, %v14984_v6  ;;  %v14995_v62 = vpop.f32.mrb[6].mxu0  ;;  %v14997_v1 = vpop.f32.mrb[6].mxu1  ;;  %v15004_v27 = vld [vmem:[#allocation10 + $0x540] sm:$0xff]  ;;  %v15006_v0 = vld [vmem:[#allocation10 + $0x548] sm:$0xff] }
 0x18b   : > { %v1980_v53 = vmul.f32 %v14978_v52, %v11740_v48  ;;  %v2156_v31 = vmul.f32 %v11756_v59, %v14986_v8  ;;  %18327 = vst [vmem:[#allocation54_spill] sm:$0xff] %v14995_v62  ;;  %18328 = vst [vmem:[#allocation55_spill] sm:$0xff] %v14997_v1  ;;  %v2009_v49 = vadd.f32 %v1977_v19, %v1832_v15  ;;  %v15008_v2 = vpop.f32.mrb[7].mxu0  ;;  %v15010_v48 = vpop.f32.mrb[7].mxu1 }
 0x18c   : > { %v2157_v42 = vmul.f32 %v14980_v50, %v11756_v59  ;;  %v15000_v58 = vadd.f32 %v1627_v3, %v1482_v4  ;;  %v15002_v60 = vadd.f32 %v1628_v11, %v1483_v7  ;;  %18331 = vst [vmem:[#allocation58_spill] sm:$0xff] %v15004_v27  ;;  %18332 = vst [vmem:[#allocation59_spill] sm:$0xff] %v15006_v0  ;;  %v15014_v59 = vld [vmem:[#allocation10 + $0x550] sm:$0xff]  ;;  %v15016_v4 = vld [vmem:[#allocation10 + $0x558] sm:$0xff] }
 0x18d   : > { %18333 = vst [vmem:[#allocation60_spill] sm:$0xff] %v15008_v2  ;;  %18334 = vst [vmem:[#allocation61_spill] sm:$0xff] %v15010_v48  ;;  %v2187_v9 = vadd.f32 %v2155_v13, %v2010_v41  ;;  %v2332_v10 = vmul.f32 %v14995_v62, %v11771_v21  ;;  %v2509_v15 = vmul.f32 %v14997_v1, %v11787_v22  ;;  %v11840_v13 = vld [vmem:[#allocation8 + $0x1] ss:$0 sm:$0xff] }
 0x18e   : > { %18329 = vst [vmem:[#allocation56_spill] sm:$0xff] %v15000_v58  ;;  %18330 = vst [vmem:[#allocation57_spill] sm:$0xff] %v15002_v60  ;;  %v2011_v19 = vadd.f32 %v1979_v43, %v1834_v28  ;;  %v2186_v11 = vadd.f32 %v2154_v20, %v2009_v49  ;;  %v2331_v7 = vmul.f32 %v11771_v21, %v15008_v2  ;;  %v11856_v49 = vld [vmem:[#allocation8 + $0x11] ss:$0 sm:$0xff]  ;;  %v11725_v21 = vld [vmem:[#allocation5 + $0x32] ss:$0 sm:$0xff] }
 0x18f   : > { %18335 = vst [vmem:[#allocation62_spill] sm:$0xff] %v15014_v59  ;;  %18336 = vst [vmem:[#allocation63_spill] sm:$0xff] %v15016_v4  ;;  %v2508_v3 = vmul.f32 %v11787_v22, %v15010_v48  ;;  %v2012_v61 = vadd.f32 %v1980_v53, %v1835_v14  ;;  %v2364_v25 = vadd.f32 %v2332_v10, %v2187_v9  ;;  %v15026_v22 = vpop.f32.mrb[8].mxu0  ;;  %v15028_v14 = vpop.f32.mrb[8].mxu1 }
 0x190   : > { %v2188_v41 = vadd.f32 %v2156_v31, %v2011_v19  ;;  %v2333_v18 = vmul.f32 %v11772_v56, %v15008_v2  ;;  %v2363_v43 = vadd.f32 %v2331_v7, %v2186_v11  ;;  %v2334_v20 = vmul.f32 %v14995_v62, %v11772_v56  ;;  %v15032_v19 = vpop.f32.mrb[9].mxu0  ;;  %v15034_v11 = vpop.f32.mrb[9].mxu1 }
 0x191   : > { %v2189_v12 = vadd.f32 %v2157_v42, %v2012_v61  ;;  %v2541_v53 = vadd.f32 %v2509_v15, %v2364_v25  ;;  %v2510_v31 = vmul.f32 %v11788_v47, %v15010_v48  ;;  %v2511_v10 = vmul.f32 %v14997_v1, %v11788_v47  ;;  %18337 = vst [vmem:[#allocation64_spill] sm:$0xff] %v15032_v19  ;;  %v11871_v15 = vld [vmem:[#allocation8 + $0x20] ss:$0 sm:$0xff] }
 0x192   : > { %v2365_v9 = vadd.f32 %v2333_v18, %v2188_v41  ;;  %v3743_v61 = vmul.f32 %v15026_v22, %v11839_v38  ;;  %v3920_v42 = vmul.f32 %v15028_v14, %v11855_v32  ;;  %v2540_v56 = vadd.f32 %v2508_v3, %v2363_v43  ;;  %v15044_v43 = vld [vmem:[#allocation8 + $0x2] ss:$0 sm:$0xff] }
 0x193   : > { %v3745_v7 = vmul.f32 %v15026_v22, %v11840_v13  ;;  %v3742_v25 = vmul.f32 %v11839_v38, %v15032_v19  ;;  %v3919_v18 = vmul.f32 %v11855_v32, %v15034_v11  ;;  %v5911_v41 = vrot.slane %v2541_v53, 7  ;;  %v15046_v51 = vpop.f32.mrb[10].mxu0  ;;  %v11872_v38 = vld [vmem:[#allocation8 + $0x21] ss:$0 sm:$0xff] }
 0x194   : > { %v3744_v47 = vmul.f32 %v11840_v13, %v15032_v19  ;;  %v3952_v28 = vadd.f32 %v3920_v42, %v3743_v61  ;;  %v5910_v63 = vrot.slane %v2540_v56, 7  ;;  %v3921_v57 = vmul.f32 %v11856_v49, %v15034_v11  ;;  %v15054_v61 = vpop.f32.mrb[11].mxu0  ;;  %v15056_v42 = vpop.f32.mrb[10].mxu1 }
 0x195   : > { %v3922_v3 = vmul.f32 %v15028_v14, %v11856_v49  ;;  %v3951_v45 = vadd.f32 %v3919_v18, %v3742_v25  ;;  %12074 = vst [vmem:[%s14846_s30 + $0x50] sm:$0x1] %v5911_v41  ;;  %v2366_v32 = vadd.f32 %v2334_v20, %v2189_v12  ;;  %v15049_v53 = vadd.f32 %v2510_v31, %v2365_v9  ;;  %v15063_v24 = vpop.f32.mrb[11].mxu1  ;;  %v11903_v9 = vld [vmem:[#allocation8 + $0x40] ss:$0 sm:$0xff] }
 0x196   : > { %v15052_v13 = vmul.f32 %v11725_v21, %v14968_v26  ;;  %v4097_v49 = vmul.f32 %v15046_v51, %v11871_v15  ;;  %v15060_v56 = vsel %vm5909_vm6, %v5910_v63, %v5911_v41  ;;  %12072 = vst [vmem:[%s14846_s30 + $0x30] sm:$0xfe] %v5910_v63  ;;  %v3953_v25 = vadd.f32 %v3921_v57, %v3744_v47 }
 0x197   : > { %18339 = vst [vmem:[#allocation66_spill] sm:$0xff] %v15060_v56  ;;  %v3954_v18 = vadd.f32 %v3922_v3, %v3745_v7  ;;  %v4096_v12 = vmul.f32 %v11871_v15, %v15054_v61  ;;  %v4274_v20 = vmul.f32 %v15056_v42, %v11887_v5  ;;  %12073 = vst [vmem:[%s14846_s30 + $0x40] sm:$0xff] %v15060_v56  ;;  %v11919_v7 = vld [vmem:[#allocation8 + $0x50] ss:$0 sm:$0xff]  ;;  %v15079_v3 = vpop.f32.mrb[12].mxu0 }
 0x198   : > { %18338 = vst [vmem:[#allocation65_spill] sm:$0xff] %v15052_v13  ;;  %v15071_v31 = vmul.f32 %v15044_v43, %v15032_v19  ;;  %v15074_v41 = vmul.f32 %v14962_v17, %v11725_v21  ;;  %v4129_v63 = vadd.f32 %v4097_v49, %v3952_v28  ;;  %v4273_v57 = vmul.f32 %v11887_v5, %v15063_v24  ;;  %v15085_v55 = vpop.f32.mrb[13].mxu0  ;;  %v15087_v28 = vpop.f32.mrb[12].mxu1 }
 0x199   : > { %v4098_v47 = vmul.f32 %v11872_v38, %v15054_v61  ;;  %v4099_v15 = vmul.f32 %v15046_v51, %v11872_v38  ;;  %18341 = vst [vmem:[#allocation68_spill] sm:$0xff] %v15079_v3  ;;  %v4128_v26 = vadd.f32 %v4096_v12, %v3951_v45  ;;  %v4275_v16 = vmul.f32 %v11888_v39, %v15063_v24  ;;  %v11904_v38 = vld [vmem:[#allocation8 + $0x41] ss:$0 sm:$0xff]  ;;  %v15090_v44 = vpop.f32.mrb[13].mxu1 }
 0x19a   : > { %18340 = vst [vmem:[#allocation67_spill] sm:$0xff] %v15074_v41  ;;  %v4276_v23 = vmul.f32 %v15056_v42, %v11888_v39  ;;  %v15083_v46 = vadd.f32 %v2511_v10, %v2366_v32  ;;  %18342 = vst [vmem:[#allocation69_spill] sm:$0xff] %v15087_v28  ;;  %v4306_v5 = vadd.f32 %v4274_v20, %v4129_v63  ;;  %v11935_v32 = vld [vmem:[#allocation8 + $0x60] ss:$0 sm:$0xff]  ;;  %v15095_v12 = vrot.slane %v15060_v56, 1 }
 0x19b   : > { %v4451_v21 = vmul.f32 %v15079_v3, %v11903_v9  ;;  %v4130_v49 = vadd.f32 %v4098_v47, %v3953_v25  ;;  %v4131_v17 = vadd.f32 %v4099_v15, %v3954_v18  ;;  %18343 = vst [vmem:[#allocation70_spill] sm:$0xff] %v15090_v44  ;;  %v4305_v45 = vadd.f32 %v4273_v57, %v4128_v26  ;;  %v11951_v63 = vld [vmem:[#allocation8 + $0x70] ss:$0 sm:$0xff]  ;;  %v11920_v15 = vld [vmem:[#allocation8 + $0x51] ss:$0 sm:$0xff]  ;;  %v15099_v59 = vpop.f32.mrb[14].mxu0 }
 0x19c   : > { %v4450_v39 = vmul.f32 %v11903_v9, %v15085_v55  ;;  %v4628_v10 = vmul.f32 %v15087_v28, %v11919_v7  ;;  %v4627_v20 = vmul.f32 %v11919_v7, %v15090_v44  ;;  %v6333_v25 = vld [vmem:[%s14846_s30 + $0x50] sm:$0x1]  ;;  %18344 = vst [vmem:[#allocation71_spill] sm:$0xff] %v15099_v59  ;;  %v4452_v27 = vmul.f32 %v11904_v38, %v15085_v55  ;;  %v15105_v56 = vpop.f32.mrb[15].mxu0 }
 0x19d   : > { %v4483_v54 = vadd.f32 %v4451_v21, %v4306_v5  ;;  %v4307_v18 = vadd.f32 %v4275_v16, %v4130_v49  ;;  %v4308_v47 = vadd.f32 %v4276_v23, %v4131_v17  ;;  %v6331_v26 = vld [vmem:[%s14846_s30 + $0x30] sm:$0xfe]  ;;  %v6504_v9 = vrot.slane %v6333_v25, 1  ;;  %18345 = vst [vmem:[#allocation72_spill] sm:$0xff] %v15105_v56  ;;  %v15107_v5 = vpop.f32.mrb[14].mxu1 }
 0x19e   : > { %v4482_v4 = vadd.f32 %v4450_v39, %v4305_v45  ;;  %v12232_v57 = vld [vmem:[%s14846_s30 + $0x30] sm:$0xfe]  ;;  %v4453_v0 = vmul.f32 %v15079_v3, %v11904_v38  ;;  %18346 = vst [vmem:[#allocation73_spill] sm:$0xff] %v15107_v5  ;;  %v4805_v16 = vmul.f32 %v15099_v59, %v11935_v32  ;;  %v6498_v17 = vrot.slane %v6331_v26, 1  ;;  %v15110_v21 = vpop.f32.mrb[15].mxu1 }
 0x19f   : > { %v4660_v7 = vadd.f32 %v4628_v10, %v4483_v54  ;;  %v8384_v23 = vrot.slane %v12232_v57, 1  ;;  %18347 = vst [vmem:[#allocation74_spill] sm:$0xff] %v15110_v21  ;;  %v4804_v45 = vmul.f32 %v11935_v32, %v15105_v56  ;;  %v4982_v39 = vmul.f32 %v15107_v5, %v11951_v63  ;;  %v11967_v25 = vld [vmem:[#allocation8 + $0x80] ss:$0 sm:$0xff]  ;;  %v11983_v54 = vld [vmem:[#allocation8 + $0x90] ss:$0 sm:$0xff] }
 0x1a0   : > { %v4659_v49 = vadd.f32 %v4627_v20, %v4482_v4  ;;  %v4629_v38 = vmul.f32 %v11920_v15, %v15090_v44  ;;  %v4981_v19 = vmul.f32 %v11951_v63, %v15110_v21  ;;  %v15118_v10 = vsel %vm6487_vm5, %v6498_v17, %v15095_v12  ;;  %v15125_v4 = vld [vmem:[%s14846_s30 + $0x50] sm:$0x1]  ;;  %v15127_v32 = vpop.f32.mrb[16].mxu0  ;;  %v15135_v1 = vpop.f32.mrb[16].mxu1 }
 0x1a1   : > { %v4837_v40 = vadd.f32 %v4805_v16, %v4660_v7  ;;  %v15122_v26 = vsel %vm6487_vm5, %v15095_v12, %v6504_v9  ;;  %18348 = vst [vmem:[#allocation75_spill] sm:$0xff] %v15127_v32  ;;  %v15131_v57 = vsel %vm6487_vm5, %v8384_v23, %v15095_v12  ;;  %v4484_v7 = vadd.f32 %v4452_v27, %v4307_v18  ;;  %v15133_v16 = vpop.f32.mrb[17].mxu0  ;;  %v15140_v62 = vpop.f32.mrb[17].mxu1 }
 0x1a2   : > { %v4836_v20 = vadd.f32 %v4804_v45, %v4659_v49  ;;  %v4485_v63 = vadd.f32 %v4453_v0, %v4308_v47  ;;  %18349 = vst [vmem:[#allocation76_spill] sm:$0xff] %v15133_v16  ;;  %18350 = vst [vmem:[#allocation77_spill] sm:$0xff] %v15135_v1  ;;  %v5159_v48 = vmul.f32 %v15127_v32, %v11967_v25  ;;  %v11999_v0 = vld [vmem:[#allocation8 + $0xa0] ss:$0 sm:$0xff]  ;;  %v11968_v47 = vld [vmem:[#allocation8 + $0x81] ss:$0 sm:$0xff] }
 0x1a3   : > { %v5014_v17 = vadd.f32 %v4982_v39, %v4837_v40  ;;  %v4630_v9 = vmul.f32 %v15087_v28, %v11920_v15  ;;  %v4806_v35 = vmul.f32 %v11936_v37, %v15105_v56  ;;  %18351 = vst [vmem:[#allocation78_spill] sm:$0xff] %v15140_v62  ;;  %v5158_v23 = vmul.f32 %v11967_v25, %v15133_v16  ;;  %v12015_v39 = vld [vmem:[#allocation8 + $0xb0] ss:$0 sm:$0xff]  ;;  %v15146_v50 = vpop.f32.mrb[18].mxu0 }
 0x1a4   : > { %v5013_v49 = vadd.f32 %v4981_v19, %v4836_v20  ;;  %v5336_v27 = vmul.f32 %v15135_v1, %v11983_v54  ;;  %v5335_v40 = vmul.f32 %v11983_v54, %v15140_v62  ;;  %v4661_v2 = vadd.f32 %v4629_v38, %v4484_v7  ;;  %18352 = vst [vmem:[#allocation79_spill] sm:$0xff] %v15146_v50  ;;  %v15151_v20 = vpop.f32.mrb[19].mxu0  ;;  %v15153_v6 = vpop.f32.mrb[18].mxu1  ;;  %v11984_v7 = vld [vmem:[#allocation8 + $0x91] ss:$0 sm:$0xff] }
 0x1a5   : > { %v5191_v45 = vadd.f32 %v5159_v48, %v5014_v17  ;;  %v4662_v15 = vadd.f32 %v4630_v9, %v4485_v63  ;;  %v4807_v52 = vmul.f32 %v15099_v59, %v11936_v37  ;;  %v4983_v19 = vmul.f32 %v11952_v36, %v15110_v21  ;;  %18353 = vst [vmem:[#allocation80_spill] sm:$0xff] %v15151_v20  ;;  %v15157_v63 = vpop.f32.mrb[19].mxu1 }
 0x1a6   : > { %v5190_v8 = vadd.f32 %v5158_v23, %v5013_v49  ;;  %v4984_v25 = vmul.f32 %v15107_v5, %v11952_v36  ;;  %18354 = vst [vmem:[#allocation81_spill] sm:$0xff] %v15153_v6  ;;  %v5513_v48 = vmul.f32 %v15146_v50, %v11999_v0  ;;  %v4838_v54 = vadd.f32 %v4806_v35, %v4661_v2  ;;  %v12000_v36 = vld [vmem:[#allocation8 + $0xa1] ss:$0 sm:$0xff] }
 0x1a7   : > { %v5368_v18 = vadd.f32 %v5336_v27, %v5191_v45  ;;  %v5160_v38 = vmul.f32 %v11968_v47, %v15133_v16  ;;  %18355 = vst [vmem:[#allocation82_spill] sm:$0xff] %v15157_v63  ;;  %v5512_v37 = vmul.f32 %v11999_v0, %v15151_v20  ;;  %v5690_v9 = vmul.f32 %v15153_v6, %v12015_v39  ;;  %v12016_v45 = vld [vmem:[#allocation8 + $0xb1] ss:$0 sm:$0xff] }
 0x1a8   : > { %v5367_v17 = vadd.f32 %v5335_v40, %v5190_v8  ;;  %v4839_v49 = vadd.f32 %v4807_v52, %v4662_v15  ;;  %v5689_v41 = vmul.f32 %v12015_v39, %v15157_v63  ;;  %v5015_v60 = vadd.f32 %v4983_v19, %v4838_v54 }
 0x1a9   : > { %v5545_v23 = vadd.f32 %v5513_v48, %v5368_v18  ;;  %v5161_v27 = vmul.f32 %v15127_v32, %v11968_v47  ;;  %v5337_v13 = vmul.f32 %v11984_v7, %v15140_v62  ;;  %v5338_v58 = vmul.f32 %v15135_v1, %v11984_v7  ;;  %v11857_v18 = vld [vmem:[#allocation8 + $0x12] ss:$0 sm:$0xff] }
 0x1aa   : > { %v5544_v35 = vadd.f32 %v5512_v37, %v5367_v17  ;;  %v5016_v2 = vadd.f32 %v4984_v25, %v4839_v49  ;;  %v5192_v40 = vadd.f32 %v5160_v38, %v5015_v60  ;;  %v5514_v0 = vmul.f32 %v12000_v36, %v15151_v20  ;;  %v11873_v25 = vld [vmem:[#allocation8 + $0x22] ss:$0 sm:$0xff] }
 0x1ab   : > { %v5722_v8 = vadd.f32 %v5690_v9, %v5545_v23  ;;  %v5515_v52 = vmul.f32 %v15146_v50, %v12000_v36  ;;  %v5691_v47 = vmul.f32 %v12016_v45, %v15157_v63  ;;  %v5692_v19 = vmul.f32 %v15153_v6, %v12016_v45  ;;  %v11905_v45 = vld [vmem:[#allocation8 + $0x42] ss:$0 sm:$0xff] }
 0x1ac   : > { %v5721_v15 = vadd.f32 %v5689_v41, %v5544_v35  ;;  %v5193_v39 = vadd.f32 %v5161_v27, %v5016_v2  ;;  %v5369_v54 = vadd.f32 %v5337_v13, %v5192_v40  ;;  %v5913_v60 = vrot.slane %v15049_v53, 7 }
 0x1ad   : > { %v6088_v48 = vrot.slane %v5722_v8, 7  ;;  %v5914_v38 = vrot.slane %v15083_v46, 7  ;;  %v3747_v41 = vmul.f32 %v15026_v22, %v15044_v43  ;;  %v3923_v37 = vmul.f32 %v11857_v18, %v15034_v11  ;;  %v11889_v46 = vld [vmem:[#allocation8 + $0x32] ss:$0 sm:$0xff] }
 0x1ae   : > { %v6087_v7 = vrot.slane %v5721_v15, 7  ;;  %v5370_v17 = vadd.f32 %v5338_v58, %v5193_v39  ;;  %v5546_v9 = vadd.f32 %v5514_v0, %v5369_v54  ;;  %12075 = vst [vmem:[%s14846_s30 + $0x60] sm:$0xfe] %v5913_v60  ;;  %v3924_v13 = vmul.f32 %v15028_v14, %v11857_v18  ;;  %v11921_v0 = vld [vmem:[#allocation8 + $0x52] ss:$0 sm:$0xff] }
 0x1af   : > { %12122 = vst [vmem:[%s14846_s30 + $0x58] sm:$0x1] %v6088_v48  ;;  %v5915_v49 = vsel %vm5909_vm6, %v5913_v60, %v5914_v38  ;;  %12077 = vst [vmem:[%s14846_s30 + $0x80] sm:$0x1] %v5914_v38  ;;  %v4100_v53 = vmul.f32 %v11873_v25, %v15054_v61  ;;  %v18357_v58 = vrot.slane %v15125_v4, 1  ;;  %v3955_v27 = vadd.f32 %v3923_v37, %v15071_v31 }
 0x1b0   : > { %v15181_v36 = vsel %vm5909_vm6, %v6087_v7, %v6088_v48  ;;  %12120 = vst [vmem:[%s14846_s30 + $0x38] sm:$0xfe] %v6087_v7  ;;  %v5547_v23 = vadd.f32 %v5515_v52, %v5370_v17  ;;  %12076 = vst [vmem:[%s14846_s30 + $0x70] sm:$0xff] %v5915_v49  ;;  %v5723_v35 = vadd.f32 %v5691_v47, %v5546_v9  ;;  %v15194_v2 = vrot.slane %v5915_v49, 1  ;;  %v11937_v15 = vld [vmem:[#allocation8 + $0x62] ss:$0 sm:$0xff] }
 0x1b1   : > { %18356 = vst [vmem:[#allocation83_spill] sm:$0xff] %v15181_v36  ;;  %v15188_v43 = vsel %vm6487_vm5, %v15095_v12, %v18357_v58  ;;  %12121 = vst [vmem:[%s14846_s30 + $0x48] sm:$0xff] %v15181_v36  ;;  %v3956_v8 = vadd.f32 %v3924_v13, %v3747_v41  ;;  %v4101_v40 = vmul.f32 %v15046_v51, %v11873_v25  ;;  %v11953_v25 = vld [vmem:[#allocation8 + $0x72] ss:$0 sm:$0xff]  ;;  %v6502_v54 = vrot.slane %v15181_v36, 1 }
 0x1b2   : > { %v5724_v4 = vadd.f32 %v5692_v19, %v5547_v23  ;;  %v4132_v18 = vadd.f32 %v4100_v53, %v3955_v27  ;;  %v4277_v12 = vmul.f32 %v11889_v46, %v15063_v24  ;;  %v4278_v52 = vmul.f32 %v15056_v42, %v11889_v46  ;;  %v11969_v7 = vld [vmem:[#allocation8 + $0x82] ss:$0 sm:$0xff] }
 0x1b3   : > { %v6090_v31 = vrot.slane %v5723_v35, 7  ;;  %v4133_v39 = vadd.f32 %v4101_v40, %v3956_v8  ;;  %v4454_v47 = vmul.f32 %v11905_v45, %v15085_v55  ;;  %v4455_v48 = vmul.f32 %v15079_v3, %v11905_v45 }
 0x1b4   : > { %v6091_v19 = vrot.slane %v5724_v4, 7  ;;  %v4309_v60 = vadd.f32 %v4277_v12, %v4132_v18  ;;  %v4631_v38 = vmul.f32 %v11921_v0, %v15090_v44  ;;  %v4632_v41 = vmul.f32 %v15087_v28, %v11921_v0  ;;  %v11985_v18 = vld [vmem:[#allocation8 + $0x92] ss:$0 sm:$0xff] }
 0x1b5   : > { %12123 = vst [vmem:[%s14846_s30 + $0x68] sm:$0xfe] %v6090_v31  ;;  %v4310_v17 = vadd.f32 %v4278_v52, %v4133_v39  ;;  %v4808_v37 = vmul.f32 %v11937_v15, %v15105_v56  ;;  %v4809_v9 = vmul.f32 %v15099_v59, %v11937_v15  ;;  %v6335_v46 = vld [vmem:[%s14846_s30 + $0x60] sm:$0xfe]  ;;  %v4985_v23 = vmul.f32 %v11953_v25, %v15110_v21 }
 0x1b6   : > { %v6334_v49 = vld [vmem:[%s14846_s30 + $0x58] sm:$0x1]  ;;  %v6092_v53 = vsel %vm5909_vm6, %v6090_v31, %v6091_v19  ;;  %12125 = vst [vmem:[%s14846_s30 + $0x88] sm:$0x1] %v6091_v19  ;;  %v4486_v58 = vadd.f32 %v4454_v47, %v4309_v60  ;;  %v4986_v27 = vmul.f32 %v15107_v5, %v11953_v25  ;;  %v5162_v4 = vmul.f32 %v11969_v7, %v15133_v16  ;;  %v12238_v31 = vld [vmem:[%s14846_s30 + $0x60] sm:$0xfe] }
 0x1b7   : > { %v12237_v13 = vld [vmem:[%s14846_s30 + $0x58] sm:$0x1]  ;;  %v6332_v45 = vld [vmem:[%s14846_s30 + $0x38] sm:$0xfe]  ;;  %v6506_v8 = vrot.slane %v6334_v49, 1  ;;  %12124 = vst [vmem:[%s14846_s30 + $0x78] sm:$0xff] %v6092_v53  ;;  %v4487_v0 = vadd.f32 %v4455_v48, %v4310_v17  ;;  %v5163_v39 = vmul.f32 %v15127_v32, %v11969_v7 }
 0x1b8   : > { %v12233_v35 = vld [vmem:[%s14846_s30 + $0x38] sm:$0xfe]  ;;  %v8392_v40 = vrot.slane %v12237_v13, 1  ;;  %v6501_v12 = vrot.slane %v6332_v45, 1  ;;  %v6508_v15 = vrot.slane %v6335_v46, 1  ;;  %v8394_v19 = vrot.slane %v12238_v31, 1 }
 0x1b9   : > { %v8387_v52 = vrot.slane %v12233_v35, 1  ;;  %v6507_v47 = vsel %vm6487_vm5, %v6502_v54, %v6506_v8  ;;  %v6337_v60 = vld [vmem:[%s14846_s30 + $0x80] sm:$0x1]  ;;  %v4663_v13 = vadd.f32 %v4631_v38, %v4486_v58  ;;  %v4664_v8 = vadd.f32 %v4632_v41, %v4487_v0  ;;  %v12001_v38 = vld [vmem:[#allocation8 + $0xa2] ss:$0 sm:$0xff] }
 0x1ba   : > { %v8393_v25 = vsel %vm6487_vm5, %v6502_v54, %v8392_v40  ;;  %v12242_v49 = vld [vmem:[%s14846_s30 + $0x80] sm:$0x1]  ;;  %v6503_v48 = vsel %vm6487_vm5, %v6501_v12, %v6502_v54  ;;  %v6510_v46 = vsel %vm6487_vm5, %v6508_v15, %v15194_v2  ;;  %v6514_v45 = vrot.slane %v6337_v60, 1 }
 0x1bb   : > { %v8389_v17 = vsel %vm6487_vm5, %v8387_v52, %v6502_v54  ;;  %6819 = vmatprep.mubr.f32.mxu1 %v6503_v48  ;;  %v8396_v7 = vsel %vm6487_vm5, %v8394_v19, %v15194_v2  ;;  %v8400_v35 = vrot.slane %v12242_v49, 1  ;;  %v4840_v40 = vadd.f32 %v4808_v37, %v4663_v13 }
 0x1bc   : > { %8705 = vmatprep.mubr.f32.mxu0 %v8389_v17  ;;  %6820 = vmatmul.mubr.f32.gmra.mrb[24].mxu1 %v15118_v10  ;;  %v6336_v54 = vld [vmem:[%s14846_s30 + $0x68] sm:$0xfe]  ;;  %v6512_v58 = vrot.slane %v6092_v53, 1  ;;  %v15236_v52 = vsel %vm6487_vm5, %v15194_v2, %v6514_v45  ;;  %v5339_v15 = vmul.f32 %v11985_v18, %v15140_v62  ;;  %v5340_v31 = vmul.f32 %v15135_v1, %v11985_v18  ;;  %v12017_v18 = vld [vmem:[#allocation8 + $0xb2] ss:$0 sm:$0xff] }
 0x1bd   : > { %8706 = vmatmul.mubr.f32.vlgmr.msra.gmra.mrb[20].mxu0 %v15131_v57  ;;  %v12239_v12 = vld [vmem:[%s14846_s30 + $0x68] sm:$0xfe]  ;;  %6824 = vmatprep.mubr.f32.mxu1 %v6507_v47  ;;  %v6511_v41 = vrot.slane %v6336_v54, 1  ;;  %v6338_v0 = vld [vmem:[%s14846_s30 + $0x88] sm:$0x1]  ;;  %v8401_v10 = vsel %vm6487_vm5, %v15194_v2, %v8400_v35  ;;  %v4841_v57 = vadd.f32 %v4809_v9, %v4664_v8  ;;  %v18358_v53 = vpack.c.bf16 %v14920_v30, %v14918_v29 }
 0x1be   : > { %8710 = vmatprep.mubr.f32.mxu0 %v8393_v25  ;;  %v8397_v37 = vrot.slane %v12239_v12, 1  ;;  %v12243_v19 = vld [vmem:[%s14846_s30 + $0x88] sm:$0x1]  ;;  %v6516_v60 = vrot.slane %v6338_v0, 1  ;;  %v5017_v13 = vadd.f32 %v4985_v23, %v4840_v40  ;;  %v5516_v48 = vmul.f32 %v12001_v38, %v15151_v20  ;;  %v11741_v9 = vld [vmem:[#allocation5 + $0x42] ss:$0 sm:$0xff] }
 0x1bf   : > { %13135 = vmatpush1.bf16.msra.mxu0 %v18358_v53  ;;  %v8402_v49 = vrot.slane %v12243_v19, 1  ;;  %v18359_v47 = vmov 0.0|0.0   ;;  %v6513_v25 = vsel %vm6487_vm5, %v6511_v41, %v6512_v58  ;;  %v5018_v45 = vadd.f32 %v4986_v27, %v4841_v57  ;;  %v11757_v35 = vld [vmem:[#allocation5 + $0x52] ss:$0 sm:$0xff]  ;;  %v11773_v54 = vld [vmem:[#allocation5 + $0x62] ss:$0 sm:$0xff] }
 0x1c0   : > { %13136 = vmatprep.subr.bf16.mxu0 %v18359_v47  ;;  %v8399_v17 = vsel %vm6487_vm5, %v8397_v37, %v6512_v58  ;;  %v5517_v2 = vmul.f32 %v15146_v50, %v12001_v38  ;;  %6825 = vmatmul.mubr.f32.gmra.mrb[26].mxu1 %v15122_v26  ;;  %v6517_v29 = vsel %vm6487_vm5, %v6512_v58, %v6516_v60  ;;  %v18362_v12 = vld [vmem:[#allocation65_spill] sm:$0xff]  ;;  %v18365_v0 = vld [vmem:[#allocation52_spill] sm:$0xff]  ;;  %v18366_v57 = vld [vmem:[#allocation50_spill] sm:$0xff] }
 0x1c1   : > { %8711 = vmatmul.mubr.f32.gmra.mrb[22].mxu0 %v15188_v43  ;;  %v8403_v30 = vsel %vm6487_vm5, %v6512_v58, %v8402_v49  ;;  %v5194_v23 = vadd.f32 %v5162_v4, %v5017_v13  ;;  %6829 = vmatprep.mubr.f32.mxu1 %v6513_v25  ;;  %v5195_v8 = vadd.f32 %v5163_v39, %v5018_v45  ;;  %v18361_v43 = vld [vmem:[#allocation56_spill] sm:$0xff]  ;;  %v18363_v37 = vld [vmem:[#allocation57_spill] sm:$0xff]  ;;  %v18364_v58 = vld [vmem:[#allocation67_spill] sm:$0xff] }
 0x1c2   : > { %8715 = vmatprep.mubr.f32.mxu0 %v8399_v17  ;;  %v5693_v40 = vmul.f32 %v12017_v18, %v15157_v63  ;;  %v5694_v27 = vmul.f32 %v15153_v6, %v12017_v18  ;;  %v18360_v38 = vpack.c.bf16 %v14924_v34, %v14922_v33  ;;  %v1836_v41 = vadd.f32 %v18362_v12, %v18361_v43  ;;  %v18367_v60 = vld [vmem:[#allocation53_spill] sm:$0xff]  ;;  %v18368_v13 = vld [vmem:[#allocation51_spill] sm:$0xff]  ;;  %v18369_v25 = vld [vmem:[#allocation60_spill] sm:$0xff] }
 0x1c3   : > { %v5371_v26 = vadd.f32 %v5339_v15, %v5194_v23  ;;  %v1837_v4 = vadd.f32 %v18364_v58, %v18363_v37  ;;  %v1981_v19 = vmul.f32 %v11741_v9, %v18365_v0  ;;  %v5372_v39 = vadd.f32 %v5340_v31, %v5195_v8  ;;  %v11789_v33 = vld [vmem:[#allocation5 + $0x72] ss:$0 sm:$0xff]  ;;  %v11842_v45 = vld [vmem:[#allocation8 + $0x3] ss:$0 sm:$0xff]  ;;  %v18370_v43 = vld [vmem:[#allocation54_spill] sm:$0xff] }
 0x1c4   : > { %13138 = vmatpush1.bf16.msra.mxu0 %v18360_v38  ;;  %v1982_v53 = vmul.f32 %v18366_v57, %v11741_v9  ;;  %v2158_v49 = vmul.f32 %v11757_v35, %v18367_v60  ;;  %v2159_v18 = vmul.f32 %v18368_v13, %v11757_v35  ;;  %6830 = vmatmul.mubr.f32.gmra.mrb[28].mxu1 %v6510_v46  ;;  %v11858_v8 = vld [vmem:[#allocation8 + $0x13] ss:$0 sm:$0xff]  ;;  %v18372_v12 = vld [vmem:[#allocation38_spill] sm:$0xff]  ;;  %v18374_v46 = vld [vmem:[#allocation61_spill] sm:$0xff] }
 0x1c5   : > { %13139 = vmatprep.subr.bf16.mxu0 %v18359_v47  ;;  %8716 = vmatmul.mubr.f32.gmra.mrb[24].mxu0 %v8396_v7  ;;  %v5548_v34 = vadd.f32 %v5516_v48, %v5371_v26  ;;  %v2013_v15 = vadd.f32 %v1981_v19, %v1836_v41  ;;  %v2335_v17 = vmul.f32 %v11773_v54, %v18369_v25  ;;  %v18371_v9 = vld [vmem:[#allocation39_spill] sm:$0xff]  ;;  %v11874_v41 = vld [vmem:[#allocation8 + $0x23] ss:$0 sm:$0xff] }
 0x1c6   : > { %6834 = vmatprep.mubr.f32.mxu1 %v6517_v29  ;;  %8720 = vmatprep.mubr.f32.mxu0 %v8403_v30  ;;  %v5549_v23 = vadd.f32 %v5517_v2, %v5372_v39  ;;  %v2014_v38 = vadd.f32 %v1982_v53, %v1837_v4  ;;  %v2336_v31 = vmul.f32 %v18370_v43, %v11773_v54  ;;  %v18375_v48 = vld [vmem:[#allocation55_spill] sm:$0xff]  ;;  %v18376_v2 = vld [vmem:[#allocation64_spill] sm:$0xff] }
 0x1c7   : > { %v18373_v37 = vpack.c.bf16 %v18371_v9, %v18372_v12  ;;  %v5725_v35 = vadd.f32 %v5693_v40, %v5548_v34  ;;  %v2190_v58 = vadd.f32 %v2158_v49, %v2013_v15  ;;  %v2512_v7 = vmul.f32 %v11789_v33, %v18374_v46  ;;  %v11890_v19 = vld [vmem:[#allocation8 + $0x33] ss:$0 sm:$0xff] }
 0x1c8   : > { %v2513_v26 = vmul.f32 %v18375_v48, %v11789_v33  ;;  %v5726_v29 = vadd.f32 %v5694_v27, %v5549_v23  ;;  %v2191_v30 = vadd.f32 %v2159_v18, %v2014_v38  ;;  %v3748_v4 = vmul.f32 %v11842_v45, %v18376_v2  ;;  %6835 = vmatmul.mubr.f32.gmra.mrb[30].mxu1 %v15236_v52  ;;  %v15283_v33 = vld [vmem:[#allocation10 + $0x560] sm:$0xff]  ;;  %v15285_v27 = vld [vmem:[#allocation10 + $0x568] sm:$0xff] }
 0x1c9   : > { %13141 = vmatpush1.bf16.msra.mxu0 %v18373_v37  ;;  %v3749_v54 = vmul.f32 %v15026_v22, %v11842_v45  ;;  %v6093_v40 = vrot.slane %v5725_v35, 7  ;;  %v2367_v39 = vadd.f32 %v2335_v17, %v2190_v58  ;;  %v3925_v53 = vmul.f32 %v11858_v8, %v15034_v11  ;;  %v11906_v52 = vld [vmem:[#allocation8 + $0x43] ss:$0 sm:$0xff]  ;;  %v18378_v17 = vld [vmem:[#allocation40_spill] sm:$0xff]  ;;  %v11922_v37 = vld [vmem:[#allocation8 + $0x53] ss:$0 sm:$0xff] }
 0x1ca   : > { %13142 = vmatprep.subr.bf16.mxu0 %v18359_v47  ;;  %8721 = vmatmul.mubr.f32.gmra.mrb[26].mxu0 %v8401_v10  ;;  %v3926_v49 = vmul.f32 %v15028_v14, %v11858_v8  ;;  %v6094_v18 = vrot.slane %v5726_v29, 7  ;;  %v2368_v34 = vadd.f32 %v2336_v31, %v2191_v30  ;;  %v4102_v15 = vmul.f32 %v11874_v41, %v15054_v61  ;;  %v18377_v10 = vld [vmem:[#allocation41_spill] sm:$0xff] }
 0x1cb   : > { %v4103_v45 = vmul.f32 %v15046_v51, %v11874_v41  ;;  %12126 = vst [vmem:[%s14846_s30 + $0x98] sm:$0xfe] %v6093_v40  ;;  %v18379_v23 = vpack.c.bf16 %v18377_v10, %v18378_v17  ;;  %v2544_v38 = vadd.f32 %v2512_v7, %v2367_v39  ;;  %v3957_v8 = vadd.f32 %v3925_v53, %v3748_v4  ;;  %v11938_v41 = vld [vmem:[#allocation8 + $0x63] ss:$0 sm:$0xff]  ;;  %v11954_v39 = vld [vmem:[#allocation8 + $0x73] ss:$0 sm:$0xff] }
 0x1cc   : > { %v3958_v9 = vadd.f32 %v3926_v49, %v3749_v54  ;;  %v4279_v12 = vmul.f32 %v11890_v19, %v15063_v24  ;;  %v6095_v35 = vsel %vm5909_vm6, %v6093_v40, %v6094_v18  ;;  %12128 = vst [vmem:[%s14846_s30 + $0xb8] sm:$0x1] %v6094_v18  ;;  %v2545_v31 = vadd.f32 %v2513_v26, %v2368_v34  ;;  %v18380_v18 = vld [vmem:[#allocation59_spill] sm:$0xff]  ;;  %v18381_v34 = vld [vmem:[#allocation58_spill] sm:$0xff] }
 0x1cd   : > { %13144 = vmatpush1.bf16.msra.mxu0 %v18379_v23  ;;  %v4280_v58 = vmul.f32 %v15056_v42, %v11890_v19  ;;  %12127 = vst [vmem:[%s14846_s30 + $0xa8] sm:$0xff] %v6095_v35  ;;  %v5916_v7 = vrot.slane %v2544_v38, 7  ;;  %v4134_v30 = vadd.f32 %v4102_v15, %v3957_v8  ;;  %v4456_v54 = vmul.f32 %v11906_v52, %v15085_v55  ;;  %v11970_v19 = vld [vmem:[#allocation8 + $0x83] ss:$0 sm:$0xff]  ;;  %v11986_v38 = vld [vmem:[#allocation8 + $0x93] ss:$0 sm:$0xff] }
 0x1ce   : > { %13145 = vmatprep.subr.bf16.mxu0 %v18359_v47  ;;  %v4135_v4 = vadd.f32 %v4103_v45, %v3958_v9  ;;  %v6522_v40 = vrot.slane %v6095_v35, 1  ;;  %v5917_v53 = vrot.slane %v2545_v31, 7  ;;  %v4457_v26 = vmul.f32 %v15079_v3, %v11906_v52  ;;  %v12002_v8 = vld [vmem:[#allocation8 + $0xa3] ss:$0 sm:$0xff] }
 0x1cf   : > { %v4633_v49 = vmul.f32 %v11922_v37, %v15090_v44  ;;  %12078 = vst [vmem:[%s14846_s30 + $0x90] sm:$0xfe] %v5916_v7  ;;  %v18382_v10 = vpack.c.bf16 %v18380_v18, %v18381_v34  ;;  %v4311_v17 = vadd.f32 %v4279_v12, %v4134_v30  ;;  %v4634_v45 = vmul.f32 %v15087_v28, %v11922_v37 }
 0x1d0   : > { %v4312_v15 = vadd.f32 %v4280_v58, %v4135_v4  ;;  %v4810_v23 = vmul.f32 %v11938_v41, %v15105_v56  ;;  %v5918_v52 = vsel %vm5909_vm6, %v5916_v7, %v5917_v53  ;;  %12080 = vst [vmem:[%s14846_s30 + $0xb0] sm:$0x1] %v5917_v53  ;;  %v4811_v9 = vmul.f32 %v15099_v59, %v11938_v41  ;;  %v12018_v4 = vld [vmem:[#allocation8 + $0xb3] ss:$0 sm:$0xff] }
 0x1d1   : > { %13147 = vmatpush1.bf16.msra.mxu0 %v18382_v10  ;;  %v4987_v35 = vmul.f32 %v11954_v39, %v15110_v21  ;;  %v4988_v12 = vmul.f32 %v15107_v5, %v11954_v39  ;;  %12079 = vst [vmem:[%s14846_s30 + $0xa0] sm:$0xff] %v5918_v52  ;;  %v4488_v37 = vadd.f32 %v4456_v54, %v4311_v17  ;;  %v11678_v10 = vld [vmem:[#allocation5 + $0x3] ss:$0 sm:$0xff] }
 0x1d2   : > { %13148 = vmatprep.subr.bf16.mxu0 %v18359_v47  ;;  %v4489_v31 = vadd.f32 %v4457_v26, %v4312_v15  ;;  %v5164_v58 = vmul.f32 %v11970_v19, %v15133_v16  ;;  %v5165_v30 = vmul.f32 %v15127_v32, %v11970_v19  ;;  %v6340_v7 = vld [vmem:[%s14846_s30 + $0x98] sm:$0xfe]  ;;  %v5341_v18 = vmul.f32 %v11986_v38, %v15140_v62  ;;  %v18383_v19 = vld [vmem:[#allocation63_spill] sm:$0xff]  ;;  %v18384_v32 = vld [vmem:[#allocation62_spill] sm:$0xff] }
 0x1d3   : > { %v12245_v53 = vld [vmem:[%s14846_s30 + $0x98] sm:$0xfe]  ;;  %v5342_v41 = vmul.f32 %v15135_v1, %v11986_v38  ;;  %v5518_v34 = vmul.f32 %v12002_v8, %v15151_v20  ;;  %v5519_v39 = vmul.f32 %v15146_v50, %v12002_v8  ;;  %v6521_v29 = vrot.slane %v6340_v7, 1  ;;  %v6342_v54 = vld [vmem:[%s14846_s30 + $0xb8] sm:$0x1] }
 0x1d4   : > { %v8407_v36 = vrot.slane %v12245_v53, 1  ;;  %v12249_v26 = vld [vmem:[%s14846_s30 + $0xb8] sm:$0x1]  ;;  %v4665_v17 = vadd.f32 %v4633_v49, %v4488_v37  ;;  %v4666_v15 = vadd.f32 %v4634_v45, %v4489_v31  ;;  %v18385_v16 = vpack.c.bf16 %v18383_v19, %v18384_v32  ;;  %v11694_v31 = vld [vmem:[#allocation5 + $0x13] ss:$0 sm:$0xff] }
 0x1d5   : > { %v6526_v62 = vrot.slane %v6342_v54, 1  ;;  %v8412_v5 = vrot.slane %v12249_v26, 1  ;;  %v5695_v38 = vmul.f32 %v12018_v4, %v15157_v63  ;;  %v5696_v20 = vmul.f32 %v15153_v6, %v12018_v4  ;;  %v18386_v54 = vld [vmem:[#allocation44_spill] sm:$0xff] }
 0x1d6   : > { %13150 = vmatpush1.bf16.msra.mxu0 %v18385_v16  ;;  %v6523_v8 = vsel %vm6487_vm5, %v6521_v29, %v6522_v40  ;;  %v8409_v49 = vsel %vm6487_vm5, %v8407_v36, %v6522_v40  ;;  %v4842_v45 = vadd.f32 %v4810_v23, %v4665_v17  ;;  %v4843_v37 = vadd.f32 %v4811_v9, %v4666_v15  ;;  %v6339_v32 = vld [vmem:[%s14846_s30 + $0x90] sm:$0xfe] }
 0x1d7   : > { %13151 = vmatprep.subr.bf16.mxu0 %v18359_v47  ;;  %6839 = vmatprep.mubr.f32.mxu1 %v6523_v8  ;;  %v6519_v16 = vrot.slane %v5918_v52, 1  ;;  %v12244_v7 = vld [vmem:[%s14846_s30 + $0x90] sm:$0xfe]  ;;  %v6527_v53 = vsel %vm6487_vm5, %v6522_v40, %v6526_v62  ;;  %v8413_v4 = vsel %vm6487_vm5, %v6522_v40, %v8412_v5  ;;  %v1275_v26 = vmul.f32 %v11678_v10, %v18386_v54  ;;  %v6341_v29 = vld [vmem:[%s14846_s30 + $0xb0] sm:$0x1]  ;;  %v18388_v52 = vld [vmem:[#allocation42_spill] sm:$0xff] }
 0x1d8   : > { %8725 = vmatprep.mubr.f32.mxu0 %v8409_v49  ;;  %v6518_v19 = vrot.slane %v6339_v32, 1  ;;  %v8404_v6 = vrot.slane %v12244_v7, 1  ;;  %v12248_v63 = vld [vmem:[%s14846_s30 + $0xb0] sm:$0x1]  ;;  %v5019_v50 = vadd.f32 %v4987_v35, %v4842_v45  ;;  %v5020_v36 = vadd.f32 %v4988_v12, %v4843_v37  ;;  %v18389_v8 = vld [vmem:[#allocation45_spill] sm:$0xff] }
 0x1d9   : > { %v18387_v23 = vpack.c.bf16 %v15285_v27, %v15283_v33  ;;  %v6524_v9 = vrot.slane %v6341_v29, 1  ;;  %v8410_v17 = vrot.slane %v12248_v63, 1  ;;  %v1276_v15 = vmul.f32 %v18388_v52, %v11678_v10  ;;  %v11710_v35 = vld [vmem:[#allocation5 + $0x23] ss:$0 sm:$0xff]  ;;  %v11726_v12 = vld [vmem:[#allocation5 + $0x33] ss:$0 sm:$0xff] }
 0x1da   : > { %v1452_v62 = vmul.f32 %v11694_v31, %v18389_v8  ;;  %v6520_v5 = vsel %vm6487_vm5, %v6518_v19, %v6519_v16  ;;  %v8406_v40 = vsel %vm6487_vm5, %v8404_v6, %v6519_v16  ;;  %v5196_v49 = vadd.f32 %v5164_v58, %v5019_v50  ;;  %v18390_v27 = vld [vmem:[#allocation43_spill] sm:$0xff]  ;;  %v11742_v45 = vld [vmem:[#allocation5 + $0x43] ss:$0 sm:$0xff]  ;;  %v18391_v6 = vld [vmem:[#allocation48_spill] sm:$0xff] }
 0x1db   : > { %13153 = vmatpush1.bf16.msra.mxu0 %v18387_v23  ;;  %v5197_v32 = vadd.f32 %v5165_v30, %v5020_v36  ;;  %6840 = vmatmul.mubr.f32.gmra.mrb[32].mxu1 %v6520_v5  ;;  %v6525_v33 = vsel %vm6487_vm5, %v6519_v16, %v6524_v9  ;;  %v8411_v63 = vsel %vm6487_vm5, %v6519_v16, %v8410_v17  ;;  %v18392_v58 = vld [vmem:[#allocation46_spill] sm:$0xff]  ;;  %v18393_v36 = vld [vmem:[#allocation49_spill] sm:$0xff]  ;;  %v11758_v5 = vld [vmem:[#allocation5 + $0x53] ss:$0 sm:$0xff] }
 0x1dc   : > { %13154 = vmatprep.subr.bf16.mxu0 %v18359_v47  ;;  %8726 = vmatmul.mubr.f32.gmra.mrb[28].mxu0 %v8406_v40  ;;  %v1453_v10 = vmul.f32 %v18390_v27, %v11694_v31  ;;  %v5373_v37 = vadd.f32 %v5341_v18, %v5196_v49  ;;  %v1484_v19 = vadd.f32 %v1452_v62, %v1275_v26  ;;  %v18394_v47 = vld [vmem:[#allocation47_spill] sm:$0xff]  ;;  %v11774_v17 = vld [vmem:[#allocation5 + $0x63] ss:$0 sm:$0xff] }
 0x1dd   : > { %6844 = vmatprep.mubr.f32.mxu1 %v6527_v53  ;;  %8730 = vmatprep.mubr.f32.mxu0 %v8413_v4  ;;  %v5374_v7 = vadd.f32 %v5342_v41, %v5197_v32  ;;  %v1629_v50 = vmul.f32 %v11710_v35, %v18391_v6  ;;  %v1630_v30 = vmul.f32 %v18392_v58, %v11710_v35  ;;  %v11790_v4 = vld [vmem:[#allocation5 + $0x73] ss:$0 sm:$0xff] }
 0x1de   : > { %v1485_v29 = vadd.f32 %v1453_v10, %v1276_v15  ;;  %v1806_v23 = vmul.f32 %v11726_v12, %v18393_v36  ;;  %v5550_v40 = vadd.f32 %v5518_v34, %v5373_v37  ;;  %v1807_v16 = vmul.f32 %v18394_v47, %v11726_v12  ;;  %v11843_v34 = vld [vmem:[#allocation8 + $0x4] ss:$0 sm:$0xff] }
 0x1df   : > { %v5551_v9 = vadd.f32 %v5519_v39, %v5374_v7  ;;  %v1983_v31 = vmul.f32 %v11742_v45, %v18365_v0  ;;  %6845 = vmatmul.mubr.f32.gmra.mrb[34].mxu1 %v6525_v33  ;;  %v1661_v18 = vadd.f32 %v1629_v50, %v1484_v19  ;;  %v1984_v53 = vmul.f32 %v18366_v57, %v11742_v45  ;;  %v11875_v10 = vld [vmem:[#allocation8 + $0x24] ss:$0 sm:$0xff] }
 0x1e0   : > { %8731 = vmatmul.mubr.f32.gmra.mrb[30].mxu0 %v8411_v63  ;;  %v1662_v41 = vadd.f32 %v1630_v30, %v1485_v29  ;;  %v5727_v62 = vadd.f32 %v5695_v38, %v5550_v40  ;;  %v2160_v32 = vmul.f32 %v11758_v5, %v18367_v60  ;;  %v2161_v12 = vmul.f32 %v18368_v13, %v11758_v5  ;;  %v11859_v63 = vld [vmem:[#allocation8 + $0x14] ss:$0 sm:$0xff] }
 0x1e1   : > { %v5728_v49 = vadd.f32 %v5696_v20, %v5551_v9  ;;  %v1838_v39 = vadd.f32 %v1806_v23, %v1661_v18  ;;  %v2337_v33 = vmul.f32 %v11774_v17, %v18369_v25  ;;  %v2338_v7 = vmul.f32 %v18370_v43, %v11774_v17  ;;  %v11891_v30 = vld [vmem:[#allocation8 + $0x34] ss:$0 sm:$0xff] }
 0x1e2   : > { %v1839_v35 = vadd.f32 %v1807_v16, %v1662_v41  ;;  %v6096_v37 = vrot.slane %v5727_v62, 7  ;;  %v2514_v20 = vmul.f32 %v11790_v4, %v18374_v46  ;;  %v3750_v29 = vmul.f32 %v11843_v34, %v18376_v2  ;;  %v11907_v16 = vld [vmem:[#allocation8 + $0x44] ss:$0 sm:$0xff] }
 0x1e3   : > { %v6097_v45 = vrot.slane %v5728_v49, 7  ;;  %v2015_v38 = vadd.f32 %v1983_v31, %v1838_v39  ;;  %v3751_v50 = vmul.f32 %v15026_v22, %v11843_v34  ;;  %v3927_v5 = vmul.f32 %v11859_v63, %v15034_v11 }
 0x1e4   : > { %v2016_v19 = vadd.f32 %v1984_v53, %v1839_v35  ;;  %12129 = vst [vmem:[%s14846_s30 + $0xc8] sm:$0xfe] %v6096_v37  ;;  %v3928_v40 = vmul.f32 %v15028_v14, %v11859_v63  ;;  %v4104_v9 = vmul.f32 %v11875_v10, %v15054_v61  ;;  %v2515_v18 = vmul.f32 %v18375_v48, %v11790_v4  ;;  %v11923_v53 = vld [vmem:[#allocation8 + $0x54] ss:$0 sm:$0xff]  ;;  %v11939_v35 = vld [vmem:[#allocation8 + $0x64] ss:$0 sm:$0xff] }
 0x1e5   : > { %v6098_v23 = vsel %vm5909_vm6, %v6096_v37, %v6097_v45  ;;  %12131 = vst [vmem:[%s14846_s30 + $0xe8] sm:$0x1] %v6097_v45  ;;  %v2192_v17 = vadd.f32 %v2160_v32, %v2015_v38  ;;  %v4105_v41 = vmul.f32 %v15046_v51, %v11875_v10  ;;  %v3959_v62 = vadd.f32 %v3927_v5, %v3750_v29  ;;  %v11955_v32 = vld [vmem:[#allocation8 + $0x74] ss:$0 sm:$0xff] }
 0x1e6   : > { %12130 = vst [vmem:[%s14846_s30 + $0xd8] sm:$0xff] %v6098_v23  ;;  %v2193_v31 = vadd.f32 %v2161_v12, %v2016_v19  ;;  %v3960_v49 = vadd.f32 %v3928_v40, %v3751_v50  ;;  %v4281_v34 = vmul.f32 %v11891_v30, %v15063_v24  ;;  %v4282_v39 = vmul.f32 %v15056_v42, %v11891_v30  ;;  %v11971_v19 = vld [vmem:[#allocation8 + $0x84] ss:$0 sm:$0xff] }
 0x1e7   : > { %v6532_v37 = vrot.slane %v6098_v23, 1  ;;  %v2369_v63 = vadd.f32 %v2337_v33, %v2192_v17  ;;  %v4458_v15 = vmul.f32 %v11907_v16, %v15085_v55  ;;  %v4136_v12 = vadd.f32 %v4104_v9, %v3959_v62  ;;  %v11987_v9 = vld [vmem:[#allocation8 + $0x94] ss:$0 sm:$0xff] }
 0x1e8   : > { %v2370_v45 = vadd.f32 %v2338_v7, %v2193_v31  ;;  %v4137_v4 = vadd.f32 %v4105_v41, %v3960_v49  ;;  %v4459_v10 = vmul.f32 %v15079_v3, %v11907_v16  ;;  %v4635_v38 = vmul.f32 %v11923_v53, %v15090_v44  ;;  %v18397_v62 = vld [vmem:[#allocation76_spill] sm:$0xff] }
 0x1e9   : > { %v2546_v29 = vadd.f32 %v2514_v20, %v2369_v63  ;;  %v4636_v30 = vmul.f32 %v15087_v28, %v11923_v53  ;;  %v4812_v33 = vmul.f32 %v11939_v35, %v15105_v56  ;;  %v4313_v7 = vadd.f32 %v4281_v34, %v4136_v12 }
 0x1ea   : > { %v2547_v50 = vadd.f32 %v2515_v18, %v2370_v45  ;;  %v4314_v23 = vadd.f32 %v4282_v39, %v4137_v4  ;;  %v4813_v5 = vmul.f32 %v15099_v59, %v11939_v35  ;;  %v4989_v40 = vmul.f32 %v11955_v32, %v15110_v21  ;;  %v18396_v18 = vld [vmem:[#allocation73_spill] sm:$0xff]  ;;  %v18398_v21 = vld [vmem:[#allocation75_spill] sm:$0xff]  ;;  %v12019_v59 = vld [vmem:[#allocation8 + $0xb4] ss:$0 sm:$0xff] }
 0x1eb   : > { %v6344_v16 = vld [vmem:[%s14846_s30 + $0xc8] sm:$0xfe]  ;;  %v5919_v31 = vrot.slane %v2546_v29, 7  ;;  %v4990_v41 = vmul.f32 %v18396_v18, %v11955_v32  ;;  %v5166_v53 = vmul.f32 %v11971_v19, %v18397_v62  ;;  %v4490_v45 = vadd.f32 %v4458_v15, %v4313_v7  ;;  %v9265_v15 = vld [vmem:[#allocation10 + $0x570] sm:$0xff] }
 0x1ec   : > { %v12251_v17 = vld [vmem:[%s14846_s30 + $0xc8] sm:$0xfe]  ;;  %v5920_v20 = vrot.slane %v2547_v50, 7  ;;  %v6531_v49 = vrot.slane %v6344_v16, 1  ;;  %v6346_v34 = vld [vmem:[%s14846_s30 + $0xe8] sm:$0x1]  ;;  %v4491_v35 = vadd.f32 %v4459_v10, %v4314_v23  ;;  %v5167_v29 = vmul.f32 %v18398_v21, %v11971_v19 }
 0x1ed   : > { %v8417_v63 = vrot.slane %v12251_v17, 1  ;;  %v12255_v39 = vld [vmem:[%s14846_s30 + $0xe8] sm:$0x1]  ;;  %12081 = vst [vmem:[%s14846_s30 + $0xc0] sm:$0xfe] %v5919_v31  ;;  %v6536_v4 = vrot.slane %v6346_v34, 1  ;;  %v4667_v16 = vadd.f32 %v4635_v38, %v4490_v45 }
 0x1ee   : > { %v5921_v12 = vsel %vm5909_vm6, %v5919_v31, %v5920_v20  ;;  %12083 = vst [vmem:[%s14846_s30 + $0xe0] sm:$0x1] %v5920_v20  ;;  %v8422_v26 = vrot.slane %v12255_v39, 1  ;;  %v12003_v50 = vld [vmem:[#allocation8 + $0xa4] ss:$0 sm:$0xff]  ;;  %v6533_v32 = vsel %vm6487_vm5, %v6531_v49, %v6532_v37  ;;  %v9266_v10 = vld [vmem:[#allocation10 + $0x578] sm:$0xff]  ;;  %v4668_v19 = vadd.f32 %v4636_v30, %v4491_v35 }
 0x1ef   : > { %v8419_v62 = vsel %vm6487_vm5, %v8417_v63, %v6532_v37  ;;  %12082 = vst [vmem:[%s14846_s30 + $0xd0] sm:$0xff] %v5921_v12  ;;  %v18399_v17 = vld [vmem:[#allocation78_spill] sm:$0xff]  ;;  %6849 = vmatprep.mubr.f32.mxu1 %v6533_v32  ;;  %v6529_v7 = vrot.slane %v5921_v12, 1  ;;  %v6537_v23 = vsel %vm6487_vm5, %v6532_v37, %v6536_v4  ;;  %v11695_v34 = vld [vmem:[#allocation5 + $0x14] ss:$0 sm:$0xff]  ;;  %v4844_v49 = vadd.f32 %v4812_v33, %v4667_v16  ;;  %v18401_v45 = vld [vmem:[#allocation79_spill] sm:$0xff] }
 0x1f0   : > { %v5343_v18 = vmul.f32 %v11987_v9, %v18399_v17  ;;  %8735 = vmatprep.mubr.f32.mxu0 %v8419_v62  ;;  %v8423_v31 = vsel %vm6487_vm5, %v6532_v37, %v8422_v26  ;;  %v11679_v20 = vld [vmem:[#allocation5 + $0x4] ss:$0 sm:$0xff]  ;;  %v5344_v63 = vmul.f32 %v15135_v1, %v11987_v9  ;;  %v18400_v39 = vld [vmem:[#allocation80_spill] sm:$0xff]  ;;  %v5521_v17 = vmul.f32 %v18401_v45, %v12003_v50  ;;  %v18403_v4 = vld [vmem:[#allocation81_spill] sm:$0xff] }
 0x1f1   : > { %v5520_v38 = vmul.f32 %v12003_v50, %v18400_v39  ;;  %v11711_v21 = vld [vmem:[#allocation5 + $0x24] ss:$0 sm:$0xff]  ;;  %v4845_v32 = vadd.f32 %v4813_v5, %v4668_v19  ;;  %v5698_v56 = vmul.f32 %v18403_v4, %v12019_v59  ;;  %v13155_v26 = vpack.c.bf16 %v9266_v10, %v9265_v15  ;;  %v11727_v37 = vld [vmem:[#allocation5 + $0x34] ss:$0 sm:$0xff]  ;;  %v15420_v4 = vld [vmem:[%s14846_s30 + $0x38] sm:$0xfc] }
 0x1f2   : > { %v18402_v62 = vld [vmem:[#allocation82_spill] sm:$0xff]  ;;  %v5021_v30 = vadd.f32 %v4989_v40, %v4844_v49  ;;  %v1277_v33 = vmul.f32 %v11679_v20, %v18386_v54  ;;  %v1278_v9 = vmul.f32 %v18388_v52, %v11679_v20  ;;  %v1454_v35 = vmul.f32 %v11695_v34, %v18389_v8  ;;  %18405 = vst [vmem:[#allocation56_spill] sm:$0xff] %v15420_v4 }
 0x1f3   : > { %v5697_v12 = vmul.f32 %v12019_v59, %v18402_v62  ;;  %v5022_v16 = vadd.f32 %v4990_v41, %v4845_v32  ;;  %13156 = vmatpush1.bf16.msra.mxu0 %v13155_v26  ;;  %v1455_v50 = vmul.f32 %v18390_v27, %v11695_v34  ;;  %v1631_v5 = vmul.f32 %v11711_v21, %v18391_v6  ;;  %v11743_v54 = vld [vmem:[#allocation5 + $0x44] ss:$0 sm:$0xff] }
 0x1f4   : > { %v1632_v19 = vmul.f32 %v18392_v58, %v11711_v21  ;;  %v6343_v62 = vld [vmem:[%s14846_s30 + $0xc0] sm:$0xfe]  ;;  %v5198_v40 = vadd.f32 %v5166_v53, %v5021_v30  ;;  %v1486_v10 = vadd.f32 %v1454_v35, %v1277_v33  ;;  %v1808_v49 = vmul.f32 %v11727_v37, %v18393_v36  ;;  %v11759_v35 = vld [vmem:[#allocation5 + $0x54] ss:$0 sm:$0xff] }
 0x1f5   : > { %v12250_v59 = vld [vmem:[%s14846_s30 + $0xc0] sm:$0xfe]  ;;  %v6345_v15 = vld [vmem:[%s14846_s30 + $0xe0] sm:$0x1]  ;;  %v1809_v20 = vmul.f32 %v18394_v47, %v11727_v37  ;;  %v18404_v8 = vmov 0.0|0.0   ;;  %v6528_v41 = vrot.slane %v6343_v62, 1  ;;  %v5199_v27 = vadd.f32 %v5167_v29, %v5022_v16 }
 0x1f6   : > { %13157 = vmatprep.subr.bf16.mxu0 %v18404_v8  ;;  %v8414_v32 = vrot.slane %v12250_v59, 1  ;;  %v6534_v26 = vrot.slane %v6345_v15, 1  ;;  %v12254_v34 = vld [vmem:[%s14846_s30 + $0xe0] sm:$0x1]  ;;  %v5375_v52 = vadd.f32 %v5343_v18, %v5198_v40  ;;  %v1487_v21 = vadd.f32 %v1455_v50, %v1278_v9  ;;  %v11775_v18 = vld [vmem:[#allocation5 + $0x64] ss:$0 sm:$0xff] }
 0x1f7   : > { %v8420_v6 = vrot.slane %v12254_v34, 1  ;;  %v1663_v58 = vadd.f32 %v1631_v5, %v1486_v10  ;;  %v6530_v53 = vsel %vm6487_vm5, %v6528_v41, %v6529_v7  ;;  %v5376_v33 = vadd.f32 %v5344_v63, %v5199_v27  ;;  %v11791_v15 = vld [vmem:[#allocation5 + $0x74] ss:$0 sm:$0xff]  ;;  %v12020_v40 = vld [vmem:[#allocation8 + $0xb5] ss:$0 sm:$0xff] }
 0x1f8   : > { %v8416_v30 = vsel %vm6487_vm5, %v8414_v32, %v6529_v7  ;;  %v6535_v37 = vsel %vm6487_vm5, %v6529_v7, %v6534_v26  ;;  %6850 = vmatmul.mubr.f32.gmra.mrb[36].mxu1 %v6530_v53  ;;  %v5552_v29 = vadd.f32 %v5520_v38, %v5375_v52  ;;  %v1664_v16 = vadd.f32 %v1632_v19, %v1487_v21  ;;  %v6303_v52 = vld [vmem:[#allocation10 + $0x40] sm:$0xff]  ;;  %v11860_v26 = vld [vmem:[#allocation8 + $0x15] ss:$0 sm:$0xff] }
 0x1f9   : > { %8736 = vmatmul.mubr.f32.gmra.mrb[32].mxu0 %v8416_v30  ;;  %v8421_v62 = vsel %vm6487_vm5, %v6529_v7, %v8420_v6  ;;  %6854 = vmatprep.mubr.f32.mxu1 %v6537_v23  ;;  %v5553_v50 = vadd.f32 %v5521_v17, %v5376_v33  ;;  %v1840_v5 = vadd.f32 %v1808_v49, %v1663_v58  ;;  %v6304_v7 = vld [vmem:[#allocation10 + $0x48] sm:$0xff]  ;;  %v9267_v58 = vld [vmem:[#allocation10 + $0x580] sm:$0xff] }
 0x1fa   : > { %8740 = vmatprep.mubr.f32.mxu0 %v8423_v31  ;;  %v1985_v59 = vmul.f32 %v11743_v54, %v18365_v0  ;;  %v5729_v27 = vadd.f32 %v5697_v12, %v5552_v29  ;;  %v1841_v63 = vadd.f32 %v1809_v20, %v1664_v16  ;;  %v1986_v41 = vmul.f32 %v18366_v57, %v11743_v54  ;;  %v9268_v31 = vld [vmem:[#allocation10 + $0x588] sm:$0xff]  ;;  %v11844_v49 = vld [vmem:[#allocation8 + $0x5] ss:$0 sm:$0xff]  ;;  %v11892_v29 = vld [vmem:[#allocation8 + $0x35] ss:$0 sm:$0xff] }
 0x1fb   : > { %v2162_v6 = vmul.f32 %v11759_v35, %v18367_v60  ;;  %v5730_v38 = vadd.f32 %v5698_v56, %v5553_v50  ;;  %v2163_v23 = vmul.f32 %v18368_v13, %v11759_v35  ;;  %v2339_v17 = vmul.f32 %v11775_v18, %v18369_v25  ;;  %v11876_v30 = vld [vmem:[#allocation8 + $0x25] ss:$0 sm:$0xff] }
 0x1fc   : > { %v2017_v19 = vadd.f32 %v1985_v59, %v1840_v5  ;;  %6855 = vmatmul.mubr.f32.gmra.mrb[38].mxu1 %v6535_v37  ;;  %v6099_v12 = vrot.slane %v5729_v27, 7  ;;  %v2018_v20 = vadd.f32 %v1986_v41, %v1841_v63  ;;  %v2340_v54 = vmul.f32 %v18370_v43, %v11775_v18  ;;  %v11908_v59 = vld [vmem:[#allocation8 + $0x45] ss:$0 sm:$0xff] }
 0x1fd   : > { %8741 = vmatmul.mubr.f32.gmra.mrb[34].mxu0 %v8421_v62  ;;  %v2516_v32 = vmul.f32 %v11791_v15, %v18374_v46  ;;  %v6100_v56 = vrot.slane %v5730_v38, 7  ;;  %v2517_v21 = vmul.f32 %v18375_v48, %v11791_v15  ;;  %v12954_v53 = vpack.c.bf16 %v6304_v7, %v6303_v52 }
 0x1fe   : > { %v2194_v34 = vadd.f32 %v2162_v6, %v2017_v19  ;;  %12132 = vst [vmem:[%s14846_s30 + $0xf8] sm:$0xfe] %v6099_v12  ;;  %v2195_v33 = vadd.f32 %v2163_v23, %v2018_v20  ;;  %v13158_v35 = vpack.c.bf16 %v9268_v31, %v9267_v58  ;;  %v3752_v37 = vmul.f32 %v11844_v49, %v18376_v2  ;;  %v11924_v6 = vld [vmem:[#allocation8 + $0x55] ss:$0 sm:$0xff]  ;;  %v11940_v23 = vld [vmem:[#allocation8 + $0x65] ss:$0 sm:$0xff] }
 0x1ff   : > { %v3753_v62 = vmul.f32 %v15026_v22, %v11844_v49  ;;  %v6101_v16 = vsel %vm5909_vm6, %v6099_v12, %v6100_v56  ;;  %12134 = vst [vmem:[%s14846_s30 + $0x118] sm:$0x1] %v6100_v56  ;;  %12955 = vmatpush1.bf16.msra.mxu1 %v12954_v53  ;;  %v3929_v50 = vmul.f32 %v11860_v26, %v15034_v11  ;;  %v11956_v12 = vld [vmem:[#allocation8 + $0x75] ss:$0 sm:$0xff]  ;;  %v11972_v56 = vld [vmem:[#allocation8 + $0x85] ss:$0 sm:$0xff] }
 0x200   : > { %v2371_v18 = vadd.f32 %v2339_v17, %v2194_v34  ;;  %v3930_v5 = vmul.f32 %v15028_v14, %v11860_v26  ;;  %12133 = vst [vmem:[%s14846_s30 + $0x108] sm:$0xff] %v6101_v16  ;;  %v6542_v15 = vrot.slane %v6101_v16, 1  ;;  %v2372_v27 = vadd.f32 %v2340_v54, %v2195_v33  ;;  %13159 = vmatpush1.bf16.msra.mxu0 %v13158_v35  ;;  %v18408_v33 = vld [vmem:[#allocation71_spill] sm:$0xff] }
 0x201   : > { %v4106_v63 = vmul.f32 %v11876_v30, %v15054_v61  ;;  %v4107_v41 = vmul.f32 %v15046_v51, %v11876_v30  ;;  %12956 = vmatprep.subr.bf16.mxu1 %v18404_v8  ;;  %13160 = vmatprep.subr.bf16.mxu0 %v18404_v8  ;;  %v3961_v7 = vadd.f32 %v3929_v50, %v3752_v37 }
 0x202   : > { %v2548_v52 = vadd.f32 %v2516_v32, %v2371_v18  ;;  %v3962_v38 = vadd.f32 %v3930_v5, %v3753_v62  ;;  %v4283_v19 = vmul.f32 %v11892_v29, %v15063_v24  ;;  %v2549_v17 = vadd.f32 %v2517_v21, %v2372_v27  ;;  %v18407_v21 = vld [vmem:[#allocation72_spill] sm:$0xff]  ;;  %v18409_v18 = vld [vmem:[#allocation74_spill] sm:$0xff]  ;;  %v18410_v5 = vld [vmem:[#allocation73_spill] sm:$0xff] }
 0x203   : > { %v4284_v58 = vmul.f32 %v15056_v42, %v11892_v29  ;;  %v4460_v31 = vmul.f32 %v11908_v59, %v15085_v55  ;;  %v4461_v49 = vmul.f32 %v15079_v3, %v11908_v59  ;;  %v4138_v54 = vadd.f32 %v4106_v63, %v3961_v7  ;;  %v11988_v27 = vld [vmem:[#allocation8 + $0x95] ss:$0 sm:$0xff] }
 0x204   : > { %v5922_v20 = vrot.slane %v2548_v52, 7  ;;  %v4139_v32 = vadd.f32 %v4107_v41, %v3962_v38  ;;  %v4637_v26 = vmul.f32 %v11924_v6, %v15090_v44  ;;  %v5923_v34 = vrot.slane %v2549_v17, 7  ;;  %v15462_v63 = vld [vmem:[%s14846_s30 + $0x30] sm:$0xfc] }
 0x205   : > { %v4638_v53 = vmul.f32 %v15087_v28, %v11924_v6  ;;  %v4814_v30 = vmul.f32 %v11940_v23, %v18407_v21  ;;  %v4815_v35 = vmul.f32 %v18408_v33, %v11940_v23  ;;  %v6348_v37 = vld [vmem:[%s14846_s30 + $0xf8] sm:$0xfe]  ;;  %v4315_v29 = vadd.f32 %v4283_v19, %v4138_v54  ;;  %18411 = vst [vmem:[#allocation65_spill] sm:$0xff] %v15462_v63 }
 0x206   : > { %v12257_v62 = vld [vmem:[%s14846_s30 + $0xf8] sm:$0xfe]  ;;  %12084 = vst [vmem:[%s14846_s30 + $0xf0] sm:$0xfe] %v5922_v20  ;;  %v4316_v16 = vadd.f32 %v4284_v58, %v4139_v32  ;;  %v4991_v50 = vmul.f32 %v11956_v12, %v18409_v18  ;;  %v4992_v59 = vmul.f32 %v18410_v5, %v11956_v12  ;;  %v6541_v41 = vrot.slane %v6348_v37, 1  ;;  %v18413_v37 = vld [vmem:[#allocation75_spill] sm:$0xff] }
 0x207   : > { %v8427_v6 = vrot.slane %v12257_v62, 1  ;;  %v5924_v52 = vsel %vm5909_vm6, %v5922_v20, %v5923_v34  ;;  %12086 = vst [vmem:[%s14846_s30 + $0x110] sm:$0x1] %v5923_v34  ;;  %v6350_v7 = vld [vmem:[%s14846_s30 + $0x118] sm:$0x1]  ;;  %v4492_v54 = vadd.f32 %v4460_v31, %v4315_v29  ;;  %v5169_v62 = vmul.f32 %v18413_v37, %v11972_v56 }
 0x208   : > { %v12261_v38 = vld [vmem:[%s14846_s30 + $0x118] sm:$0x1]  ;;  %12085 = vst [vmem:[%s14846_s30 + $0x100] sm:$0xff] %v5924_v52  ;;  %v6539_v9 = vrot.slane %v5924_v52, 1  ;;  %v6546_v19 = vrot.slane %v6350_v7, 1  ;;  %v6543_v12 = vsel %vm6487_vm5, %v6541_v41, %v6542_v15  ;;  %v4493_v4 = vadd.f32 %v4461_v49, %v4316_v16  ;;  %v9269_v7 = vld [vmem:[#allocation10 + $0x590] sm:$0xff] }
 0x209   : > { %v18412_v23 = vld [vmem:[#allocation76_spill] sm:$0xff]  ;;  %v8432_v58 = vrot.slane %v12261_v38, 1  ;;  %v12004_v32 = vld [vmem:[#allocation8 + $0xa5] ss:$0 sm:$0xff]  ;;  %v8429_v10 = vsel %vm6487_vm5, %v8427_v6, %v6542_v15  ;;  %6859 = vmatprep.mubr.f32.mxu1 %v6543_v12  ;;  %v4669_v52 = vadd.f32 %v4637_v26, %v4492_v54  ;;  %v18416_v54 = vld [vmem:[#allocation81_spill] sm:$0xff] }
 0x20a   : > { %v5168_v17 = vmul.f32 %v11972_v56, %v18412_v23  ;;  %8745 = vmatprep.mubr.f32.mxu0 %v8429_v10  ;;  %v6547_v20 = vsel %vm6487_vm5, %v6542_v15, %v6546_v19  ;;  %v9270_v31 = vld [vmem:[#allocation10 + $0x598] sm:$0xff]  ;;  %v11680_v29 = vld [vmem:[#allocation5 + $0x5] ss:$0 sm:$0xff]  ;;  %v4670_v38 = vadd.f32 %v4638_v53, %v4493_v4  ;;  %v5346_v56 = vmul.f32 %v15135_v1, %v11988_v27  ;;  %v11696_v16 = vld [vmem:[#allocation5 + $0x15] ss:$0 sm:$0xff] }
 0x20b   : > { %v8433_v34 = vsel %vm6487_vm5, %v6542_v15, %v8432_v58  ;;  %v18414_v6 = vld [vmem:[#allocation78_spill] sm:$0xff]  ;;  %v5522_v10 = vmul.f32 %v12004_v32, %v18400_v39  ;;  %v4846_v19 = vadd.f32 %v4814_v30, %v4669_v52  ;;  %v5523_v15 = vmul.f32 %v18401_v45, %v12004_v32  ;;  %v18417_v63 = vld [vmem:[#allocation44_spill] sm:$0xff]  ;;  %v18419_v52 = vld [vmem:[#allocation45_spill] sm:$0xff] }
 0x20c   : > { %v5345_v49 = vmul.f32 %v11988_v27, %v18414_v6  ;;  %v18415_v58 = vld [vmem:[#allocation82_spill] sm:$0xff]  ;;  %v15482_v12 = vmul.f32 %v18416_v54, %v12020_v40  ;;  %v4847_v4 = vadd.f32 %v4815_v35, %v4670_v38  ;;  %v13161_v53 = vpack.c.bf16 %v9270_v31, %v9269_v7 }
 0x20d   : > { %v5699_v26 = vmul.f32 %v12020_v40, %v18415_v58  ;;  %v6347_v37 = vld [vmem:[%s14846_s30 + $0xf0] sm:$0xfe]  ;;  %v1279_v6 = vmul.f32 %v11680_v29, %v18417_v63  ;;  %v18418_v23 = vld [vmem:[#allocation42_spill] sm:$0xff]  ;;  %v5023_v30 = vadd.f32 %v4991_v50, %v4846_v19  ;;  %v1456_v32 = vmul.f32 %v11696_v16, %v18419_v52 }
 0x20e   : > { %v12256_v41 = vld [vmem:[%s14846_s30 + $0xf0] sm:$0xfe]  ;;  %v1280_v27 = vmul.f32 %v18418_v23, %v11680_v29  ;;  %v6538_v1 = vrot.slane %v6347_v37, 1  ;;  %v6349_v39 = vld [vmem:[%s14846_s30 + $0x110] sm:$0x1]  ;;  %v5024_v33 = vadd.f32 %v4992_v59, %v4847_v4  ;;  %13162 = vmatpush1.bf16.msra.mxu0 %v13161_v53  ;;  %v5766_v38 = vlaneseq }
 0x20f   : > { %v8424_v5 = vrot.slane %v12256_v41, 1  ;;  %v12260_v18 = vld [vmem:[%s14846_s30 + $0x110] sm:$0x1]  ;;  %v6544_v45 = vrot.slane %v6349_v39, 1  ;;  %v11712_v35 = vld [vmem:[#allocation5 + $0x25] ss:$0 sm:$0xff]  ;;  %v5200_v29 = vadd.f32 %v5168_v17, %v5023_v30  ;;  %v1488_v37 = vadd.f32 %v1456_v32, %v1279_v6  ;;  %13163 = vmatprep.subr.bf16.mxu0 %v18404_v8 }
 0x210   : > { %v8430_v58 = vrot.slane %v12260_v18, 1  ;;  %v18420_v40 = vld [vmem:[#allocation43_spill] sm:$0xff]  ;;  %v6540_v7 = vsel %vm6487_vm5, %v6538_v1, %v6539_v9  ;;  %v11728_v41 = vld [vmem:[#allocation5 + $0x35] ss:$0 sm:$0xff]  ;;  %v5201_v50 = vadd.f32 %v5169_v62, %v5024_v33  ;;  %v11744_v59 = vld [vmem:[#allocation5 + $0x45] ss:$0 sm:$0xff] }
 0x211   : > { %v1457_v54 = vmul.f32 %v18420_v40, %v11696_v16  ;;  %v8426_v31 = vsel %vm6487_vm5, %v8424_v5, %v6539_v9  ;;  %6860 = vmatmul.mubr.f32.gmra.mrb[40].mxu1 %v6540_v7  ;;  %v6545_v39 = vsel %vm6487_vm5, %v6539_v9, %v6544_v45  ;;  %v15498_v16 = vld [vmem:[%s14846_s30 + $0x68] sm:$0xfc]  ;;  %v5377_v1 = vadd.f32 %v5345_v49, %v5200_v29  ;;  %v18422_v17 = vld [vmem:[#allocation48_spill] sm:$0xff]  ;;  %v11776_v33 = vld [vmem:[#allocation5 + $0x65] ss:$0 sm:$0xff] }
 0x212   : > { %8746 = vmatmul.mubr.f32.gmra.mrb[36].mxu0 %v8426_v31  ;;  %v8431_v18 = vsel %vm6487_vm5, %v6539_v9, %v8430_v58  ;;  %18421 = vst [vmem:[#allocation57_spill] sm:$0xff] %v15498_v16  ;;  %6864 = vmatprep.mubr.f32.mxu1 %v6547_v20  ;;  %v1633_v6 = vmul.f32 %v11712_v35, %v18422_v17  ;;  %v11760_v19 = vld [vmem:[#allocation5 + $0x55] ss:$0 sm:$0xff]  ;;  %v18423_v30 = vld [vmem:[#allocation46_spill] sm:$0xff]  ;;  %vm15514_vm7 = vcmp.lt.s32.totalorder %v5766_v38, 256 }
 0x213   : > { %8750 = vmatprep.mubr.f32.mxu0 %v8433_v34  ;;  %v1489_v5 = vadd.f32 %v1457_v54, %v1280_v27  ;;  %v5378_v53 = vadd.f32 %v5346_v56, %v5201_v50  ;;  %v1634_v32 = vmul.f32 %v18423_v30, %v11712_v35  ;;  %v1810_v45 = vmul.f32 %v11728_v41, %v18393_v36  ;;  %v11792_v49 = vld [vmem:[#allocation5 + $0x75] ss:$0 sm:$0xff]  ;;  %v6306_v35 = vld [vmem:[#allocation10 + $0x58] sm:$0xff] }
 0x214   : > { %v1811_v9 = vmul.f32 %v18394_v47, %v11728_v41  ;;  %v5554_v62 = vadd.f32 %v5522_v10, %v5377_v1  ;;  %v1665_v58 = vadd.f32 %v1633_v6, %v1488_v37  ;;  %v1987_v20 = vmul.f32 %v11744_v59, %v18365_v0  ;;  %v15512_v10 = vld [vmem:[#allocation10 + $0x50] sm:$0xff]  ;;  %v15526_v41 = vld [vmem:[#allocation10 + $0x5a0] sm:$0xff] }
 0x215   : > { %v15507_v34 = vmul.f32 %v18366_v57, %v11744_v59  ;;  %6865 = vmatmul.mubr.f32.gmra.mrb[42].mxu1 %v6545_v39  ;;  %v5555_v56 = vadd.f32 %v5523_v15, %v5378_v53  ;;  %v1666_v54 = vadd.f32 %v1634_v32, %v1489_v5  ;;  %v15510_v27 = vmul.f32 %v11760_v19, %v18367_v60  ;;  %v15528_v39 = vld [vmem:[#allocation10 + $0x5a8] sm:$0xff]  ;;  %v11861_v5 = vld [vmem:[#allocation8 + $0x16] ss:$0 sm:$0xff] }
 0x216   : > { %8751 = vmatmul.mubr.f32.gmra.mrb[38].mxu0 %v8431_v18  ;;  %v15518_v31 = vadd.f32 %v5699_v26, %v5554_v62  ;;  %v1842_v15 = vadd.f32 %v1810_v45, %v1665_v58  ;;  %v15521_v29 = vmul.f32 %v18368_v13, %v11760_v19  ;;  %v15524_v37 = vmul.f32 %v11776_v33, %v18369_v25  ;;  %v11845_v18 = vld [vmem:[#allocation8 + $0x6] ss:$0 sm:$0xff]  ;;  %v13945_v26 = vld [vmem:[%s14846_s30 + $0x8] sm:$0xff] }
 0x217   : > { %12055 = vst.msk [vmem:[%s14846_s30 + $0x51] ss:$8 sm:$0x3] %vm15514_vm7, %v13945_v26  ;;  %5770 = vst.msk [vmem:[%s14846_s30] ss:$8 sm:$0x3] %vm15514_vm7, %v13945_v26  ;;  %v5732_v50 = vadd.f32 %v15482_v12, %v5555_v56  ;;  %v1843_v59 = vadd.f32 %v1811_v9, %v1666_v54  ;;  %v2342_v38 = vmul.f32 %v18370_v43, %v11776_v33 }
 0x218   : > { %12037 = vst.msk [vmem:[%s14846_s30 + $0x30] ss:$8 sm:$0x3] %vm15514_vm7, %v13945_v26  ;;  %12038 = vst.msk [vmem:[%s14846_s30 + $0x60] ss:$8 sm:$0x3] %vm15514_vm7, %v13945_v26  ;;  %v2518_v1 = vmul.f32 %v11792_v49, %v18374_v46  ;;  %v2019_v19 = vadd.f32 %v1987_v20, %v1842_v15  ;;  %v2519_v53 = vmul.f32 %v18375_v48, %v11792_v49 }
 0x219   : > { %12039 = vst.msk [vmem:[%s14846_s30 + $0x90] ss:$8 sm:$0x3] %vm15514_vm7, %v13945_v26  ;;  %12040 = vst.msk [vmem:[%s14846_s30 + $0xc0] ss:$8 sm:$0x3] %vm15514_vm7, %v13945_v26  ;;  %v12957_v32 = vpack.c.bf16 %v6306_v35, %v15512_v10  ;;  %v2020_v58 = vadd.f32 %v15507_v34, %v1843_v59  ;;  %v13164_v12 = vpack.c.bf16 %v15528_v39, %v15526_v41 }
 0x21a   : > { %12041 = vst.msk [vmem:[%s14846_s30 + $0xf0] ss:$8 sm:$0x3] %vm15514_vm7, %v13945_v26  ;;  %12042 = vst.msk [vmem:[%s14846_s30 + $0x120] ss:$8 sm:$0x3] %vm15514_vm7, %v13945_v26  ;;  %v3754_v9 = vmul.f32 %v11845_v18, %v18376_v2  ;;  %v2196_v33 = vadd.f32 %v15510_v27, %v2019_v19  ;;  %v3755_v20 = vmul.f32 %v15026_v22, %v11845_v18 }
 0x21b   : > { %12043 = vst.msk [vmem:[%s14846_s30 + $0x150] ss:$8 sm:$0x3] %vm15514_vm7, %v13945_v26  ;;  %12044 = vst.msk [vmem:[%s14846_s30 + $0x180] ss:$8 sm:$0x3] %vm15514_vm7, %v13945_v26  ;;  %12958 = vmatpush1.bf16.msra.mxu1 %v12957_v32  ;;  %v3931_v49 = vmul.f32 %v11861_v5, %v15034_v11  ;;  %v3932_v56 = vmul.f32 %v15028_v14, %v11861_v5  ;;  %v2197_v35 = vadd.f32 %v15521_v29, %v2020_v58 }
 0x21c   : > { %12045 = vst.msk [vmem:[%s14846_s30 + $0x1b0] ss:$8 sm:$0x3] %vm15514_vm7, %v13945_v26  ;;  %12046 = vst.msk [vmem:[%s14846_s30 + $0x1e0] ss:$8 sm:$0x3] %vm15514_vm7, %v13945_v26  ;;  %13165 = vmatpush1.bf16.msra.mxu0 %v13164_v12  ;;  %v2373_v15 = vadd.f32 %v15524_v37, %v2196_v33  ;;  %12959 = vmatprep.subr.bf16.mxu1 %v18404_v8 }
 0x21d   : > { %12047 = vst.msk [vmem:[%s14846_s30 + $0x210] ss:$8 sm:$0x3] %vm15514_vm7, %v13945_v26  ;;  %12048 = vst.msk [vmem:[%s14846_s30 + $0x240] ss:$8 sm:$0x3] %vm15514_vm7, %v13945_v26  ;;  %13166 = vmatprep.subr.bf16.mxu0 %v18404_v8  ;;  %v3963_v41 = vadd.f32 %v3931_v49, %v3754_v9  ;;  %v3964_v39 = vadd.f32 %v3932_v56, %v3755_v20 }
 0x21e   : > { %12049 = vst.msk [vmem:[%s14846_s30 + $0x270] ss:$8 sm:$0x3] %vm15514_vm7, %v13945_v26  ;;  %12050 = vst.msk [vmem:[%s14846_s30 + $0x2a0] ss:$8 sm:$0x3] %vm15514_vm7, %v13945_v26 }
 0x21f   : > { %12051 = vst.msk [vmem:[%s14846_s30 + $0x2d0] ss:$8 sm:$0x3] %vm15514_vm7, %v13945_v26  ;;  %12052 = vst.msk [vmem:[%s14846_s30 + $0x300] ss:$8 sm:$0x3] %vm15514_vm7, %v13945_v26 }
 0x220   : > { %12053 = vst.msk [vmem:[%s14846_s30 + $0x330] ss:$8 sm:$0x3] %vm15514_vm7, %v13945_v26  ;;  %12054 = vst.msk [vmem:[%s14846_s30 + $0x21] ss:$8 sm:$0x3] %vm15514_vm7, %v13945_v26 }
 0x221   : > { %12056 = vst.msk [vmem:[%s14846_s30 + $0x81] ss:$8 sm:$0x3] %vm15514_vm7, %v13945_v26  ;;  %12057 = vst.msk [vmem:[%s14846_s30 + $0xb1] ss:$8 sm:$0x3] %vm15514_vm7, %v13945_v26 }
 0x222   : > { %12058 = vst.msk [vmem:[%s14846_s30 + $0xe1] ss:$8 sm:$0x3] %vm15514_vm7, %v13945_v26  ;;  %12059 = vst.msk [vmem:[%s14846_s30 + $0x111] ss:$8 sm:$0x3] %vm15514_vm7, %v13945_v26 }
 0x223   : > { %12060 = vst.msk [vmem:[%s14846_s30 + $0x141] ss:$8 sm:$0x3] %vm15514_vm7, %v13945_v26  ;;  %12061 = vst.msk [vmem:[%s14846_s30 + $0x171] ss:$8 sm:$0x3] %vm15514_vm7, %v13945_v26 }
 0x224   : > { %12062 = vst.msk [vmem:[%s14846_s30 + $0x1a1] ss:$8 sm:$0x3] %vm15514_vm7, %v13945_v26  ;;  %12063 = vst.msk [vmem:[%s14846_s30 + $0x1d1] ss:$8 sm:$0x3] %vm15514_vm7, %v13945_v26 }
 0x225   : > { %12064 = vst.msk [vmem:[%s14846_s30 + $0x201] ss:$8 sm:$0x3] %vm15514_vm7, %v13945_v26  ;;  %12065 = vst.msk [vmem:[%s14846_s30 + $0x231] ss:$8 sm:$0x3] %vm15514_vm7, %v13945_v26 }
 0x226   : > { %12066 = vst.msk [vmem:[%s14846_s30 + $0x261] ss:$8 sm:$0x3] %vm15514_vm7, %v13945_v26  ;;  %12067 = vst.msk [vmem:[%s14846_s30 + $0x291] ss:$8 sm:$0x3] %vm15514_vm7, %v13945_v26 }
 0x227   : > { %12068 = vst.msk [vmem:[%s14846_s30 + $0x2c1] ss:$8 sm:$0x3] %vm15514_vm7, %v13945_v26  ;;  %12069 = vst.msk [vmem:[%s14846_s30 + $0x2f1] ss:$8 sm:$0x3] %vm15514_vm7, %v13945_v26 }
 0x228   : > { %12070 = vst.msk [vmem:[%s14846_s30 + $0x321] ss:$8 sm:$0x3] %vm15514_vm7, %v13945_v26  ;;  %12071 = vst.msk [vmem:[%s14846_s30 + $0x351] ss:$8 sm:$0x3] %vm15514_vm7, %v13945_v26 }
 0x229   : > { %v6102_v6 = vrot.slane %v15518_v31, 7  ;;  %v11877_v45 = vld [vmem:[#allocation8 + $0x26] ss:$0 sm:$0xff]  ;;  %v6103_v62 = vrot.slane %v5732_v50, 7  ;;  %v11893_v54 = vld [vmem:[#allocation8 + $0x36] ss:$0 sm:$0xff]  ;;  %v2374_v50 = vadd.f32 %v2342_v38, %v2197_v35 }
 0x22a   : > { %v11909_v10 = vld [vmem:[#allocation8 + $0x46] ss:$0 sm:$0xff]  ;;  %v4108_v7 = vmul.f32 %v11877_v45, %v15054_v61  ;;  %v4109_v31 = vmul.f32 %v15046_v51, %v11877_v45  ;;  %v11925_v18 = vld [vmem:[#allocation8 + $0x56] ss:$0 sm:$0xff]  ;;  %v4285_v29 = vmul.f32 %v11893_v54, %v15063_v24  ;;  %v4286_v59 = vmul.f32 %v15056_v42, %v11893_v54  ;;  %v18426_v49 = vld [vmem:[#allocation71_spill] sm:$0xff] }
 0x22b   : > { %12135 = vst [vmem:[%s14846_s30 + $0x128] sm:$0xfe] %v6102_v6  ;;  %v6104_v34 = vsel %vm5909_vm6, %v6102_v6, %v6103_v62  ;;  %12137 = vst [vmem:[%s14846_s30 + $0x148] sm:$0x1] %v6103_v62  ;;  %v11941_v26 = vld [vmem:[#allocation8 + $0x66] ss:$0 sm:$0xff]  ;;  %v4462_v5 = vmul.f32 %v11909_v10, %v15085_v55  ;;  %v2550_v6 = vadd.f32 %v2518_v1, %v2373_v15 }
 0x22c   : > { %12136 = vst [vmem:[%s14846_s30 + $0x138] sm:$0xff] %v6104_v34  ;;  %v6552_v27 = vrot.slane %v6104_v34, 1  ;;  %v4140_v37 = vadd.f32 %v4108_v7, %v3963_v41  ;;  %v4141_v19 = vadd.f32 %v4109_v31, %v3964_v39  ;;  %v4463_v32 = vmul.f32 %v15079_v3, %v11909_v10  ;;  %v11957_v45 = vld [vmem:[#allocation8 + $0x76] ss:$0 sm:$0xff]  ;;  %v11973_v62 = vld [vmem:[#allocation8 + $0x86] ss:$0 sm:$0xff] }
 0x22d   : > { %v2551_v58 = vadd.f32 %v2519_v53, %v2374_v50  ;;  %v4639_v12 = vmul.f32 %v11925_v18, %v15090_v44  ;;  %v4640_v38 = vmul.f32 %v15087_v28, %v11925_v18  ;;  %v4816_v9 = vmul.f32 %v11941_v26, %v18407_v21  ;;  %v15672_v54 = vld [vmem:[%s14846_s30 + $0x58] sm:$0x3]  ;;  %v18428_v35 = vld [vmem:[#allocation74_spill] sm:$0xff]  ;;  %v18429_v31 = vld [vmem:[#allocation73_spill] sm:$0xff] }
 0x22e   : > { %v5925_v33 = vrot.slane %v2550_v6, 7  ;;  %v4317_v20 = vadd.f32 %v4285_v29, %v4140_v37  ;;  %v4318_v1 = vadd.f32 %v4286_v59, %v4141_v19  ;;  %v4817_v56 = vmul.f32 %v18426_v49, %v11941_v26  ;;  %18427 = vst [vmem:[#allocation67_spill] sm:$0xff] %v15672_v54  ;;  %v18430_v41 = vld [vmem:[#allocation76_spill] sm:$0xff]  ;;  %v12005_v49 = vld [vmem:[#allocation8 + $0xa6] ss:$0 sm:$0xff] }
 0x22f   : > { %v5926_v53 = vrot.slane %v2551_v58, 7  ;;  %v4993_v7 = vmul.f32 %v11957_v45, %v18428_v35  ;;  %v4994_v15 = vmul.f32 %v18429_v31, %v11957_v45  ;;  %v5170_v39 = vmul.f32 %v11973_v62, %v18430_v41  ;;  %v18431_v58 = vld [vmem:[#allocation75_spill] sm:$0xff]  ;;  %v11989_v35 = vld [vmem:[#allocation8 + $0x96] ss:$0 sm:$0xff] }
 0x230   : > { %12087 = vst [vmem:[%s14846_s30 + $0x120] sm:$0xfe] %v5925_v33  ;;  %v4494_v6 = vadd.f32 %v4462_v5, %v4317_v20  ;;  %v4495_v26 = vadd.f32 %v4463_v32, %v4318_v1  ;;  %v5171_v16 = vmul.f32 %v18431_v58, %v11973_v62  ;;  %v12021_v31 = vld [vmem:[#allocation8 + $0xb6] ss:$0 sm:$0xff]  ;;  %v9274_v1 = vld [vmem:[#allocation10 + $0x5b8] sm:$0xff] }
 0x231   : > { %v5927_v37 = vsel %vm5909_vm6, %v5925_v33, %v5926_v53  ;;  %12089 = vst [vmem:[%s14846_s30 + $0x140] sm:$0x1] %v5926_v53  ;;  %v9273_v20 = vld [vmem:[#allocation10 + $0x5b0] sm:$0xff]  ;;  %v11681_v62 = vld [vmem:[#allocation5 + $0x6] ss:$0 sm:$0xff]  ;;  %v18437_v58 = vld [vmem:[#allocation81_spill] sm:$0xff] }
 0x232   : > { %v6352_v10 = vld [vmem:[%s14846_s30 + $0x128] sm:$0xfe]  ;;  %v6354_v29 = vld [vmem:[%s14846_s30 + $0x148] sm:$0x1]  ;;  %12088 = vst [vmem:[%s14846_s30 + $0x130] sm:$0xff] %v5927_v37  ;;  %v4671_v41 = vadd.f32 %v4639_v12, %v4494_v6  ;;  %v4672_v33 = vadd.f32 %v4640_v38, %v4495_v26  ;;  %v18434_v6 = vld [vmem:[#allocation80_spill] sm:$0xff]  ;;  %v5702_v53 = vmul.f32 %v18437_v58, %v12021_v31 }
 0x233   : > { %v12263_v34 = vld [vmem:[%s14846_s30 + $0x128] sm:$0xfe]  ;;  %v6551_v18 = vrot.slane %v6352_v10, 1  ;;  %v12267_v59 = vld [vmem:[%s14846_s30 + $0x148] sm:$0x1]  ;;  %v6556_v19 = vrot.slane %v6354_v29, 1 }
 0x234   : > { %v8437_v50 = vrot.slane %v12263_v34, 1  ;;  %v8442_v4 = vrot.slane %v12267_v59, 1  ;;  %v6549_v34 = vrot.slane %v5927_v37, 1  ;;  %v18433_v59 = vld [vmem:[#allocation77_spill] sm:$0xff]  ;;  %v5524_v37 = vmul.f32 %v12005_v49, %v18434_v6  ;;  %v18436_v38 = vld [vmem:[#allocation82_spill] sm:$0xff] }
 0x235   : > { %v6553_v45 = vsel %vm6487_vm5, %v6551_v18, %v6552_v27  ;;  %v6557_v5 = vsel %vm6487_vm5, %v6552_v27, %v6556_v19  ;;  %v4848_v18 = vadd.f32 %v4816_v9, %v4671_v41  ;;  %v5348_v12 = vmul.f32 %v18433_v59, %v11989_v35  ;;  %v11713_v19 = vld [vmem:[#allocation5 + $0x26] ss:$0 sm:$0xff] }
 0x236   : > { %v8439_v10 = vsel %vm6487_vm5, %v8437_v50, %v6552_v27  ;;  %6869 = vmatprep.mubr.f32.mxu1 %v6553_v45  ;;  %v8443_v32 = vsel %vm6487_vm5, %v6552_v27, %v8442_v4  ;;  %v18432_v50 = vld [vmem:[#allocation78_spill] sm:$0xff]  ;;  %v11697_v45 = vld [vmem:[#allocation5 + $0x16] ss:$0 sm:$0xff]  ;;  %v18435_v4 = vld [vmem:[#allocation79_spill] sm:$0xff]  ;;  %v5701_v26 = vmul.f32 %v12021_v31, %v18436_v38  ;;  %v13167_v9 = vpack.c.bf16 %v9274_v1, %v9273_v20 }
 0x237   : > { %8755 = vmatprep.mubr.f32.mxu0 %v8439_v10  ;;  %v5347_v29 = vmul.f32 %v11989_v35, %v18432_v50  ;;  %v4849_v10 = vadd.f32 %v4817_v56, %v4672_v33  ;;  %v5525_v27 = vmul.f32 %v18435_v4, %v12005_v49  ;;  %v5025_v54 = vadd.f32 %v4993_v7, %v4848_v18  ;;  %v6351_v59 = vld [vmem:[%s14846_s30 + $0x120] sm:$0xfe]  ;;  %v15705_v33 = vld [vmem:[%s14846_s30 + $0x50] sm:$0x3] }
 0x238   : > { %v1281_v41 = vmul.f32 %v11681_v62, %v18417_v63  ;;  %v1282_v35 = vmul.f32 %v18418_v23, %v11681_v62  ;;  %v12262_v6 = vld [vmem:[%s14846_s30 + $0x120] sm:$0xfe]  ;;  %v1458_v21 = vmul.f32 %v11697_v45, %v18419_v52  ;;  %v1459_v56 = vmul.f32 %v18420_v40, %v11697_v45  ;;  %18438 = vst [vmem:[#allocation52_spill] sm:$0xff] %v15705_v33  ;;  %v6353_v31 = vld [vmem:[%s14846_s30 + $0x140] sm:$0x1]  ;;  %v18451_v33 = vld [vmem:[#allocation79_spill] sm:$0xff] }
 0x239   : > { %v5026_v50 = vadd.f32 %v4994_v15, %v4849_v10  ;;  %v1635_v49 = vmul.f32 %v11713_v19, %v18422_v17  ;;  %v6548_v38 = vrot.slane %v6351_v59, 1  ;;  %v8434_v4 = vrot.slane %v12262_v6, 1  ;;  %v12266_v7 = vld [vmem:[%s14846_s30 + $0x140] sm:$0x1]  ;;  %13168 = vmatpush1.bf16.msra.mxu0 %v13167_v9  ;;  %v11729_v6 = vld [vmem:[#allocation5 + $0x36] ss:$0 sm:$0xff] }
 0x23a   : > { %v5202_v20 = vadd.f32 %v5170_v39, %v5025_v54  ;;  %v1636_v1 = vmul.f32 %v18423_v30, %v11713_v19  ;;  %v6554_v62 = vrot.slane %v6353_v31, 1  ;;  %v8440_v18 = vrot.slane %v12266_v7, 1  ;;  %13169 = vmatprep.subr.bf16.mxu0 %v18404_v8  ;;  %v11745_v40 = vld [vmem:[#allocation5 + $0x46] ss:$0 sm:$0xff]  ;;  %v11793_v31 = vld [vmem:[#allocation5 + $0x76] ss:$0 sm:$0xff] }
 0x23b   : > { %v5203_v23 = vadd.f32 %v5171_v16, %v5026_v50  ;;  %v1490_v15 = vadd.f32 %v1458_v21, %v1281_v41  ;;  %v6550_v45 = vsel %vm6487_vm5, %v6548_v38, %v6549_v34  ;;  %v8436_v10 = vsel %vm6487_vm5, %v8434_v4, %v6549_v34  ;;  %v11761_v21 = vld [vmem:[#allocation5 + $0x56] ss:$0 sm:$0xff]  ;;  %v15717_v38 = vld [vmem:[%s14846_s30 + $0x78] sm:$0xff]  ;;  %v15721_v41 = vld [vmem:[%s14846_s30 + $0x60] sm:$0xfc] }
 0x23c   : > { %v5379_v17 = vadd.f32 %v5347_v29, %v5202_v20  ;;  %v1491_v59 = vadd.f32 %v1459_v56, %v1282_v35  ;;  %6870 = vmatmul.mubr.f32.gmra.mrb[44].mxu1 %v6550_v45  ;;  %8756 = vmatmul.mubr.f32.gmra.mrb[40].mxu0 %v8436_v10  ;;  %v6555_v54 = vsel %vm6487_vm5, %v6549_v34, %v6554_v62  ;;  %v11846_v7 = vld [vmem:[#allocation8 + $0x7] ss:$0 sm:$0xff]  ;;  %v6308_v62 = vld [vmem:[#allocation10 + $0x68] sm:$0xff] }
 0x23d   : > { %v8441_v39 = vsel %vm6487_vm5, %v6549_v34, %v8440_v18  ;;  %v5380_v16 = vadd.f32 %v5348_v12, %v5203_v23  ;;  %6874 = vmatprep.mubr.f32.mxu1 %v6557_v5  ;;  %8760 = vmatprep.mubr.f32.mxu0 %v8443_v32  ;;  %v1667_v4 = vadd.f32 %v1635_v49, %v1490_v15  ;;  %v11777_v12 = vld [vmem:[#allocation5 + $0x66] ss:$0 sm:$0xff]  ;;  %v9276_v15 = vld [vmem:[#allocation10 + $0x5c8] sm:$0xff] }
 0x23e   : > { %v5556_v19 = vadd.f32 %v5524_v37, %v5379_v17  ;;  %v1668_v29 = vadd.f32 %v1636_v1, %v1491_v59  ;;  %18439 = vst [vmem:[#allocation50_spill] sm:$0xff] %v15717_v38  ;;  %18440 = vst [vmem:[#allocation39_spill] sm:$0xff] %v15721_v41  ;;  %v1812_v56 = vmul.f32 %v11729_v6, %v18393_v36  ;;  %v6307_v49 = vld [vmem:[#allocation10 + $0x60] sm:$0xff] }
 0x23f   : > { %v5557_v35 = vadd.f32 %v5525_v27, %v5380_v16  ;;  %v1813_v34 = vmul.f32 %v18394_v47, %v11729_v6  ;;  %v1989_v23 = vmul.f32 %v11745_v40, %v18365_v0  ;;  %v1990_v17 = vmul.f32 %v18366_v57, %v11745_v40  ;;  %v9275_v18 = vld [vmem:[#allocation10 + $0x5c0] sm:$0xff]  ;;  %v11862_v6 = vld [vmem:[#allocation8 + $0x17] ss:$0 sm:$0xff] }
 0x240   : > { %v5733_v5 = vadd.f32 %v5701_v26, %v5556_v19  ;;  %v2166_v32 = vmul.f32 %v11761_v21, %v18367_v60  ;;  %v2167_v37 = vmul.f32 %v18368_v13, %v11761_v21  ;;  %6875 = vmatmul.mubr.f32.gmra.mrb[46].mxu1 %v6555_v54  ;;  %8761 = vmatmul.mubr.f32.gmra.mrb[42].mxu0 %v8441_v39  ;;  %v11878_v21 = vld [vmem:[#allocation8 + $0x27] ss:$0 sm:$0xff] }
 0x241   : > { %v5734_v27 = vadd.f32 %v5702_v53, %v5557_v35  ;;  %v1844_v20 = vadd.f32 %v1812_v56, %v1667_v4  ;;  %v1845_v1 = vadd.f32 %v1813_v34, %v1668_v29  ;;  %v2343_v40 = vmul.f32 %v11777_v12, %v18369_v25  ;;  %v11894_v56 = vld [vmem:[#allocation8 + $0x37] ss:$0 sm:$0xff] }
 0x242   : > { %v6105_v26 = vrot.slane %v5733_v5, 7  ;;  %v2344_v10 = vmul.f32 %v18370_v43, %v11777_v12  ;;  %v2520_v59 = vmul.f32 %v11793_v31, %v18374_v46  ;;  %v2521_v16 = vmul.f32 %v18375_v48, %v11793_v31 }
 0x243   : > { %v6106_v54 = vrot.slane %v5734_v27, 7  ;;  %v2021_v39 = vadd.f32 %v1989_v23, %v1844_v20  ;;  %v2022_v53 = vadd.f32 %v1990_v17, %v1845_v1  ;;  %v12960_v19 = vpack.c.bf16 %v6308_v62, %v6307_v49  ;;  %v11910_v27 = vld [vmem:[#allocation8 + $0x47] ss:$0 sm:$0xff] }
 0x244   : > { %12138 = vst [vmem:[%s14846_s30 + $0x158] sm:$0xfe] %v6105_v26  ;;  %v13170_v4 = vpack.c.bf16 %v9276_v15, %v9275_v18  ;;  %v3756_v29 = vmul.f32 %v11846_v7, %v18376_v2  ;;  %v3757_v35 = vmul.f32 %v15026_v22, %v11846_v7  ;;  %v3933_v23 = vmul.f32 %v11862_v6, %v15034_v11  ;;  %v11926_v7 = vld [vmem:[#allocation8 + $0x57] ss:$0 sm:$0xff]  ;;  %v11942_v18 = vld [vmem:[#allocation8 + $0x67] ss:$0 sm:$0xff] }
 0x245   : > { %v6107_v34 = vsel %vm5909_vm6, %v6105_v26, %v6106_v54  ;;  %12140 = vst [vmem:[%s14846_s30 + $0x178] sm:$0x1] %v6106_v54  ;;  %v2198_v12 = vadd.f32 %v2166_v32, %v2021_v39  ;;  %v2199_v5 = vadd.f32 %v2167_v37, %v2022_v53  ;;  %12961 = vmatpush1.bf16.msra.mxu1 %v12960_v19  ;;  %v11958_v39 = vld [vmem:[#allocation8 + $0x77] ss:$0 sm:$0xff] }
 0x246   : > { %12139 = vst [vmem:[%s14846_s30 + $0x168] sm:$0xff] %v6107_v34  ;;  %v6562_v17 = vrot.slane %v6107_v34, 1  ;;  %13171 = vmatpush1.bf16.msra.mxu0 %v13170_v4  ;;  %v3934_v31 = vmul.f32 %v15028_v14, %v11862_v6  ;;  %v4110_v49 = vmul.f32 %v11878_v21, %v15054_v61  ;;  %v4111_v20 = vmul.f32 %v15046_v51, %v11878_v21 }
 0x247   : > { %v2375_v1 = vadd.f32 %v2343_v40, %v2198_v12  ;;  %v2376_v62 = vadd.f32 %v2344_v10, %v2199_v5  ;;  %13172 = vmatprep.subr.bf16.mxu0 %v18404_v8  ;;  %v3965_v32 = vadd.f32 %v3933_v23, %v3756_v29  ;;  %v4287_v37 = vmul.f32 %v11894_v56, %v15063_v24  ;;  %v18441_v29 = vld [vmem:[#allocation72_spill] sm:$0xff] }
 0x248   : > { %v3966_v15 = vadd.f32 %v3934_v31, %v3757_v35  ;;  %v4288_v26 = vmul.f32 %v15056_v42, %v11894_v56  ;;  %v4464_v6 = vmul.f32 %v11910_v27, %v15085_v55  ;;  %v4465_v54 = vmul.f32 %v15079_v3, %v11910_v27  ;;  %12962 = vmatprep.subr.bf16.mxu1 %v18404_v8  ;;  %v18442_v56 = vld [vmem:[#allocation71_spill] sm:$0xff]  ;;  %v18443_v31 = vld [vmem:[#allocation74_spill] sm:$0xff] }
 0x249   : > { %v2552_v40 = vadd.f32 %v2520_v59, %v2375_v1  ;;  %v2553_v10 = vadd.f32 %v2521_v16, %v2376_v62  ;;  %v4142_v53 = vadd.f32 %v4110_v49, %v3965_v32  ;;  %v4641_v21 = vmul.f32 %v11926_v7, %v15090_v44 }
 0x24a   : > { %v4143_v19 = vadd.f32 %v4111_v20, %v3966_v15  ;;  %v4642_v4 = vmul.f32 %v15087_v28, %v11926_v7  ;;  %v4818_v35 = vmul.f32 %v11942_v18, %v18441_v29  ;;  %v4819_v34 = vmul.f32 %v18442_v56, %v11942_v18  ;;  %v18444_v7 = vld [vmem:[#allocation73_spill] sm:$0xff] }
 0x24b   : > { %v6356_v12 = vld [vmem:[%s14846_s30 + $0x158] sm:$0xfe]  ;;  %v5928_v23 = vrot.slane %v2552_v40, 7  ;;  %v5929_v27 = vrot.slane %v2553_v10, 7  ;;  %v4319_v59 = vadd.f32 %v4287_v37, %v4142_v53  ;;  %v4995_v16 = vmul.f32 %v11958_v39, %v18443_v31  ;;  %v11974_v40 = vld [vmem:[#allocation8 + $0x87] ss:$0 sm:$0xff] }
 0x24c   : > { %v12269_v5 = vld [vmem:[%s14846_s30 + $0x158] sm:$0xfe]  ;;  %v6561_v1 = vrot.slane %v6356_v12, 1  ;;  %v6358_v62 = vld [vmem:[%s14846_s30 + $0x178] sm:$0x1]  ;;  %v4320_v32 = vadd.f32 %v4288_v26, %v4143_v19  ;;  %v4996_v15 = vmul.f32 %v18444_v7, %v11958_v39  ;;  %v18453_v31 = vld [vmem:[#allocation42_spill] sm:$0xff] }
 0x24d   : > { %v8447_v49 = vrot.slane %v12269_v5, 1  ;;  %v12273_v20 = vld [vmem:[%s14846_s30 + $0x178] sm:$0x1]  ;;  %v5930_v45 = vsel %vm5909_vm6, %v5928_v23, %v5929_v27  ;;  %12090 = vst [vmem:[%s14846_s30 + $0x150] sm:$0xfe] %v5928_v23  ;;  %v6566_v18 = vrot.slane %v6358_v62, 1  ;;  %v4496_v50 = vadd.f32 %v4464_v6, %v4319_v59 }
 0x24e   : > { %12092 = vst [vmem:[%s14846_s30 + $0x170] sm:$0x1] %v5929_v27  ;;  %v8452_v9 = vrot.slane %v12273_v20, 1  ;;  %v11990_v37 = vld [vmem:[#allocation8 + $0x97] ss:$0 sm:$0xff]  ;;  %v6563_v10 = vsel %vm6487_vm5, %v6561_v1, %v6562_v17  ;;  %12091 = vst [vmem:[%s14846_s30 + $0x160] sm:$0xff] %v5930_v45  ;;  %v4497_v5 = vadd.f32 %v4465_v54, %v4320_v32 }
 0x24f   : > { %v8449_v53 = vsel %vm6487_vm5, %v8447_v49, %v6562_v17  ;;  %v6559_v12 = vrot.slane %v5930_v45, 1  ;;  %v12006_v26 = vld [vmem:[#allocation8 + $0xa7] ss:$0 sm:$0xff]  ;;  %6879 = vmatprep.mubr.f32.mxu1 %v6563_v10  ;;  %v6567_v39 = vsel %vm6487_vm5, %v6562_v17, %v6566_v18  ;;  %v4673_v23 = vadd.f32 %v4641_v21, %v4496_v50  ;;  %v12022_v27 = vld [vmem:[#allocation8 + $0xb7] ss:$0 sm:$0xff]  ;;  %v9278_v59 = vld [vmem:[#allocation10 + $0x5d8] sm:$0xff] }
 0x250   : > { %8765 = vmatprep.mubr.f32.mxu0 %v8449_v53  ;;  %v8453_v19 = vsel %vm6487_vm5, %v6562_v17, %v8452_v9  ;;  %v9277_v6 = vld [vmem:[#allocation10 + $0x5d0] sm:$0xff]  ;;  %v4674_v20 = vadd.f32 %v4642_v4, %v4497_v5  ;;  %v18448_v32 = vld [vmem:[#allocation78_spill] sm:$0xff]  ;;  %v18449_v9 = vld [vmem:[#allocation77_spill] sm:$0xff]  ;;  %v5527_v1 = vmul.f32 %v18451_v33, %v12006_v26 }
 0x251   : > { %v15769_v62 = vld [vmem:[%s14846_s30 + $0x70] sm:$0xff]  ;;  %v5349_v10 = vmul.f32 %v11990_v37, %v18448_v32  ;;  %v11682_v53 = vld [vmem:[#allocation5 + $0x7] ss:$0 sm:$0xff]  ;;  %v4850_v50 = vadd.f32 %v4818_v35, %v4673_v23  ;;  %v5350_v17 = vmul.f32 %v18449_v9, %v11990_v37  ;;  %v13173_v32 = vpack.c.bf16 %v9278_v59, %v9277_v6  ;;  %v15784_v37 = vld [vmem:[%s14846_s30 + $0x88] sm:$0x3] }
 0x252   : > { %18445 = vst [vmem:[#allocation38_spill] sm:$0xff] %v15769_v62  ;;  %v18446_v49 = vld [vmem:[#allocation76_spill] sm:$0xff]  ;;  %v18447_v45 = vld [vmem:[#allocation75_spill] sm:$0xff]  ;;  %v11714_v4 = vld [vmem:[#allocation5 + $0x27] ss:$0 sm:$0xff]  ;;  %v4851_v5 = vadd.f32 %v4819_v34, %v4674_v20  ;;  %v1283_v7 = vmul.f32 %v11682_v53, %v18417_v63  ;;  %v1284_v35 = vmul.f32 %v18453_v31, %v11682_v53 }
 0x253   : > { %v5172_v41 = vmul.f32 %v11974_v40, %v18446_v49  ;;  %v5173_v54 = vmul.f32 %v18447_v45, %v11974_v40  ;;  %v11698_v18 = vld [vmem:[#allocation5 + $0x17] ss:$0 sm:$0xff]  ;;  %v18452_v62 = vld [vmem:[#allocation82_spill] sm:$0xff]  ;;  %v5704_v40 = vmul.f32 %v18437_v58, %v12022_v27  ;;  %v5027_v45 = vadd.f32 %v4995_v16, %v4850_v50  ;;  %18454 = vst [vmem:[#allocation64_spill] sm:$0xff] %v15784_v37  ;;  %v18455_v34 = vld [vmem:[#allocation43_spill] sm:$0xff] }
 0x254   : > { %v18450_v21 = vld [vmem:[#allocation80_spill] sm:$0xff]  ;;  %v5703_v49 = vmul.f32 %v12022_v27, %v18452_v62  ;;  %v1460_v23 = vmul.f32 %v11698_v18, %v18419_v52  ;;  %v5028_v33 = vadd.f32 %v4996_v15, %v4851_v5  ;;  %13174 = vmatpush1.bf16.msra.mxu0 %v13173_v32  ;;  %v1461_v20 = vmul.f32 %v18455_v34, %v11698_v18  ;;  %v15795_v5 = vld [vmem:[%s14846_s30 + $0x80] sm:$0x3] }
 0x255   : > { %v5526_v38 = vmul.f32 %v12006_v26, %v18450_v21  ;;  %v6355_v21 = vld [vmem:[%s14846_s30 + $0x150] sm:$0xfe]  ;;  %v6357_v26 = vld [vmem:[%s14846_s30 + $0x170] sm:$0x1]  ;;  %v1638_v16 = vmul.f32 %v18423_v30, %v11714_v4  ;;  %v5204_v31 = vadd.f32 %v5172_v41, %v5027_v45  ;;  %13175 = vmatprep.subr.bf16.mxu0 %v18404_v8  ;;  %18457 = vst [vmem:[#allocation41_spill] sm:$0xff] %v15795_v5 }
 0x256   : > { %v12268_v9 = vld [vmem:[%s14846_s30 + $0x150] sm:$0xfe]  ;;  %v6558_v59 = vrot.slane %v6355_v21, 1  ;;  %v6564_v63 = vrot.slane %v6357_v26, 1  ;;  %v12272_v53 = vld [vmem:[%s14846_s30 + $0x170] sm:$0x1]  ;;  %v5205_v58 = vadd.f32 %v5173_v54, %v5028_v33  ;;  %v1492_v62 = vadd.f32 %v1460_v23, %v1283_v7 }
 0x257   : > { %v18456_v27 = vld [vmem:[#allocation48_spill] sm:$0xff]  ;;  %v8444_v50 = vrot.slane %v12268_v9, 1  ;;  %v8450_v52 = vrot.slane %v12272_v53, 1  ;;  %v1493_v56 = vadd.f32 %v1461_v20, %v1284_v35  ;;  %v5381_v21 = vadd.f32 %v5349_v10, %v5204_v31  ;;  %v11746_v9 = vld [vmem:[#allocation5 + $0x47] ss:$0 sm:$0xff]  ;;  %v9280_v53 = vld [vmem:[#allocation10 + $0x5e8] sm:$0xff] }
 0x258   : > { %v1637_v6 = vmul.f32 %v11714_v4, %v18456_v27  ;;  %v11730_v15 = vld [vmem:[#allocation5 + $0x37] ss:$0 sm:$0xff]  ;;  %v6560_v32 = vsel %vm6487_vm5, %v6558_v59, %v6559_v12  ;;  %v6565_v4 = vsel %vm6487_vm5, %v6559_v12, %v6564_v63  ;;  %v5382_v45 = vadd.f32 %v5350_v17, %v5205_v58  ;;  %v11778_v20 = vld [vmem:[#allocation5 + $0x67] ss:$0 sm:$0xff]  ;;  %v15805_v31 = vld [vmem:[%s14846_s30 + $0x98] sm:$0xfc] }
 0x259   : > { %v8446_v18 = vsel %vm6487_vm5, %v8444_v50, %v6559_v12  ;;  %6880 = vmatmul.mubr.f32.gmra.mrb[48].mxu1 %v6560_v32  ;;  %v8451_v41 = vsel %vm6487_vm5, %v6559_v12, %v8450_v52  ;;  %v11762_v7 = vld [vmem:[#allocation5 + $0x57] ss:$0 sm:$0xff]  ;;  %v5558_v35 = vadd.f32 %v5526_v38, %v5381_v21  ;;  %v1670_v23 = vadd.f32 %v1638_v16, %v1493_v56  ;;  %v6310_v17 = vld [vmem:[#allocation10 + $0x78] sm:$0xff]  ;;  %v9279_v50 = vld [vmem:[#allocation10 + $0x5e0] sm:$0xff] }
 0x25a   : > { %8766 = vmatmul.mubr.f32.gmra.mrb[44].mxu0 %v8446_v18  ;;  %v1669_v33 = vadd.f32 %v1637_v6, %v1492_v62  ;;  %6884 = vmatprep.mubr.f32.mxu1 %v6567_v39  ;;  %v1814_v26 = vmul.f32 %v11730_v15, %v18393_v36  ;;  %18458 = vst [vmem:[#allocation40_spill] sm:$0xff] %v15805_v31  ;;  %v11794_v12 = vld [vmem:[#allocation5 + $0x77] ss:$0 sm:$0xff]  ;;  %v12023_v31 = vld [vmem:[#allocation8 + $0xb8] ss:$0 sm:$0xff] }
 0x25b   : > { %8770 = vmatprep.mubr.f32.mxu0 %v8453_v19  ;;  %v5559_v10 = vadd.f32 %v5527_v1, %v5382_v45  ;;  %v1815_v59 = vmul.f32 %v18394_v47, %v11730_v15  ;;  %v1991_v52 = vmul.f32 %v11746_v9, %v18365_v0  ;;  %v1992_v58 = vmul.f32 %v18366_v57, %v11746_v9  ;;  %v6309_v19 = vld [vmem:[#allocation10 + $0x70] sm:$0xff]  ;;  %v11847_v15 = vld [vmem:[#allocation8 + $0x8] ss:$0 sm:$0xff]  ;;  %v11863_v45 = vld [vmem:[#allocation8 + $0x18] ss:$0 sm:$0xff] }
 0x25c   : > { %v5735_v62 = vadd.f32 %v5703_v49, %v5558_v35  ;;  %v1846_v39 = vadd.f32 %v1814_v26, %v1669_v33  ;;  %v2168_v38 = vmul.f32 %v11762_v7, %v18367_v60  ;;  %v2169_v56 = vmul.f32 %v18368_v13, %v11762_v7  ;;  %v11879_v7 = vld [vmem:[#allocation8 + $0x28] ss:$0 sm:$0xff] }
 0x25d   : > { %6885 = vmatmul.mubr.f32.gmra.mrb[50].mxu1 %v6565_v4  ;;  %v5736_v6 = vadd.f32 %v5704_v40, %v5559_v10  ;;  %v1847_v16 = vadd.f32 %v1815_v59, %v1670_v23  ;;  %v2345_v1 = vmul.f32 %v11778_v20, %v18369_v25  ;;  %v2346_v21 = vmul.f32 %v18370_v43, %v11778_v20  ;;  %v11895_v59 = vld [vmem:[#allocation8 + $0x38] ss:$0 sm:$0xff]  ;;  %v11683_v5 = vld [vmem:[#allocation5 + $0x8] ss:$0 sm:$0xff] }
 0x25e   : > { %8771 = vmatmul.mubr.f32.gmra.mrb[46].mxu0 %v8451_v41  ;;  %v6108_v49 = vrot.slane %v5735_v62, 7  ;;  %v2023_v18 = vadd.f32 %v1991_v52, %v1846_v39  ;;  %v2522_v9 = vmul.f32 %v11794_v12, %v18374_v46  ;;  %v2523_v40 = vmul.f32 %v18375_v48, %v11794_v12  ;;  %v11911_v62 = vld [vmem:[#allocation8 + $0x48] ss:$0 sm:$0xff] }
 0x25f   : > { %v6109_v4 = vrot.slane %v5736_v6, 7  ;;  %v2024_v41 = vadd.f32 %v1992_v58, %v1847_v16  ;;  %v12963_v33 = vpack.c.bf16 %v6310_v17, %v6309_v19  ;;  %v13176_v23 = vpack.c.bf16 %v9280_v53, %v9279_v50  ;;  %v11927_v6 = vld [vmem:[#allocation8 + $0x58] ss:$0 sm:$0xff] }
 0x260   : > { %12141 = vst [vmem:[%s14846_s30 + $0x188] sm:$0xfe] %v6108_v49  ;;  %v2200_v35 = vadd.f32 %v2168_v38, %v2023_v18  ;;  %v3758_v26 = vmul.f32 %v11847_v15, %v18376_v2  ;;  %v3759_v10 = vmul.f32 %v15026_v22, %v11847_v15  ;;  %v3935_v58 = vmul.f32 %v11863_v45, %v15034_v11  ;;  %v11943_v15 = vld [vmem:[#allocation8 + $0x68] ss:$0 sm:$0xff] }
 0x261   : > { %v6110_v20 = vsel %vm5909_vm6, %v6108_v49, %v6109_v4  ;;  %12143 = vst [vmem:[%s14846_s30 + $0x1a8] sm:$0x1] %v6109_v4  ;;  %v2201_v52 = vadd.f32 %v2169_v56, %v2024_v41  ;;  %12964 = vmatpush1.bf16.msra.mxu1 %v12963_v33  ;;  %v3936_v12 = vmul.f32 %v15028_v14, %v11863_v45  ;;  %v11959_v4 = vld [vmem:[#allocation8 + $0x78] ss:$0 sm:$0xff] }
 0x262   : > { %12142 = vst [vmem:[%s14846_s30 + $0x198] sm:$0xff] %v6110_v20  ;;  %v6572_v39 = vrot.slane %v6110_v20, 1  ;;  %v2377_v19 = vadd.f32 %v2345_v1, %v2200_v35  ;;  %13177 = vmatpush1.bf16.msra.mxu0 %v13176_v23  ;;  %v4112_v38 = vmul.f32 %v11879_v7, %v15054_v61  ;;  %v4113_v17 = vmul.f32 %v15046_v51, %v11879_v7  ;;  %v11975_v35 = vld [vmem:[#allocation8 + $0x88] ss:$0 sm:$0xff] }
 0x263   : > { %12965 = vmatprep.subr.bf16.mxu1 %v18404_v8  ;;  %v2378_v16 = vadd.f32 %v2346_v21, %v2201_v52  ;;  %13178 = vmatprep.subr.bf16.mxu0 %v18404_v8  ;;  %v3967_v56 = vadd.f32 %v3935_v58, %v3758_v26  ;;  %v3968_v50 = vadd.f32 %v3936_v12, %v3759_v10  ;;  %v18459_v10 = vld [vmem:[#allocation71_spill] sm:$0xff] }
 0x264   : > { %v4289_v53 = vmul.f32 %v11895_v59, %v15063_v24  ;;  %v2554_v49 = vadd.f32 %v2522_v9, %v2377_v19  ;;  %v4290_v1 = vmul.f32 %v15056_v42, %v11895_v59  ;;  %v4466_v18 = vmul.f32 %v11911_v62, %v15085_v55 }
 0x265   : > { %v4467_v45 = vmul.f32 %v15079_v3, %v11911_v62  ;;  %v2555_v41 = vadd.f32 %v2523_v40, %v2378_v16  ;;  %v4144_v33 = vadd.f32 %v4112_v38, %v3967_v56  ;;  %v4145_v21 = vadd.f32 %v4113_v17, %v3968_v50  ;;  %v18460_v62 = vld [vmem:[#allocation74_spill] sm:$0xff]  ;;  %v18461_v50 = vld [vmem:[#allocation73_spill] sm:$0xff] }
 0x266   : > { %v4643_v7 = vmul.f32 %v11927_v6, %v15090_v44  ;;  %v5931_v23 = vrot.slane %v2554_v49, 7  ;;  %v4644_v9 = vmul.f32 %v15087_v28, %v11927_v6  ;;  %v4820_v26 = vmul.f32 %v11943_v15, %v18441_v29  ;;  %v18462_v49 = vld [vmem:[#allocation76_spill] sm:$0xff]  ;;  %v18476_v29 = vld [vmem:[#allocation42_spill] sm:$0xff] }
 0x267   : > { %v4821_v59 = vmul.f32 %v18459_v10, %v11943_v15  ;;  %v6360_v20 = vld [vmem:[%s14846_s30 + $0x188] sm:$0xfe]  ;;  %v5932_v40 = vrot.slane %v2555_v41, 7  ;;  %v4321_v58 = vadd.f32 %v4289_v53, %v4144_v33  ;;  %v4322_v12 = vadd.f32 %v4290_v1, %v4145_v21  ;;  %v11991_v53 = vld [vmem:[#allocation8 + $0x98] ss:$0 sm:$0xff] }
 0x268   : > { %v12275_v52 = vld [vmem:[%s14846_s30 + $0x188] sm:$0xfe]  ;;  %v4997_v19 = vmul.f32 %v11959_v4, %v18460_v62  ;;  %v6571_v38 = vrot.slane %v6360_v20, 1  ;;  %12093 = vst [vmem:[%s14846_s30 + $0x180] sm:$0xfe] %v5931_v23  ;;  %v4998_v6 = vmul.f32 %v18461_v50, %v11959_v4  ;;  %v5174_v32 = vmul.f32 %v11975_v35, %v18462_v49  ;;  %v18473_v50 = vld [vmem:[#allocation56_spill] sm:$0xff] }
 0x269   : > { %v8457_v17 = vrot.slane %v12275_v52, 1  ;;  %v6362_v16 = vld [vmem:[%s14846_s30 + $0x1a8] sm:$0x1]  ;;  %v5933_v63 = vsel %vm5909_vm6, %v5931_v23, %v5932_v40  ;;  %12095 = vst [vmem:[%s14846_s30 + $0x1a0] sm:$0x1] %v5932_v40  ;;  %v4498_v41 = vadd.f32 %v4466_v18, %v4321_v58  ;;  %v4499_v20 = vadd.f32 %v4467_v45, %v4322_v12  ;;  %v9282_v18 = vld [vmem:[#allocation10 + $0x5f8] sm:$0xff] }
 0x26a   : > { %v12279_v56 = vld [vmem:[%s14846_s30 + $0x1a8] sm:$0x1]  ;;  %v6576_v15 = vrot.slane %v6362_v16, 1  ;;  %v6573_v1 = vsel %vm6487_vm5, %v6571_v38, %v6572_v39  ;;  %12094 = vst [vmem:[%s14846_s30 + $0x190] sm:$0xff] %v5933_v63  ;;  %v6569_v21 = vrot.slane %v5933_v63, 1  ;;  %v9281_v16 = vld [vmem:[#allocation10 + $0x5f0] sm:$0xff] }
 0x26b   : > { %v8462_v54 = vrot.slane %v12279_v56, 1  ;;  %v8459_v33 = vsel %vm6487_vm5, %v8457_v17, %v6572_v39  ;;  %v12007_v52 = vld [vmem:[#allocation8 + $0xa8] ss:$0 sm:$0xff]  ;;  %6889 = vmatprep.mubr.f32.mxu1 %v6573_v1  ;;  %v4675_v40 = vadd.f32 %v4643_v7, %v4498_v41  ;;  %v4676_v17 = vadd.f32 %v4644_v9, %v4499_v20  ;;  %v18464_v63 = vld [vmem:[#allocation75_spill] sm:$0xff]  ;;  %v18466_v1 = vld [vmem:[#allocation77_spill] sm:$0xff] }
 0x26c   : > { %8775 = vmatprep.mubr.f32.mxu0 %v8459_v33  ;;  %v6577_v4 = vsel %vm6487_vm5, %v6572_v39, %v6576_v15  ;;  %v15853_v58 = vld [vmem:[%s14846_s30 + $0xa8] sm:$0xff]  ;;  %v5175_v45 = vmul.f32 %v18464_v63, %v11975_v35  ;;  %v5352_v33 = vmul.f32 %v18466_v1, %v11991_v53  ;;  %v11699_v15 = vld [vmem:[#allocation5 + $0x18] ss:$0 sm:$0xff]  ;;  %v18470_v9 = vld [vmem:[#allocation81_spill] sm:$0xff]  ;;  %v13179_v35 = vpack.c.bf16 %v9282_v18, %v9281_v16 }
 0x26d   : > { %v8463_v23 = vsel %vm6487_vm5, %v6572_v39, %v8462_v54  ;;  %18463 = vst [vmem:[#allocation59_spill] sm:$0xff] %v15853_v58  ;;  %v18465_v12 = vld [vmem:[#allocation78_spill] sm:$0xff]  ;;  %v4852_v54 = vadd.f32 %v4820_v26, %v4675_v40  ;;  %v18467_v39 = vld [vmem:[#allocation80_spill] sm:$0xff]  ;;  %v18468_v41 = vld [vmem:[#allocation79_spill] sm:$0xff]  ;;  %v4853_v58 = vadd.f32 %v4821_v59, %v4676_v17  ;;  %v5706_v20 = vmul.f32 %v18470_v9, %v12023_v31 }
 0x26e   : > { %v5351_v56 = vmul.f32 %v11991_v53, %v18465_v12  ;;  %v5528_v7 = vmul.f32 %v12007_v52, %v18467_v39  ;;  %v5529_v37 = vmul.f32 %v18468_v41, %v12007_v52  ;;  %v18469_v49 = vld [vmem:[#allocation82_spill] sm:$0xff]  ;;  %v18471_v63 = vld [vmem:[#allocation83_spill] sm:$0xff]  ;;  %v18474_v53 = vrot.slane %v18473_v50, 2  ;;  %v18475_v39 = vld [vmem:[#allocation44_spill] sm:$0xff]  ;;  %13180 = vmatpush1.bf16.msra.mxu0 %v13179_v35 }
 0x26f   : > { %v5705_v38 = vmul.f32 %v12023_v31, %v18469_v49  ;;  %v18472_v12 = vrot.slane %v18471_v63, 2  ;;  %v6359_v62 = vld [vmem:[%s14846_s30 + $0x180] sm:$0xfe]  ;;  %v5029_v40 = vadd.f32 %v4997_v19, %v4852_v54  ;;  %v1285_v10 = vmul.f32 %v11683_v5, %v18475_v39  ;;  %v15874_v49 = vld [vmem:[%s14846_s30 + $0x90] sm:$0xfc]  ;;  %13181 = vmatprep.subr.bf16.mxu0 %v18404_v8 }
 0x270   : > { %v12274_v26 = vld [vmem:[%s14846_s30 + $0x180] sm:$0xfe]  ;;  %v1286_v52 = vmul.f32 %v18476_v29, %v11683_v5  ;;  %18478 = vst [vmem:[#allocation58_spill] sm:$0xff] %v15874_v49  ;;  %v6568_v59 = vrot.slane %v6359_v62, 1  ;;  %v6361_v16 = vld [vmem:[%s14846_s30 + $0x1a0] sm:$0x1]  ;;  %v5030_v17 = vadd.f32 %v4998_v6, %v4853_v58  ;;  %v1463_v50 = vmul.f32 %v18455_v34, %v11699_v15 }
 0x271   : > { %v9031_v1 = vsel %vm7323_vm8, %v18474_v53, %v18472_v12  ;;  %v18477_v41 = vld [vmem:[#allocation45_spill] sm:$0xff]  ;;  %v8454_v31 = vrot.slane %v12274_v26, 1  ;;  %v6574_v12 = vrot.slane %v6361_v16, 1  ;;  %v5206_v9 = vadd.f32 %v5174_v32, %v5029_v40  ;;  %v11715_v54 = vld [vmem:[#allocation5 + $0x28] ss:$0 sm:$0xff] }
 0x272   : > { %v1462_v28 = vmul.f32 %v11699_v15, %v18477_v41  ;;  %v12278_v18 = vld [vmem:[%s14846_s30 + $0x1a0] sm:$0x1]  ;;  %v6570_v5 = vsel %vm6487_vm5, %v6568_v59, %v6569_v21  ;;  %v5207_v29 = vadd.f32 %v5175_v45, %v5030_v17  ;;  %v1495_v62 = vadd.f32 %v1463_v50, %v1286_v52  ;;  %v11731_v26 = vld [vmem:[#allocation5 + $0x38] ss:$0 sm:$0xff]  ;;  %v11747_v6 = vld [vmem:[#allocation5 + $0x48] ss:$0 sm:$0xff] }
 0x273   : > { %v8460_v53 = vrot.slane %v12278_v18, 1  ;;  %v8456_v41 = vsel %vm6487_vm5, %v8454_v31, %v6569_v21  ;;  %6890 = vmatmul.mubr.f32.gmra.mrb[52].mxu1 %v6570_v5  ;;  %v6575_v58 = vsel %vm6487_vm5, %v6569_v21, %v6574_v12  ;;  %v1639_v35 = vmul.f32 %v11715_v54, %v18456_v27  ;;  %v11763_v40 = vld [vmem:[#allocation5 + $0x58] ss:$0 sm:$0xff]  ;;  %v15888_v52 = vld [vmem:[%s14846_s30 + $0xa0] sm:$0xff] }
 0x274   : > { %v1494_v19 = vadd.f32 %v1462_v28, %v1285_v10  ;;  %8776 = vmatmul.mubr.f32.gmra.mrb[48].mxu0 %v8456_v41  ;;  %v5383_v28 = vadd.f32 %v5351_v56, %v5206_v9  ;;  %6894 = vmatprep.mubr.f32.mxu1 %v6577_v4  ;;  %v5384_v15 = vadd.f32 %v5352_v33, %v5207_v29  ;;  %v15892_v41 = vld [vmem:[%s14846_s30 + $0xb8] sm:$0x3]  ;;  %v6311_v12 = vld [vmem:[#allocation10 + $0x80] sm:$0xff]  ;;  %v12008_v10 = vld [vmem:[#allocation8 + $0xa9] ss:$0 sm:$0xff] }
 0x275   : > { %v8461_v32 = vsel %vm6487_vm5, %v6569_v21, %v8460_v53  ;;  %8780 = vmatprep.mubr.f32.mxu0 %v8463_v23  ;;  %v1640_v45 = vmul.f32 %v18423_v30, %v11715_v54  ;;  %18479 = vst [vmem:[#allocation63_spill] sm:$0xff] %v15888_v52  ;;  %18480 = vst [vmem:[#allocation62_spill] sm:$0xff] %v15892_v41  ;;  %v1816_v21 = vmul.f32 %v11731_v26, %v18393_v36  ;;  %v11779_v23 = vld [vmem:[#allocation5 + $0x68] ss:$0 sm:$0xff]  ;;  %v11795_v18 = vld [vmem:[#allocation5 + $0x78] ss:$0 sm:$0xff] }
 0x276   : > { %v5560_v31 = vadd.f32 %v5528_v7, %v5383_v28  ;;  %v1817_v56 = vmul.f32 %v18394_v47, %v11731_v26  ;;  %v1993_v4 = vmul.f32 %v11747_v6, %v18365_v0  ;;  %v5561_v29 = vadd.f32 %v5529_v37, %v5384_v15  ;;  %v9606_v26 = vld [vmem:[#allocation10 + $0x600] sm:$0xff]  ;;  %v11848_v15 = vld [vmem:[#allocation8 + $0x9] ss:$0 sm:$0xff]  ;;  %v18497_v41 = vld [vmem:[#allocation75_spill] sm:$0xff] }
 0x277   : > { %v1671_v33 = vadd.f32 %v1639_v35, %v1494_v19  ;;  %v1672_v9 = vadd.f32 %v1640_v45, %v1495_v62  ;;  %v1994_v16 = vmul.f32 %v18366_v57, %v11747_v6  ;;  %6895 = vmatmul.mubr.f32.gmra.mrb[54].mxu1 %v6575_v58  ;;  %v2170_v50 = vmul.f32 %v11763_v40, %v18367_v60  ;;  %v6312_v62 = vld [vmem:[#allocation10 + $0x88] sm:$0xff]  ;;  %v18499_v49 = vld [vmem:[#allocation77_spill] sm:$0xff]  ;;  %v11700_v52 = vld [vmem:[#allocation5 + $0x19] ss:$0 sm:$0xff] }
 0x278   : > { %8781 = vmatmul.mubr.f32.gmra.mrb[50].mxu0 %v8461_v32  ;;  %v5737_v17 = vadd.f32 %v5705_v38, %v5560_v31  ;;  %v2171_v7 = vmul.f32 %v18368_v13, %v11763_v40  ;;  %v5738_v54 = vadd.f32 %v5706_v20, %v5561_v29  ;;  %v2347_v19 = vmul.f32 %v11779_v23, %v18369_v25  ;;  %v9607_v6 = vld [vmem:[#allocation10 + $0x608] sm:$0xff]  ;;  %v18483_v31 = vld [vmem:[#allocation65_spill] sm:$0xff]  ;;  %v11864_v29 = vld [vmem:[#allocation8 + $0x19] ss:$0 sm:$0xff] }
 0x279   : > { %9347 = vmatprep.mubr.f32.mxu0 %v9031_v1  ;;  %v1848_v5 = vadd.f32 %v1816_v21, %v1671_v33  ;;  %v1849_v37 = vadd.f32 %v1817_v56, %v1672_v9  ;;  %v2348_v38 = vmul.f32 %v18370_v43, %v11779_v23  ;;  %v2524_v32 = vmul.f32 %v11795_v18, %v18374_v46  ;;  %v18481_v45 = vld [vmem:[#allocation66_spill] sm:$0xff]  ;;  %v18485_v33 = vld [vmem:[#allocation67_spill] sm:$0xff] }
 0x27a   : > { %v6111_v58 = vrot.slane %v5737_v17, 7  ;;  %v2525_v28 = vmul.f32 %v18375_v48, %v11795_v18  ;;  %v6112_v35 = vrot.slane %v5738_v54, 7  ;;  %v18482_v40 = vrot.slane %v18481_v45, 2 }
 0x27b   : > { %v2025_v20 = vadd.f32 %v1993_v4, %v1848_v5  ;;  %v2026_v1 = vadd.f32 %v1994_v16, %v1849_v37  ;;  %v18484_v21 = vrot.slane %v18483_v31, 2  ;;  %v12966_v23 = vpack.c.bf16 %v6312_v62, %v6311_v12  ;;  %v18488_v4 = vld [vmem:[#allocation52_spill] sm:$0xff]  ;;  %v11880_v31 = vld [vmem:[#allocation8 + $0x29] ss:$0 sm:$0xff] }
 0x27c   : > { %12144 = vst [vmem:[%s14846_s30 + $0x1b8] sm:$0xfe] %v6111_v58  ;;  %v18486_v9 = vrot.slane %v18485_v33, 2  ;;  %v18487_v17 = vrot.slane %v18471_v63, 2  ;;  %v13182_v54 = vpack.c.bf16 %v9607_v6, %v9606_v26  ;;  %v18489_v16 = vrot.slane %v18488_v4, 2 }
 0x27d   : > { %v9028_v56 = vsel %vm7323_vm8, %v18484_v21, %v18482_v40  ;;  %v18490_v5 = vmov %v18482_v40  ;;  %v15922_v40 = vsel %vm5909_vm6, %v6111_v58, %v6112_v35  ;;  %12146 = vst [vmem:[%s14846_s30 + $0x1d8] sm:$0x1] %v6112_v35  ;;  %v2202_v21 = vadd.f32 %v2170_v50, %v2025_v20  ;;  %v11896_v63 = vld [vmem:[#allocation8 + $0x39] ss:$0 sm:$0xff]  ;;  %12967 = vmatpush1.bf16.msra.mxu1 %v12966_v23 }
 0x27e   : > { %9348 = vmatmul.mubr.f32.vlgmr.msra.gmra.mrb[20].mxu0 %v9028_v56  ;;  %v9035_v18 = vsel %vm7323_vm8, %v18487_v17, %v18486_v9  ;;  %v9033_v37 = vsel %vm7323_vm8, %v18490_v5, %v18489_v16  ;;  %v2203_v12 = vadd.f32 %v2171_v7, %v2026_v1  ;;  %v3760_v62 = vmul.f32 %v11848_v15, %v18376_v2  ;;  %v11912_v56 = vld [vmem:[#allocation8 + $0x49] ss:$0 sm:$0xff]  ;;  %v11928_v1 = vld [vmem:[#allocation8 + $0x59] ss:$0 sm:$0xff] }
 0x27f   : > { %9352 = vmatprep.mubr.f32.mxu0 %v9035_v18  ;;  %12145 = vst [vmem:[%s14846_s30 + $0x1c8] sm:$0xff] %v15922_v40  ;;  %v6582_v26 = vrot.slane %v15922_v40, 1  ;;  %13183 = vmatpush1.bf16.msra.mxu0 %v13182_v54  ;;  %v3761_v6 = vmul.f32 %v15026_v22, %v11848_v15  ;;  %v3937_v45 = vmul.f32 %v11864_v29, %v15034_v11  ;;  %v11944_v17 = vld [vmem:[#allocation8 + $0x69] ss:$0 sm:$0xff]  ;;  %v11960_v54 = vld [vmem:[#allocation8 + $0x79] ss:$0 sm:$0xff] }
 0x280   : > { %v3938_v58 = vmul.f32 %v15028_v14, %v11864_v29  ;;  %v2379_v35 = vadd.f32 %v2347_v19, %v2202_v21  ;;  %v2380_v50 = vadd.f32 %v2348_v38, %v2203_v12  ;;  %v4114_v7 = vmul.f32 %v11880_v31, %v15054_v61  ;;  %12968 = vmatprep.subr.bf16.mxu1 %v18404_v8  ;;  %v11976_v40 = vld [vmem:[#allocation8 + $0x89] ss:$0 sm:$0xff]  ;;  %v18492_v12 = vld [vmem:[#allocation72_spill] sm:$0xff] }
 0x281   : > { %v4115_v20 = vmul.f32 %v15046_v51, %v11880_v31  ;;  %v3969_v33 = vadd.f32 %v3937_v45, %v3760_v62  ;;  %v4291_v15 = vmul.f32 %v11896_v63, %v15063_v24  ;;  %v4292_v9 = vmul.f32 %v15056_v42, %v11896_v63  ;;  %13184 = vmatprep.subr.bf16.mxu0 %v18404_v8  ;;  %v18493_v63 = vld [vmem:[#allocation71_spill] sm:$0xff] }
 0x282   : > { %9353 = vmatmul.mubr.f32.gmra.mrb[22].mxu0 %v9033_v37  ;;  %v3970_v23 = vadd.f32 %v3938_v58, %v3761_v6  ;;  %v2556_v29 = vadd.f32 %v2524_v32, %v2379_v35  ;;  %v2557_v18 = vadd.f32 %v2525_v28, %v2380_v50  ;;  %v4468_v19 = vmul.f32 %v11912_v56, %v15085_v55  ;;  %v18491_v37 = vld [vmem:[#allocation69_spill] sm:$0xff]  ;;  %v18494_v50 = vld [vmem:[#allocation74_spill] sm:$0xff] }
 0x283   : > { %v4469_v38 = vmul.f32 %v15079_v3, %v11912_v56  ;;  %v4146_v4 = vadd.f32 %v4114_v7, %v3969_v33  ;;  %v4645_v5 = vmul.f32 %v11928_v1, %v15090_v44  ;;  %v4646_v31 = vmul.f32 %v18491_v37, %v11928_v1  ;;  %v6364_v21 = vld [vmem:[%s14846_s30 + $0x1b8] sm:$0xfe] }
 0x284   : > { %v4147_v16 = vadd.f32 %v4115_v20, %v3970_v23  ;;  %v5934_v32 = vrot.slane %v2556_v29, 7  ;;  %v5935_v28 = vrot.slane %v2557_v18, 7  ;;  %v4822_v62 = vmul.f32 %v11944_v17, %v18492_v12  ;;  %v6366_v58 = vld [vmem:[%s14846_s30 + $0x1d8] sm:$0x1]  ;;  %v11992_v20 = vld [vmem:[#allocation8 + $0x99] ss:$0 sm:$0xff] }
 0x285   : > { %v4823_v6 = vmul.f32 %v18493_v63, %v11944_v17  ;;  %v6581_v45 = vrot.slane %v6364_v21, 1  ;;  %v4323_v56 = vadd.f32 %v4291_v15, %v4146_v4  ;;  %v4999_v7 = vmul.f32 %v11960_v54, %v18494_v50  ;;  %v18495_v23 = vld [vmem:[#allocation73_spill] sm:$0xff]  ;;  %v18496_v18 = vld [vmem:[#allocation76_spill] sm:$0xff]  ;;  %v11684_v4 = vld [vmem:[#allocation5 + $0x9] ss:$0 sm:$0xff] }
 0x286   : > { %v4324_v35 = vadd.f32 %v4292_v9, %v4147_v16  ;;  %v5936_v33 = vsel %vm5909_vm6, %v5934_v32, %v5935_v28  ;;  %12096 = vst [vmem:[%s14846_s30 + $0x1b0] sm:$0xfe] %v5934_v32  ;;  %12098 = vst [vmem:[%s14846_s30 + $0x1d0] sm:$0x1] %v5935_v28  ;;  %v6586_v1 = vrot.slane %v6366_v58, 1  ;;  %v5000_v29 = vmul.f32 %v18495_v23, %v11960_v54  ;;  %v18498_v28 = vld [vmem:[#allocation78_spill] sm:$0xff] }
 0x287   : > { %v5176_v53 = vmul.f32 %v11976_v40, %v18496_v18  ;;  %v6583_v59 = vsel %vm6487_vm5, %v6581_v45, %v6582_v26  ;;  %12097 = vst [vmem:[%s14846_s30 + $0x1c0] sm:$0xff] %v5936_v33  ;;  %v6579_v17 = vrot.slane %v5936_v33, 1  ;;  %v4500_v21 = vadd.f32 %v4468_v19, %v4323_v56  ;;  %v12024_v9 = vld [vmem:[#allocation8 + $0xb9] ss:$0 sm:$0xff]  ;;  %v18501_v63 = vld [vmem:[#allocation79_spill] sm:$0xff]  ;;  %v18502_v56 = vld [vmem:[#allocation82_spill] sm:$0xff] }
 0x288   : > { %v4501_v15 = vadd.f32 %v4469_v38, %v4324_v35  ;;  %6899 = vmatprep.mubr.f32.mxu1 %v6583_v59  ;;  %v6587_v16 = vsel %vm6487_vm5, %v6582_v26, %v6586_v1  ;;  %v5177_v32 = vmul.f32 %v18497_v41, %v11976_v40  ;;  %v5353_v58 = vmul.f32 %v11992_v20, %v18498_v28  ;;  %v18500_v50 = vld [vmem:[#allocation80_spill] sm:$0xff]  ;;  %v11716_v19 = vld [vmem:[#allocation5 + $0x29] ss:$0 sm:$0xff]  ;;  %v18503_v26 = vld [vmem:[#allocation81_spill] sm:$0xff] }
 0x289   : > { %v5354_v54 = vmul.f32 %v18499_v49, %v11992_v20  ;;  %v4677_v18 = vadd.f32 %v4645_v5, %v4500_v21  ;;  %v5530_v45 = vmul.f32 %v12008_v10, %v18500_v50  ;;  %v5531_v33 = vmul.f32 %v18501_v63, %v12008_v10  ;;  %v11732_v38 = vld [vmem:[#allocation5 + $0x39] ss:$0 sm:$0xff]  ;;  %v18504_v40 = vld [vmem:[#allocation50_spill] sm:$0xff]  ;;  %v18506_v28 = vld [vmem:[#allocation57_spill] sm:$0xff] }
 0x28a   : > { %v4678_v23 = vadd.f32 %v4646_v31, %v4501_v15  ;;  %v5707_v59 = vmul.f32 %v12024_v9, %v18502_v56  ;;  %v5708_v35 = vmul.f32 %v18503_v26, %v12024_v9  ;;  %v18505_v1 = vrot.slane %v18504_v40, 2  ;;  %v18508_v10 = vld [vmem:[#allocation42_spill] sm:$0xff]  ;;  %v18509_v63 = vld [vmem:[#allocation45_spill] sm:$0xff] }
 0x28b   : > { %v18507_v41 = vrot.slane %v18506_v28, 2  ;;  %v1287_v5 = vmul.f32 %v11684_v4, %v18475_v39  ;;  %v4854_v31 = vadd.f32 %v4822_v62, %v4677_v18  ;;  %v1288_v15 = vmul.f32 %v18508_v10, %v11684_v4  ;;  %v11748_v49 = vld [vmem:[#allocation5 + $0x49] ss:$0 sm:$0xff] }
 0x28c   : > { %v4855_v21 = vadd.f32 %v4823_v6, %v4678_v23  ;;  %v1464_v50 = vmul.f32 %v11700_v52, %v18509_v63  ;;  %v1465_v56 = vmul.f32 %v18455_v34, %v11700_v52  ;;  %v1641_v9 = vmul.f32 %v11716_v19, %v18456_v27  ;;  %v11764_v23 = vld [vmem:[#allocation5 + $0x59] ss:$0 sm:$0xff] }
 0x28d   : > { %v9041_v20 = vsel %vm7323_vm8, %v18507_v41, %v18505_v1  ;;  %v1642_v26 = vmul.f32 %v18423_v30, %v11716_v19  ;;  %v1818_v28 = vmul.f32 %v11732_v38, %v18393_v36  ;;  %v6363_v12 = vld [vmem:[%s14846_s30 + $0x1b0] sm:$0xfe]  ;;  %v6365_v41 = vld [vmem:[%s14846_s30 + $0x1d0] sm:$0x1]  ;;  %v5031_v1 = vadd.f32 %v4999_v7, %v4854_v31  ;;  %v11780_v30 = vld [vmem:[#allocation5 + $0x69] ss:$0 sm:$0xff] }
 0x28e   : > { %9357 = vmatprep.mubr.f32.mxu0 %v9041_v20  ;;  %v5032_v39 = vadd.f32 %v5000_v29, %v4855_v21  ;;  %v1496_v62 = vadd.f32 %v1464_v50, %v1287_v5  ;;  %v1819_v6 = vmul.f32 %v18394_v47, %v11732_v38  ;;  %v6578_v18 = vrot.slane %v6363_v12, 1  ;;  %v11796_v36 = vld [vmem:[#allocation5 + $0x79] ss:$0 sm:$0xff] }
 0x28f   : > { %v6584_v4 = vrot.slane %v6365_v41, 1  ;;  %v1497_v20 = vadd.f32 %v1465_v56, %v1288_v15  ;;  %v1995_v63 = vmul.f32 %v11748_v49, %v18365_v0  ;;  %v5208_v52 = vadd.f32 %v5176_v53, %v5031_v1  ;;  %v6313_v53 = vld [vmem:[#allocation10 + $0x90] sm:$0xff]  ;;  %v15991_v15 = vld [vmem:[%s14846_s30 + $0xc8] sm:$0xfc] }
 0x290   : > { %v5209_v34 = vadd.f32 %v5177_v32, %v5032_v39  ;;  %v1673_v27 = vadd.f32 %v1641_v9, %v1496_v62  ;;  %v1996_v19 = vmul.f32 %v18366_v57, %v11748_v49  ;;  %v6580_v10 = vsel %vm6487_vm5, %v6578_v18, %v6579_v17  ;;  %v6314_v32 = vld [vmem:[#allocation10 + $0x98] sm:$0xff]  ;;  %18510 = vst [vmem:[#allocation47_spill] sm:$0xff] %v15991_v15  ;;  %v18513_v41 = vld [vmem:[#allocation39_spill] sm:$0xff] }
 0x291   : > { %v6585_v50 = vsel %vm6487_vm5, %v6579_v17, %v6584_v4  ;;  %v1674_v7 = vadd.f32 %v1642_v26, %v1497_v20  ;;  %v2172_v29 = vmul.f32 %v11764_v23, %v18367_v60  ;;  %6900 = vmatmul.mubr.f32.gmra.mrb[56].mxu1 %v6580_v10  ;;  %v5385_v12 = vadd.f32 %v5353_v58, %v5208_v52  ;;  %v15987_v26 = vld [vmem:[%s14846_s30 + $0xb0] sm:$0x3]  ;;  %v11865_v20 = vld [vmem:[#allocation8 + $0x1a] ss:$0 sm:$0xff] }
 0x292   : > { %v5386_v38 = vadd.f32 %v5354_v54, %v5209_v34  ;;  %v1850_v56 = vadd.f32 %v1818_v28, %v1673_v27  ;;  %v2173_v39 = vmul.f32 %v18368_v13, %v11764_v23  ;;  %6904 = vmatprep.mubr.f32.mxu1 %v6587_v16  ;;  %v2349_v5 = vmul.f32 %v11780_v30, %v18369_v25  ;;  %v9608_v27 = vld [vmem:[#allocation10 + $0x610] sm:$0xff]  ;;  %v9609_v54 = vld [vmem:[#allocation10 + $0x618] sm:$0xff]  ;;  %v18511_v16 = vld [vmem:[#allocation38_spill] sm:$0xff] }
 0x293   : > { %v1851_v49 = vadd.f32 %v1819_v6, %v1674_v7  ;;  %v2350_v31 = vmul.f32 %v18370_v43, %v11780_v30  ;;  %v2526_v17 = vmul.f32 %v11796_v36, %v18374_v46  ;;  %v5562_v21 = vadd.f32 %v5530_v45, %v5385_v12  ;;  %v18515_v6 = vld [vmem:[#allocation64_spill] sm:$0xff]  ;;  %v18518_v12 = vld [vmem:[#allocation41_spill] sm:$0xff] }
 0x294   : > { %v5563_v10 = vadd.f32 %v5531_v33, %v5386_v38  ;;  %v2027_v58 = vadd.f32 %v1995_v63, %v1850_v56  ;;  %v2527_v34 = vmul.f32 %v18375_v48, %v11796_v36  ;;  %v18512_v28 = vrot.slane %v18511_v16, 2  ;;  %v11849_v33 = vld [vmem:[#allocation8 + $0xa] ss:$0 sm:$0xff] }
 0x295   : > { %v2028_v9 = vadd.f32 %v1996_v19, %v1851_v49  ;;  %v18514_v1 = vrot.slane %v18513_v41, 2  ;;  %v12969_v62 = vpack.c.bf16 %v6314_v32, %v6313_v53  ;;  %v18516_v23 = vrot.slane %v18515_v6, 2  ;;  %6905 = vmatmul.mubr.f32.gmra.mrb[58].mxu1 %v6585_v50  ;;  %v11881_v53 = vld [vmem:[#allocation8 + $0x2a] ss:$0 sm:$0xff] }
 0x296   : > { %v18517_v45 = vrot.slane %v18504_v40, 2  ;;  %v5739_v36 = vadd.f32 %v5707_v59, %v5562_v21  ;;  %v5740_v18 = vadd.f32 %v5708_v35, %v5563_v10  ;;  %v2204_v4 = vadd.f32 %v2172_v29, %v2027_v58  ;;  %v11897_v58 = vld [vmem:[#allocation8 + $0x3a] ss:$0 sm:$0xff] }
 0x297   : > { %v9038_v30 = vsel %vm7323_vm8, %v18514_v1, %v18512_v28  ;;  %v2205_v19 = vadd.f32 %v2173_v39, %v2028_v9  ;;  %12970 = vmatpush1.bf16.msra.mxu1 %v12969_v62  ;;  %v13185_v7 = vpack.c.bf16 %v9609_v54, %v9608_v27  ;;  %v18519_v38 = vrot.slane %v18518_v12, 2  ;;  %v11913_v27 = vld [vmem:[#allocation8 + $0x4a] ss:$0 sm:$0xff] }
 0x298   : > { %v9045_v63 = vsel %vm7323_vm8, %v18517_v45, %v18516_v23  ;;  %9358 = vmatmul.mubr.f32.gmra.mrb[24].mxu0 %v9038_v30  ;;  %v18520_v56 = vmov %v18512_v28  ;;  %v6114_v35 = vrot.slane %v5739_v36, 7  ;;  %v6115_v50 = vrot.slane %v5740_v18, 7  ;;  %12971 = vmatprep.subr.bf16.mxu1 %v18404_v8  ;;  %v11929_v30 = vld [vmem:[#allocation8 + $0x5a] ss:$0 sm:$0xff]  ;;  %v11945_v62 = vld [vmem:[#allocation8 + $0x6a] ss:$0 sm:$0xff] }
 0x299   : > { %9362 = vmatprep.mubr.f32.mxu0 %v9045_v63  ;;  %v9043_v40 = vsel %vm7323_vm8, %v18520_v56, %v18519_v38  ;;  %v2381_v29 = vadd.f32 %v2349_v5, %v2204_v4  ;;  %v3762_v32 = vmul.f32 %v11849_v33, %v18376_v2  ;;  %v2382_v39 = vadd.f32 %v2350_v31, %v2205_v19  ;;  %v11961_v63 = vld [vmem:[#allocation8 + $0x7a] ss:$0 sm:$0xff]  ;;  %v11977_v4 = vld [vmem:[#allocation8 + $0x8a] ss:$0 sm:$0xff]  ;;  %v18522_v38 = vld [vmem:[#allocation71_spill] sm:$0xff] }
 0x29a   : > { %13186 = vmatpush1.bf16.msra.mxu0 %v13185_v7  ;;  %v3763_v49 = vmul.f32 %v15026_v22, %v11849_v33  ;;  %v3939_v21 = vmul.f32 %v11865_v20, %v15034_v11  ;;  %v3940_v10 = vmul.f32 %v15028_v14, %v11865_v20  ;;  %v16016_v54 = vsel %vm5909_vm6, %v6114_v35, %v6115_v50  ;;  %v18521_v7 = vld [vmem:[#allocation72_spill] sm:$0xff] }
 0x29b   : > { %12147 = vst [vmem:[%s14846_s30 + $0x1e8] sm:$0xfe] %v6114_v35  ;;  %12149 = vst [vmem:[%s14846_s30 + $0x208] sm:$0x1] %v6115_v50  ;;  %v2558_v5 = vadd.f32 %v2526_v17, %v2381_v29  ;;  %v4116_v9 = vmul.f32 %v11881_v53, %v15054_v61  ;;  %v4117_v31 = vmul.f32 %v15046_v51, %v11881_v53  ;;  %v6592_v16 = vrot.slane %v16016_v54, 1  ;;  %v18523_v29 = vld [vmem:[#allocation74_spill] sm:$0xff] }
 0x29c   : > { %9363 = vmatmul.mubr.f32.gmra.mrb[26].mxu0 %v9043_v40  ;;  %12148 = vst [vmem:[%s14846_s30 + $0x1f8] sm:$0xff] %v16016_v54  ;;  %v2559_v28 = vadd.f32 %v2527_v34, %v2382_v39  ;;  %v3971_v41 = vadd.f32 %v3939_v21, %v3762_v32  ;;  %v3972_v1 = vadd.f32 %v3940_v10, %v3763_v49  ;;  %v11993_v40 = vld [vmem:[#allocation8 + $0x9a] ss:$0 sm:$0xff]  ;;  %v12009_v39 = vld [vmem:[#allocation8 + $0xaa] ss:$0 sm:$0xff]  ;;  %v18524_v21 = vld [vmem:[#allocation73_spill] sm:$0xff] }
 0x29d   : > { %13187 = vmatprep.subr.bf16.mxu0 %v18404_v8  ;;  %v5937_v6 = vrot.slane %v2558_v5, 7  ;;  %v4293_v17 = vmul.f32 %v11897_v58, %v15063_v24  ;;  %v4294_v23 = vmul.f32 %v15056_v42, %v11897_v58  ;;  %v4470_v45 = vmul.f32 %v11913_v27, %v15085_v55  ;;  %v18525_v58 = vld [vmem:[#allocation76_spill] sm:$0xff]  ;;  %v18526_v54 = vld [vmem:[#allocation75_spill] sm:$0xff] }
 0x29e   : > { %v5938_v33 = vrot.slane %v2559_v28, 7  ;;  %v4148_v36 = vadd.f32 %v4116_v9, %v3971_v41  ;;  %v4149_v34 = vadd.f32 %v4117_v31, %v3972_v1  ;;  %v4471_v18 = vmul.f32 %v15079_v3, %v11913_v27  ;;  %v12025_v9 = vld [vmem:[#allocation8 + $0xba] ss:$0 sm:$0xff] }
 0x29f   : > { %12099 = vst [vmem:[%s14846_s30 + $0x1e0] sm:$0xfe] %v5937_v6  ;;  %v4647_v20 = vmul.f32 %v11929_v30, %v15090_v44  ;;  %v4648_v19 = vmul.f32 %v18491_v37, %v11929_v30  ;;  %v4824_v12 = vmul.f32 %v11945_v62, %v18521_v7  ;;  %v4825_v56 = vmul.f32 %v18522_v38, %v11945_v62  ;;  %v18527_v30 = vld [vmem:[#allocation78_spill] sm:$0xff]  ;;  %v18544_v7 = vld [vmem:[#allocation49_spill] sm:$0xff] }
 0x2a0   : > { %v5939_v53 = vsel %vm5909_vm6, %v5937_v6, %v5938_v33  ;;  %12101 = vst [vmem:[%s14846_s30 + $0x200] sm:$0x1] %v5938_v33  ;;  %v4325_v35 = vadd.f32 %v4293_v17, %v4148_v36  ;;  %v4326_v50 = vadd.f32 %v4294_v23, %v4149_v34  ;;  %v5001_v32 = vmul.f32 %v11961_v63, %v18523_v29  ;;  %v18528_v6 = vld [vmem:[#allocation77_spill] sm:$0xff]  ;;  %v11685_v23 = vld [vmem:[#allocation5 + $0xa] ss:$0 sm:$0xff]  ;;  %v18529_v34 = vld [vmem:[#allocation80_spill] sm:$0xff] }
 0x2a1   : > { %12100 = vst [vmem:[%s14846_s30 + $0x1f0] sm:$0xff] %v5939_v53  ;;  %v6589_v49 = vrot.slane %v5939_v53, 1  ;;  %v5002_v10 = vmul.f32 %v18524_v21, %v11961_v63  ;;  %v5178_v27 = vmul.f32 %v11977_v4, %v18525_v58  ;;  %v5179_v5 = vmul.f32 %v18526_v54, %v11977_v4  ;;  %v18530_v63 = vld [vmem:[#allocation79_spill] sm:$0xff]  ;;  %v18531_v4 = vld [vmem:[#allocation82_spill] sm:$0xff]  ;;  %v16065_v58 = vld [vmem:[%s14846_s30 + $0xd8] sm:$0xff] }
 0x2a2   : > { %v6368_v31 = vld [vmem:[%s14846_s30 + $0x1e8] sm:$0xfe]  ;;  %v6370_v28 = vld [vmem:[%s14846_s30 + $0x208] sm:$0x1]  ;;  %v4502_v41 = vadd.f32 %v4470_v45, %v4325_v35  ;;  %v4503_v1 = vadd.f32 %v4471_v18, %v4326_v50  ;;  %v5355_v62 = vmul.f32 %v11993_v40, %v18527_v30  ;;  %v5356_v17 = vmul.f32 %v18528_v6, %v11993_v40  ;;  %v18532_v45 = vld [vmem:[#allocation81_spill] sm:$0xff]  ;;  %18539 = vst [vmem:[#allocation83_spill] sm:$0xff] %v16065_v58 }
 0x2a3   : > { %v6591_v33 = vrot.slane %v6368_v31, 1  ;;  %v6596_v36 = vrot.slane %v6370_v28, 1  ;;  %v5532_v53 = vmul.f32 %v12009_v39, %v18529_v34  ;;  %v5533_v59 = vmul.f32 %v18530_v63, %v12009_v39  ;;  %v11701_v35 = vld [vmem:[#allocation5 + $0x1a] ss:$0 sm:$0xff]  ;;  %v11717_v40 = vld [vmem:[#allocation5 + $0x2a] ss:$0 sm:$0xff] }
 0x2a4   : > { %v4679_v52 = vadd.f32 %v4647_v20, %v4502_v41  ;;  %v4680_v15 = vadd.f32 %v4648_v19, %v4503_v1  ;;  %v16049_v54 = vmul.f32 %v12025_v9, %v18531_v4  ;;  %v16052_v18 = vmul.f32 %v18532_v45, %v12025_v9  ;;  %v18533_v28 = vld [vmem:[#allocation59_spill] sm:$0xff]  ;;  %v18535_v6 = vld [vmem:[#allocation40_spill] sm:$0xff]  ;;  %v18538_v45 = vld [vmem:[#allocation42_spill] sm:$0xff] }
 0x2a5   : > { %v6593_v50 = vsel %vm6487_vm5, %v6591_v33, %v6592_v16  ;;  %v6597_v31 = vsel %vm6487_vm5, %v6592_v16, %v6596_v36  ;;  %v18534_v34 = vrot.slane %v18533_v28, 2  ;;  %v18536_v39 = vrot.slane %v18535_v6, 2  ;;  %v18537_v19 = vld [vmem:[#allocation44_spill] sm:$0xff]  ;;  %v18540_v21 = vld [vmem:[#allocation45_spill] sm:$0xff]  ;;  %v18541_v29 = vld [vmem:[#allocation43_spill] sm:$0xff] }
 0x2a6   : > { %v1289_v41 = vmul.f32 %v11685_v23, %v18537_v19  ;;  %6909 = vmatprep.mubr.f32.mxu1 %v6593_v50  ;;  %v6367_v1 = vld [vmem:[%s14846_s30 + $0x1e0] sm:$0xfe]  ;;  %v4856_v4 = vadd.f32 %v4824_v12, %v4679_v52  ;;  %v4857_v9 = vadd.f32 %v4825_v56, %v4680_v15  ;;  %v1290_v63 = vmul.f32 %v18538_v45, %v11685_v23  ;;  %v11733_v30 = vld [vmem:[#allocation5 + $0x3a] ss:$0 sm:$0xff]  ;;  %v11749_v56 = vld [vmem:[#allocation5 + $0x4a] ss:$0 sm:$0xff] }
 0x2a7   : > { %v9051_v20 = vsel %vm7323_vm8, %v18536_v39, %v18534_v34  ;;  %v6588_v33 = vrot.slane %v6367_v1, 1  ;;  %v6369_v36 = vld [vmem:[%s14846_s30 + $0x200] sm:$0x1]  ;;  %v1466_v6 = vmul.f32 %v11701_v35, %v18540_v21  ;;  %v1467_v34 = vmul.f32 %v18541_v29, %v11701_v35  ;;  %v18542_v39 = vld [vmem:[#allocation48_spill] sm:$0xff]  ;;  %v18543_v15 = vld [vmem:[#allocation46_spill] sm:$0xff] }
 0x2a8   : > { %9367 = vmatprep.mubr.f32.mxu0 %v9051_v20  ;;  %v1643_v19 = vmul.f32 %v11717_v40, %v18542_v39  ;;  %v6594_v50 = vrot.slane %v6369_v36, 1  ;;  %v5033_v38 = vadd.f32 %v5001_v32, %v4856_v4  ;;  %v5034_v52 = vadd.f32 %v5002_v10, %v4857_v9  ;;  %v11765_v1 = vld [vmem:[#allocation5 + $0x5a] ss:$0 sm:$0xff]  ;;  %v11781_v36 = vld [vmem:[#allocation5 + $0x6a] ss:$0 sm:$0xff] }
 0x2a9   : > { %v1644_v12 = vmul.f32 %v18543_v15, %v11717_v40  ;;  %v6590_v23 = vsel %vm6487_vm5, %v6588_v33, %v6589_v49  ;;  %v1498_v20 = vadd.f32 %v1466_v6, %v1289_v41  ;;  %v1499_v45 = vadd.f32 %v1467_v34, %v1290_v63  ;;  %v11797_v41 = vld [vmem:[#allocation5 + $0x7a] ss:$0 sm:$0xff]  ;;  %v9611_v6 = vld [vmem:[#allocation10 + $0x628] sm:$0xff] }
 0x2aa   : > { %v1820_v16 = vmul.f32 %v11733_v30, %v18544_v7  ;;  %6910 = vmatmul.mubr.f32.gmra.mrb[60].mxu1 %v6590_v23  ;;  %v6595_v21 = vsel %vm6487_vm5, %v6589_v49, %v6594_v50  ;;  %v5210_v58 = vadd.f32 %v5178_v27, %v5033_v38  ;;  %v5211_v35 = vadd.f32 %v5179_v5, %v5034_v52  ;;  %v6315_v38 = vld [vmem:[#allocation10 + $0xa0] sm:$0xff]  ;;  %v6316_v27 = vld [vmem:[#allocation10 + $0xa8] sm:$0xff] }
 0x2ab   : > { %v1821_v39 = vmul.f32 %v18394_v47, %v11733_v30  ;;  %6914 = vmatprep.mubr.f32.mxu1 %v6597_v31  ;;  %v1675_v32 = vadd.f32 %v1643_v19, %v1498_v20  ;;  %v1676_v10 = vadd.f32 %v1644_v12, %v1499_v45  ;;  %v1997_v4 = vmul.f32 %v11749_v56, %v18365_v0  ;;  %v9610_v19 = vld [vmem:[#allocation10 + $0x620] sm:$0xff] }
 0x2ac   : > { %v1998_v40 = vmul.f32 %v18366_v57, %v11749_v56  ;;  %v5387_v63 = vadd.f32 %v5355_v62, %v5210_v58  ;;  %v5388_v9 = vadd.f32 %v5356_v17, %v5211_v35  ;;  %v2174_v33 = vmul.f32 %v11765_v1, %v18367_v60  ;;  %v16086_v17 = vld [vmem:[%s14846_s30 + $0xc0] sm:$0xfc]  ;;  %v18545_v56 = vld [vmem:[#allocation63_spill] sm:$0xff]  ;;  %v11850_v35 = vld [vmem:[#allocation8 + $0xb] ss:$0 sm:$0xff] }
 0x2ad   : > { %v2175_v49 = vmul.f32 %v18368_v13, %v11765_v1  ;;  %v1852_v5 = vadd.f32 %v1820_v16, %v1675_v32  ;;  %v1853_v30 = vadd.f32 %v1821_v39, %v1676_v10  ;;  %v2351_v31 = vmul.f32 %v11781_v36, %v18369_v25  ;;  %v18547_v39 = vld [vmem:[#allocation58_spill] sm:$0xff] }
 0x2ae   : > { %v2352_v45 = vmul.f32 %v18370_v43, %v11781_v36  ;;  %6915 = vmatmul.mubr.f32.gmra.mrb[62].mxu1 %v6595_v21  ;;  %v5564_v34 = vadd.f32 %v5532_v53, %v5387_v63  ;;  %v5565_v50 = vadd.f32 %v5533_v59, %v5388_v9  ;;  %v2528_v58 = vmul.f32 %v11797_v41, %v18374_v46  ;;  %v18549_v53 = vld [vmem:[#allocation62_spill] sm:$0xff] }
 0x2af   : > { %v2529_v62 = vmul.f32 %v18375_v48, %v11797_v41  ;;  %v2029_v52 = vadd.f32 %v1997_v4, %v1852_v5  ;;  %v2030_v12 = vadd.f32 %v1998_v40, %v1853_v30  ;;  %v18546_v16 = vrot.slane %v18545_v56, 2  ;;  %v11866_v40 = vld [vmem:[#allocation8 + $0x1b] ss:$0 sm:$0xff] }
 0x2b0   : > { %v18548_v23 = vrot.slane %v18547_v39, 2  ;;  %v12972_v1 = vpack.c.bf16 %v6316_v27, %v6315_v38  ;;  %v5741_v21 = vadd.f32 %v16049_v54, %v5564_v34  ;;  %v5742_v59 = vadd.f32 %v16052_v18, %v5565_v50  ;;  %v11882_v18 = vld [vmem:[#allocation8 + $0x2b] ss:$0 sm:$0xff]  ;;  %v11898_v27 = vld [vmem:[#allocation8 + $0x3b] ss:$0 sm:$0xff] }
 0x2b1   : > { %v18550_v36 = vrot.slane %v18549_v53, 2  ;;  %v18551_v32 = vrot.slane %v18533_v28, 2  ;;  %v13188_v4 = vpack.c.bf16 %v9611_v6, %v9610_v19  ;;  %v2206_v41 = vadd.f32 %v2174_v33, %v2029_v52  ;;  %v11914_v50 = vld [vmem:[#allocation8 + $0x4b] ss:$0 sm:$0xff] }
 0x2b2   : > { %v9048_v20 = vsel %vm7323_vm8, %v18548_v23, %v18546_v16  ;;  %v2207_v63 = vadd.f32 %v2175_v49, %v2030_v12  ;;  %12973 = vmatpush1.bf16.msra.mxu1 %v12972_v1  ;;  %v18552_v9 = vrot.slane %v15987_v26, 2  ;;  %v18553_v38 = vmov %v18546_v16  ;;  %v11946_v1 = vld [vmem:[#allocation8 + $0x6b] ss:$0 sm:$0xff] }
 0x2b3   : > { %9368 = vmatmul.mubr.f32.gmra.mrb[28].mxu0 %v9048_v20  ;;  %v9055_v10 = vsel %vm7323_vm8, %v18551_v32, %v18550_v36  ;;  %v6117_v5 = vrot.slane %v5741_v21, 7  ;;  %v6118_v30 = vrot.slane %v5742_v59, 7  ;;  %v3764_v33 = vmul.f32 %v11850_v35, %v18376_v2  ;;  %12974 = vmatprep.subr.bf16.mxu1 %v18404_v8  ;;  %v11962_v36 = vld [vmem:[#allocation8 + $0x7b] ss:$0 sm:$0xff]  ;;  %v11686_v28 = vld [vmem:[#allocation5 + $0xb] ss:$0 sm:$0xff] }
 0x2b4   : > { %9372 = vmatprep.mubr.f32.mxu0 %v9055_v10  ;;  %v9053_v54 = vsel %vm7323_vm8, %v18553_v38, %v18552_v9  ;;  %13189 = vmatpush1.bf16.msra.mxu0 %v13188_v4  ;;  %v3765_v49 = vmul.f32 %v15026_v22, %v11850_v35  ;;  %v2383_v26 = vadd.f32 %v2351_v31, %v2206_v41  ;;  %v18555_v38 = vld [vmem:[#allocation71_spill] sm:$0xff] }
 0x2b5   : > { %v2384_v19 = vadd.f32 %v2352_v45, %v2207_v63  ;;  %v3941_v6 = vmul.f32 %v11866_v40, %v15034_v11  ;;  %v3942_v34 = vmul.f32 %v15028_v14, %v11866_v40  ;;  %13190 = vmatprep.subr.bf16.mxu0 %v18404_v8  ;;  %v16113_v52 = vsel %vm5909_vm6, %v6117_v5, %v6118_v30  ;;  %v11930_v45 = vld [vmem:[#allocation8 + $0x5b] ss:$0 sm:$0xff] }
 0x2b6   : > { %12150 = vst [vmem:[%s14846_s30 + $0x218] sm:$0xfe] %v6117_v5  ;;  %12152 = vst [vmem:[%s14846_s30 + $0x238] sm:$0x1] %v6118_v30  ;;  %v4118_v12 = vmul.f32 %v11882_v18, %v15054_v61  ;;  %v4119_v56 = vmul.f32 %v15046_v51, %v11882_v18  ;;  %v4295_v31 = vmul.f32 %v11898_v27, %v15063_v24  ;;  %v6602_v16 = vrot.slane %v16113_v52, 1  ;;  %v18554_v63 = vld [vmem:[#allocation72_spill] sm:$0xff] }
 0x2b7   : > { %9373 = vmatmul.mubr.f32.gmra.mrb[30].mxu0 %v9053_v54  ;;  %12151 = vst [vmem:[%s14846_s30 + $0x228] sm:$0xff] %v16113_v52  ;;  %v2560_v39 = vadd.f32 %v2528_v58, %v2383_v26  ;;  %v2561_v23 = vadd.f32 %v2529_v62, %v2384_v19  ;;  %v3973_v20 = vadd.f32 %v3941_v6, %v3764_v33  ;;  %v11978_v58 = vld [vmem:[#allocation8 + $0x8b] ss:$0 sm:$0xff]  ;;  %v11994_v18 = vld [vmem:[#allocation8 + $0x9b] ss:$0 sm:$0xff]  ;;  %v18557_v26 = vld [vmem:[#allocation73_spill] sm:$0xff] }
 0x2b8   : > { %v3974_v35 = vadd.f32 %v3942_v34, %v3765_v49  ;;  %v4296_v21 = vmul.f32 %v15056_v42, %v11898_v27  ;;  %v4472_v59 = vmul.f32 %v11914_v50, %v15085_v55  ;;  %v4473_v53 = vmul.f32 %v15079_v3, %v11914_v50  ;;  %v12010_v27 = vld [vmem:[#allocation8 + $0xab] ss:$0 sm:$0xff]  ;;  %v18558_v50 = vld [vmem:[#allocation76_spill] sm:$0xff] }
 0x2b9   : > { %v5940_v32 = vrot.slane %v2560_v39, 7  ;;  %v5941_v10 = vrot.slane %v2561_v23, 7  ;;  %v4150_v4 = vadd.f32 %v4118_v12, %v3973_v20  ;;  %v4649_v40 = vmul.f32 %v11930_v45, %v15090_v44  ;;  %v18556_v33 = vld [vmem:[#allocation74_spill] sm:$0xff]  ;;  %v18559_v12 = vld [vmem:[#allocation75_spill] sm:$0xff]  ;;  %v18573_v3 = vld [vmem:[#allocation48_spill] sm:$0xff] }
 0x2ba   : > { %v4151_v62 = vadd.f32 %v4119_v56, %v3974_v35  ;;  %v4650_v41 = vmul.f32 %v18491_v37, %v11930_v45  ;;  %v4826_v9 = vmul.f32 %v11946_v1, %v18554_v63  ;;  %v4827_v54 = vmul.f32 %v18555_v38, %v11946_v1  ;;  %v12026_v45 = vld [vmem:[#allocation8 + $0xbb] ss:$0 sm:$0xff]  ;;  %v18560_v1 = vld [vmem:[#allocation78_spill] sm:$0xff]  ;;  %v18572_v38 = vld [vmem:[#allocation45_spill] sm:$0xff] }
 0x2bb   : > { %v5942_v5 = vsel %vm5909_vm6, %v5940_v32, %v5941_v10  ;;  %12102 = vst [vmem:[%s14846_s30 + $0x210] sm:$0xfe] %v5940_v32  ;;  %12104 = vst [vmem:[%s14846_s30 + $0x230] sm:$0x1] %v5941_v10  ;;  %v4327_v30 = vadd.f32 %v4295_v31, %v4150_v4  ;;  %v5003_v49 = vmul.f32 %v11962_v36, %v18556_v33  ;;  %v18561_v32 = vld [vmem:[#allocation77_spill] sm:$0xff]  ;;  %v18562_v31 = vld [vmem:[#allocation80_spill] sm:$0xff] }
 0x2bc   : > { %v5004_v19 = vmul.f32 %v18557_v26, %v11962_v36  ;;  %12103 = vst [vmem:[%s14846_s30 + $0x220] sm:$0xff] %v5942_v5  ;;  %v6599_v6 = vrot.slane %v5942_v5, 1  ;;  %v4328_v34 = vadd.f32 %v4296_v21, %v4151_v62  ;;  %v5180_v52 = vmul.f32 %v11978_v58, %v18558_v50  ;;  %v18563_v21 = vld [vmem:[#allocation79_spill] sm:$0xff]  ;;  %v11702_v50 = vld [vmem:[#allocation5 + $0x1b] ss:$0 sm:$0xff] }
 0x2bd   : > { %v5181_v56 = vmul.f32 %v18559_v12, %v11978_v58  ;;  %v6372_v39 = vld [vmem:[%s14846_s30 + $0x218] sm:$0xfe]  ;;  %v6374_v23 = vld [vmem:[%s14846_s30 + $0x238] sm:$0x1]  ;;  %v4504_v20 = vadd.f32 %v4472_v59, %v4327_v30  ;;  %v5357_v35 = vmul.f32 %v11994_v18, %v18560_v1  ;;  %v5358_v10 = vmul.f32 %v18561_v32, %v11994_v18  ;;  %v18564_v12 = vld [vmem:[#allocation82_spill] sm:$0xff] }
 0x2be   : > { %v16143_v4 = vmul.f32 %v12010_v27, %v18562_v31  ;;  %v6601_v36 = vrot.slane %v6372_v39, 1  ;;  %v6606_v26 = vrot.slane %v6374_v23, 1  ;;  %v4505_v5 = vadd.f32 %v4473_v53, %v4328_v34  ;;  %v18565_v59 = vld [vmem:[#allocation81_spill] sm:$0xff]  ;;  %v18566_v18 = vld [vmem:[#allocation83_spill] sm:$0xff]  ;;  %v11718_v53 = vld [vmem:[#allocation5 + $0x2b] ss:$0 sm:$0xff] }
 0x2bf   : > { %v16146_v62 = vmul.f32 %v18563_v21, %v12010_v27  ;;  %v4681_v58 = vadd.f32 %v4649_v40, %v4504_v20  ;;  %v16149_v33 = vmul.f32 %v12026_v45, %v18564_v12  ;;  %v16152_v30 = vmul.f32 %v18565_v59, %v12026_v45  ;;  %v18568_v31 = vld [vmem:[#allocation47_spill] sm:$0xff]  ;;  %v11734_v34 = vld [vmem:[#allocation5 + $0x3b] ss:$0 sm:$0xff]  ;;  %v18571_v59 = vld [vmem:[#allocation42_spill] sm:$0xff] }
 0x2c0   : > { %v18567_v32 = vrot.slane %v18566_v18, 2  ;;  %v18569_v1 = vrot.slane %v18568_v31, 2  ;;  %v6603_v27 = vsel %vm6487_vm5, %v6601_v36, %v6602_v16  ;;  %v6607_v40 = vsel %vm6487_vm5, %v6602_v16, %v6606_v26  ;;  %v18570_v20 = vld [vmem:[#allocation44_spill] sm:$0xff]  ;;  %v11750_v37 = vld [vmem:[#allocation5 + $0x4b] ss:$0 sm:$0xff] }
 0x2c1   : > { %v4682_v23 = vadd.f32 %v4650_v41, %v4505_v5  ;;  %v1291_v12 = vmul.f32 %v11686_v28, %v18570_v20  ;;  %6919 = vmatprep.mubr.f32.mxu1 %v6603_v27  ;;  %v4858_v45 = vadd.f32 %v4826_v9, %v4681_v58  ;;  %v1292_v21 = vmul.f32 %v18571_v59, %v11686_v28  ;;  %v11766_v58 = vld [vmem:[#allocation5 + $0x5b] ss:$0 sm:$0xff] }
 0x2c2   : > { %v9061_v39 = vsel %vm7323_vm8, %v18569_v1, %v18567_v32  ;;  %v1468_v63 = vmul.f32 %v11702_v50, %v18572_v38  ;;  %v1469_v31 = vmul.f32 %v18541_v29, %v11702_v50  ;;  %v6371_v1 = vld [vmem:[%s14846_s30 + $0x210] sm:$0xfe]  ;;  %v6373_v32 = vld [vmem:[%s14846_s30 + $0x230] sm:$0x1]  ;;  %v1645_v36 = vmul.f32 %v11718_v53, %v18573_v3  ;;  %v11782_v29 = vld [vmem:[#allocation5 + $0x6b] ss:$0 sm:$0xff] }
 0x2c3   : > { %9377 = vmatprep.mubr.f32.mxu0 %v9061_v39  ;;  %v4859_v44 = vadd.f32 %v4827_v54, %v4682_v23  ;;  %v1646_v16 = vmul.f32 %v18543_v15, %v11718_v53  ;;  %v1822_v41 = vmul.f32 %v11734_v34, %v18544_v7  ;;  %v6598_v26 = vrot.slane %v6371_v1, 1  ;;  %v11798_v7 = vld [vmem:[#allocation5 + $0x7b] ss:$0 sm:$0xff] }
 0x2c4   : > { %v6604_v5 = vrot.slane %v6373_v32, 1  ;;  %v5035_v39 = vadd.f32 %v5003_v49, %v4858_v45  ;;  %v1500_v9 = vadd.f32 %v1468_v63, %v1291_v12  ;;  %v1501_v27 = vadd.f32 %v1469_v31, %v1292_v21  ;;  %v12343_v45 = vld [vmem:[%s14846_s30 + $0xe8] sm:$0x3] }
 0x2c5   : > { %v5036_v28 = vadd.f32 %v5004_v19, %v4859_v44  ;;  %v1823_v38 = vmul.f32 %v18394_v47, %v11734_v34  ;;  %v1999_v50 = vmul.f32 %v11750_v37, %v18365_v0  ;;  %v6600_v54 = vsel %vm6487_vm5, %v6598_v26, %v6599_v6  ;;  %v6317_v34 = vld [vmem:[#allocation10 + $0xb0] sm:$0xff] }
 0x2c6   : > { %v6605_v23 = vsel %vm6487_vm5, %v6599_v6, %v6604_v5  ;;  %v5212_v53 = vadd.f32 %v5180_v52, %v5035_v39  ;;  %v1677_v15 = vadd.f32 %v1645_v36, %v1500_v9  ;;  %6920 = vmatmul.mubr.f32.gmra.mrb[64].mxu1 %v6600_v54  ;;  %v1678_v49 = vadd.f32 %v1646_v16, %v1501_v27  ;;  %v6318_v52 = vld [vmem:[#allocation10 + $0xb8] sm:$0xff]  ;;  %v9612_v36 = vld [vmem:[#allocation10 + $0x630] sm:$0xff]  ;;  %v12342_v5 = vld [vmem:[%s14846_s30 + $0xe0] sm:$0x3] }
 0x2c7   : > { %v5213_v1 = vadd.f32 %v5181_v56, %v5036_v28  ;;  %v2000_v63 = vmul.f32 %v18366_v57, %v11750_v37  ;;  %v2176_v44 = vmul.f32 %v11766_v58, %v18367_v60  ;;  %6924 = vmatprep.mubr.f32.mxu1 %v6607_v40  ;;  %v2177_v21 = vmul.f32 %v18368_v13, %v11766_v58  ;;  %v9613_v16 = vld [vmem:[#allocation10 + $0x638] sm:$0xff]  ;;  %v11851_v58 = vld [vmem:[#allocation8 + $0xc] ss:$0 sm:$0xff] }
 0x2c8   : > { %v5389_v19 = vadd.f32 %v5357_v35, %v5212_v53  ;;  %v1854_v12 = vadd.f32 %v1822_v41, %v1677_v15  ;;  %v2353_v6 = vmul.f32 %v11782_v29, %v18369_v25  ;;  %v1855_v32 = vadd.f32 %v1823_v38, %v1678_v49  ;;  %v13951_v41 = vld [vmem:[%s14846_s30 + $0xd0] sm:$0xff]  ;;  %v11867_v54 = vld [vmem:[#allocation8 + $0x1c] ss:$0 sm:$0xff]  ;;  %v11883_v49 = vld [vmem:[#allocation8 + $0x2c] ss:$0 sm:$0xff] }
 0x2c9   : > { %v5390_v31 = vadd.f32 %v5358_v10, %v5213_v1  ;;  %v2354_v56 = vmul.f32 %v18370_v43, %v11782_v29  ;;  %v2530_v37 = vmul.f32 %v11798_v7, %v18374_v46  ;;  %v2531_v15 = vmul.f32 %v18375_v48, %v11798_v7 }
 0x2ca   : > { %v5566_v35 = vadd.f32 %v16143_v4, %v5389_v19  ;;  %v2031_v40 = vadd.f32 %v1999_v50, %v1854_v12  ;;  %v9057_v26 = vrot.slane %v13951_v41, 2  ;;  %6925 = vmatmul.mubr.f32.gmra.mrb[66].mxu1 %v6605_v23  ;;  %v2032_v9 = vadd.f32 %v2000_v63, %v1855_v32 }
 0x2cb   : > { %v5567_v39 = vadd.f32 %v16146_v62, %v5390_v31  ;;  %v12975_v10 = vpack.c.bf16 %v6318_v52, %v6317_v34  ;;  %v9064_v38 = vrot.slane %v12343_v45, 2  ;;  %v18574_v27 = vrot.slane %v16086_v17, 2  ;;  %v11915_v31 = vld [vmem:[#allocation8 + $0x4c] ss:$0 sm:$0xff] }
 0x2cc   : > { %v5743_v29 = vadd.f32 %v16149_v33, %v5566_v35  ;;  %v2208_v28 = vadd.f32 %v2176_v44, %v2031_v40  ;;  %v13191_v50 = vpack.c.bf16 %v9613_v16, %v9612_v36  ;;  %v2209_v53 = vadd.f32 %v2177_v21, %v2032_v9  ;;  %v11931_v35 = vld [vmem:[#allocation8 + $0x5c] ss:$0 sm:$0xff]  ;;  %v11947_v40 = vld [vmem:[#allocation8 + $0x6c] ss:$0 sm:$0xff] }
 0x2cd   : > { %v9058_v4 = vsel %vm7323_vm8, %v18574_v27, %v9057_v26  ;;  %v5744_v7 = vadd.f32 %v16152_v30, %v5567_v39  ;;  %12976 = vmatpush1.bf16.msra.mxu1 %v12975_v10  ;;  %v18575_v62 = vrot.slane %v18566_v18, 2  ;;  %v9062_v1 = vrot.slane %v12342_v5, 2  ;;  %v11899_v30 = vld [vmem:[#allocation8 + $0x3c] ss:$0 sm:$0xff]  ;;  %v18577_v27 = vld [vmem:[#allocation70_spill] sm:$0xff] }
 0x2ce   : > { %9378 = vmatmul.mubr.f32.gmra.mrb[32].mxu0 %v9058_v4  ;;  %v6120_v33 = vrot.slane %v5743_v29, 7  ;;  %v2385_v63 = vadd.f32 %v2353_v6, %v2208_v28  ;;  %v3766_v17 = vmul.f32 %v11851_v58, %v18376_v2  ;;  %v3767_v44 = vmul.f32 %v15026_v22, %v11851_v58  ;;  %12977 = vmatprep.subr.bf16.mxu1 %v18404_v8  ;;  %v11963_v39 = vld [vmem:[#allocation8 + $0x7c] ss:$0 sm:$0xff]  ;;  %v11979_v29 = vld [vmem:[#allocation8 + $0x8c] ss:$0 sm:$0xff] }
 0x2cf   : > { %v9065_v23 = vsel %vm7323_vm8, %v18575_v62, %v9064_v38  ;;  %13192 = vmatpush1.bf16.msra.mxu0 %v13191_v50  ;;  %v6121_v19 = vrot.slane %v5744_v7, 7  ;;  %v2386_v12 = vadd.f32 %v2354_v56, %v2209_v53  ;;  %v9063_v21 = vsel %vm7323_vm8, %v9057_v26, %v9062_v1  ;;  %v18576_v38 = vld [vmem:[#allocation68_spill] sm:$0xff]  ;;  %v18578_v50 = vld [vmem:[#allocation69_spill] sm:$0xff] }
 0x2d0   : > { %9382 = vmatprep.mubr.f32.mxu0 %v9065_v23  ;;  %v3943_v18 = vmul.f32 %v11867_v54, %v15034_v11  ;;  %13193 = vmatprep.subr.bf16.mxu0 %v18404_v8  ;;  %12153 = vst [vmem:[%s14846_s30 + $0x248] sm:$0xfe] %v6120_v33  ;;  %v2562_v6 = vadd.f32 %v2530_v37, %v2385_v63  ;;  %v18579_v7 = vld [vmem:[#allocation72_spill] sm:$0xff]  ;;  %v11995_v62 = vld [vmem:[#allocation8 + $0x9c] ss:$0 sm:$0xff]  ;;  %v18581_v63 = vld [vmem:[#allocation74_spill] sm:$0xff] }
 0x2d1   : > { %v3944_v34 = vmul.f32 %v15028_v14, %v11867_v54  ;;  %v4120_v52 = vmul.f32 %v11883_v49, %v15054_v61  ;;  %v4121_v45 = vmul.f32 %v15046_v51, %v11883_v49  ;;  %v16205_v32 = vsel %vm5909_vm6, %v6120_v33, %v6121_v19  ;;  %12155 = vst [vmem:[%s14846_s30 + $0x268] sm:$0x1] %v6121_v19  ;;  %v18580_v49 = vld [vmem:[#allocation71_spill] sm:$0xff] }
 0x2d2   : > { %v2563_v56 = vadd.f32 %v2531_v15, %v2386_v12  ;;  %9383 = vmatmul.mubr.f32.gmra.mrb[34].mxu0 %v9063_v21  ;;  %v3975_v36 = vadd.f32 %v3943_v18, %v3766_v17  ;;  %v4297_v16 = vmul.f32 %v11899_v30, %v15063_v24  ;;  %12154 = vst [vmem:[%s14846_s30 + $0x258] sm:$0xff] %v16205_v32  ;;  %v6612_v37 = vrot.slane %v16205_v32, 1  ;;  %v18582_v12 = vld [vmem:[#allocation73_spill] sm:$0xff]  ;;  %v18583_v18 = vld [vmem:[#allocation76_spill] sm:$0xff] }
 0x2d3   : > { %v5943_v41 = vrot.slane %v2562_v6, 7  ;;  %v3976_v26 = vadd.f32 %v3944_v34, %v3767_v44  ;;  %v4298_v5 = vmul.f32 %v15056_v42, %v11899_v30  ;;  %v4474_v15 = vmul.f32 %v11915_v31, %v15085_v55  ;;  %v12011_v44 = vld [vmem:[#allocation8 + $0xac] ss:$0 sm:$0xff]  ;;  %v12027_v34 = vld [vmem:[#allocation8 + $0xbc] ss:$0 sm:$0xff] }
 0x2d4   : > { %v5944_v9 = vrot.slane %v2563_v56, 7  ;;  %v4152_v10 = vadd.f32 %v4120_v52, %v3975_v36  ;;  %v4475_v58 = vmul.f32 %v18576_v38, %v11915_v31  ;;  %v4651_v4 = vmul.f32 %v11931_v35, %v18577_v27  ;;  %v18584_v31 = vld [vmem:[#allocation75_spill] sm:$0xff]  ;;  %v18585_v56 = vld [vmem:[#allocation78_spill] sm:$0xff] }
 0x2d5   : > { %12105 = vst [vmem:[%s14846_s30 + $0x240] sm:$0xfe] %v5943_v41  ;;  %v4153_v28 = vadd.f32 %v4121_v45, %v3976_v26  ;;  %v4652_v54 = vmul.f32 %v18578_v50, %v11931_v35  ;;  %v4828_v53 = vmul.f32 %v11947_v40, %v18579_v7  ;;  %v4829_v33 = vmul.f32 %v18580_v49, %v11947_v40  ;;  %v12345_v40 = vld [vmem:[%s14846_s30 + $0xf8] sm:$0xfc]  ;;  %v18592_v49 = vld [vmem:[#allocation43_spill] sm:$0xff] }
 0x2d6   : > { %v5945_v23 = vsel %vm5909_vm6, %v5943_v41, %v5944_v9  ;;  %12107 = vst [vmem:[%s14846_s30 + $0x260] sm:$0x1] %v5944_v9  ;;  %v4329_v1 = vadd.f32 %v4297_v16, %v4152_v10  ;;  %v5005_v17 = vmul.f32 %v11963_v39, %v18581_v63  ;;  %v5006_v21 = vmul.f32 %v18582_v12, %v11963_v39  ;;  %v18586_v16 = vld [vmem:[#allocation77_spill] sm:$0xff]  ;;  %v18587_v10 = vld [vmem:[#allocation80_spill] sm:$0xff]  ;;  %v18588_v39 = vld [vmem:[#allocation79_spill] sm:$0xff] }
 0x2d7   : > { %12106 = vst [vmem:[%s14846_s30 + $0x250] sm:$0xff] %v5945_v23  ;;  %v6609_v30 = vrot.slane %v5945_v23, 1  ;;  %v4330_v19 = vadd.f32 %v4298_v5, %v4153_v28  ;;  %v5182_v6 = vmul.f32 %v11979_v29, %v18583_v18  ;;  %v6376_v52 = vld [vmem:[%s14846_s30 + $0x248] sm:$0xfe]  ;;  %v5183_v32 = vmul.f32 %v18584_v31, %v11979_v29 }
 0x2d8   : > { %v4506_v45 = vadd.f32 %v4474_v15, %v4329_v1  ;;  %v5359_v36 = vmul.f32 %v11995_v62, %v18585_v56  ;;  %v5360_v35 = vmul.f32 %v18586_v16, %v11995_v62  ;;  %v6611_v41 = vrot.slane %v6376_v52, 1  ;;  %v6378_v26 = vld [vmem:[%s14846_s30 + $0x268] sm:$0x1]  ;;  %v11687_v23 = vld [vmem:[#allocation5 + $0xc] ss:$0 sm:$0xff]  ;;  %v18590_v56 = vld [vmem:[#allocation81_spill] sm:$0xff] }
 0x2d9   : > { %v4507_v9 = vadd.f32 %v4475_v58, %v4330_v19  ;;  %v5536_v5 = vmul.f32 %v12011_v44, %v18587_v10  ;;  %v16234_v28 = vmul.f32 %v18588_v39, %v12011_v44  ;;  %v6616_v18 = vrot.slane %v6378_v26, 1  ;;  %v18589_v1 = vld [vmem:[#allocation82_spill] sm:$0xff]  ;;  %v11703_v16 = vld [vmem:[#allocation5 + $0x1c] ss:$0 sm:$0xff]  ;;  %v11719_v39 = vld [vmem:[#allocation5 + $0x2c] ss:$0 sm:$0xff] }
 0x2da   : > { %v4683_v15 = vadd.f32 %v4651_v4, %v4506_v45  ;;  %v16237_v29 = vmul.f32 %v12027_v34, %v18589_v1  ;;  %v16240_v62 = vmul.f32 %v18590_v56, %v12027_v34  ;;  %v6613_v52 = vsel %vm6487_vm5, %v6611_v41, %v6612_v37  ;;  %v16244_v31 = vld [vmem:[%s14846_s30 + $0x108] sm:$0xff] }
 0x2db   : > { %v4684_v58 = vadd.f32 %v4652_v54, %v4507_v9  ;;  %v9069_v19 = vrot.slane %v12345_v40, 2  ;;  %v18248_v44 = vrot.slane %v16244_v31, 2  ;;  %6929 = vmatprep.mubr.f32.mxu1 %v6613_v52  ;;  %v6617_v4 = vsel %vm6487_vm5, %v6612_v37, %v6616_v18  ;;  %v18591_v40 = vld [vmem:[#allocation45_spill] sm:$0xff]  ;;  %v11751_v18 = vld [vmem:[#allocation5 + $0x4c] ss:$0 sm:$0xff] }
 0x2dc   : > { %v6375_v26 = vld [vmem:[%s14846_s30 + $0x240] sm:$0xfe]  ;;  %v4860_v45 = vadd.f32 %v4828_v53, %v4683_v15  ;;  %v1293_v1 = vmul.f32 %v11687_v23, %v18570_v20  ;;  %v1294_v34 = vmul.f32 %v18571_v59, %v11687_v23  ;;  %v1470_v41 = vmul.f32 %v11703_v16, %v18591_v40  ;;  %v11735_v9 = vld [vmem:[#allocation5 + $0x3c] ss:$0 sm:$0xff] }
 0x2dd   : > { %v6608_v56 = vrot.slane %v6375_v26, 1  ;;  %v6377_v10 = vld [vmem:[%s14846_s30 + $0x260] sm:$0x1]  ;;  %v4861_v12 = vadd.f32 %v4829_v33, %v4684_v58  ;;  %v9071_v54 = vsel %vm7323_vm8, %v9069_v19, %v18248_v44  ;;  %v1471_v37 = vmul.f32 %v18592_v49, %v11703_v16  ;;  %v18593_v33 = vld [vmem:[#allocation46_spill] sm:$0xff]  ;;  %v11767_v59 = vld [vmem:[#allocation5 + $0x5c] ss:$0 sm:$0xff] }
 0x2de   : > { %v6614_v63 = vrot.slane %v6377_v10, 1  ;;  %v5037_v52 = vadd.f32 %v5005_v17, %v4860_v45  ;;  %9387 = vmatprep.mubr.f32.mxu0 %v9071_v54  ;;  %v1647_v53 = vmul.f32 %v11719_v39, %v18573_v3  ;;  %v1502_v26 = vadd.f32 %v1470_v41, %v1293_v1  ;;  %v18594_v17 = vld [vmem:[#allocation49_spill] sm:$0xff]  ;;  %v11783_v54 = vld [vmem:[#allocation5 + $0x6c] ss:$0 sm:$0xff] }
 0x2df   : > { %v6610_v23 = vsel %vm6487_vm5, %v6608_v56, %v6609_v30  ;;  %v5038_v15 = vadd.f32 %v5006_v21, %v4861_v12  ;;  %v1648_v58 = vmul.f32 %v18593_v33, %v11719_v39  ;;  %v1503_v10 = vadd.f32 %v1471_v37, %v1294_v34  ;;  %v11799_v21 = vld [vmem:[#allocation5 + $0x7c] ss:$0 sm:$0xff] }
 0x2e0   : > { %6930 = vmatmul.mubr.f32.gmra.mrb[68].mxu1 %v6610_v23  ;;  %v6615_v19 = vsel %vm6487_vm5, %v6609_v30, %v6614_v63  ;;  %v5214_v44 = vadd.f32 %v5182_v6, %v5037_v52  ;;  %v1824_v45 = vmul.f32 %v11735_v9, %v18594_v17  ;;  %v1679_v3 = vadd.f32 %v1647_v53, %v1502_v26  ;;  %v12344_v30 = vld [vmem:[%s14846_s30 + $0xf0] sm:$0xfc]  ;;  %v12347_v53 = vld [vmem:[%s14846_s30 + $0x118] sm:$0x3]  ;;  %v9615_v23 = vld [vmem:[#allocation10 + $0x648] sm:$0xff] }
 0x2e1   : > { %6934 = vmatprep.mubr.f32.mxu1 %v6617_v4  ;;  %v5215_v16 = vadd.f32 %v5183_v32, %v5038_v15  ;;  %v1825_v49 = vmul.f32 %v18394_v47, %v11735_v9  ;;  %v2001_v12 = vmul.f32 %v11751_v18, %v18365_v0  ;;  %v1680_v39 = vadd.f32 %v1648_v58, %v1503_v10  ;;  %v6319_v4 = vld [vmem:[#allocation10 + $0xc0] sm:$0xff]  ;;  %v6320_v9 = vld [vmem:[#allocation10 + $0xc8] sm:$0xff]  ;;  %v12346_v26 = vld [vmem:[%s14846_s30 + $0x110] sm:$0x3] }
 0x2e2   : > { %v5391_v56 = vadd.f32 %v5359_v36, %v5214_v44  ;;  %v2002_v1 = vmul.f32 %v18366_v57, %v11751_v18  ;;  %v2178_v63 = vmul.f32 %v11767_v59, %v18367_v60  ;;  %v1856_v34 = vadd.f32 %v1824_v45, %v1679_v3  ;;  %v9614_v18 = vld [vmem:[#allocation10 + $0x640] sm:$0xff]  ;;  %v11852_v45 = vld [vmem:[#allocation8 + $0xd] ss:$0 sm:$0xff] }
 0x2e3   : > { %v5392_v6 = vadd.f32 %v5360_v35, %v5215_v16  ;;  %v2179_v41 = vmul.f32 %v18368_v13, %v11767_v59  ;;  %v2355_v32 = vmul.f32 %v11783_v54, %v18369_v25  ;;  %v1857_v36 = vadd.f32 %v1825_v49, %v1680_v39 }
 0x2e4   : > { %6935 = vmatmul.mubr.f32.gmra.mrb[70].mxu1 %v6615_v19  ;;  %v5568_v52 = vadd.f32 %v5536_v5, %v5391_v56  ;;  %v2356_v44 = vmul.f32 %v18370_v43, %v11783_v54  ;;  %v2532_v37 = vmul.f32 %v11799_v21, %v18374_v46  ;;  %v2033_v59 = vadd.f32 %v2001_v12, %v1856_v34  ;;  %v13953_v5 = vld [vmem:[%s14846_s30 + $0x100] sm:$0xff]  ;;  %v16279_v46 = vld [vmem:[%s14846_s30 + $0x128] sm:$0xfc] }
 0x2e5   : > { %v5569_v3 = vadd.f32 %v16234_v28, %v5392_v6  ;;  %v2533_v35 = vmul.f32 %v18375_v48, %v11799_v21  ;;  %v9066_v15 = vrot.slane %v12344_v30, 2  ;;  %v2034_v19 = vadd.f32 %v2002_v1, %v1857_v36 }
 0x2e6   : > { %v5745_v58 = vadd.f32 %v16237_v29, %v5568_v52  ;;  %v9067_v49 = vrot.slane %v13953_v5, 2  ;;  %v12978_v10 = vpack.c.bf16 %v6320_v9, %v6319_v4  ;;  %v2210_v16 = vadd.f32 %v2178_v63, %v2033_v59  ;;  %v11868_v29 = vld [vmem:[#allocation8 + $0x1d] ss:$0 sm:$0xff]  ;;  %v11884_v4 = vld [vmem:[#allocation8 + $0x2d] ss:$0 sm:$0xff] }
 0x2e7   : > { %v5746_v54 = vadd.f32 %v16240_v62, %v5569_v3  ;;  %v9074_v56 = vrot.slane %v12347_v53, 2  ;;  %v13194_v39 = vpack.c.bf16 %v9615_v23, %v9614_v18  ;;  %v2211_v12 = vadd.f32 %v2179_v41, %v2034_v19  ;;  %v11916_v3 = vld [vmem:[#allocation8 + $0x4d] ss:$0 sm:$0xff] }
 0x2e8   : > { %v6123_v28 = vrot.slane %v5745_v58, 7  ;;  %v9068_v21 = vsel %vm7323_vm8, %v9066_v15, %v9067_v49  ;;  %12979 = vmatpush1.bf16.msra.mxu1 %v12978_v10  ;;  %v9072_v30 = vrot.slane %v12346_v26, 2  ;;  %v2387_v6 = vadd.f32 %v2355_v32, %v2210_v16  ;;  %v11900_v32 = vld [vmem:[#allocation8 + $0x3d] ss:$0 sm:$0xff]  ;;  %v11948_v10 = vld [vmem:[#allocation8 + $0x6d] ss:$0 sm:$0xff] }
 0x2e9   : > { %v6124_v1 = vrot.slane %v5746_v54, 7  ;;  %9388 = vmatmul.mubr.f32.gmra.mrb[36].mxu0 %v9068_v21  ;;  %v18595_v34 = vrot.slane %v16244_v31, 2  ;;  %v3768_v63 = vmul.f32 %v11852_v45, %v18376_v2  ;;  %12980 = vmatprep.subr.bf16.mxu1 %v18404_v8  ;;  %v2388_v41 = vadd.f32 %v2356_v44, %v2211_v12  ;;  %v11932_v58 = vld [vmem:[#allocation8 + $0x5d] ss:$0 sm:$0xff] }
 0x2ea   : > { %12156 = vst [vmem:[%s14846_s30 + $0x278] sm:$0xfe] %v6123_v28  ;;  %13195 = vmatpush1.bf16.msra.mxu0 %v13194_v39  ;;  %v9073_v9 = vsel %vm7323_vm8, %v9067_v49, %v9072_v30  ;;  %v3769_v52 = vmul.f32 %v15026_v22, %v11852_v45  ;;  %v2564_v53 = vadd.f32 %v2532_v37, %v2387_v6  ;;  %v11964_v45 = vld [vmem:[#allocation8 + $0x7d] ss:$0 sm:$0xff]  ;;  %v11980_v30 = vld [vmem:[#allocation8 + $0x8d] ss:$0 sm:$0xff] }
 0x2eb   : > { %v9075_v62 = vsel %vm7323_vm8, %v18595_v34, %v9074_v56  ;;  %v6125_v31 = vsel %vm5909_vm6, %v6123_v28, %v6124_v1  ;;  %12158 = vst [vmem:[%s14846_s30 + $0x298] sm:$0x1] %v6124_v1  ;;  %v3945_v18 = vmul.f32 %v11868_v29, %v15034_v11  ;;  %v3946_v23 = vmul.f32 %v15028_v14, %v11868_v29  ;;  %v11996_v29 = vld [vmem:[#allocation8 + $0x9d] ss:$0 sm:$0xff]  ;;  %v18596_v34 = vld [vmem:[#allocation71_spill] sm:$0xff] }
 0x2ec   : > { %9392 = vmatprep.mubr.f32.mxu0 %v9075_v62  ;;  %13196 = vmatprep.subr.bf16.mxu0 %v18404_v8  ;;  %12157 = vst [vmem:[%s14846_s30 + $0x288] sm:$0xff] %v6125_v31  ;;  %v6622_v44 = vrot.slane %v6125_v31, 1  ;;  %v2565_v59 = vadd.f32 %v2533_v35, %v2388_v41  ;;  %v4122_v15 = vmul.f32 %v11884_v4, %v15054_v61  ;;  %v5946_v19 = vrot.slane %v2564_v53, 7  ;;  %v12012_v41 = vld [vmem:[#allocation8 + $0xad] ss:$0 sm:$0xff]  ;;  %v18598_v53 = vld [vmem:[#allocation73_spill] sm:$0xff] }
 0x2ed   : > { %v4123_v26 = vmul.f32 %v15046_v51, %v11884_v4  ;;  %9393 = vmatmul.mubr.f32.gmra.mrb[38].mxu0 %v9073_v9  ;;  %v3977_v5 = vadd.f32 %v3945_v18, %v3768_v63  ;;  %v3978_v37 = vadd.f32 %v3946_v23, %v3769_v52  ;;  %v4299_v49 = vmul.f32 %v11900_v32, %v15063_v24  ;;  %v18597_v63 = vld [vmem:[#allocation74_spill] sm:$0xff]  ;;  %v12028_v23 = vld [vmem:[#allocation8 + $0xbd] ss:$0 sm:$0xff] }
 0x2ee   : > { %v5947_v54 = vrot.slane %v2565_v59, 7  ;;  %v4300_v16 = vmul.f32 %v15056_v42, %v11900_v32  ;;  %v4476_v35 = vmul.f32 %v11916_v3, %v15085_v55  ;;  %v4477_v56 = vmul.f32 %v18576_v38, %v11916_v3  ;;  %12108 = vst [vmem:[%s14846_s30 + $0x270] sm:$0xfe] %v5946_v19 }
 0x2ef   : > { %v4154_v39 = vadd.f32 %v4122_v15, %v3977_v5  ;;  %v4155_v28 = vadd.f32 %v4123_v26, %v3978_v37  ;;  %v4653_v12 = vmul.f32 %v11932_v58, %v18577_v27  ;;  %v4654_v21 = vmul.f32 %v18578_v50, %v11932_v58  ;;  %v18599_v15 = vld [vmem:[#allocation76_spill] sm:$0xff]  ;;  %v18600_v58 = vld [vmem:[#allocation75_spill] sm:$0xff]  ;;  %v18601_v5 = vld [vmem:[#allocation78_spill] sm:$0xff] }
 0x2f0   : > { %v5948_v1 = vsel %vm5909_vm6, %v5946_v19, %v5947_v54  ;;  %12110 = vst [vmem:[%s14846_s30 + $0x290] sm:$0x1] %v5947_v54  ;;  %v4830_v6 = vmul.f32 %v11948_v10, %v18579_v7  ;;  %v4831_v62 = vmul.f32 %v18596_v34, %v11948_v10  ;;  %v5007_v4 = vmul.f32 %v11964_v45, %v18597_v63  ;;  %v18602_v63 = vld [vmem:[#allocation77_spill] sm:$0xff] }
 0x2f1   : > { %v6380_v9 = vld [vmem:[%s14846_s30 + $0x278] sm:$0xfe]  ;;  %12109 = vst [vmem:[%s14846_s30 + $0x280] sm:$0xff] %v5948_v1  ;;  %v6619_v52 = vrot.slane %v5948_v1, 1  ;;  %v4331_v32 = vadd.f32 %v4299_v49, %v4154_v39  ;;  %v4332_v31 = vadd.f32 %v4300_v16, %v4155_v28  ;;  %v5008_v18 = vmul.f32 %v18598_v53, %v11964_v45  ;;  %v11688_v49 = vld [vmem:[#allocation5 + $0xd] ss:$0 sm:$0xff] }
 0x2f2   : > { %v6621_v3 = vrot.slane %v6380_v9, 1  ;;  %v6382_v59 = vld [vmem:[%s14846_s30 + $0x298] sm:$0x1]  ;;  %v5184_v26 = vmul.f32 %v11980_v30, %v18599_v15  ;;  %v5185_v19 = vmul.f32 %v18600_v58, %v11980_v30  ;;  %v5361_v37 = vmul.f32 %v11996_v29, %v18601_v5  ;;  %v11704_v16 = vld [vmem:[#allocation5 + $0x1d] ss:$0 sm:$0xff]  ;;  %v18604_v9 = vld [vmem:[#allocation79_spill] sm:$0xff] }
 0x2f3   : > { %v6626_v10 = vrot.slane %v6382_v59, 1  ;;  %v4508_v54 = vadd.f32 %v4476_v35, %v4331_v32  ;;  %v4509_v36 = vadd.f32 %v4477_v56, %v4332_v31  ;;  %v5362_v1 = vmul.f32 %v18602_v63, %v11996_v29  ;;  %v18603_v39 = vld [vmem:[#allocation80_spill] sm:$0xff]  ;;  %v18605_v30 = vld [vmem:[#allocation82_spill] sm:$0xff]  ;;  %v18606_v29 = vld [vmem:[#allocation81_spill] sm:$0xff] }
 0x2f4   : > { %v6623_v45 = vsel %vm6487_vm5, %v6621_v3, %v6622_v44  ;;  %v16321_v28 = vmul.f32 %v12012_v41, %v18603_v39  ;;  %v16324_v15 = vmul.f32 %v18604_v9, %v12012_v41  ;;  %v16327_v5 = vmul.f32 %v12028_v23, %v18605_v30  ;;  %v11720_v59 = vld [vmem:[#allocation5 + $0x2d] ss:$0 sm:$0xff]  ;;  %v16335_v63 = vld [vmem:[%s14846_s30 + $0x138] sm:$0xff]  ;;  %v18607_v9 = vld [vmem:[#allocation42_spill] sm:$0xff] }
 0x2f5   : > { %6939 = vmatprep.mubr.f32.mxu1 %v6623_v45  ;;  %v6627_v35 = vsel %vm6487_vm5, %v6622_v44, %v6626_v10  ;;  %v4685_v56 = vadd.f32 %v4653_v12, %v4508_v54  ;;  %v4686_v32 = vadd.f32 %v4654_v21, %v4509_v36  ;;  %v16331_v31 = vmul.f32 %v18606_v29, %v12028_v23  ;;  %v6379_v3 = vld [vmem:[%s14846_s30 + $0x270] sm:$0xfe]  ;;  %v11736_v23 = vld [vmem:[#allocation5 + $0x3d] ss:$0 sm:$0xff] }
 0x2f6   : > { %v18254_v39 = vrot.slane %v16335_v63, 2  ;;  %v1295_v41 = vmul.f32 %v11688_v49, %v18570_v20  ;;  %v1296_v58 = vmul.f32 %v18607_v9, %v11688_v49  ;;  %v1472_v30 = vmul.f32 %v11704_v16, %v18591_v40  ;;  %v18608_v36 = vld [vmem:[#allocation43_spill] sm:$0xff]  ;;  %v18610_v20 = vld [vmem:[#allocation48_spill] sm:$0xff] }
 0x2f7   : > { %v6618_v45 = vrot.slane %v6379_v3, 1  ;;  %v6381_v53 = vld [vmem:[%s14846_s30 + $0x290] sm:$0x1]  ;;  %v4862_v44 = vadd.f32 %v4830_v6, %v4685_v56  ;;  %v4863_v12 = vadd.f32 %v4831_v62, %v4686_v32  ;;  %v1473_v21 = vmul.f32 %v18608_v36, %v11704_v16  ;;  %v11752_v49 = vld [vmem:[#allocation5 + $0x4d] ss:$0 sm:$0xff] }
 0x2f8   : > { %v6624_v10 = vrot.slane %v6381_v53, 1  ;;  %v18609_v54 = vrot.slane %v16279_v46, 2  ;;  %v1504_v34 = vadd.f32 %v1472_v30, %v1295_v41  ;;  %v1649_v7 = vmul.f32 %v11720_v59, %v18610_v20  ;;  %v11768_v62 = vld [vmem:[#allocation5 + $0x5d] ss:$0 sm:$0xff]  ;;  %v11784_v30 = vld [vmem:[#allocation5 + $0x6d] ss:$0 sm:$0xff] }
 0x2f9   : > { %v6620_v40 = vsel %vm6487_vm5, %v6618_v45, %v6619_v52  ;;  %v5039_v3 = vadd.f32 %v5007_v4, %v4862_v44  ;;  %v5040_v9 = vadd.f32 %v5008_v18, %v4863_v12  ;;  %v1505_v6 = vadd.f32 %v1473_v21, %v1296_v58  ;;  %v11800_v18 = vld [vmem:[#allocation5 + $0x7d] ss:$0 sm:$0xff] }
 0x2fa   : > { %v9081_v29 = vsel %vm7323_vm8, %v18609_v54, %v18254_v39  ;;  %6940 = vmatmul.mubr.f32.gmra.mrb[72].mxu1 %v6620_v40  ;;  %v6625_v53 = vsel %vm6487_vm5, %v6619_v52, %v6624_v10  ;;  %v1650_v16 = vmul.f32 %v18593_v33, %v11720_v59  ;;  %v1681_v46 = vadd.f32 %v1649_v7, %v1504_v34  ;;  %v12348_v59 = vld [vmem:[%s14846_s30 + $0x120] sm:$0xfc]  ;;  %v12351_v54 = vld [vmem:[%s14846_s30 + $0x148] sm:$0x3]  ;;  %v16371_v39 = vld [vmem:[%s14846_s30 + $0x158] sm:$0xfc] }
 0x2fb   : > { %9397 = vmatprep.mubr.f32.mxu0 %v9081_v29  ;;  %v1826_v56 = vmul.f32 %v11736_v23, %v18594_v17  ;;  %6944 = vmatprep.mubr.f32.mxu1 %v6627_v35  ;;  %v5216_v32 = vadd.f32 %v5184_v26, %v5039_v3  ;;  %v5217_v41 = vadd.f32 %v5185_v19, %v5040_v9  ;;  %v6321_v19 = vld [vmem:[#allocation10 + $0xd0] sm:$0xff]  ;;  %v6322_v9 = vld [vmem:[#allocation10 + $0xd8] sm:$0xff] }
 0x2fc   : > { %v1827_v45 = vmul.f32 %v18394_v47, %v11736_v23  ;;  %v2003_v4 = vmul.f32 %v11752_v49, %v18365_v0  ;;  %v1682_v58 = vadd.f32 %v1650_v16, %v1505_v6  ;;  %v2004_v29 = vmul.f32 %v18366_v57, %v11752_v49  ;;  %v18611_v23 = vld [vmem:[#allocation61_spill] sm:$0xff]  ;;  %v9616_v49 = vld [vmem:[#allocation10 + $0x650] sm:$0xff] }
 0x2fd   : > { %v1858_v40 = vadd.f32 %v1826_v56, %v1681_v46  ;;  %v2180_v52 = vmul.f32 %v11768_v62, %v18367_v60  ;;  %v5393_v7 = vadd.f32 %v5361_v37, %v5216_v32  ;;  %v5394_v34 = vadd.f32 %v5362_v1, %v5217_v41  ;;  %v9617_v3 = vld [vmem:[#allocation10 + $0x658] sm:$0xff]  ;;  %v12350_v16 = vld [vmem:[%s14846_s30 + $0x140] sm:$0x3]  ;;  %v13955_v56 = vld [vmem:[%s14846_s30 + $0x130] sm:$0xff] }
 0x2fe   : > { %v2181_v44 = vmul.f32 %v18368_v13, %v11768_v62  ;;  %v2357_v26 = vmul.f32 %v11784_v30, %v18369_v25  ;;  %6945 = vmatmul.mubr.f32.gmra.mrb[74].mxu1 %v6625_v53  ;;  %v1859_v35 = vadd.f32 %v1827_v45, %v1682_v58  ;;  %v2358_v21 = vmul.f32 %v18370_v43, %v11784_v30  ;;  %v11853_v30 = vld [vmem:[#allocation8 + $0xe] ss:$0 sm:$0xff] }
 0x2ff   : > { %v2035_v12 = vadd.f32 %v2003_v4, %v1858_v40  ;;  %v2534_v10 = vmul.f32 %v11800_v18, %v18611_v23  ;;  %v5570_v37 = vadd.f32 %v16321_v28, %v5393_v7  ;;  %v5571_v1 = vadd.f32 %v16324_v15, %v5394_v34 }
 0x300   : > { %v2535_v6 = vmul.f32 %v18375_v48, %v11800_v18  ;;  %v9076_v62 = vrot.slane %v12348_v59, 2  ;;  %v2036_v46 = vadd.f32 %v2004_v29, %v1859_v35  ;;  %v9077_v32 = vrot.slane %v13955_v56, 2  ;;  %v11869_v29 = vld [vmem:[#allocation8 + $0x1e] ss:$0 sm:$0xff] }
 0x301   : > { %v2212_v53 = vadd.f32 %v2180_v52, %v2035_v12  ;;  %v12981_v41 = vpack.c.bf16 %v6322_v9, %v6321_v19  ;;  %v5747_v45 = vadd.f32 %v16327_v5, %v5570_v37  ;;  %v5748_v4 = vadd.f32 %v16331_v31, %v5571_v1  ;;  %v11885_v19 = vld [vmem:[#allocation8 + $0x2e] ss:$0 sm:$0xff]  ;;  %v11901_v35 = vld [vmem:[#allocation8 + $0x3e] ss:$0 sm:$0xff] }
 0x302   : > { %v9084_v58 = vrot.slane %v12351_v54, 2  ;;  %v13197_v40 = vpack.c.bf16 %v9617_v3, %v9616_v49  ;;  %v2213_v28 = vadd.f32 %v2181_v44, %v2036_v46  ;;  %v9078_v18 = vsel %vm7323_vm8, %v9076_v62, %v9077_v32 }
 0x303   : > { %v2389_v15 = vadd.f32 %v2357_v26, %v2212_v53  ;;  %12982 = vmatpush1.bf16.msra.mxu1 %v12981_v41  ;;  %v9082_v59 = vrot.slane %v12350_v16, 2  ;;  %v6126_v52 = vrot.slane %v5747_v45, 7  ;;  %v6127_v7 = vrot.slane %v5748_v4, 7  ;;  %9398 = vmatmul.mubr.f32.gmra.mrb[40].mxu0 %v9078_v18  ;;  %v11933_v16 = vld [vmem:[#allocation8 + $0x5e] ss:$0 sm:$0xff] }
 0x304   : > { %v18612_v5 = vrot.slane %v16335_v63, 2  ;;  %v3770_v34 = vmul.f32 %v11853_v30, %v18376_v2  ;;  %12983 = vmatprep.subr.bf16.mxu1 %v18404_v8  ;;  %v2390_v44 = vadd.f32 %v2358_v21, %v2213_v28  ;;  %13198 = vmatpush1.bf16.msra.mxu0 %v13197_v40  ;;  %v3771_v63 = vmul.f32 %v15026_v22, %v11853_v30  ;;  %v11917_v21 = vld [vmem:[#allocation8 + $0x4e] ss:$0 sm:$0xff]  ;;  %v11965_v30 = vld [vmem:[#allocation8 + $0x7e] ss:$0 sm:$0xff] }
 0x305   : > { %v2566_v26 = vadd.f32 %v2534_v10, %v2389_v15  ;;  %v9083_v9 = vsel %vm7323_vm8, %v9077_v32, %v9082_v59  ;;  %v16382_v54 = vsel %vm5909_vm6, %v6126_v52, %v6127_v7  ;;  %12159 = vst [vmem:[%s14846_s30 + $0x2a8] sm:$0xfe] %v6126_v52  ;;  %12161 = vst [vmem:[%s14846_s30 + $0x2c8] sm:$0x1] %v6127_v7  ;;  %13199 = vmatprep.subr.bf16.mxu0 %v18404_v8  ;;  %v11949_v41 = vld [vmem:[#allocation8 + $0x6e] ss:$0 sm:$0xff] }
 0x306   : > { %v9085_v31 = vsel %vm7323_vm8, %v18612_v5, %v9084_v58  ;;  %18613 = vst [vmem:[#allocation56_spill] sm:$0xff] %v16382_v54  ;;  %v3947_v49 = vmul.f32 %v11869_v29, %v15034_v11  ;;  %v3948_v3 = vmul.f32 %v15028_v14, %v11869_v29  ;;  %12160 = vst [vmem:[%s14846_s30 + $0x2b8] sm:$0xff] %v16382_v54  ;;  %v6632_v10 = vrot.slane %v16382_v54, 1  ;;  %v11981_v59 = vld [vmem:[#allocation8 + $0x8e] ss:$0 sm:$0xff]  ;;  %v18615_v7 = vld [vmem:[#allocation72_spill] sm:$0xff] }
 0x307   : > { %9402 = vmatprep.mubr.f32.mxu0 %v9085_v31  ;;  %v2567_v37 = vadd.f32 %v2535_v6, %v2390_v44  ;;  %v5949_v1 = vrot.slane %v2566_v26, 7  ;;  %v4124_v62 = vmul.f32 %v11885_v19, %v15054_v61  ;;  %v4125_v56 = vmul.f32 %v15046_v51, %v11885_v19  ;;  %v11997_v29 = vld [vmem:[#allocation8 + $0x9e] ss:$0 sm:$0xff]  ;;  %v18616_v31 = vld [vmem:[#allocation71_spill] sm:$0xff]  ;;  %v18617_v19 = vld [vmem:[#allocation74_spill] sm:$0xff] }
 0x308   : > { %9403 = vmatmul.mubr.f32.gmra.mrb[42].mxu0 %v9083_v9  ;;  %v3979_v46 = vadd.f32 %v3947_v49, %v3770_v34  ;;  %v3980_v53 = vadd.f32 %v3948_v3, %v3771_v63  ;;  %v4301_v32 = vmul.f32 %v11901_v35, %v15063_v24  ;;  %v4302_v4 = vmul.f32 %v15056_v42, %v11901_v35  ;;  %v18618_v63 = vld [vmem:[#allocation73_spill] sm:$0xff]  ;;  %v12013_v3 = vld [vmem:[#allocation8 + $0xae] ss:$0 sm:$0xff] }
 0x309   : > { %v5950_v45 = vrot.slane %v2567_v37, 7  ;;  %12111 = vst [vmem:[%s14846_s30 + $0x2a0] sm:$0xfe] %v5949_v1  ;;  %v4478_v6 = vmul.f32 %v11917_v21, %v15085_v55  ;;  %v4479_v58 = vmul.f32 %v18576_v38, %v11917_v21  ;;  %v4655_v15 = vmul.f32 %v11933_v16, %v18577_v27  ;;  %v12029_v21 = vld [vmem:[#allocation8 + $0xbe] ss:$0 sm:$0xff] }
 0x30a   : > { %v4156_v40 = vadd.f32 %v4124_v62, %v3979_v46  ;;  %v4157_v28 = vadd.f32 %v4125_v56, %v3980_v53  ;;  %v4656_v18 = vmul.f32 %v18578_v50, %v11933_v16  ;;  %v4832_v5 = vmul.f32 %v11949_v41, %v18615_v7  ;;  %v18619_v62 = vld [vmem:[#allocation76_spill] sm:$0xff]  ;;  %v18620_v46 = vld [vmem:[#allocation75_spill] sm:$0xff]  ;;  %v18621_v56 = vld [vmem:[#allocation78_spill] sm:$0xff] }
 0x30b   : > { %v16403_v52 = vsel %vm5909_vm6, %v5949_v1, %v5950_v45  ;;  %12113 = vst [vmem:[%s14846_s30 + $0x2c0] sm:$0x1] %v5950_v45  ;;  %v4833_v34 = vmul.f32 %v18616_v31, %v11949_v41  ;;  %v5009_v44 = vmul.f32 %v11965_v30, %v18617_v19  ;;  %v5010_v49 = vmul.f32 %v18618_v63, %v11965_v30  ;;  %v18622_v45 = vld [vmem:[#allocation77_spill] sm:$0xff]  ;;  %v18623_v30 = vld [vmem:[#allocation80_spill] sm:$0xff]  ;;  %v18625_v31 = vld [vmem:[#allocation82_spill] sm:$0xff] }
 0x30c   : > { %18614 = vst [vmem:[#allocation66_spill] sm:$0xff] %v16403_v52  ;;  %12112 = vst [vmem:[%s14846_s30 + $0x2b0] sm:$0xff] %v16403_v52  ;;  %v6629_v26 = vrot.slane %v16403_v52, 1  ;;  %v4333_v9 = vadd.f32 %v4301_v32, %v4156_v40  ;;  %v4334_v35 = vadd.f32 %v4302_v4, %v4157_v28  ;;  %v6384_v37 = vld [vmem:[%s14846_s30 + $0x2a8] sm:$0xfe]  ;;  %v5186_v16 = vmul.f32 %v11981_v59, %v18619_v62  ;;  %v18629_v27 = vld [vmem:[#allocation45_spill] sm:$0xff] }
 0x30d   : > { %v6386_v1 = vld [vmem:[%s14846_s30 + $0x2c8] sm:$0x1]  ;;  %v5187_v53 = vmul.f32 %v18620_v46, %v11981_v59  ;;  %v5363_v41 = vmul.f32 %v11997_v29, %v18621_v56  ;;  %v5364_v12 = vmul.f32 %v18622_v45, %v11997_v29  ;;  %v6631_v54 = vrot.slane %v6384_v37, 1  ;;  %v11689_v4 = vld [vmem:[#allocation5 + $0xe] ss:$0 sm:$0xff]  ;;  %v18626_v59 = vld [vmem:[#allocation81_spill] sm:$0xff] }
 0x30e   : > { %v6636_v19 = vrot.slane %v6386_v1, 1  ;;  %v4510_v52 = vadd.f32 %v4478_v6, %v4333_v9  ;;  %v4511_v32 = vadd.f32 %v4479_v58, %v4334_v35  ;;  %v16420_v40 = vmul.f32 %v12013_v3, %v18623_v30  ;;  %v18624_v28 = vld [vmem:[#allocation79_spill] sm:$0xff]  ;;  %v11705_v29 = vld [vmem:[#allocation5 + $0x1e] ss:$0 sm:$0xff]  ;;  %v18627_v30 = vld [vmem:[#allocation44_spill] sm:$0xff] }
 0x30f   : > { %v16423_v63 = vmul.f32 %v18624_v28, %v12013_v3  ;;  %v16426_v62 = vmul.f32 %v12029_v21, %v18625_v31  ;;  %v16429_v56 = vmul.f32 %v18626_v59, %v12029_v21  ;;  %v6633_v6 = vsel %vm6487_vm5, %v6631_v54, %v6632_v10  ;;  %v11721_v1 = vld [vmem:[#allocation5 + $0x2e] ss:$0 sm:$0xff]  ;;  %v18628_v46 = vld [vmem:[#allocation42_spill] sm:$0xff]  ;;  %v16441_v59 = vld [vmem:[%s14846_s30 + $0x150] sm:$0xfc] }
 0x310   : > { %v6383_v9 = vld [vmem:[%s14846_s30 + $0x2a0] sm:$0xfe]  ;;  %v6637_v58 = vsel %vm6487_vm5, %v6632_v10, %v6636_v19  ;;  %v4687_v35 = vadd.f32 %v4655_v15, %v4510_v52  ;;  %v4688_v37 = vadd.f32 %v4656_v18, %v4511_v32  ;;  %6949 = vmatprep.mubr.f32.mxu1 %v6633_v6  ;;  %v16435_v28 = vld [vmem:[%s14846_s30 + $0x168] sm:$0xff]  ;;  %v1297_v45 = vmul.f32 %v11689_v4, %v18627_v30  ;;  %v11737_v18 = vld [vmem:[#allocation5 + $0x3e] ss:$0 sm:$0xff] }
 0x311   : > { %v6628_v3 = vrot.slane %v6383_v9, 1  ;;  %v18260_v31 = vrot.slane %v16435_v28, 2  ;;  %v1298_v21 = vmul.f32 %v18628_v46, %v11689_v4  ;;  %v1474_v10 = vmul.f32 %v11705_v29, %v18629_v27 }
 0x312   : > { %v6385_v7 = vld [vmem:[%s14846_s30 + $0x2c0] sm:$0x1]  ;;  %v4864_v54 = vadd.f32 %v4832_v5, %v4687_v35  ;;  %v4865_v50 = vadd.f32 %v4833_v34, %v4688_v37  ;;  %v1475_v15 = vmul.f32 %v18608_v36, %v11705_v29  ;;  %v18630_v32 = vrot.slane %v16371_v39, 2  ;;  %v11753_v35 = vld [vmem:[#allocation5 + $0x4e] ss:$0 sm:$0xff] }
 0x313   : > { %v6630_v52 = vsel %vm6487_vm5, %v6628_v3, %v6629_v26  ;;  %v6634_v19 = vrot.slane %v6385_v7, 1  ;;  %v1651_v4 = vmul.f32 %v11721_v1, %v18610_v20  ;;  %v1506_v34 = vadd.f32 %v1474_v10, %v1297_v45  ;;  %v11769_v37 = vld [vmem:[#allocation5 + $0x5e] ss:$0 sm:$0xff]  ;;  %v6324_v10 = vld [vmem:[#allocation10 + $0xe8] sm:$0xff] }
 0x314   : > { %v9091_v6 = vsel %vm7323_vm8, %v18630_v32, %v18260_v31  ;;  %6950 = vmatmul.mubr.f32.gmra.mrb[76].mxu1 %v6630_v52  ;;  %v5041_v9 = vadd.f32 %v5009_v44, %v4864_v54  ;;  %v5042_v5 = vadd.f32 %v5010_v49, %v4865_v50  ;;  %v9086_v29 = vrot.slane %v16441_v59, 2  ;;  %v11785_v44 = vld [vmem:[#allocation5 + $0x6e] ss:$0 sm:$0xff]  ;;  %v11801_v49 = vld [vmem:[#allocation5 + $0x7e] ss:$0 sm:$0xff] }
 0x315   : > { %9407 = vmatprep.mubr.f32.mxu0 %v9091_v6  ;;  %6954 = vmatprep.mubr.f32.mxu1 %v6637_v58  ;;  %v6635_v7 = vsel %vm6487_vm5, %v6629_v26, %v6634_v19  ;;  %v1507_v3 = vadd.f32 %v1475_v15, %v1298_v21  ;;  %v1652_v36 = vmul.f32 %v18593_v33, %v11721_v1  ;;  %v12355_v15 = vld [vmem:[%s14846_s30 + $0x178] sm:$0x3] }
 0x316   : > { %v1828_v39 = vmul.f32 %v11737_v18, %v18594_v17  ;;  %v5218_v32 = vadd.f32 %v5186_v16, %v5041_v9  ;;  %v5219_v31 = vadd.f32 %v5187_v53, %v5042_v5  ;;  %v1683_v52 = vadd.f32 %v1651_v4, %v1506_v34  ;;  %v6323_v53 = vld [vmem:[#allocation10 + $0xe0] sm:$0xff]  ;;  %v9619_v9 = vld [vmem:[#allocation10 + $0x668] sm:$0xff]  ;;  %v12354_v34 = vld [vmem:[%s14846_s30 + $0x170] sm:$0x3] }
 0x317   : > { %v1829_v50 = vmul.f32 %v18394_v47, %v11737_v18  ;;  %v1684_v45 = vadd.f32 %v1652_v36, %v1507_v3  ;;  %v2005_v54 = vmul.f32 %v11753_v35, %v18365_v0  ;;  %v2006_v59 = vmul.f32 %v18366_v57, %v11753_v35  ;;  %v9618_v4 = vld [vmem:[#allocation10 + $0x660] sm:$0xff] }
 0x318   : > { %v2182_v26 = vmul.f32 %v11769_v37, %v18367_v60  ;;  %6955 = vmatmul.mubr.f32.gmra.mrb[78].mxu1 %v6635_v7  ;;  %v5395_v58 = vadd.f32 %v5363_v41, %v5218_v32  ;;  %v5396_v1 = vadd.f32 %v5364_v12, %v5219_v31  ;;  %v1860_v21 = vadd.f32 %v1828_v39, %v1683_v52  ;;  %v6325_v32 = vld [vmem:[#allocation10 + $0xf0] sm:$0xff]  ;;  %v6326_v52 = vld [vmem:[#allocation10 + $0xf8] sm:$0xff] }
 0x319   : > { %v2183_v16 = vmul.f32 %v18368_v13, %v11769_v37  ;;  %v1861_v18 = vadd.f32 %v1829_v50, %v1684_v45  ;;  %v2359_v36 = vmul.f32 %v11785_v44, %v18369_v25  ;;  %v2360_v19 = vmul.f32 %v18370_v43, %v11785_v44  ;;  %v13957_v37 = vld [vmem:[%s14846_s30 + $0x160] sm:$0xff]  ;;  %v12378_v60 = vld [vmem:[%s14846_s30 + $0x290] sm:$0x3] }
 0x31a   : > { %v2536_v6 = vmul.f32 %v11801_v49, %v18611_v23  ;;  %v5572_v41 = vadd.f32 %v16420_v40, %v5395_v58  ;;  %v5573_v12 = vadd.f32 %v16423_v63, %v5396_v1  ;;  %v2037_v31 = vadd.f32 %v2005_v54, %v1860_v21  ;;  %v12357_v58 = vld [vmem:[%s14846_s30 + $0x188] sm:$0xfc] }
 0x31b   : > { %v2537_v5 = vmul.f32 %v18375_v48, %v11801_v49  ;;  %v2038_v35 = vadd.f32 %v2006_v59, %v1861_v18  ;;  %v9087_v7 = vrot.slane %v13957_v37, 2  ;;  %v12984_v3 = vpack.c.bf16 %v6324_v10, %v6323_v53  ;;  %v9620_v10 = vld [vmem:[#allocation10 + $0x670] sm:$0xff]  ;;  %v12358_v37 = vld [vmem:[%s14846_s30 + $0x1a0] sm:$0x3] }
 0x31c   : > { %v9094_v39 = vrot.slane %v12355_v15, 2  ;;  %v5749_v50 = vadd.f32 %v16426_v62, %v5572_v41  ;;  %v5750_v44 = vadd.f32 %v16429_v56, %v5573_v12  ;;  %v2214_v40 = vadd.f32 %v2182_v26, %v2037_v31  ;;  %v12356_v26 = vld [vmem:[%s14846_s30 + $0x180] sm:$0xfc]  ;;  %v9621_v15 = vld [vmem:[#allocation10 + $0x678] sm:$0xff] }
 0x31d   : > { %v13200_v45 = vpack.c.bf16 %v9619_v9, %v9618_v4  ;;  %v2215_v63 = vadd.f32 %v2183_v16, %v2038_v35  ;;  %v9088_v49 = vsel %vm7323_vm8, %v9086_v29, %v9087_v7  ;;  %12985 = vmatpush1.bf16.msra.mxu1 %v12984_v3  ;;  %v18631_v54 = vrot.slane %v16435_v28, 2  ;;  %v12359_v28 = vld [vmem:[%s14846_s30 + $0x1a8] sm:$0x3]  ;;  %v16487_v4 = vld [vmem:[%s14846_s30 + $0x198] sm:$0xff]  ;;  %v9630_v48 = vld [vmem:[#allocation10 + $0x6c0] sm:$0xff] }
 0x31e   : > { %v9092_v1 = vrot.slane %v12354_v34, 2  ;;  %v6129_v21 = vrot.slane %v5749_v50, 7  ;;  %v6130_v62 = vrot.slane %v5750_v44, 7  ;;  %v2391_v53 = vadd.f32 %v2359_v36, %v2214_v40  ;;  %9408 = vmatmul.mubr.f32.gmra.mrb[44].mxu0 %v9088_v49  ;;  %12986 = vmatprep.subr.bf16.mxu1 %v18404_v8  ;;  %18633 = vst [vmem:[#allocation67_spill] sm:$0xff] %v16487_v4  ;;  %v16497_v3 = vld [vmem:[%s14846_s30 + $0x1c8] sm:$0xff] }
 0x31f   : > { %v9095_v59 = vsel %vm7323_vm8, %v18631_v54, %v9094_v39  ;;  %v12987_v56 = vpack.c.bf16 %v6326_v52, %v6325_v32  ;;  %v2392_v16 = vadd.f32 %v2360_v19, %v2215_v63  ;;  %13201 = vmatpush1.bf16.msra.mxu0 %v13200_v45  ;;  %v9099_v29 = vrot.slane %v12357_v58, 2  ;;  %v12361_v32 = vld [vmem:[%s14846_s30 + $0x1b8] sm:$0xfc]  ;;  %v9622_v52 = vld [vmem:[#allocation10 + $0x680] sm:$0xff]  ;;  %v9623_v50 = vld [vmem:[#allocation10 + $0x688] sm:$0xff] }
 0x320   : > { %9412 = vmatprep.mubr.f32.mxu0 %v9095_v59  ;;  %v16482_v18 = vsel %vm5909_vm6, %v6129_v21, %v6130_v62  ;;  %12162 = vst [vmem:[%s14846_s30 + $0x2d8] sm:$0xfe] %v6129_v21  ;;  %12164 = vst [vmem:[%s14846_s30 + $0x2f8] sm:$0x1] %v6130_v62  ;;  %v2568_v36 = vadd.f32 %v2536_v6, %v2391_v53  ;;  %v9100_v9 = vrot.slane %v16487_v4, 2  ;;  %13202 = vmatprep.subr.bf16.mxu0 %v18404_v8  ;;  %v16512_v58 = vld [vmem:[%s14846_s30 + $0x1c0] sm:$0xff] }
 0x321   : > { %18632 = vst [vmem:[#allocation65_spill] sm:$0xff] %v16482_v18  ;;  %12163 = vst [vmem:[%s14846_s30 + $0x2e8] sm:$0xff] %v16482_v18  ;;  %v2569_v19 = vadd.f32 %v2537_v5, %v2392_v16  ;;  %v9093_v41 = vsel %vm7323_vm8, %v9087_v7, %v9092_v1  ;;  %12988 = vmatpush1.bf16.msra.mxu1 %v12987_v56  ;;  %v9096_v12 = vrot.slane %v12356_v26, 2  ;;  %v9104_v34 = vrot.slane %v12359_v28, 2  ;;  %v16501_v7 = vld [vmem:[%s14846_s30 + $0x190] sm:$0xff]  ;;  %v16520_v1 = vld [vmem:[#allocation10 + $0x200] sm:$0xff] }
 0x322   : > { %v5952_v31 = vrot.slane %v2568_v36, 7  ;;  %9413 = vmatmul.mubr.f32.gmra.mrb[46].mxu0 %v9093_v41  ;;  %v9101_v6 = vsel %vm7323_vm8, %v9099_v29, %v9100_v9  ;;  %v13203_v35 = vpack.c.bf16 %v9621_v15, %v9620_v10  ;;  %12989 = vmatprep.subr.bf16.mxu1 %v18404_v8  ;;  %18634 = vst [vmem:[#allocation52_spill] sm:$0xff] %v16501_v7  ;;  %v9097_v39 = vrot.slane %v16501_v7, 2  ;;  %v12360_v63 = vld [vmem:[%s14846_s30 + $0x1b0] sm:$0xfc]  ;;  %v9625_v53 = vld [vmem:[#allocation10 + $0x698] sm:$0xff] }
 0x323   : > { %v5953_v5 = vrot.slane %v2569_v19, 7  ;;  %9417 = vmatprep.mubr.f32.mxu0 %v9101_v6  ;;  %v9102_v45 = vrot.slane %v12358_v37, 2  ;;  %v9105_v49 = vsel %vm7323_vm8, %v9100_v9, %v9104_v34  ;;  %v9109_v54 = vrot.slane %v12361_v32, 2  ;;  %v9624_v62 = vld [vmem:[#allocation10 + $0x690] sm:$0xff]  ;;  %v16523_v26 = vld [vmem:[#allocation10 + $0x208] sm:$0xff]  ;;  %v9629_v7 = vld [vmem:[#allocation10 + $0x6b8] sm:$0xff] }
 0x324   : > { %12114 = vst [vmem:[%s14846_s30 + $0x2d0] sm:$0xfe] %v5952_v31  ;;  %13204 = vmatpush1.bf16.msra.mxu0 %v13203_v35  ;;  %v9098_v40 = vsel %vm7323_vm8, %v9096_v12, %v9097_v39  ;;  %v9110_v59 = vrot.slane %v16497_v3, 2  ;;  %v13206_v21 = vpack.c.bf16 %v9623_v50, %v9622_v52  ;;  %v12363_v16 = vld [vmem:[%s14846_s30 + $0x1d8] sm:$0x3]  ;;  %v6642_v28 = vrot.slane %v16482_v18, 1 }
 0x325   : > { %v16507_v44 = vsel %vm5909_vm6, %v5952_v31, %v5953_v5  ;;  %12116 = vst [vmem:[%s14846_s30 + $0x2f0] sm:$0x1] %v5953_v5  ;;  %13205 = vmatprep.subr.bf16.mxu0 %v18404_v8  ;;  %v9106_v15 = vrot.slane %v12360_v63, 2  ;;  %v18261_v36 = vrot.slane %v16512_v58, 2  ;;  %v16530_v9 = vld [vmem:[%s14846_s30 + $0x1f0] sm:$0xff]  ;;  %v9103_v19 = vsel %vm7323_vm8, %v9097_v39, %v9102_v45  ;;  %v16537_v12 = vld [vmem:[%s14846_s30 + $0x1f8] sm:$0xff] }
 0x326   : > { %18635 = vst [vmem:[#allocation50_spill] sm:$0xff] %v16507_v44  ;;  %12115 = vst [vmem:[%s14846_s30 + $0x2e0] sm:$0xff] %v16507_v44  ;;  %9418 = vmatmul.mubr.f32.gmra.mrb[48].mxu0 %v9098_v40  ;;  %v16534_v41 = vld [vmem:[%s14846_s30 + $0x1d0] sm:$0x3]  ;;  %v16540_v31 = vld [vmem:[%s14846_s30 + $0x1e8] sm:$0xfc]  ;;  %v13209_v34 = vpack.c.bf16 %v9625_v53, %v9624_v62  ;;  %v9111_v37 = vsel %vm7323_vm8, %v9109_v54, %v9110_v59 }
 0x327   : > { %v6388_v56 = vld [vmem:[%s14846_s30 + $0x2d8] sm:$0xfe]  ;;  %9422 = vmatprep.mubr.f32.mxu0 %v9105_v49  ;;  %v6390_v10 = vld [vmem:[%s14846_s30 + $0x2f8] sm:$0x1]  ;;  %v16543_v6 = vld [vmem:[%s14846_s30 + $0x1e0] sm:$0xfc] }
 0x328   : > { %v6641_v29 = vrot.slane %v6388_v56, 1  ;;  %13207 = vmatpush1.bf16.msra.mxu0 %v13206_v21  ;;  %v16549_v3 = vld [vmem:[%s14846_s30 + $0x218] sm:$0xfc]  ;;  %v9626_v5 = vld [vmem:[#allocation10 + $0x6a0] sm:$0xff]  ;;  %v9627_v39 = vld [vmem:[#allocation10 + $0x6a8] sm:$0xff]  ;;  %v6646_v52 = vrot.slane %v6390_v10, 1  ;;  %v9108_v56 = vsel %vm7323_vm8, %v9106_v15, %v18261_v36 }
 0x329   : > { %13208 = vmatprep.subr.bf16.mxu0 %v18404_v8  ;;  %v9114_v40 = vrot.slane %v12363_v16, 2  ;;  %v16554_v45 = vld [vmem:[#allocation10 + $0x210] sm:$0xff]  ;;  %v16556_v63 = vld [vmem:[#allocation10 + $0x218] sm:$0xff]  ;;  %v12366_v49 = vld [vmem:[%s14846_s30 + $0x200] sm:$0x3]  ;;  %v6639_v62 = vrot.slane %v16507_v44, 1  ;;  %v13212_v50 = vpack.c.bf16 %v9627_v39, %v9626_v5 }
 0x32a   : > { %v6643_v35 = vsel %vm6487_vm5, %v6641_v29, %v6642_v28  ;;  %9423 = vmatmul.mubr.f32.gmra.mrb[50].mxu0 %v9103_v19  ;;  %v16560_v54 = vld [vmem:[%s14846_s30 + $0x210] sm:$0xfc]  ;;  %v9119_v29 = vrot.slane %v16540_v31, 2  ;;  %v16569_v16 = vld [vmem:[%s14846_s30 + $0x228] sm:$0xff]  ;;  %v9120_v10 = vrot.slane %v16537_v12, 2  ;;  %v9116_v19 = vrot.slane %v16543_v6, 2 }
 0x32b   : > { %6959 = vmatprep.mubr.f32.mxu1 %v6643_v35  ;;  %v6387_v32 = vld [vmem:[%s14846_s30 + $0x2d0] sm:$0xfe]  ;;  %9427 = vmatprep.mubr.f32.mxu0 %v9111_v37  ;;  %v9117_v35 = vrot.slane %v16530_v9, 2  ;;  %v12367_v37 = vld [vmem:[%s14846_s30 + $0x208] sm:$0x3]  ;;  %v9112_v12 = vrot.slane %v16534_v41, 2  ;;  %v6647_v4 = vsel %vm6487_vm5, %v6642_v28, %v6646_v52 }
 0x32c   : > { %v6638_v21 = vrot.slane %v6387_v32, 1  ;;  %v6389_v53 = vld [vmem:[%s14846_s30 + $0x2f0] sm:$0x1]  ;;  %13210 = vmatpush1.bf16.msra.mxu0 %v13209_v34  ;;  %v16576_v32 = vld [vmem:[%s14846_s30 + $0x220] sm:$0xff]  ;;  %v9115_v34 = vsel %vm7323_vm8, %v9110_v59, %v9114_v40  ;;  %v12371_v9 = vld [vmem:[%s14846_s30 + $0x238] sm:$0x3]  ;;  %v9121_v18 = vsel %vm7323_vm8, %v9119_v29, %v9120_v10 }
 0x32d   : > { %13211 = vmatprep.subr.bf16.mxu0 %v18404_v8  ;;  %v6644_v31 = vrot.slane %v6389_v53, 1  ;;  %v16582_v6 = vld [vmem:[#allocation10 + $0x220] sm:$0xff]  ;;  %v9628_v36 = vld [vmem:[#allocation10 + $0x6b0] sm:$0xff]  ;;  %v6232_v5 = vld [vmem:[%s14846_s30 + $0x8] sm:$0xff]  ;;  %v9129_v59 = vrot.slane %v16549_v3, 2  ;;  %v9130_v40 = vrot.slane %v16569_v16, 2 }
 0x32e   : > { %v6640_v15 = vsel %vm6487_vm5, %v6638_v21, %v6639_v62  ;;  %9428 = vmatmul.mubr.f32.gmra.mrb[52].mxu0 %v9108_v56  ;;  %v16591_v41 = vld [vmem:[#allocation10 + $0x228] sm:$0xff]  ;;  %v16594_v21 = vld [vmem:[%s14846_s30 + $0x230] sm:$0x3]  ;;  %v16597_v53 = vld [vmem:[%s14846_s30 + $0x258] sm:$0xff]  ;;  %v9124_v52 = vrot.slane %v12367_v37, 2  ;;  %v9122_v56 = vrot.slane %v12366_v49, 2  ;;  %v13215_v49 = vpack.c.bf16 %v9629_v7, %v9628_v36 }
 0x32f   : > { %6960 = vmatmul.mubr.f32.gmra.mrb[80].mxu1 %v6640_v15  ;;  %9432 = vmatprep.mubr.f32.mxu0 %v9115_v34  ;;  %v16600_v28 = vld [vmem:[%s14846_s30 + $0x248] sm:$0xfc]  ;;  %v9126_v15 = vrot.slane %v16560_v54, 2  ;;  %v9127_v3 = vrot.slane %v16576_v32, 2  ;;  %v12372_v16 = vld [vmem:[%s14846_s30 + $0x240] sm:$0xfc] }
 0x330   : > { %6964 = vmatprep.mubr.f32.mxu1 %v6647_v4  ;;  %13213 = vmatpush1.bf16.msra.mxu0 %v13212_v50  ;;  %v12375_v34 = vld [vmem:[%s14846_s30 + $0x268] sm:$0x3]  ;;  %v18636_v39 = vrot.slane %v16512_v58, 2  ;;  %v9118_v4 = vsel %vm7323_vm8, %v9116_v19, %v9117_v35  ;;  %v12300_v37 = vld [vmem:[%s14846_s30 + $0x250] sm:$0xff]  ;;  %v12374_v54 = vld [vmem:[%s14846_s30 + $0x260] sm:$0x3]  ;;  %v6645_v50 = vsel %vm6487_vm5, %v6639_v62, %v6644_v31  ;;  %v9125_v58 = vsel %vm7323_vm8, %v9120_v10, %v9124_v52 }
 0x331   : > { %13214 = vmatprep.subr.bf16.mxu0 %v18404_v8  ;;  %v6231_v32 = vld [vmem:[%s14846_s30] sm:$0xff]  ;;  %v16620_v19 = vld [vmem:[#allocation10 + $0x230] sm:$0xff]  ;;  %v12377_v7 = vld [vmem:[%s14846_s30 + $0x278] sm:$0xfc]  ;;  %v9131_v62 = vsel %vm7323_vm8, %v9129_v59, %v9130_v40  ;;  %v9134_v31 = vrot.slane %v12371_v9, 2  ;;  %v9140_v10 = vrot.slane %v16597_v53, 2 }
 0x332   : > { %v9113_v44 = vsel %vm7323_vm8, %v18636_v39, %v9112_v12  ;;  %v9123_v12 = vsel %vm7323_vm8, %v9117_v35, %v9122_v56  ;;  %v16623_v39 = vld [vmem:[%s14846_s30 + $0x288] sm:$0xff]  ;;  %v12306_v35 = vld [vmem:[%s14846_s30 + $0x280] sm:$0xff]  ;;  %v12376_v52 = vld [vmem:[%s14846_s30 + $0x270] sm:$0xfc]  ;;  %v16632_v56 = vsel %vm7323_vm8, %v9126_v15, %v9127_v3  ;;  %v9132_v29 = vrot.slane %v16594_v21, 2 }
 0x333   : > { %9433 = vmatmul.mubr.f32.gmra.mrb[54].mxu0 %v9113_v44  ;;  %v9631_v36 = vld [vmem:[#allocation10 + $0x6c8] sm:$0xff]  ;;  %6965 = vmatmul.mubr.f32.gmra.mrb[82].mxu1 %v6645_v50  ;;  %v9139_v44 = vrot.slane %v16600_v28, 2  ;;  %v9136_v23 = vrot.slane %v12372_v16, 2  ;;  %v9137_v43 = vrot.slane %v12300_v37, 2  ;;  %v16635_v50 = vld [vmem:[#allocation10 + $0x238] sm:$0xff]  ;;  %v16642_v59 = vsel %vm7323_vm8, %v9130_v40, %v9134_v31  ;;  %v9632_v15 = vld [vmem:[#allocation10 + $0x6d0] sm:$0xff] }
 0x334   : > { %9437 = vmatprep.mubr.f32.mxu0 %v9121_v18  ;;  %7034 = vmatprep.mubr.f32.mxu1 %v6232_v5  ;;  %v16637_v18 = vld [vmem:[#allocation10 + $0x240] sm:$0xff]  ;;  %v16639_v9 = vld [vmem:[#allocation10 + $0x248] sm:$0xff]  ;;  %v9144_v53 = vrot.slane %v12375_v34, 2  ;;  %v9142_v5 = vrot.slane %v12374_v54, 2  ;;  %v12379_v28 = vld [vmem:[%s14846_s30 + $0x298] sm:$0x3]  ;;  %v13218_v21 = vpack.c.bf16 %v9631_v36, %v9630_v48  ;;  %v16649_v40 = vsel %vm7323_vm8, %v9127_v3, %v9132_v29 }
 0x335   : > { %13216 = vmatpush1.bf16.msra.mxu0 %v13215_v49  ;;  %v9633_v16 = vld [vmem:[#allocation10 + $0x6d8] sm:$0xff]  ;;  %v9149_v37 = vrot.slane %v12377_v7, 2  ;;  %v9150_v49 = vrot.slane %v16623_v39, 2  ;;  %v9146_v25 = vrot.slane %v12376_v52, 2  ;;  %v9147_v13 = vrot.slane %v12306_v35, 2  ;;  %v9635_v31 = vld [vmem:[#allocation10 + $0x6e8] sm:$0xff] }
 0x336   : > { %13217 = vmatprep.subr.bf16.mxu0 %v18404_v8  ;;  %v16652_v34 = vsel %vm7323_vm8, %v9139_v44, %v9140_v10  ;;  %v12999_v48 = vpack.c.bf16 %v16635_v50, %v16620_v19  ;;  %v11854_v54 = vld [vmem:[#allocation8 + $0xf] ss:$0 sm:$0xff]  ;;  %v16657_v36 = vld [vmem:[%s14846_s30 + $0x18] sm:$0xff]  ;;  %v16667_v3 = vsel %vm7323_vm8, %v9140_v10, %v9144_v53  ;;  %v13002_v29 = vpack.c.bf16 %v16639_v9, %v16637_v18  ;;  %v16764_v50 = vld [vmem:[%s14846_s30 + $0x60] sm:$0xff] }
 0x337   : > { %9438 = vmatmul.mubr.f32.gmra.mrb[56].mxu0 %v9118_v4  ;;  %7035 = vmatmul.mubr.f32.vlgmr.msra.gmra.mrb[20].mxu1 %v6231_v32  ;;  %v18637_v4 = vpack.c.bf16 %v16523_v26, %v16520_v1  ;;  %v16664_v32 = vsel %vm7323_vm8, %v9136_v23, %v9137_v43  ;;  %v9154_v39 = vrot.slane %v12379_v28, 2  ;;  %v9152_v7 = vrot.slane %v12378_v60, 2  ;;  %v9634_v26 = vld [vmem:[#allocation10 + $0x6e0] sm:$0xff]  ;;  %v11870_v23 = vld [vmem:[#allocation8 + $0x1f] ss:$0 sm:$0xff] }
 0x338   : > { %9442 = vmatprep.mubr.f32.mxu0 %v9125_v58  ;;  %7039 = vmatprep.mubr.f32.mxu1 %v16657_v36  ;;  %v16670_v58 = vsel %vm7323_vm8, %v9137_v43, %v9142_v5  ;;  %v13221_v1 = vpack.c.bf16 %v9633_v16, %v9632_v15  ;;  %v16676_v44 = vsel %vm7323_vm8, %v9149_v37, %v9150_v49  ;;  %v11886_v35 = vld [vmem:[#allocation8 + $0x2f] ss:$0 sm:$0xff]  ;;  %v11902_v52 = vld [vmem:[#allocation8 + $0x3f] ss:$0 sm:$0xff]  ;;  %v16691_v5 = vld [vmem:[#allocation10 + $0x250] sm:$0xff] }
 0x339   : > { %12991 = vmatpush1.bf16.msra.mxu1 %v18637_v4  ;;  %13219 = vmatpush1.bf16.msra.mxu0 %v13218_v21  ;;  %v16679_v43 = vsel %vm7323_vm8, %v9146_v25, %v9147_v13  ;;  %v3772_v10 = vmul.f32 %v11854_v54, %v18376_v2  ;;  %v6236_v60 = vld [vmem:[%s14846_s30 + $0x38] sm:$0xff]  ;;  %v16686_v53 = vsel %vm7323_vm8, %v9150_v49, %v9154_v39  ;;  %v11918_v28 = vld [vmem:[#allocation8 + $0x4f] ss:$0 sm:$0xff] }
 0x33a   : > { %12992 = vmatprep.subr.bf16.mxu1 %v18404_v8  ;;  %13220 = vmatprep.subr.bf16.mxu0 %v18404_v8  ;;  %v3773_v25 = vmul.f32 %v15026_v22, %v11854_v54  ;;  %v18638_v2 = vpack.c.bf16 %v16556_v63, %v16554_v45  ;;  %v16697_v21 = vld [vmem:[#allocation10 + $0x258] sm:$0xff]  ;;  %v16701_v15 = vld [vmem:[#allocation10 + $0x268] sm:$0xff]  ;;  %v13224_v16 = vpack.c.bf16 %v9635_v31, %v9634_v26  ;;  %v6235_v63 = vld [vmem:[%s14846_s30 + $0x30] sm:$0xff] }
 0x33b   : > { %9443 = vmatmul.mubr.f32.gmra.mrb[58].mxu0 %v9123_v12  ;;  %7040 = vmatmul.mubr.f32.gmra.mrb[22].mxu1 %v16657_v36  ;;  %v16689_v12 = vsel %vm7323_vm8, %v9147_v13, %v9152_v7  ;;  %v3949_v13 = vmul.f32 %v11870_v23, %v15034_v11  ;;  %v3950_v37 = vmul.f32 %v15028_v14, %v11870_v23  ;;  %v11934_v14 = vld [vmem:[#allocation8 + $0x5f] ss:$0 sm:$0xff]  ;;  %v11950_v39 = vld [vmem:[#allocation8 + $0x6f] ss:$0 sm:$0xff] }
 0x33c   : > { %9447 = vmatprep.mubr.f32.mxu0 %v9131_v62  ;;  %7044 = vmatprep.mubr.f32.mxu1 %v6236_v60  ;;  %v16699_v62 = vld [vmem:[#allocation10 + $0x260] sm:$0xff]  ;;  %v4126_v22 = vmul.f32 %v11886_v35, %v15054_v61  ;;  %v4127_v49 = vmul.f32 %v15046_v51, %v11886_v35  ;;  %v4303_v45 = vmul.f32 %v11902_v52, %v15063_v24  ;;  %v16720_v7 = vld [vmem:[%s14846_s30 + $0x48] sm:$0xff] }
 0x33d   : > { %12994 = vmatpush1.bf16.msra.mxu1 %v18638_v2  ;;  %13222 = vmatpush1.bf16.msra.mxu0 %v13221_v1  ;;  %v3981_v54 = vadd.f32 %v3949_v13, %v3772_v10  ;;  %v3982_v4 = vadd.f32 %v3950_v37, %v3773_v25  ;;  %v4304_v11 = vmul.f32 %v15056_v42, %v11902_v52  ;;  %v11982_v31 = vld [vmem:[#allocation8 + $0x8f] ss:$0 sm:$0xff]  ;;  %v18641_v10 = vld [vmem:[#allocation69_spill] sm:$0xff]  ;;  %v18642_v52 = vld [vmem:[#allocation72_spill] sm:$0xff] }
 0x33e   : > { %12995 = vmatprep.subr.bf16.mxu1 %v18404_v8  ;;  %13223 = vmatprep.subr.bf16.mxu0 %v18404_v8  ;;  %v13005_v51 = vpack.c.bf16 %v16697_v21, %v16691_v5  ;;  %v13008_v24 = vpack.c.bf16 %v16701_v15, %v16699_v62  ;;  %v4480_v61 = vmul.f32 %v11918_v28, %v15085_v55  ;;  %v18640_v55 = vld [vmem:[#allocation70_spill] sm:$0xff]  ;;  %v11998_v25 = vld [vmem:[#allocation8 + $0x9f] ss:$0 sm:$0xff]  ;;  %v18643_v2 = vld [vmem:[#allocation71_spill] sm:$0xff] }
 0x33f   : > { %9448 = vmatmul.mubr.f32.gmra.mrb[60].mxu0 %v16632_v56  ;;  %7045 = vmatmul.mubr.f32.gmra.mrb[24].mxu1 %v6235_v63  ;;  %v11966_v56 = vld [vmem:[#allocation8 + $0x7f] ss:$0 sm:$0xff]  ;;  %v18639_v42 = vpack.c.bf16 %v16591_v41, %v16582_v6  ;;  %v4158_v1 = vadd.f32 %v4126_v22, %v3981_v54  ;;  %v4159_v26 = vadd.f32 %v4127_v49, %v3982_v4  ;;  %v18644_v37 = vld [vmem:[#allocation74_spill] sm:$0xff]  ;;  %v11690_v22 = vld [vmem:[#allocation5 + $0xf] ss:$0 sm:$0xff] }
 0x340   : > { %9452 = vmatprep.mubr.f32.mxu0 %v16642_v59  ;;  %7049 = vmatprep.mubr.f32.mxu1 %v16720_v7  ;;  %v4481_v59 = vmul.f32 %v18576_v38, %v11918_v28  ;;  %v4657_v23 = vmul.f32 %v11934_v14, %v18640_v55  ;;  %v4658_v35 = vmul.f32 %v18641_v10, %v11934_v14  ;;  %v12014_v28 = vld [vmem:[#allocation8 + $0xaf] ss:$0 sm:$0xff]  ;;  %v16735_v49 = vld [vmem:[%s14846_s30 + $0x40] sm:$0xff]  ;;  %v11706_v14 = vld [vmem:[#allocation5 + $0x1f] ss:$0 sm:$0xff] }
 0x341   : > { %12997 = vmatpush1.bf16.msra.mxu1 %v18639_v42  ;;  %13225 = vmatpush1.bf16.msra.mxu0 %v13224_v16  ;;  %v4834_v60 = vmul.f32 %v11950_v39, %v18642_v52  ;;  %v4335_v6 = vadd.f32 %v4303_v45, %v4158_v1  ;;  %v4336_v41 = vadd.f32 %v4304_v11, %v4159_v26  ;;  %v16739_v16 = vld [vmem:[%s14846_s30 + $0x68] sm:$0xff]  ;;  %v18645_v63 = vld [vmem:[#allocation73_spill] sm:$0xff]  ;;  %v18650_v10 = vld [vmem:[#allocation80_spill] sm:$0xff] }
 0x342   : > { %12998 = vmatprep.subr.bf16.mxu1 %v18404_v8  ;;  %v4835_v13 = vmul.f32 %v18643_v2, %v11950_v39  ;;  %v5011_v38 = vmul.f32 %v11966_v56, %v18644_v37  ;;  %v5012_v54 = vmul.f32 %v18645_v63, %v11966_v56  ;;  %v18647_v4 = vld [vmem:[#allocation75_spill] sm:$0xff]  ;;  %v18648_v1 = vld [vmem:[#allocation78_spill] sm:$0xff]  ;;  %v18649_v56 = vld [vmem:[#allocation77_spill] sm:$0xff]  ;;  %v1299_v19 = vmul.f32 %v11690_v22, %v18627_v30 }
 0x343   : > { %9453 = vmatmul.mubr.f32.gmra.mrb[62].mxu0 %v16649_v40  ;;  %7050 = vmatmul.mubr.f32.gmra.mrb[26].mxu1 %v16735_v49  ;;  %v18646_v40 = vld [vmem:[#allocation76_spill] sm:$0xff]  ;;  %v5189_v11 = vmul.f32 %v18647_v4, %v11982_v31  ;;  %v4512_v39 = vadd.f32 %v4480_v61, %v4335_v6  ;;  %v4513_v42 = vadd.f32 %v4481_v59, %v4336_v41  ;;  %v18651_v52 = vld [vmem:[#allocation79_spill] sm:$0xff]  ;;  %v12030_v59 = vld [vmem:[#allocation8 + $0xbf] ss:$0 sm:$0xff] }
 0x344   : > { %9457 = vmatprep.mubr.f32.mxu0 %v16652_v34  ;;  %v5188_v45 = vmul.f32 %v11982_v31, %v18646_v40  ;;  %7054 = vmatprep.mubr.f32.mxu1 %v16739_v16  ;;  %v16750_v26 = vmul.f32 %v11998_v25, %v18648_v1  ;;  %v11722_v34 = vld [vmem:[#allocation5 + $0x2f] ss:$0 sm:$0xff]  ;;  %v16754_v55 = vmul.f32 %v18649_v56, %v11998_v25  ;;  %v11738_v41 = vld [vmem:[#allocation5 + $0x3f] ss:$0 sm:$0xff]  ;;  %v12383_v21 = vld [vmem:[%s14846_s30 + $0x2c8] sm:$0x3] }
 0x345   : > { %13000 = vmatpush1.bf16.msra.mxu1 %v12999_v48  ;;  %v16757_v31 = vmul.f32 %v12014_v28, %v18650_v10  ;;  %v16760_v2 = vmul.f32 %v18651_v52, %v12014_v28  ;;  %v4689_v48 = vadd.f32 %v4657_v23, %v4512_v39  ;;  %v4690_v61 = vadd.f32 %v4658_v35, %v4513_v42  ;;  %v18652_v37 = vld [vmem:[#allocation43_spill] sm:$0xff]  ;;  %v16775_v23 = vld [vmem:[%s14846_s30 + $0x78] sm:$0xff] }
 0x346   : > { %13001 = vmatprep.subr.bf16.mxu1 %v18404_v8  ;;  %v1300_v6 = vmul.f32 %v18628_v46, %v11690_v22  ;;  %v1476_v25 = vmul.f32 %v11706_v14, %v18629_v27  ;;  %v1477_v28 = vmul.f32 %v18652_v37, %v11706_v14  ;;  %v1653_v30 = vmul.f32 %v11722_v34, %v18610_v20  ;;  %v16782_v22 = vld [vmem:[%s14846_s30 + $0x2a8] sm:$0xfc]  ;;  %v16793_v39 = vld [vmem:[%s14846_s30 + $0x70] sm:$0xff]  ;;  %v16797_v42 = vld [vmem:[%s14846_s30 + $0x98] sm:$0xff] }
 0x347   : > { %9458 = vmatmul.mubr.f32.gmra.mrb[64].mxu0 %v16664_v32  ;;  %7055 = vmatmul.mubr.f32.gmra.mrb[28].mxu1 %v16764_v50  ;;  %v1654_v63 = vmul.f32 %v18593_v33, %v11722_v34  ;;  %v11754_v32 = vld [vmem:[#allocation5 + $0x4f] ss:$0 sm:$0xff]  ;;  %v4866_v27 = vadd.f32 %v4834_v60, %v4689_v48  ;;  %v4867_v46 = vadd.f32 %v4835_v13, %v4690_v61  ;;  %v18653_v20 = vld [vmem:[#allocation82_spill] sm:$0xff]  ;;  %v11802_v56 = vld [vmem:[#allocation5 + $0x7f] ss:$0 sm:$0xff] }
 0x348   : > { %9462 = vmatprep.mubr.f32.mxu0 %v16667_v3  ;;  %7059 = vmatprep.mubr.f32.mxu1 %v16775_v23  ;;  %v1508_v35 = vadd.f32 %v1476_v25, %v1299_v19  ;;  %v11770_v3 = vld [vmem:[#allocation5 + $0x5f] ss:$0 sm:$0xff]  ;;  %v16786_v33 = vmul.f32 %v12030_v59, %v18653_v20  ;;  %v1509_v40 = vadd.f32 %v1477_v28, %v1300_v6  ;;  %v11786_v13 = vld [vmem:[#allocation5 + $0x6f] ss:$0 sm:$0xff]  ;;  %v7563_v10 = vld [vmem:[#allocation10 + $0x270] sm:$0xff]  ;;  %v9164_v20 = vrot.slane %v12383_v21, 2 }
 0x349   : > { %13003 = vmatpush1.bf16.msra.mxu1 %v13002_v29  ;;  %v1830_v4 = vmul.f32 %v11738_v41, %v18594_v17  ;;  %v1831_v14 = vmul.f32 %v18394_v47, %v11738_v41  ;;  %v5043_v18 = vadd.f32 %v5011_v38, %v4866_v27  ;;  %v5044_v9 = vadd.f32 %v5012_v54, %v4867_v46  ;;  %v16808_v52 = vld [vmem:[%s14846_s30 + $0x90] sm:$0xff]  ;;  %v18655_v19 = vld [vmem:[#allocation81_spill] sm:$0xff]  ;;  %v18658_v37 = vld [vmem:[#allocation54_spill] sm:$0xff] }
 0x34a   : > { %13004 = vmatprep.subr.bf16.mxu1 %v18404_v8  ;;  %v1685_v29 = vadd.f32 %v1653_v30, %v1508_v35  ;;  %v2007_v60 = vmul.f32 %v11754_v32, %v18365_v0  ;;  %v1686_v17 = vadd.f32 %v1654_v63, %v1509_v40  ;;  %v2008_v47 = vmul.f32 %v18366_v57, %v11754_v32  ;;  %v12380_v57 = vld [vmem:[%s14846_s30 + $0x2a0] sm:$0xfc]  ;;  %v18656_v6 = vld [vmem:[#allocation51_spill] sm:$0xff]  ;;  %v18657_v41 = vld [vmem:[#allocation60_spill] sm:$0xff] }
 0x34b   : > { %9463 = vmatmul.mubr.f32.gmra.mrb[66].mxu0 %v16670_v58  ;;  %7060 = vmatmul.mubr.f32.gmra.mrb[30].mxu1 %v16793_v39  ;;  %v18654_v58 = vld [vmem:[#allocation53_spill] sm:$0xff]  ;;  %v9159_v0 = vrot.slane %v16782_v22, 2  ;;  %v5220_v54 = vadd.f32 %v5188_v45, %v5043_v18  ;;  %v5221_v1 = vadd.f32 %v5189_v11, %v5044_v9  ;;  %v5720_v48 = vmul.f32 %v18655_v19, %v12030_v59  ;;  %v9636_v30 = vld [vmem:[#allocation10 + $0x6f0] sm:$0xff]  ;;  %v7566_v62 = vld [vmem:[#allocation10 + $0x288] sm:$0xff] }
 0x34c   : > { %9467 = vmatprep.mubr.f32.mxu0 %v16676_v44  ;;  %v2184_v38 = vmul.f32 %v11770_v3, %v18654_v58  ;;  %7064 = vmatprep.mubr.f32.mxu1 %v16797_v42  ;;  %v1862_v34 = vadd.f32 %v1830_v4, %v1685_v29  ;;  %v7564_v44 = vld [vmem:[#allocation10 + $0x278] sm:$0xff]  ;;  %v1863_v61 = vadd.f32 %v1831_v14, %v1686_v17  ;;  %v18661_v4 = vld [vmem:[#allocation55_spill] sm:$0xff]  ;;  %v7565_v9 = vld [vmem:[#allocation10 + $0x280] sm:$0xff] }
 0x34d   : > { %13006 = vmatpush1.bf16.msra.mxu1 %v13005_v51  ;;  %v2185_v25 = vmul.f32 %v18656_v6, %v11770_v3  ;;  %v2361_v5 = vmul.f32 %v11786_v13, %v18657_v41  ;;  %v5397_v51 = vadd.f32 %v16750_v26, %v5220_v54  ;;  %v5398_v45 = vadd.f32 %v16754_v55, %v5221_v1  ;;  %v9637_v63 = vld [vmem:[#allocation10 + $0x6f8] sm:$0xff]  ;;  %v16825_v3 = vld [vmem:[%s14846_s30 + $0xa8] sm:$0xff] }
 0x34e   : > { %13007 = vmatprep.subr.bf16.mxu1 %v18404_v8  ;;  %v2039_v11 = vadd.f32 %v2007_v60, %v1862_v34  ;;  %v2362_v28 = vmul.f32 %v18658_v37, %v11786_v13  ;;  %v18659_v59 = vld [vmem:[#allocation56_spill] sm:$0xff]  ;;  %v2040_v27 = vadd.f32 %v2008_v47, %v1863_v61  ;;  %v18660_v46 = vld [vmem:[#allocation61_spill] sm:$0xff]  ;;  %v9156_v26 = vrot.slane %v12380_v57, 2  ;;  %13226 = vmatprep.subr.bf16.mxu0 %v18404_v8  ;;  %v16845_v13 = vld [vmem:[%s14846_s30 + $0xc8] sm:$0xff] }
 0x34f   : > { %9468 = vmatmul.mubr.f32.gmra.mrb[68].mxu0 %v16679_v43  ;;  %7065 = vmatmul.mubr.f32.gmra.mrb[32].mxu1 %v16808_v52  ;;  %v9160_v32 = vrot.slane %v18659_v59, 2  ;;  %v2538_v35 = vmul.f32 %v11802_v56, %v18660_v46  ;;  %v13011_v43 = vpack.c.bf16 %v7564_v44, %v7563_v10  ;;  %v5574_v55 = vadd.f32 %v16757_v31, %v5397_v51  ;;  %v16841_v60 = vld [vmem:[%s14846_s30 + $0xa0] sm:$0xff]  ;;  %v12385_v58 = vld [vmem:[%s14846_s30 + $0x2d8] sm:$0xfc]  ;;  %v7567_v10 = vld [vmem:[#allocation10 + $0x290] sm:$0xff] }
 0x350   : > { %9472 = vmatprep.mubr.f32.mxu0 %v16686_v53  ;;  %7069 = vmatprep.mubr.f32.mxu1 %v16825_v3  ;;  %v5575_v53 = vadd.f32 %v16760_v2, %v5398_v45  ;;  %v2216_v22 = vadd.f32 %v2184_v38, %v2039_v11  ;;  %v2217_v40 = vadd.f32 %v2185_v25, %v2040_v27  ;;  %v18662_v17 = vld [vmem:[#allocation66_spill] sm:$0xff]  ;;  %v7568_v44 = vld [vmem:[#allocation10 + $0x298] sm:$0xff]  ;;  %v12384_v61 = vld [vmem:[%s14846_s30 + $0x2d0] sm:$0xfc] }
 0x351   : > { %13009 = vmatpush1.bf16.msra.mxu1 %v13008_v24  ;;  %v2539_v14 = vmul.f32 %v18661_v4, %v11802_v56  ;;  %v13227_v18 = vpack.c.bf16 %v9637_v63, %v9636_v30  ;;  %v9161_v15 = vsel %vm7323_vm8, %v9159_v0, %v9160_v32  ;;  %v12382_v24 = vld [vmem:[%s14846_s30 + $0x2c0] sm:$0x3]  ;;  %v5751_v31 = vadd.f32 %v16786_v33, %v5574_v55  ;;  %v12387_v41 = vld [vmem:[%s14846_s30 + $0x2f8] sm:$0x3]  ;;  %v7570_v59 = vld [vmem:[#allocation10 + $0x2a8] sm:$0xff] }
 0x352   : > { %13010 = vmatprep.subr.bf16.mxu1 %v18404_v8  ;;  %v5752_v2 = vadd.f32 %v5720_v48, %v5575_v53  ;;  %v2393_v29 = vadd.f32 %v2361_v5, %v2216_v22  ;;  %v9157_v47 = vrot.slane %v18662_v17, 2  ;;  %v2394_v38 = vadd.f32 %v2362_v28, %v2217_v40  ;;  %v16853_v57 = vld [vmem:[%s14846_s30 + $0xc0] sm:$0xff]  ;;  %v16868_v21 = vld [vmem:[%s14846_s30 + $0xd8] sm:$0xff]  ;;  %v12386_v46 = vld [vmem:[%s14846_s30 + $0x2f0] sm:$0x3] }
 0x353   : > { %9473 = vmatmul.mubr.f32.gmra.mrb[70].mxu0 %v16689_v12  ;;  %7070 = vmatmul.mubr.f32.gmra.mrb[34].mxu1 %v16841_v60  ;;  %v6132_v12 = vrot.slane %v5751_v31, 7  ;;  %v13014_v54 = vpack.c.bf16 %v7566_v62, %v7565_v9  ;;  %v9162_v34 = vrot.slane %v12382_v24, 2  ;;  %v9165_v19 = vsel %vm7323_vm8, %v9160_v32, %v9164_v20  ;;  %v18663_v51 = vld [vmem:[#allocation65_spill] sm:$0xff]  ;;  %v7571_v4 = vld [vmem:[#allocation10 + $0x2b0] sm:$0xff]  ;;  %v16903_v31 = vld [vmem:[%s14846_s30 + $0x108] sm:$0xff] }
 0x354   : > { %9477 = vmatprep.mubr.f32.mxu0 %v9161_v15  ;;  %7074 = vmatprep.mubr.f32.mxu1 %v16845_v13  ;;  %v6133_v0 = vrot.slane %v5752_v2, 7  ;;  %v2570_v33 = vadd.f32 %v2538_v35, %v2393_v29  ;;  %v9158_v1 = vsel %vm7323_vm8, %v9156_v26, %v9157_v47  ;;  %v2571_v56 = vadd.f32 %v2539_v14, %v2394_v38  ;;  %v7569_v63 = vld [vmem:[#allocation10 + $0x2a0] sm:$0xff]  ;;  %v16884_v35 = vld [vmem:[%s14846_s30 + $0xd0] sm:$0xff]  ;;  %v7572_v14 = vld [vmem:[#allocation10 + $0x2b8] sm:$0xff] }
 0x355   : > { %13012 = vmatpush1.bf16.msra.mxu1 %v13011_v43  ;;  %13228 = vmatpush1.bf16.msra.mxu0 %v13227_v18  ;;  %v9169_v48 = vrot.slane %v12385_v58, 2  ;;  %12165 = vst [vmem:[%s14846_s30 + $0x308] sm:$0xfe] %v6132_v12  ;;  %v9170_v45 = vrot.slane %v18663_v51, 2  ;;  %v13017_v11 = vpack.c.bf16 %v7568_v44, %v7567_v10  ;;  %v9163_v37 = vsel %vm7323_vm8, %v9157_v47, %v9162_v34  ;;  %v16888_v43 = vld [vmem:[%s14846_s30 + $0xf8] sm:$0xff]  ;;  %v18664_v26 = vld [vmem:[#allocation50_spill] sm:$0xff] }
 0x356   : > { %13013 = vmatprep.subr.bf16.mxu1 %v18404_v8  ;;  %v16858_v6 = vsel %vm5909_vm6, %v6132_v12, %v6133_v0  ;;  %12167 = vst [vmem:[%s14846_s30 + $0x328] sm:$0x1] %v6133_v0  ;;  %v5955_v25 = vrot.slane %v2570_v33, 7  ;;  %13229 = vmatprep.subr.bf16.mxu0 %v18404_v8  ;;  %v5956_v5 = vrot.slane %v2571_v56, 7  ;;  %v9166_v28 = vrot.slane %v12384_v61, 2  ;;  %v16896_v18 = vld [vmem:[%s14846_s30 + $0xf0] sm:$0xff] }
 0x357   : > { %9478 = vmatmul.mubr.f32.gmra.mrb[72].mxu0 %v9158_v1  ;;  %7075 = vmatmul.mubr.f32.gmra.mrb[36].mxu1 %v16853_v57  ;;  %12166 = vst [vmem:[%s14846_s30 + $0x318] sm:$0xff] %v16858_v6  ;;  %v9171_v32 = vsel %vm7323_vm8, %v9169_v48, %v9170_v45  ;;  %v9174_v27 = vrot.slane %v12387_v41, 2  ;;  %v9167_v55 = vrot.slane %v18664_v26, 2  ;;  %v13020_v53 = vpack.c.bf16 %v7570_v59, %v7569_v63  ;;  %v7573_v58 = vld [vmem:[#allocation10 + $0x2c0] sm:$0xff]  ;;  %v7574_v38 = vld [vmem:[#allocation10 + $0x2c8] sm:$0xff]  ;;  %v7576_v48 = vld [vmem:[#allocation10 + $0x2d8] sm:$0xff] }
 0x358   : > { %9482 = vmatprep.mubr.f32.mxu0 %v9165_v19  ;;  %7079 = vmatprep.mubr.f32.mxu1 %v16868_v21  ;;  %12117 = vst [vmem:[%s14846_s30 + $0x300] sm:$0xfe] %v5955_v25  ;;  %v16875_v30 = vsel %vm5909_vm6, %v5955_v25, %v5956_v5  ;;  %12119 = vst [vmem:[%s14846_s30 + $0x320] sm:$0x1] %v5956_v5  ;;  %v9172_v20 = vrot.slane %v12386_v46, 2  ;;  %v9180_v2 = vrot.slane %v16858_v6, 2 }
 0x359   : > { %13015 = vmatpush1.bf16.msra.mxu1 %v13014_v54  ;;  %12118 = vst [vmem:[%s14846_s30 + $0x310] sm:$0xff] %v16875_v30  ;;  %v9168_v22 = vsel %vm7323_vm8, %v9166_v28, %v9167_v55  ;;  %v9175_v9 = vsel %vm7323_vm8, %v9170_v45, %v9174_v27  ;;  %v13023_v29 = vpack.c.bf16 %v7572_v14, %v7571_v4  ;;  %v16912_v54 = vld [vmem:[%s14846_s30 + $0x100] sm:$0xff]  ;;  %v16916_v1 = vld [vmem:[%s14846_s30 + $0x128] sm:$0xff]  ;;  %v9177_v34 = vrot.slane %v16875_v30, 2  ;;  %v7575_v19 = vld [vmem:[#allocation10 + $0x2d0] sm:$0xff] }
 0x35a   : > { %13016 = vmatprep.subr.bf16.mxu1 %v18404_v8  ;;  %v9173_v17 = vsel %vm7323_vm8, %v9167_v55, %v9172_v20  ;;  %v13026_v56 = vpack.c.bf16 %v7574_v38, %v7573_v58  ;;  %v16923_v61 = vld [vmem:[%s14846_s30 + $0x120] sm:$0xff]  ;;  %v16928_v25 = vld [vmem:[%s14846_s30 + $0x138] sm:$0xff]  ;;  %v13029_v41 = vpack.c.bf16 %v7576_v48, %v7575_v19  ;;  %v10313_v45 = vld [vmem:[#allocation10 + $0x708] sm:$0xff] }
 0x35b   : > { %9483 = vmatmul.mubr.f32.gmra.mrb[74].mxu0 %v9163_v37  ;;  %7080 = vmatmul.mubr.f32.gmra.mrb[38].mxu1 %v16884_v35  ;;  %v10312_v51 = vld [vmem:[#allocation10 + $0x700] sm:$0xff]  ;;  %v7578_v37 = vld [vmem:[#allocation10 + $0x2e8] sm:$0xff]  ;;  %v16934_v28 = vld [vmem:[%s14846_s30 + $0x130] sm:$0xff] }
 0x35c   : > { %9487 = vmatprep.mubr.f32.mxu0 %v9171_v32  ;;  %7084 = vmatprep.mubr.f32.mxu1 %v16888_v43  ;;  %v12389_v40 = vld [vmem:[%s14846_s30 + $0x308] sm:$0xfc]  ;;  %v16938_v63 = vld [vmem:[%s14846_s30 + $0x158] sm:$0xff]  ;;  %v13230_v59 = vpack.c.bf16 %v10313_v45, %v10312_v51  ;;  %v16943_v32 = vld [vmem:[%s14846_s30 + $0x150] sm:$0xff] }
 0x35d   : > { %13018 = vmatpush1.bf16.msra.mxu1 %v13017_v11  ;;  %v9179_v62 = vrot.slane %v12389_v40, 2  ;;  %v12391_v24 = vld [vmem:[%s14846_s30 + $0x328] sm:$0x3]  ;;  %v7577_v11 = vld [vmem:[#allocation10 + $0x2e0] sm:$0xff]  ;;  %v10314_v27 = vld [vmem:[#allocation10 + $0x710] sm:$0xff] }
 0x35e   : > { %13019 = vmatprep.subr.bf16.mxu1 %v18404_v8  ;;  %v9184_v0 = vrot.slane %v12391_v24, 2  ;;  %v10315_v46 = vld [vmem:[#allocation10 + $0x718] sm:$0xff]  ;;  %v13032_v26 = vpack.c.bf16 %v7578_v37, %v7577_v11  ;;  %v16957_v40 = vld [vmem:[%s14846_s30 + $0x70] sm:$0xff]  ;;  %v10317_v4 = vld [vmem:[#allocation10 + $0x728] sm:$0xff] }
 0x35f   : > { %9488 = vmatmul.mubr.f32.gmra.mrb[76].mxu0 %v9168_v22  ;;  %7085 = vmatmul.mubr.f32.gmra.mrb[40].mxu1 %v16896_v18  ;;  %v12388_v15 = vld [vmem:[%s14846_s30 + $0x300] sm:$0xfc]  ;;  %v9181_v12 = vsel %vm7323_vm8, %v9179_v62, %v9180_v2  ;;  %v12390_v33 = vld [vmem:[%s14846_s30 + $0x320] sm:$0x3]  ;;  %v16948_v55 = vld [vmem:[%s14846_s30 + $0x78] sm:$0xff]  ;;  %v13233_v20 = vpack.c.bf16 %v10315_v46, %v10314_v27 }
 0x360   : > { %9492 = vmatprep.mubr.f32.mxu0 %v9175_v9  ;;  %7089 = vmatprep.mubr.f32.mxu1 %v16903_v31  ;;  %v9176_v47 = vrot.slane %v12388_v15, 2  ;;  %v9182_v44 = vrot.slane %v12390_v33, 2  ;;  %v9185_v6 = vsel %vm7323_vm8, %v9180_v2, %v9184_v0  ;;  %v7580_v22 = vld [vmem:[#allocation10 + $0x2f8] sm:$0xff]  ;;  %v16963_v9 = vld [vmem:[%s14846_s30 + $0x160] sm:$0xff]  ;;  %v16967_v62 = vld [vmem:[%s14846_s30 + $0x188] sm:$0xff] }
 0x361   : > { %13021 = vmatpush1.bf16.msra.mxu1 %v13020_v53  ;;  %v7579_v53 = vld [vmem:[#allocation10 + $0x2f0] sm:$0xff]  ;;  %v10319_v2 = vld [vmem:[#allocation10 + $0x738] sm:$0xff]  ;;  %v16984_v58 = vld [vmem:[%s14846_s30 + $0xa0] sm:$0xff] }
 0x362   : > { %13022 = vmatprep.subr.bf16.mxu1 %v18404_v8  ;;  %v9178_v10 = vsel %vm7323_vm8, %v9176_v47, %v9177_v34  ;;  %v9183_v5 = vsel %vm7323_vm8, %v9177_v34, %v9182_v44  ;;  %v13035_v14 = vpack.c.bf16 %v7580_v22, %v7579_v53  ;;  %v10318_v24 = vld [vmem:[#allocation10 + $0x730] sm:$0xff]  ;;  %v10320_v38 = vld [vmem:[#allocation10 + $0x740] sm:$0xff]  ;;  %v16990_v0 = vld [vmem:[%s14846_s30 + $0x1b8] sm:$0xff] }
 0x363   : > { %9493 = vmatmul.mubr.f32.gmra.mrb[78].mxu0 %v9173_v17  ;;  %7090 = vmatmul.mubr.f32.gmra.mrb[42].mxu1 %v16912_v54  ;;  %v16977_v17 = vld [vmem:[%s14846_s30 + $0xa8] sm:$0xff]  ;;  %v13239_v47 = vpack.c.bf16 %v10319_v2, %v10318_v24  ;;  %v10322_v34 = vld [vmem:[#allocation10 + $0x750] sm:$0xff]  ;;  %v12403_v44 = vld [vmem:[%s14846_s30 + $0xd8] sm:$0xff] }
 0x364   : > { %9497 = vmatprep.mubr.f32.mxu0 %v9181_v12  ;;  %7094 = vmatprep.mubr.f32.mxu1 %v16916_v1  ;;  %v18666_v12 = vld [vmem:[#allocation52_spill] sm:$0xff]  ;;  %v17018_v37 = vld [vmem:[%s14846_s30 + $0x1e0] sm:$0xff]  ;;  %v10329_v53 = vld [vmem:[#allocation10 + $0x788] sm:$0xff] }
 0x365   : > { %13024 = vmatpush1.bf16.msra.mxu1 %v13023_v29  ;;  %v16973_v29 = vld [vmem:[%s14846_s30 + $0x180] sm:$0xff]  ;;  %v12402_v48 = vld [vmem:[%s14846_s30 + $0xd0] sm:$0xff]  ;;  %v10327_v11 = vld [vmem:[#allocation10 + $0x778] sm:$0xff] }
 0x366   : > { %13025 = vmatprep.subr.bf16.mxu1 %v18404_v8  ;;  %v10326_v45 = vld [vmem:[#allocation10 + $0x770] sm:$0xff]  ;;  %v12406_v46 = vld [vmem:[%s14846_s30 + $0x100] sm:$0xff]  ;;  %v17031_v22 = vld [vmem:[%s14846_s30 + $0x218] sm:$0xff] }
 0x367   : > { %9498 = vmatmul.mubr.f32.gmra.mrb[80].mxu0 %v9178_v10  ;;  %7095 = vmatmul.mubr.f32.gmra.mrb[44].mxu1 %v16923_v61  ;;  %v16996_v10 = vld [vmem:[%s14846_s30 + $0x1b0] sm:$0xff]  ;;  %v13251_v27 = vpack.c.bf16 %v10327_v11, %v10326_v45  ;;  %v10339_v11 = vld [vmem:[#allocation10 + $0x7d8] sm:$0xff] }
 0x368   : > { %9502 = vmatprep.mubr.f32.mxu0 %v9185_v6  ;;  %7099 = vmatprep.mubr.f32.mxu1 %v16928_v25  ;;  %v10324_v6 = vld [vmem:[#allocation10 + $0x760] sm:$0xff]  ;;  %v12410_v2 = vld [vmem:[%s14846_s30 + $0x130] sm:$0xff] }
 0x369   : > { %13027 = vmatpush1.bf16.msra.mxu1 %v13026_v56  ;;  %v10323_v56 = vld [vmem:[#allocation10 + $0x758] sm:$0xff]  ;;  %v10338_v45 = vld [vmem:[#allocation10 + $0x7d0] sm:$0xff] }
 0x36a   : > { %13028 = vmatprep.subr.bf16.mxu1 %v18404_v8  ;;  %v13245_v19 = vpack.c.bf16 %v10323_v56, %v10322_v34  ;;  %v17053_v34 = vld [vmem:[%s14846_s30 + $0x240] sm:$0xff]  ;;  %v12415_v56 = vld [vmem:[%s14846_s30 + $0x168] sm:$0xff] }
 0x36b   : > { %9503 = vmatmul.mubr.f32.gmra.mrb[82].mxu0 %v9183_v5  ;;  %7100 = vmatmul.mubr.f32.gmra.mrb[46].mxu1 %v16934_v28  ;;  %v17012_v5 = vld [vmem:[%s14846_s30 + $0x1e8] sm:$0xff] }
 0x36c   : > { %9702 = vmatprep.mubr.f32.mxu0 %v16739_v16  ;;  %7104 = vmatprep.mubr.f32.mxu1 %v16938_v63  ;;  %v16953_v16 = vld [vmem:[%s14846_s30 + $0x168] sm:$0xff] }
 0x36d   : > { %13030 = vmatpush1.bf16.msra.mxu1 %v13029_v41  ;;  %v10325_v41 = vld [vmem:[#allocation10 + $0x768] sm:$0xff] }
 0x36e   : > { %13031 = vmatprep.subr.bf16.mxu1 %v18404_v8  ;;  %v13248_v51 = vpack.c.bf16 %v10325_v41, %v10324_v6  ;;  %v10337_v6 = vld [vmem:[#allocation10 + $0x7c8] sm:$0xff]  ;;  %v13982_v41 = vld [vmem:[%s14846_s30 + $0x250] sm:$0xff] }
 0x36f   : > { %9703 = vmatmul.mubr.f32.vlgmr.msra.gmra.mrb[20].mxu0 %v16764_v50  ;;  %7105 = vmatmul.mubr.f32.gmra.mrb[48].mxu1 %v16943_v32  ;;  %v10316_v50 = vld [vmem:[#allocation10 + $0x720] sm:$0xff] }
 0x370   : > { %9707 = vmatprep.mubr.f32.mxu0 %v16948_v55  ;;  %7109 = vmatprep.mubr.f32.mxu1 %v16953_v16  ;;  %v13236_v15 = vpack.c.bf16 %v10317_v4, %v10316_v50  ;;  %v10330_v50 = vld [vmem:[#allocation10 + $0x790] sm:$0xff]  ;;  %v10331_v4 = vld [vmem:[#allocation10 + $0x798] sm:$0xff] }
 0x371   : > { %13231 = vmatpush1.bf16.msra.mxu0 %v13230_v59  ;;  %13033 = vmatpush1.bf16.msra.mxu1 %v13032_v26  ;;  %v12407_v59 = vld [vmem:[%s14846_s30 + $0x108] sm:$0xff]  ;;  %v10328_v26 = vld [vmem:[#allocation10 + $0x780] sm:$0xff]  ;;  %v13257_v24 = vpack.c.bf16 %v10331_v4, %v10330_v50  ;;  %v10342_v4 = vld [vmem:[#allocation10 + $0x7f0] sm:$0xff] }
 0x372   : > { %13232 = vmatprep.subr.bf16.mxu0 %v18404_v8  ;;  %13034 = vmatprep.subr.bf16.mxu1 %v18404_v8 }
 0x373   : > { %9708 = vmatmul.mubr.f32.gmra.mrb[22].mxu0 %v16957_v40  ;;  %7110 = vmatmul.mubr.f32.gmra.mrb[50].mxu1 %v16963_v9 }
 0x374   : > { %9712 = vmatprep.mubr.f32.mxu0 %v16797_v42  ;;  %7114 = vmatprep.mubr.f32.mxu1 %v16967_v62  ;;  %v18665_v42 = vld [vmem:[#allocation67_spill] sm:$0xff] }
 0x375   : > { %13234 = vmatpush1.bf16.msra.mxu0 %v13233_v20  ;;  %13036 = vmatpush1.bf16.msra.mxu1 %v13035_v14  ;;  %v13254_v20 = vpack.c.bf16 %v10329_v53, %v10328_v26  ;;  %v17037_v14 = vld [vmem:[%s14846_s30 + $0x210] sm:$0xff]  ;;  %v10340_v53 = vld [vmem:[#allocation10 + $0x7e0] sm:$0xff] }
 0x376   : > { %13235 = vmatprep.subr.bf16.mxu0 %v18404_v8  ;;  %13037 = vmatprep.subr.bf16.mxu1 %v18404_v8  ;;  %v12418_v26 = vld [vmem:[%s14846_s30 + $0x190] sm:$0xff] }
 0x377   : > { %9713 = vmatmul.mubr.f32.gmra.mrb[24].mxu0 %v16808_v52  ;;  %7115 = vmatmul.mubr.f32.gmra.mrb[52].mxu1 %v16973_v29  ;;  %v10321_v52 = vld [vmem:[#allocation10 + $0x748] sm:$0xff] }
 0x378   : > { %9717 = vmatprep.mubr.f32.mxu0 %v16977_v17  ;;  %7119 = vmatprep.mubr.f32.mxu1 %v18665_v42  ;;  %v13242_v33 = vpack.c.bf16 %v10321_v52, %v10320_v38  ;;  %v10332_v42 = vld [vmem:[#allocation10 + $0x7a0] sm:$0xff] }
 0x379   : > { %13237 = vmatpush1.bf16.msra.mxu0 %v13236_v15  ;;  %v12411_v15 = vld [vmem:[%s14846_s30 + $0x138] sm:$0xff]  ;;  %v13980_v38 = vld [vmem:[%s14846_s30 + $0x220] sm:$0xff] }
 0x37a   : > { %13238 = vmatprep.subr.bf16.mxu0 %v18404_v8 }
 0x37b   : > { %9718 = vmatmul.mubr.f32.gmra.mrb[26].mxu0 %v16984_v58  ;;  %7120 = vmatmul.mubr.f32.gmra.mrb[54].mxu1 %v18666_v12  ;;  %v10334_v12 = vld [vmem:[#allocation10 + $0x7b0] sm:$0xff] }
 0x37c   : > { %9722 = vmatprep.mubr.f32.mxu0 %v16845_v13  ;;  %7124 = vmatprep.mubr.f32.mxu1 %v16990_v0  ;;  %v17002_v13 = vld [vmem:[%s14846_s30 + $0x1c8] sm:$0xff] }
 0x37d   : > { %13240 = vmatpush1.bf16.msra.mxu0 %v13239_v47  ;;  %v10333_v47 = vld [vmem:[#allocation10 + $0x7a8] sm:$0xff] }
 0x37e   : > { %13241 = vmatprep.subr.bf16.mxu0 %v18404_v8  ;;  %v13260_v52 = vpack.c.bf16 %v10333_v47, %v10332_v42  ;;  %v12422_v42 = vld [vmem:[%s14846_s30 + $0x1c0] sm:$0xff]  ;;  %v7196_v47 = vld [vmem:[%s14846_s30 + $0x8] sm:$0xfc] }
 0x37f   : > { %9723 = vmatmul.mubr.f32.gmra.mrb[28].mxu0 %v16853_v57  ;;  %7125 = vmatmul.mubr.f32.gmra.mrb[56].mxu1 %v16996_v10  ;;  %v17008_v57 = vld [vmem:[%s14846_s30 + $0x1c0] sm:$0xff] }
 0x380   : > { %9727 = vmatprep.mubr.f32.mxu0 %v12403_v44  ;;  %7129 = vmatprep.mubr.f32.mxu1 %v17002_v13 }
 0x381   : > { %13243 = vmatpush1.bf16.msra.mxu0 %v13242_v33  ;;  %v10335_v33 = vld [vmem:[#allocation10 + $0x7b8] sm:$0xff] }
 0x382   : > { %13244 = vmatprep.subr.bf16.mxu0 %v18404_v8  ;;  %v13263_v44 = vpack.c.bf16 %v10335_v33, %v10334_v12  ;;  %v7328_v12 = vrot.slane %v16657_v36, 2  ;;  %v7195_v33 = vld [vmem:[%s14846_s30] sm:$0xfc] }
 0x383   : > { %9728 = vmatmul.mubr.f32.gmra.mrb[30].mxu0 %v12402_v48  ;;  %7130 = vmatmul.mubr.f32.gmra.mrb[58].mxu1 %v17008_v57  ;;  %v10336_v48 = vld [vmem:[#allocation10 + $0x7c0] sm:$0xff] }
 0x384   : > { %9732 = vmatprep.mubr.f32.mxu0 %v16888_v43  ;;  %7134 = vmatprep.mubr.f32.mxu1 %v17012_v5  ;;  %v17024_v43 = vld [vmem:[%s14846_s30 + $0x1f8] sm:$0xff] }
 0x385   : > { %13246 = vmatpush1.bf16.msra.mxu0 %v13245_v19  ;;  %v12414_v19 = vld [vmem:[%s14846_s30 + $0x160] sm:$0xff] }
 0x386   : > { %13247 = vmatprep.subr.bf16.mxu0 %v18404_v8 }
 0x387   : > { %9733 = vmatmul.mubr.f32.gmra.mrb[32].mxu0 %v16896_v18  ;;  %7135 = vmatmul.mubr.f32.gmra.mrb[60].mxu1 %v17018_v37  ;;  %v13978_v18 = vld [vmem:[%s14846_s30 + $0x1f0] sm:$0xff] }
 0x388   : > { %9737 = vmatprep.mubr.f32.mxu0 %v12407_v59  ;;  %7139 = vmatprep.mubr.f32.mxu1 %v17024_v43  ;;  %v17069_v59 = vld [vmem:[%s14846_s30 + $0x270] sm:$0xff] }
 0x389   : > { %13249 = vmatpush1.bf16.msra.mxu0 %v13248_v51  ;;  %v13266_v51 = vpack.c.bf16 %v10337_v6, %v10336_v48  ;;  %v12426_v48 = vld [vmem:[%s14846_s30 + $0x1f0] sm:$0xff] }
 0x38a   : > { %13250 = vmatprep.subr.bf16.mxu0 %v18404_v8 }
 0x38b   : > { %9738 = vmatmul.mubr.f32.gmra.mrb[34].mxu0 %v12406_v46  ;;  %7140 = vmatmul.mubr.f32.gmra.mrb[62].mxu1 %v13978_v18  ;;  %v13269_v46 = vpack.c.bf16 %v10339_v11, %v10338_v45  ;;  %v10341_v18 = vld [vmem:[#allocation10 + $0x7e8] sm:$0xff]  ;;  %v13988_v11 = vld [vmem:[%s14846_s30 + $0x2e0] sm:$0xff] }
 0x38c   : > { %9742 = vmatprep.mubr.f32.mxu0 %v16916_v1  ;;  %7144 = vmatprep.mubr.f32.mxu1 %v17031_v22  ;;  %v13979_v1 = vld [vmem:[%s14846_s30 + $0x228] sm:$0xff]  ;;  %v13272_v50 = vpack.c.bf16 %v10341_v18, %v10340_v53  ;;  %v7905_v53 = vld [vmem:[#allocation10 + $0x310] sm:$0xff]  ;;  %v7906_v18 = vld [vmem:[#allocation10 + $0x318] sm:$0xff] }
 0x38d   : > { %13252 = vmatpush1.bf16.msra.mxu0 %v13251_v27  ;;  %v12419_v27 = vld [vmem:[%s14846_s30 + $0x198] sm:$0xff]  ;;  %v7904_v45 = vld [vmem:[#allocation10 + $0x308] sm:$0xff] }
 0x38e   : > { %13253 = vmatprep.subr.bf16.mxu0 %v18404_v8 }
 0x38f   : > { %9743 = vmatmul.mubr.f32.gmra.mrb[36].mxu0 %v16923_v61  ;;  %7145 = vmatmul.mubr.f32.gmra.mrb[64].mxu1 %v17037_v14  ;;  %v17047_v61 = vld [vmem:[%s14846_s30 + $0x248] sm:$0xff] }
 0x390   : > { %9747 = vmatprep.mubr.f32.mxu0 %v12411_v15  ;;  %7149 = vmatprep.mubr.f32.mxu1 %v13979_v1  ;;  %v10343_v15 = vld [vmem:[#allocation10 + $0x7f8] sm:$0xff]  ;;  %v17085_v1 = vld [vmem:[%s14846_s30 + $0x2a0] sm:$0xff] }
 0x391   : > { %13255 = vmatpush1.bf16.msra.mxu0 %v13254_v20  ;;  %v13984_v20 = vld [vmem:[%s14846_s30 + $0x280] sm:$0xff] }
 0x392   : > { %13256 = vmatprep.subr.bf16.mxu0 %v18404_v8 }
 0x393   : > { %9748 = vmatmul.mubr.f32.gmra.mrb[38].mxu0 %v12410_v2  ;;  %7150 = vmatmul.mubr.f32.gmra.mrb[66].mxu1 %v13980_v38  ;;  %v13275_v2 = vpack.c.bf16 %v10343_v15, %v10342_v4  ;;  %v13986_v38 = vld [vmem:[%s14846_s30 + $0x2b0] sm:$0xff]  ;;  %v7202_v15 = vld [vmem:[%s14846_s30 + $0x58] sm:$0x3] }
 0x394   : > { %9752 = vmatprep.mubr.f32.mxu0 %v16938_v63  ;;  %7154 = vmatprep.mubr.f32.mxu1 %v17047_v61  ;;  %v13981_v63 = vld [vmem:[%s14846_s30 + $0x258] sm:$0xff]  ;;  %v7199_v4 = vld [vmem:[%s14846_s30 + $0x30] sm:$0xfc] }
 0x395   : > { %13258 = vmatpush1.bf16.msra.mxu0 %v13257_v24  ;;  %v12423_v24 = vld [vmem:[%s14846_s30 + $0x1c8] sm:$0xff] }
 0x396   : > { %13259 = vmatprep.subr.bf16.mxu0 %v18404_v8 }
 0x397   : > { %9753 = vmatmul.mubr.f32.gmra.mrb[40].mxu0 %v16943_v32  ;;  %7155 = vmatmul.mubr.f32.gmra.mrb[68].mxu1 %v17053_v34  ;;  %v17063_v32 = vld [vmem:[%s14846_s30 + $0x278] sm:$0xff] }
 0x398   : > { %9757 = vmatprep.mubr.f32.mxu0 %v12415_v56  ;;  %7159 = vmatprep.mubr.f32.mxu1 %v13981_v63  ;;  %v17104_v56 = vld [vmem:[%s14846_s30 + $0x2d0] sm:$0xff]  ;;  %v7198_v63 = vld [vmem:[%s14846_s30 + $0x28] sm:$0x3] }
 0x399   : > { %13261 = vmatpush1.bf16.msra.mxu0 %v13260_v52  ;;  %v7327_v52 = vrot.slane %v7196_v47, 2  ;;  %v7332_v6 = vrot.slane %v7198_v63, 2  ;;  %v7334_v47 = vrot.slane %v7199_v4, 2  ;;  %v7914_v4 = vld [vmem:[#allocation10 + $0x358] sm:$0xff] }
 0x39a   : > { %13262 = vmatprep.subr.bf16.mxu0 %v18404_v8 }
 0x39b   : > { %9758 = vmatmul.mubr.f32.gmra.mrb[42].mxu0 %v12414_v19  ;;  %7160 = vmatmul.mubr.f32.gmra.mrb[70].mxu1 %v13982_v41  ;;  %v7324_v19 = vrot.slane %v7195_v33, 2  ;;  %v7329_v36 = vsel %vm7323_vm8, %v7327_v52, %v7328_v12  ;;  %v7197_v41 = vld [vmem:[%s14846_s30 + $0x20] sm:$0x3]  ;;  %v7342_v52 = vrot.slane %v7202_v15, 2  ;;  %v7201_v33 = vld [vmem:[%s14846_s30 + $0x50] sm:$0x3] }
 0x39c   : > { %9762 = vmatprep.mubr.f32.mxu0 %v16967_v62  ;;  %7164 = vmatprep.mubr.f32.mxu1 %v17063_v32  ;;  %v13983_v62 = vld [vmem:[%s14846_s30 + $0x288] sm:$0xff] }
 0x39d   : > { %13264 = vmatpush1.bf16.msra.mxu0 %v13263_v44  ;;  %v12427_v44 = vld [vmem:[%s14846_s30 + $0x1f8] sm:$0xff] }
 0x39e   : > { %13265 = vmatprep.subr.bf16.mxu0 %v18404_v8 }
 0x39f   : > { %9763 = vmatmul.mubr.f32.gmra.mrb[44].mxu0 %v16973_v29  ;;  %7165 = vmatmul.mubr.f32.gmra.mrb[72].mxu1 %v17069_v59  ;;  %v17079_v29 = vld [vmem:[%s14846_s30 + $0x2a8] sm:$0xff] }
 0x3a0   : > { %9767 = vmatprep.mubr.f32.mxu0 %v12419_v27  ;;  %7169 = vmatprep.mubr.f32.mxu1 %v13983_v62  ;;  %v7330_v27 = vrot.slane %v7197_v41, 2  ;;  %v7200_v62 = vld [vmem:[%s14846_s30 + $0x38] sm:$0xfc]  ;;  %v7206_v41 = vld [vmem:[%s14846_s30 + $0x88] sm:$0x3] }
 0x3a1   : > { %13267 = vmatpush1.bf16.msra.mxu0 %v13266_v51  ;;  %v7903_v51 = vld [vmem:[#allocation10 + $0x300] sm:$0xff] }
 0x3a2   : > { %13268 = vmatprep.subr.bf16.mxu0 %v18404_v8 }
 0x3a3   : > { %9768 = vmatmul.mubr.f32.gmra.mrb[46].mxu0 %v12418_v26  ;;  %7170 = vmatmul.mubr.f32.gmra.mrb[74].mxu1 %v13984_v20  ;;  %v7333_v26 = vsel %vm7323_vm8, %v7328_v12, %v7332_v6  ;;  %v12431_v20 = vld [vmem:[%s14846_s30 + $0x228] sm:$0xff] }
 0x3a4   : > { %9772 = vmatprep.mubr.f32.mxu0 %v16990_v0  ;;  %7174 = vmatprep.mubr.f32.mxu1 %v17079_v29  ;;  %v13985_v0 = vld [vmem:[%s14846_s30 + $0x2b8] sm:$0xff] }
 0x3a5   : > { %13270 = vmatpush1.bf16.msra.mxu0 %v13269_v46  ;;  %v13038_v46 = vpack.c.bf16 %v7904_v45, %v7903_v51  ;;  %v7348_v45 = vrot.slane %v16775_v23, 2  ;;  %v7345_v23 = vrot.slane %v16793_v39, 2  ;;  %v7207_v39 = vld [vmem:[%s14846_s30 + $0x90] sm:$0xfc] }
 0x3a6   : > { %13271 = vmatprep.subr.bf16.mxu0 %v18404_v8 }
 0x3a7   : > { %9773 = vmatmul.mubr.f32.gmra.mrb[48].mxu0 %v16996_v10  ;;  %7175 = vmatmul.mubr.f32.gmra.mrb[76].mxu1 %v17085_v1  ;;  %v17096_v10 = vld [vmem:[%s14846_s30 + $0x2d8] sm:$0xff] }
 0x3a8   : > { %9777 = vmatprep.mubr.f32.mxu0 %v12423_v24  ;;  %7179 = vmatprep.mubr.f32.mxu1 %v13985_v0  ;;  %v13041_v24 = vpack.c.bf16 %v7906_v18, %v7905_v53  ;;  %v7338_v0 = vrot.slane %v16720_v7, 2  ;;  %v7204_v7 = vld [vmem:[%s14846_s30 + $0x68] sm:$0xfc]  ;;  %v7205_v53 = vld [vmem:[%s14846_s30 + $0x80] sm:$0x3] }
 0x3a9   : > { %13273 = vmatpush1.bf16.msra.mxu0 %v13272_v50  ;;  %v7337_v50 = vrot.slane %v7200_v62, 2  ;;  %v7347_v6 = vrot.slane %v7204_v7, 2  ;;  %v7208_v18 = vld [vmem:[%s14846_s30 + $0x98] sm:$0xfc]  ;;  %v7350_v15 = vrot.slane %v7205_v53, 2 }
 0x3aa   : > { %13274 = vmatprep.subr.bf16.mxu0 %v18404_v8  ;;  %v7216_v53 = vld [vmem:[%s14846_s30 + $0xf8] sm:$0xfc] }
 0x3ab   : > { %9778 = vmatmul.mubr.f32.gmra.mrb[50].mxu0 %v12422_v42  ;;  %7180 = vmatmul.mubr.f32.gmra.mrb[78].mxu1 %v13986_v38  ;;  %v7907_v42 = vld [vmem:[#allocation10 + $0x320] sm:$0xff]  ;;  %v7339_v38 = vsel %vm7323_vm8, %v7337_v50, %v7338_v0  ;;  %v7913_v50 = vld [vmem:[#allocation10 + $0x350] sm:$0xff] }
 0x3ac   : > { %9782 = vmatprep.mubr.f32.mxu0 %v17012_v5  ;;  %7184 = vmatprep.mubr.f32.mxu1 %v17096_v10  ;;  %v13987_v5 = vld [vmem:[%s14846_s30 + $0x2e8] sm:$0xff] }
 0x3ad   : > { %13276 = vmatpush1.bf16.msra.mxu0 %v13275_v2  ;;  %v12430_v2 = vld [vmem:[%s14846_s30 + $0x220] sm:$0xff] }
 0x3ae   : > { %13277 = vmatprep.subr.bf16.mxu0 %v18404_v8 }
 0x3af   : > { %9783 = vmatmul.mubr.f32.gmra.mrb[52].mxu0 %v17018_v37  ;;  %7185 = vmatmul.mubr.f32.gmra.mrb[80].mxu1 %v17104_v56  ;;  %v7326_v37 = vsel %vm7323_vm8, %v7324_v19, %v7328_v12 }
 0x3b0   : > { %9787 = vmatprep.mubr.f32.mxu0 %v12427_v44  ;;  %7189 = vmatprep.mubr.f32.mxu1 %v13987_v5  ;;  %v7909_v44 = vld [vmem:[#allocation10 + $0x330] sm:$0xff]  ;;  %v7910_v5 = vld [vmem:[#allocation10 + $0x338] sm:$0xff] }
 0x3b1   : > { %v13047_v51 = vpack.c.bf16 %v7910_v5, %v7909_v44  ;;  %v7212_v44 = vld [vmem:[%s14846_s30 + $0xc8] sm:$0xfc] }
 0x3b3   : > { %9788 = vmatmul.mubr.f32.gmra.mrb[54].mxu0 %v12426_v48  ;;  %7190 = vmatmul.mubr.f32.gmra.mrb[82].mxu1 %v13988_v11  ;;  %v7340_v48 = vrot.slane %v7201_v33, 2  ;;  %v12434_v11 = vld [vmem:[%s14846_s30 + $0x250] sm:$0xff]  ;;  %v7354_v33 = vrot.slane %v7207_v39, 2  ;;  %v12446_v39 = vld [vmem:[%s14846_s30 + $0x2e0] sm:$0xff] }
 0x3b4   : > { %9792 = vmatprep.mubr.f32.mxu0 %v17031_v22  ;;  %7645 = vmatprep.mubr.f32.mxu1 %v7329_v36  ;;  %v7331_v22 = vsel %vm7323_vm8, %v7328_v12, %v7330_v27  ;;  %v7335_v12 = vrot.slane %v16735_v49, 2  ;;  %v12435_v36 = vld [vmem:[%s14846_s30 + $0x258] sm:$0xff]  ;;  %v7203_v49 = vld [vmem:[%s14846_s30 + $0x60] sm:$0xfc] }
 0x3b5   : > { %v7344_v62 = vrot.slane %v7203_v49, 2  ;;  %v7367_v49 = vrot.slane %v7212_v44, 2 }
 0x3b6   : > { %v7336_v19 = vsel %vm7323_vm8, %v7334_v47, %v7335_v12  ;;  %v7341_v27 = vsel %vm7323_vm8, %v7335_v12, %v7340_v48  ;;  %v12438_v47 = vld [vmem:[%s14846_s30 + $0x280] sm:$0xff]  ;;  %v7918_v48 = vld [vmem:[#allocation10 + $0x378] sm:$0xff] }
 0x3b7   : > { %9793 = vmatmul.mubr.f32.gmra.mrb[56].mxu0 %v17037_v14  ;;  %7646 = vmatmul.mubr.f32.vlgmr.msra.gmra.mrb[20].mxu1 %v7326_v37  ;;  %v7908_v14 = vld [vmem:[#allocation10 + $0x328] sm:$0xff]  ;;  %v7911_v37 = vld [vmem:[#allocation10 + $0x340] sm:$0xff] }
 0x3b8   : > { %9797 = vmatprep.mubr.f32.mxu0 %v12431_v20  ;;  %7650 = vmatprep.mubr.f32.mxu1 %v7333_v26  ;;  %v13044_v63 = vpack.c.bf16 %v7908_v14, %v7907_v42  ;;  %v7352_v26 = vrot.slane %v7206_v41, 2  ;;  %v13053_v42 = vpack.c.bf16 %v7914_v4, %v7913_v50  ;;  %v7358_v14 = vrot.slane %v16825_v3, 2  ;;  %v7214_v41 = vld [vmem:[%s14846_s30 + $0xe8] sm:$0x3] }
 0x3b9   : > { %13039 = vmatpush1.bf16.msra.mxu1 %v13038_v46  ;;  %v7349_v46 = vsel %vm7323_vm8, %v7347_v6, %v7348_v45  ;;  %v7355_v3 = vrot.slane %v16841_v60, 2  ;;  %v12443_v6 = vld [vmem:[%s14846_s30 + $0x2b8] sm:$0xff]  ;;  %v7211_v60 = vld [vmem:[%s14846_s30 + $0xc0] sm:$0xfc] }
 0x3ba   : > { %13040 = vmatprep.subr.bf16.mxu1 %v18404_v8 }
 0x3bb   : > { %9798 = vmatmul.mubr.f32.gmra.mrb[58].mxu0 %v12430_v2  ;;  %7651 = vmatmul.mubr.f32.gmra.mrb[22].mxu1 %v7331_v22  ;;  %v7346_v22 = vsel %vm7323_vm8, %v7344_v62, %v7345_v23  ;;  %v7210_v2 = vld [vmem:[%s14846_s30 + $0xb8] sm:$0x3] }
 0x3bc   : > { %9802 = vmatprep.mubr.f32.mxu0 %v17047_v61  ;;  %7655 = vmatprep.mubr.f32.mxu1 %v7339_v38  ;;  %v7343_v61 = vsel %vm7323_vm8, %v7338_v0, %v7342_v52  ;;  %v7357_v0 = vrot.slane %v7208_v18, 2  ;;  %v7915_v38 = vld [vmem:[#allocation10 + $0x360] sm:$0xff]  ;;  %v7351_v52 = vsel %vm7323_vm8, %v7345_v23, %v7350_v15  ;;  %v7362_v7 = vrot.slane %v7210_v2, 2  ;;  %v7921_v18 = vld [vmem:[#allocation10 + $0x390] sm:$0xff]  ;;  %v7924_v2 = vld [vmem:[#allocation10 + $0x3a8] sm:$0xff] }
 0x3bd   : > { %13042 = vmatpush1.bf16.msra.mxu1 %v13041_v24  ;;  %v12439_v24 = vld [vmem:[%s14846_s30 + $0x288] sm:$0xff]  ;;  %v7215_v15 = vld [vmem:[%s14846_s30 + $0xf0] sm:$0xfc] }
 0x3be   : > { %13043 = vmatprep.subr.bf16.mxu1 %v18404_v8  ;;  %v7359_v12 = vsel %vm7323_vm8, %v7357_v0, %v7358_v14  ;;  %v7378_v0 = vrot.slane %v16903_v31, 2  ;;  %v7375_v31 = vrot.slane %v16912_v54, 2  ;;  %v7219_v54 = vld [vmem:[%s14846_s30 + $0x120] sm:$0xfc] }
 0x3bf   : > { %9803 = vmatmul.mubr.f32.gmra.mrb[60].mxu0 %v17053_v34  ;;  %7656 = vmatmul.mubr.f32.gmra.mrb[24].mxu1 %v7336_v19  ;;  %v7912_v34 = vld [vmem:[#allocation10 + $0x348] sm:$0xff]  ;;  %v7917_v19 = vld [vmem:[#allocation10 + $0x370] sm:$0xff] }
 0x3c0   : > { %9807 = vmatprep.mubr.f32.mxu0 %v12435_v36  ;;  %7660 = vmatprep.mubr.f32.mxu1 %v7343_v61  ;;  %v13050_v20 = vpack.c.bf16 %v7912_v34, %v7911_v37  ;;  %v7356_v36 = vsel %vm7323_vm8, %v7354_v33, %v7355_v3  ;;  %v7919_v37 = vld [vmem:[#allocation10 + $0x380] sm:$0xff]  ;;  %v7220_v33 = vld [vmem:[%s14846_s30 + $0x128] sm:$0xfc] }
 0x3c1   : > { %13045 = vmatpush1.bf16.msra.mxu1 %v13044_v63  ;;  %v7209_v63 = vld [vmem:[%s14846_s30 + $0xb0] sm:$0x3] }
 0x3c2   : > { %13046 = vmatprep.subr.bf16.mxu1 %v18404_v8  ;;  %v7360_v61 = vrot.slane %v7209_v63, 2  ;;  %v7925_v63 = vld [vmem:[#allocation10 + $0x3b0] sm:$0xff] }
 0x3c3   : > { %9808 = vmatmul.mubr.f32.gmra.mrb[62].mxu0 %v12434_v11  ;;  %7661 = vmatmul.mubr.f32.gmra.mrb[26].mxu1 %v7341_v27  ;;  %v12442_v11 = vld [vmem:[%s14846_s30 + $0x2b0] sm:$0xff]  ;;  %v7364_v27 = vrot.slane %v7211_v60, 2  ;;  %v7927_v60 = vld [vmem:[#allocation10 + $0x3c0] sm:$0xff] }
 0x3c4   : > { %9812 = vmatprep.mubr.f32.mxu0 %v17063_v32  ;;  %7665 = vmatprep.mubr.f32.mxu1 %v7349_v46  ;;  %v7353_v32 = vsel %vm7323_vm8, %v7348_v45, %v7352_v26  ;;  %v7368_v45 = vrot.slane %v16868_v21, 2  ;;  %v7361_v34 = vsel %vm7323_vm8, %v7355_v3, %v7360_v61  ;;  %v7372_v46 = vrot.slane %v7214_v41, 2  ;;  %v7213_v26 = vld [vmem:[%s14846_s30 + $0xe0] sm:$0x3]  ;;  %v7926_v3 = vld [vmem:[#allocation10 + $0x3b8] sm:$0xff]  ;;  %v7928_v41 = vld [vmem:[#allocation10 + $0x3c8] sm:$0xff] }
 0x3c5   : > { %13048 = vmatpush1.bf16.msra.mxu1 %v13047_v51  ;;  %v13059_v51 = vpack.c.bf16 %v7918_v48, %v7917_v19  ;;  %v7365_v21 = vrot.slane %v16884_v35, 2  ;;  %v7370_v4 = vrot.slane %v7213_v26, 2  ;;  %v7377_v35 = vrot.slane %v7216_v53, 2  ;;  %v12451_v19 = vld [vmem:[%s14846_s30 + $0x318] sm:$0xff]  ;;  %v7222_v61 = vld [vmem:[%s14846_s30 + $0x148] sm:$0x3] }
 0x3c6   : > { %13049 = vmatprep.subr.bf16.mxu1 %v18404_v8  ;;  %v7369_v62 = vsel %vm7323_vm8, %v7367_v49, %v7368_v45  ;;  %v7388_v49 = vrot.slane %v16928_v25, 2  ;;  %v7385_v25 = vrot.slane %v16934_v28, 2  ;;  %v7930_v26 = vld [vmem:[#allocation10 + $0x3d8] sm:$0xff] }
 0x3c7   : > { %9813 = vmatmul.mubr.f32.gmra.mrb[64].mxu0 %v17069_v59  ;;  %7666 = vmatmul.mubr.f32.gmra.mrb[28].mxu1 %v7346_v22  ;;  %v7916_v59 = vld [vmem:[#allocation10 + $0x368] sm:$0xff]  ;;  %v7366_v50 = vsel %vm7323_vm8, %v7364_v27, %v7365_v21 }
 0x3c8   : > { %9817 = vmatprep.mubr.f32.mxu0 %v12439_v24  ;;  %7670 = vmatprep.mubr.f32.mxu1 %v7353_v32  ;;  %v13056_v5 = vpack.c.bf16 %v7916_v59, %v7915_v38  ;;  %v12447_v22 = vld [vmem:[%s14846_s30 + $0x2e8] sm:$0xff]  ;;  %v7218_v24 = vld [vmem:[%s14846_s30 + $0x118] sm:$0x3]  ;;  %v7379_v38 = vsel %vm7323_vm8, %v7377_v35, %v7378_v0 }
 0x3c9   : > { %13051 = vmatpush1.bf16.msra.mxu1 %v13050_v20  ;;  %v7922_v20 = vld [vmem:[#allocation10 + $0x398] sm:$0xff]  ;;  %v7382_v59 = vrot.slane %v7218_v24, 2  ;;  %v12457_v27 = vld [vmem:[%s14846_s30 + $0x68] sm:$0xfe]  ;;  %v12461_v35 = vld [vmem:[%s14846_s30 + $0x88] sm:$0x1] }
 0x3ca   : > { %13052 = vmatprep.subr.bf16.mxu1 %v18404_v8  ;;  %v13065_v32 = vpack.c.bf16 %v7922_v20, %v7921_v18  ;;  %v10091_v18 = vrot.slane %v16948_v55, 1  ;;  %v12456_v20 = vld [vmem:[%s14846_s30 + $0x60] sm:$0xfe]  ;;  %v7398_v24 = vrot.slane %v16953_v16, 2  ;;  %v10088_v55 = vrot.slane %v16957_v40, 1  ;;  %v7932_v16 = vld [vmem:[#allocation10 + $0x3e8] sm:$0xff] }
 0x3cb   : > { %9818 = vmatmul.mubr.f32.gmra.mrb[66].mxu0 %v12438_v47  ;;  %7671 = vmatmul.mubr.f32.gmra.mrb[30].mxu1 %v7351_v52  ;;  %v12449_v47 = vld [vmem:[%s14846_s30 + $0x308] sm:$0xff]  ;;  %v7217_v52 = vld [vmem:[%s14846_s30 + $0x110] sm:$0x3]  ;;  %v7383_v48 = vsel %vm7323_vm8, %v7378_v0, %v7382_v59  ;;  %v10954_v0 = vld [vmem:[#allocation10 + $0x800] sm:$0xff] }
 0x3cc   : > { %9822 = vmatprep.mubr.f32.mxu0 %v17079_v29  ;;  %7675 = vmatprep.mubr.f32.mxu1 %v7359_v12  ;;  %v7363_v29 = vsel %vm7323_vm8, %v7358_v14, %v7362_v7  ;;  %v7374_v14 = vrot.slane %v7215_v15, 2  ;;  %v12448_v7 = vld [vmem:[%s14846_s30 + $0x300] sm:$0xff]  ;;  %v12463_v59 = vld [vmem:[%s14846_s30 + $0x98] sm:$0xfe] }
 0x3cd   : > { %13054 = vmatpush1.bf16.msra.mxu1 %v13053_v42  ;;  %v7371_v42 = vsel %vm7323_vm8, %v7365_v21, %v7370_v4  ;;  %v7223_v4 = vld [vmem:[%s14846_s30 + $0x150] sm:$0xfc] }
 0x3ce   : > { %13055 = vmatprep.subr.bf16.mxu1 %v18404_v8  ;;  %v7376_v44 = vsel %vm7323_vm8, %v7374_v14, %v7375_v31 }
 0x3cf   : > { %9823 = vmatmul.mubr.f32.gmra.mrb[68].mxu0 %v17085_v1  ;;  %7676 = vmatmul.mubr.f32.gmra.mrb[32].mxu1 %v7356_v36  ;;  %v7920_v1 = vld [vmem:[#allocation10 + $0x388] sm:$0xff]  ;;  %v7387_v36 = vrot.slane %v7220_v33, 2  ;;  %v10095_v33 = vrot.slane %v12461_v35, 1  ;;  %v12466_v35 = vld [vmem:[%s14846_s30 + $0xb0] sm:$0x1] }
 0x3d0   : > { %9827 = vmatprep.mubr.f32.mxu0 %v12443_v6  ;;  %7680 = vmatprep.mubr.f32.mxu1 %v7363_v29  ;;  %v13062_v23 = vpack.c.bf16 %v7920_v1, %v7919_v37  ;;  %v12453_v6 = vld [vmem:[%s14846_s30 + $0x338] sm:$0xff]  ;;  %v13071_v29 = vpack.c.bf16 %v7926_v3, %v7925_v63  ;;  %v7392_v37 = vrot.slane %v7222_v61, 2  ;;  %v7221_v1 = vld [vmem:[%s14846_s30 + $0x140] sm:$0x3]  ;;  %v7227_v3 = vld [vmem:[%s14846_s30 + $0x180] sm:$0xfc] }
 0x3d1   : > { %13057 = vmatpush1.bf16.msra.mxu1 %v13056_v5  ;;  %v7380_v5 = vrot.slane %v7217_v52, 2  ;;  %v7390_v53 = vrot.slane %v7221_v1, 2  ;;  %v7395_v52 = vrot.slane %v16963_v9, 2  ;;  %v10096_v9 = vsel %vm6487_vm5, %v10091_v18, %v10095_v33  ;;  %v7230_v1 = vld [vmem:[%s14846_s30 + $0x1a8] sm:$0x3] }
 0x3d2   : > { %13058 = vmatprep.subr.bf16.mxu1 %v18404_v8  ;;  %v7393_v28 = vsel %vm7323_vm8, %v7388_v49, %v7392_v37  ;;  %v10101_v61 = vrot.slane %v16977_v17, 1  ;;  %v7404_v37 = vrot.slane %v7227_v3, 2  ;;  %v12473_v33 = vld [vmem:[%s14846_s30 + $0xe8] sm:$0x1] }
 0x3d3   : > { %9828 = vmatmul.mubr.f32.gmra.mrb[70].mxu0 %v12442_v11  ;;  %7681 = vmatmul.mubr.f32.gmra.mrb[34].mxu1 %v7361_v34  ;;  %v7389_v11 = vsel %vm7323_vm8, %v7387_v36, %v7388_v49  ;;  %v12452_v34 = vld [vmem:[%s14846_s30 + $0x330] sm:$0xff]  ;;  %v7934_v49 = vld [vmem:[#allocation10 + $0x3f8] sm:$0xff] }
 0x3d4   : > { %9832 = vmatprep.mubr.f32.mxu0 %v17096_v10  ;;  %7685 = vmatprep.mubr.f32.mxu1 %v7369_v62  ;;  %v7373_v10 = vsel %vm7323_vm8, %v7368_v45, %v7372_v46  ;;  %v7384_v45 = vrot.slane %v7219_v54, 2  ;;  %v7224_v62 = vld [vmem:[%s14846_s30 + $0x158] sm:$0xfc]  ;;  %v13074_v46 = vpack.c.bf16 %v7928_v41, %v7927_v60  ;;  %v10100_v54 = vrot.slane %v12463_v59, 1 }
 0x3d5   : > { %13060 = vmatpush1.bf16.msra.mxu1 %v13059_v51  ;;  %v7381_v51 = vsel %vm7323_vm8, %v7375_v31, %v7380_v5  ;;  %v7228_v31 = vld [vmem:[%s14846_s30 + $0x188] sm:$0xfc]  ;;  %v10956_v5 = vld [vmem:[#allocation10 + $0x810] sm:$0xff]  ;;  %v10103_v59 = vrot.slane %v12466_v35, 1 }
 0x3d6   : > { %13061 = vmatprep.subr.bf16.mxu1 %v18404_v8  ;;  %v7386_v21 = vsel %vm7323_vm8, %v7384_v45, %v7385_v25  ;;  %v7407_v41 = vrot.slane %v7228_v31, 2  ;;  %v13990_v45 = vld [vmem:[%s14846_s30 + $0x198] sm:$0xff] }
 0x3d7   : > { %9833 = vmatmul.mubr.f32.gmra.mrb[72].mxu0 %v17104_v56  ;;  %7686 = vmatmul.mubr.f32.gmra.mrb[36].mxu1 %v7366_v50  ;;  %v7923_v56 = vld [vmem:[#allocation10 + $0x3a0] sm:$0xff]  ;;  %v7397_v50 = vrot.slane %v7224_v62, 2  ;;  %v12467_v62 = vld [vmem:[%s14846_s30 + $0xb8] sm:$0x1] }
 0x3d8   : > { %9837 = vmatprep.mubr.f32.mxu0 %v12447_v22  ;;  %7690 = vmatprep.mubr.f32.mxu1 %v7373_v10  ;;  %v13068_v12 = vpack.c.bf16 %v7924_v2, %v7923_v56  ;;  %v13989_v22 = vld [vmem:[%s14846_s30 + $0x18] sm:$0xff]  ;;  %v7391_v56 = vsel %vm7323_vm8, %v7385_v25, %v7390_v53  ;;  %v7394_v2 = vrot.slane %v7223_v4, 2  ;;  %v10098_v25 = vrot.slane %v16984_v58, 1  ;;  %v7229_v53 = vld [vmem:[%s14846_s30 + $0x1a0] sm:$0x3] }
 0x3d9   : > { %13063 = vmatpush1.bf16.msra.mxu1 %v13062_v23  ;;  %v10090_v23 = vrot.slane %v12457_v27, 1  ;;  %v7226_v10 = vld [vmem:[%s14846_s30 + $0x178] sm:$0x3] }
 0x3da   : > { %13064 = vmatprep.subr.bf16.mxu1 %v18404_v8  ;;  %v7402_v40 = vrot.slane %v7226_v10, 2  ;;  %v7396_v36 = vsel %vm7323_vm8, %v7394_v2, %v7395_v52  ;;  %v17256_v4 = vld [vmem:[%s14846_s30 + $0xd8] sm:$0xff]  ;;  %v10105_v10 = vrot.slane %v12467_v62, 1  ;;  %v17296_v62 = vld [vmem:[%s14846_s30 + $0x100] sm:$0xff] }
 0x3db   : > { %9838 = vmatmul.mubr.f32.gmra.mrb[74].mxu0 %v12446_v39  ;;  %7691 = vmatmul.mubr.f32.gmra.mrb[38].mxu1 %v7371_v42  ;;  %v10955_v39 = vld [vmem:[#allocation10 + $0x808] sm:$0xff]  ;;  %v7225_v42 = vld [vmem:[%s14846_s30 + $0x170] sm:$0x3]  ;;  %v10092_v14 = vsel %vm6487_vm5, %v10090_v23, %v10091_v18  ;;  %v10102_v23 = vsel %vm6487_vm5, %v10100_v54, %v10101_v61  ;;  %v7234_v31 = vld [vmem:[%s14846_s30 + $0x1d8] sm:$0x3]  ;;  %v7415_v54 = vrot.slane %v17008_v57, 2 }
 0x3dc   : > { %9842 = vmatprep.mubr.f32.mxu0 %v12449_v47  ;;  %7695 = vmatprep.mubr.f32.mxu1 %v7379_v38  ;;  %v7931_v47 = vld [vmem:[#allocation10 + $0x3e0] sm:$0xff]  ;;  %v7399_v38 = vsel %vm7323_vm8, %v7397_v50, %v7398_v24  ;;  %v7400_v63 = vrot.slane %v7225_v42, 2  ;;  %v7403_v60 = vsel %vm7323_vm8, %v7398_v24, %v7402_v40  ;;  %v13991_v18 = vld [vmem:[%s14846_s30 + $0x190] sm:$0xff]  ;;  %v12469_v50 = vld [vmem:[%s14846_s30 + $0xc8] sm:$0xfe]  ;;  %v10106_v2 = vsel %vm6487_vm5, %v10101_v61, %v10105_v10 }
 0x3dd   : > { %13066 = vmatpush1.bf16.msra.mxu1 %v13065_v32  ;;  %v10087_v32 = vrot.slane %v12456_v20, 1  ;;  %v7405_v20 = vrot.slane %v13991_v18, 2  ;;  %v10110_v42 = vrot.slane %v12469_v50, 1  ;;  %v7422_v61 = vrot.slane %v7234_v31, 2  ;;  %v10964_v57 = vld [vmem:[#allocation10 + $0x850] sm:$0xff]  ;;  %v10967_v10 = vld [vmem:[#allocation10 + $0x868] sm:$0xff] }
 0x3de   : > { %13067 = vmatprep.subr.bf16.mxu1 %v18404_v8  ;;  %v7428_v18 = vrot.slane %v17024_v43, 2  ;;  %v10118_v50 = vrot.slane %v17296_v62, 1  ;;  %v10968_v31 = vld [vmem:[#allocation10 + $0x870] sm:$0xff] }
 0x3df   : > { %9843 = vmatmul.mubr.f32.gmra.mrb[76].mxu0 %v12448_v7  ;;  %7696 = vmatmul.mubr.f32.gmra.mrb[40].mxu1 %v7376_v44  ;;  %v12460_v7 = vld [vmem:[%s14846_s30 + $0x80] sm:$0x1]  ;;  %v10089_v44 = vsel %vm6487_vm5, %v10087_v32, %v10088_v55  ;;  %v7406_v24 = vsel %vm7323_vm8, %v7404_v37, %v7405_v20  ;;  %v7231_v32 = vld [vmem:[%s14846_s30 + $0x1b0] sm:$0xfc]  ;;  %v10965_v37 = vld [vmem:[#allocation10 + $0x858] sm:$0xff] }
 0x3e0   : > { %9847 = vmatprep.mubr.f32.mxu0 %v12451_v19  ;;  %7700 = vmatprep.mubr.f32.mxu1 %v7383_v48  ;;  %v10957_v19 = vld [vmem:[#allocation10 + $0x818] sm:$0xff]  ;;  %v13080_v48 = vpack.c.bf16 %v7932_v16, %v7931_v47  ;;  %v12468_v47 = vld [vmem:[%s14846_s30 + $0xc0] sm:$0xfe]  ;;  %v17268_v16 = vld [vmem:[%s14846_s30 + $0xd0] sm:$0xff] }
 0x3e1   : > { %13069 = vmatpush1.bf16.msra.mxu1 %v13068_v12  ;;  %v13278_v12 = vpack.c.bf16 %v10955_v39, %v10954_v0  ;;  %v10960_v0 = vld [vmem:[#allocation10 + $0x830] sm:$0xff]  ;;  %v10961_v39 = vld [vmem:[#allocation10 + $0x838] sm:$0xff]  ;;  %v10107_v3 = vrot.slane %v12468_v47, 1 }
 0x3e2   : > { %13070 = vmatprep.subr.bf16.mxu1 %v18404_v8  ;;  %v12478_v47 = vld [vmem:[%s14846_s30 + $0x110] sm:$0x1] }
 0x3e3   : > { %9848 = vmatmul.mubr.f32.gmra.mrb[78].mxu0 %v16875_v30  ;;  %7701 = vmatmul.mubr.f32.gmra.mrb[42].mxu1 %v7381_v51  ;;  %v7929_v30 = vld [vmem:[#allocation10 + $0x3d0] sm:$0xff]  ;;  %v10093_v51 = vrot.slane %v12460_v7, 1  ;;  %v7414_v7 = vrot.slane %v7231_v32, 2 }
 0x3e4   : > { %9852 = vmatprep.mubr.f32.mxu0 %v12453_v6  ;;  %7705 = vmatprep.mubr.f32.mxu1 %v7389_v11  ;;  %v13077_v15 = vpack.c.bf16 %v7930_v26, %v7929_v30  ;;  %v12462_v6 = vld [vmem:[%s14846_s30 + $0x90] sm:$0xfe]  ;;  %v7408_v11 = vrot.slane %v13990_v45, 2  ;;  %v10959_v30 = vld [vmem:[#allocation10 + $0x828] sm:$0xff] }
 0x3e5   : > { %13072 = vmatpush1.bf16.msra.mxu1 %v13071_v29  ;;  %v7933_v29 = vld [vmem:[#allocation10 + $0x3f0] sm:$0xff]  ;;  %v10094_v17 = vsel %vm6487_vm5, %v10088_v55, %v10093_v51  ;;  %v10097_v27 = vrot.slane %v12462_v6, 1  ;;  %v12475_v6 = vld [vmem:[%s14846_s30 + $0xf8] sm:$0xfe]  ;;  %v7416_v45 = vsel %vm7323_vm8, %v7414_v7, %v7415_v54 }
 0x3e6   : > { %13073 = vmatprep.subr.bf16.mxu1 %v18404_v8  ;;  %v13083_v26 = vpack.c.bf16 %v7934_v49, %v7933_v29  ;;  %v7409_v58 = vsel %vm7323_vm8, %v7407_v41, %v7408_v11  ;;  %v17285_v29 = vld [vmem:[%s14846_s30 + $0x108] sm:$0xff]  ;;  %v12472_v41 = vld [vmem:[%s14846_s30 + $0xe0] sm:$0x1] }
 0x3e7   : > { %9853 = vmatmul.mubr.f32.gmra.mrb[80].mxu0 %v12452_v34  ;;  %7706 = vmatmul.mubr.f32.gmra.mrb[44].mxu1 %v7386_v21  ;;  %v13281_v34 = vpack.c.bf16 %v10957_v19, %v10956_v5  ;;  %v7401_v21 = vsel %vm7323_vm8, %v7395_v52, %v7400_v63  ;;  %v10099_v55 = vsel %vm6487_vm5, %v10097_v27, %v10098_v25  ;;  %v7418_v52 = vrot.slane %v17002_v13, 2  ;;  %v10962_v5 = vld [vmem:[#allocation10 + $0x840] sm:$0xff]  ;;  %v10963_v19 = vld [vmem:[#allocation10 + $0x848] sm:$0xff] }
 0x3e8   : > { %9857 = vmatprep.mubr.f32.mxu0 %v13989_v22  ;;  %7710 = vmatprep.mubr.f32.mxu1 %v7393_v28  ;;  %v7412_v28 = vrot.slane %v7230_v1, 2  ;;  %v10104_v63 = vsel %vm6487_vm5, %v10098_v25, %v10103_v59  ;;  %v7236_v49 = vld [vmem:[%s14846_s30 + $0x1e8] sm:$0xfc]  ;;  %v13290_v51 = vpack.c.bf16 %v10963_v19, %v10962_v5  ;;  %v10121_v27 = vrot.slane %v17285_v29, 1  ;;  %v12474_v25 = vld [vmem:[%s14846_s30 + $0xf0] sm:$0xfe] }
 0x3e9   : > { %13075 = vmatpush1.bf16.msra.mxu1 %v13074_v46  ;;  %v10958_v46 = vld [vmem:[#allocation10 + $0x820] sm:$0xff]  ;;  %v7239_v59 = vld [vmem:[%s14846_s30 + $0x210] sm:$0xfc] }
 0x3ea   : > { %13076 = vmatprep.subr.bf16.mxu1 %v18404_v8  ;;  %v17325_v5 = vld [vmem:[%s14846_s30 + $0x130] sm:$0xff] }
 0x3eb   : > { %9858 = vmatmul.mubr.f32.gmra.mrb[82].mxu0 %v13989_v22  ;;  %7711 = vmatmul.mubr.f32.gmra.mrb[46].mxu1 %v7391_v56  ;;  %v7232_v22 = vld [vmem:[%s14846_s30 + $0x1b8] sm:$0xfc]  ;;  %v7410_v56 = vrot.slane %v7229_v53, 2  ;;  %v7238_v53 = vld [vmem:[%s14846_s30 + $0x208] sm:$0x3] }
 0x3ec   : > { %10408 = vmatprep.mubr.f32.mxu0 %v10092_v14  ;;  %7715 = vmatprep.mubr.f32.mxu1 %v7399_v38  ;;  %v10111_v14 = vrot.slane %v17256_v4, 1  ;;  %v7413_v38 = vsel %vm7323_vm8, %v7408_v11, %v7412_v28  ;;  %v7417_v40 = vrot.slane %v7232_v22, 2  ;;  %v10117_v28 = vrot.slane %v12474_v25, 1  ;;  %v10966_v22 = vld [vmem:[#allocation10 + $0x860] sm:$0xff] }
 0x3ed   : > { %13078 = vmatpush1.bf16.msra.mxu1 %v13077_v15  ;;  %v13284_v15 = vpack.c.bf16 %v10959_v30, %v10958_v46  ;;  %v7411_v13 = vsel %vm7323_vm8, %v7405_v20, %v7410_v56  ;;  %v7423_v46 = vsel %vm7323_vm8, %v7418_v52, %v7422_v61  ;;  %v7427_v30 = vrot.slane %v7236_v49, 2  ;;  %v13992_v56 = vld [vmem:[%s14846_s30 + $0x1f0] sm:$0xff]  ;;  %v12485_v61 = vld [vmem:[%s14846_s30 + $0x148] sm:$0x1] }
 0x3ee   : > { %13079 = vmatprep.subr.bf16.mxu1 %v18404_v8  ;;  %v7434_v49 = vrot.slane %v7239_v59, 2 }
 0x3ef   : > { %10409 = vmatmul.mubr.f32.vlgmr.msra.gmra.mrb[20].mxu0 %v10089_v44  ;;  %7716 = vmatmul.mubr.f32.gmra.mrb[48].mxu1 %v7396_v36  ;;  %v10108_v44 = vrot.slane %v17268_v16, 1  ;;  %v10112_v36 = vsel %vm6487_vm5, %v10110_v42, %v10111_v14  ;;  %v7429_v32 = vsel %vm7323_vm8, %v7427_v30, %v7428_v18  ;;  %v7240_v42 = vld [vmem:[%s14846_s30 + $0x218] sm:$0xfc]  ;;  %v17341_v30 = vld [vmem:[%s14846_s30 + $0x168] sm:$0xff] }
 0x3f0   : > { %10413 = vmatprep.mubr.f32.mxu0 %v10096_v9  ;;  %7720 = vmatprep.mubr.f32.mxu1 %v7403_v60  ;;  %v7419_v9 = vsel %vm7323_vm8, %v7417_v40, %v7418_v52  ;;  %v10115_v60 = vrot.slane %v12473_v33, 1  ;;  %v10119_v52 = vsel %vm6487_vm5, %v10117_v28, %v10118_v50  ;;  %v10969_v33 = vld [vmem:[#allocation10 + $0x878] sm:$0xff]  ;;  %v10972_v28 = vld [vmem:[#allocation10 + $0x890] sm:$0xff] }
 0x3f1   : > { %13279 = vmatpush1.bf16.msra.mxu0 %v13278_v12  ;;  %13081 = vmatpush1.bf16.msra.mxu1 %v13080_v48  ;;  %v13287_v12 = vpack.c.bf16 %v10961_v39, %v10960_v0  ;;  %v7233_v48 = vld [vmem:[%s14846_s30 + $0x1d0] sm:$0x3]  ;;  %v10109_v11 = vsel %vm6487_vm5, %v10107_v3, %v10108_v44  ;;  %v12481_v0 = vld [vmem:[%s14846_s30 + $0x128] sm:$0xfe]  ;;  %v17312_v39 = vld [vmem:[%s14846_s30 + $0x138] sm:$0xff] }
 0x3f2   : > { %13280 = vmatprep.subr.bf16.mxu0 %v18404_v8  ;;  %13082 = vmatprep.subr.bf16.mxu1 %v18404_v8  ;;  %v7420_v1 = vrot.slane %v7233_v48, 2  ;;  %v10131_v3 = vrot.slane %v17312_v39, 1  ;;  %v10123_v48 = vrot.slane %v12478_v47, 1 }
 0x3f3   : > { %10414 = vmatmul.mubr.f32.gmra.mrb[22].mxu0 %v10094_v17  ;;  %7721 = vmatmul.mubr.f32.gmra.mrb[50].mxu1 %v7401_v21  ;;  %v10120_v17 = vrot.slane %v12475_v6, 1  ;;  %v10113_v21 = vrot.slane %v12472_v41, 1  ;;  %v13299_v6 = vpack.c.bf16 %v10969_v33, %v10968_v31  ;;  %v10974_v31 = vld [vmem:[#allocation10 + $0x8a0] sm:$0xff]  ;;  %v10975_v33 = vld [vmem:[#allocation10 + $0x8a8] sm:$0xff] }
 0x3f4   : > { %10418 = vmatprep.mubr.f32.mxu0 %v10102_v23  ;;  %7725 = vmatprep.mubr.f32.mxu1 %v7409_v58  ;;  %v12479_v23 = vld [vmem:[%s14846_s30 + $0x118] sm:$0x1]  ;;  %v13293_v58 = vpack.c.bf16 %v10965_v37, %v10964_v57  ;;  %v7421_v35 = vsel %vm7323_vm8, %v7415_v54, %v7420_v1  ;;  %v7241_v37 = vld [vmem:[%s14846_s30 + $0x230] sm:$0x3] }
 0x3f5   : > { %13282 = vmatpush1.bf16.msra.mxu0 %v13281_v34  ;;  %13084 = vmatpush1.bf16.msra.mxu1 %v13083_v26  ;;  %v10116_v34 = vsel %vm6487_vm5, %v10111_v14, %v10115_v60  ;;  %v7235_v26 = vld [vmem:[%s14846_s30 + $0x1e0] sm:$0xfc]  ;;  %v10114_v20 = vsel %vm6487_vm5, %v10108_v44, %v10113_v21  ;;  %v10122_v43 = vsel %vm6487_vm5, %v10120_v17, %v10121_v27  ;;  %v10125_v14 = vrot.slane %v12479_v23, 1  ;;  %v7242_v54 = vld [vmem:[%s14846_s30 + $0x238] sm:$0x3] }
 0x3f6   : > { %13283 = vmatprep.subr.bf16.mxu0 %v18404_v8  ;;  %13325 = vmatprep.subr.bf16.mxu1 %v18404_v8  ;;  %v12480_v44 = vld [vmem:[%s14846_s30 + $0x120] sm:$0xfe]  ;;  %v10124_v60 = vsel %vm6487_vm5, %v10118_v50, %v10123_v48  ;;  %v7442_v25 = vrot.slane %v7242_v54, 2  ;;  %v10135_v21 = vrot.slane %v12485_v61, 1  ;;  %v10973_v50 = vld [vmem:[#allocation10 + $0x898] sm:$0xff] }
 0x3f7   : > { %10419 = vmatmul.mubr.f32.gmra.mrb[24].mxu0 %v10099_v55  ;;  %7726 = vmatmul.mubr.f32.gmra.mrb[52].mxu1 %v7406_v24  ;;  %v7237_v24 = vld [vmem:[%s14846_s30 + $0x200] sm:$0x3]  ;;  %v7432_v55 = vrot.slane %v7238_v53, 2  ;;  %v10126_v7 = vsel %vm6487_vm5, %v10121_v27, %v10125_v14  ;;  %v10127_v41 = vrot.slane %v12480_v44, 1  ;;  %v12491_v14 = vld [vmem:[%s14846_s30 + $0x178] sm:$0x1]  ;;  %v13305_v47 = vpack.c.bf16 %v10973_v50, %v10972_v28 }
 0x3f8   : > { %10423 = vmatprep.mubr.f32.mxu0 %v10106_v2  ;;  %7730 = vmatprep.mubr.f32.mxu1 %v7413_v38  ;;  %v7425_v2 = vrot.slane %v13992_v56, 2  ;;  %v13296_v38 = vpack.c.bf16 %v10967_v10, %v10966_v22  ;;  %v7430_v40 = vrot.slane %v7237_v24, 2  ;;  %v13994_v17 = vld [vmem:[%s14846_s30 + $0x220] sm:$0xff]  ;;  %v7440_v22 = vrot.slane %v7241_v37, 2  ;;  %v12486_v24 = vld [vmem:[%s14846_s30 + $0x150] sm:$0xfe] }
 0x3f9   : > { %13285 = vmatpush1.bf16.msra.mxu0 %v13284_v15  ;;  %v7424_v15 = vrot.slane %v7235_v26, 2  ;;  %v7433_v19 = vsel %vm7323_vm8, %v7428_v18, %v7432_v55  ;;  %v7435_v27 = vrot.slane %v13994_v17, 2  ;;  %v7244_v26 = vld [vmem:[%s14846_s30 + $0x248] sm:$0xfc]  ;;  %v12484_v53 = vld [vmem:[%s14846_s30 + $0x140] sm:$0x1]  ;;  %v10136_v10 = vsel %vm6487_vm5, %v10131_v3, %v10135_v21 }
 0x3fa   : > { %13286 = vmatprep.subr.bf16.mxu0 %v18404_v8  ;;  %v7431_v57 = vsel %vm7323_vm8, %v7425_v2, %v7430_v40  ;;  %v7243_v18 = vld [vmem:[%s14846_s30 + $0x240] sm:$0xfc]  ;;  %v7447_v55 = vrot.slane %v7244_v26, 2  ;;  %v13995_v56 = vld [vmem:[%s14846_s30 + $0x258] sm:$0xff]  ;;  %v10137_v59 = vrot.slane %v12486_v24, 1  ;;  %v13996_v44 = vld [vmem:[%s14846_s30 + $0x250] sm:$0xff] }
 0x3fb   : > { %10424 = vmatmul.mubr.f32.gmra.mrb[26].mxu0 %v10104_v63  ;;  %7731 = vmatmul.mubr.f32.gmra.mrb[54].mxu1 %v7411_v13  ;;  %v10130_v63 = vrot.slane %v12481_v0, 1  ;;  %v7437_v13 = vrot.slane %v7240_v42, 2  ;;  %v10133_v0 = vrot.slane %v12484_v53, 1  ;;  %v7246_v42 = vld [vmem:[%s14846_s30 + $0x268] sm:$0x3]  ;;  %v10145_v54 = vrot.slane %v12491_v14, 1 }
 0x3fc   : > { %10428 = vmatprep.mubr.f32.mxu0 %v10112_v36  ;;  %7735 = vmatprep.mubr.f32.mxu1 %v7419_v9  ;;  %v13993_v36 = vld [vmem:[%s14846_s30 + $0x228] sm:$0xff]  ;;  %v12490_v61 = vld [vmem:[%s14846_s30 + $0x170] sm:$0x1]  ;;  %v7250_v26 = vld [vmem:[%s14846_s30 + $0x298] sm:$0x3] }
 0x3fd   : > { %13288 = vmatpush1.bf16.msra.mxu0 %v13287_v12  ;;  %v7426_v12 = vsel %vm7323_vm8, %v7424_v15, %v7425_v2  ;;  %v7438_v9 = vrot.slane %v13993_v36, 2  ;;  %v10132_v1 = vsel %vm6487_vm5, %v10130_v63, %v10131_v3  ;;  %v10141_v15 = vrot.slane %v17341_v30, 1  ;;  %v12493_v48 = vld [vmem:[%s14846_s30 + $0x188] sm:$0xfe]  ;;  %v17369_v36 = vld [vmem:[%s14846_s30 + $0x198] sm:$0xff]  ;;  %v10978_v50 = vld [vmem:[#allocation10 + $0x8c0] sm:$0xff] }
 0x3fe   : > { %13289 = vmatprep.subr.bf16.mxu0 %v18404_v8  ;;  %v7448_v2 = vrot.slane %v13995_v56, 2  ;;  %v10151_v37 = vrot.slane %v17369_v36, 1  ;;  %v12497_v21 = vld [vmem:[%s14846_s30 + $0x1a8] sm:$0x1]  ;;  %v7252_v14 = vld [vmem:[%s14846_s30 + $0x2a8] sm:$0xfc] }
 0x3ff   : > { %10429 = vmatmul.mubr.f32.gmra.mrb[28].mxu0 %v10109_v11  ;;  %7736 = vmatmul.mubr.f32.gmra.mrb[56].mxu1 %v7416_v45  ;;  %v10970_v45 = vld [vmem:[#allocation10 + $0x880] sm:$0xff]  ;;  %v10971_v11 = vld [vmem:[#allocation10 + $0x888] sm:$0xff] }
 0x400   : > { %10433 = vmatprep.mubr.f32.mxu0 %v10116_v34  ;;  %7740 = vmatprep.mubr.f32.mxu1 %v7423_v46  ;;  %v7439_v34 = vsel %vm7323_vm8, %v7437_v13, %v7438_v9  ;;  %v12487_v46 = vld [vmem:[%s14846_s30 + $0x158] sm:$0xfe]  ;;  %v13302_v23 = vpack.c.bf16 %v10971_v11, %v10970_v45  ;;  %v7449_v3 = vsel %vm7323_vm8, %v7447_v55, %v7448_v2  ;;  %v7452_v13 = vrot.slane %v7246_v42, 2  ;;  %v17396_v56 = vld [vmem:[%s14846_s30 + $0x1c8] sm:$0xff] }
 0x401   : > { %13291 = vmatpush1.bf16.msra.mxu0 %v13290_v51  ;;  %v10128_v51 = vrot.slane %v17325_v5, 1  ;;  %v10146_v11 = vsel %vm6487_vm5, %v10141_v15, %v10145_v54  ;;  %v7462_v55 = vrot.slane %v7250_v26, 2  ;;  %v14000_v26 = vld [vmem:[%s14846_s30 + $0x2b0] sm:$0xff] }
 0x402   : > { %13292 = vmatprep.subr.bf16.mxu0 %v18404_v8  ;;  %v7453_v17 = vsel %vm7323_vm8, %v7448_v2, %v7452_v13  ;;  %v13998_v2 = vld [vmem:[%s14846_s30 + $0x280] sm:$0xff] }
 0x403   : > { %10434 = vmatmul.mubr.f32.gmra.mrb[30].mxu0 %v10114_v20  ;;  %7741 = vmatmul.mubr.f32.gmra.mrb[58].mxu1 %v7421_v35  ;;  %v10129_v20 = vsel %vm6487_vm5, %v10127_v41, %v10128_v51  ;;  %v10140_v35 = vrot.slane %v12487_v46, 1  ;;  %v10134_v40 = vsel %vm6487_vm5, %v10128_v51, %v10133_v0  ;;  %v10976_v41 = vld [vmem:[#allocation10 + $0x8b0] sm:$0xff]  ;;  %v10977_v51 = vld [vmem:[#allocation10 + $0x8b8] sm:$0xff]  ;;  %v10143_v46 = vrot.slane %v12490_v61, 1  ;;  %v17409_v13 = vld [vmem:[%s14846_s30 + $0x1c0] sm:$0xff] }
 0x404   : > { %10438 = vmatprep.mubr.f32.mxu0 %v10122_v43  ;;  %7745 = vmatprep.mubr.f32.mxu1 %v7429_v32  ;;  %v17353_v43 = vld [vmem:[%s14846_s30 + $0x160] sm:$0xff]  ;;  %v7443_v32 = vsel %vm7323_vm8, %v7438_v9, %v7442_v25  ;;  %v7248_v9 = vld [vmem:[%s14846_s30 + $0x278] sm:$0xfc]  ;;  %v7247_v25 = vld [vmem:[%s14846_s30 + $0x270] sm:$0xfc]  ;;  %v13311_v53 = vpack.c.bf16 %v10977_v51, %v10976_v41  ;;  %v7455_v42 = vrot.slane %v13998_v2, 2 }
 0x405   : > { %13294 = vmatpush1.bf16.msra.mxu0 %v13293_v58  ;;  %v7436_v58 = vsel %vm7323_vm8, %v7434_v49, %v7435_v27  ;;  %v10142_v63 = vsel %vm6487_vm5, %v10140_v35, %v10141_v15  ;;  %v7454_v35 = vrot.slane %v7247_v25, 2  ;;  %v7249_v15 = vld [vmem:[%s14846_s30 + $0x290] sm:$0x3]  ;;  %v12499_v0 = vld [vmem:[%s14846_s30 + $0x1b8] sm:$0xfe] }
 0x406   : > { %13295 = vmatprep.subr.bf16.mxu0 %v18404_v8  ;;  %v13999_v61 = vld [vmem:[%s14846_s30 + $0x2b8] sm:$0xff] }
 0x407   : > { %10439 = vmatmul.mubr.f32.gmra.mrb[32].mxu0 %v10119_v52  ;;  %7746 = vmatmul.mubr.f32.gmra.mrb[60].mxu1 %v7426_v12  ;;  %v10138_v52 = vrot.slane %v17353_v43, 1  ;;  %v7441_v12 = vsel %vm7323_vm8, %v7435_v27, %v7440_v22  ;;  %v7457_v27 = vrot.slane %v7248_v9, 2  ;;  %v10979_v22 = vld [vmem:[#allocation10 + $0x8c8] sm:$0xff]  ;;  %v7467_v9 = vrot.slane %v7252_v14, 2  ;;  %v17437_v14 = vld [vmem:[%s14846_s30 + $0x1f0] sm:$0xff] }
 0x408   : > { %10443 = vmatprep.mubr.f32.mxu0 %v10126_v7  ;;  %7750 = vmatprep.mubr.f32.mxu1 %v7433_v19  ;;  %v7245_v7 = vld [vmem:[%s14846_s30 + $0x260] sm:$0x3]  ;;  %v7445_v19 = vrot.slane %v13996_v44, 2  ;;  %v10161_v44 = vrot.slane %v17396_v56, 1 }
 0x409   : > { %13297 = vmatpush1.bf16.msra.mxu0 %v13296_v38  ;;  %v7444_v38 = vrot.slane %v7243_v18, 2  ;;  %v7450_v45 = vrot.slane %v7245_v7, 2  ;;  %v10144_v18 = vsel %vm6487_vm5, %v10138_v52, %v10143_v46  ;;  %v7456_v7 = vsel %vm7323_vm8, %v7454_v35, %v7455_v42 }
 0x40a   : > { %13298 = vmatprep.subr.bf16.mxu0 %v18404_v8 }
 0x40b   : > { %10444 = vmatmul.mubr.f32.gmra.mrb[34].mxu0 %v10124_v60  ;;  %7751 = vmatmul.mubr.f32.gmra.mrb[62].mxu1 %v7431_v57  ;;  %v7446_v49 = vsel %vm7323_vm8, %v7444_v38, %v7445_v19  ;;  %v10139_v60 = vsel %vm6487_vm5, %v10137_v59, %v10138_v52  ;;  %v10150_v57 = vrot.slane %v12493_v48, 1  ;;  %v12496_v38 = vld [vmem:[%s14846_s30 + $0x1a0] sm:$0x1]  ;;  %v7460_v59 = vrot.slane %v7249_v15, 2  ;;  %v7251_v52 = vld [vmem:[%s14846_s30 + $0x2a0] sm:$0xfc] }
 0x40c   : > { %10448 = vmatprep.mubr.f32.mxu0 %v10132_v1  ;;  %7755 = vmatprep.mubr.f32.mxu1 %v7439_v34  ;;  %v12492_v1 = vld [vmem:[%s14846_s30 + $0x180] sm:$0xfe]  ;;  %v17380_v34 = vld [vmem:[%s14846_s30 + $0x190] sm:$0xff]  ;;  %v10153_v54 = vrot.slane %v12496_v38, 1  ;;  %v7464_v51 = vrot.slane %v7251_v52, 2 }
 0x40d   : > { %13300 = vmatpush1.bf16.msra.mxu0 %v13299_v6  ;;  %v13308_v6 = vpack.c.bf16 %v10975_v33, %v10974_v31  ;;  %v10148_v28 = vrot.slane %v17380_v34, 1  ;;  %v10152_v24 = vsel %vm6487_vm5, %v10150_v57, %v10151_v37  ;;  %v10980_v33 = vld [vmem:[#allocation10 + $0x8d0] sm:$0xff]  ;;  %v10158_v57 = vrot.slane %v17409_v13, 1 }
 0x40e   : > { %13301 = vmatprep.subr.bf16.mxu0 %v18404_v8  ;;  %v10984_v15 = vld [vmem:[#allocation10 + $0x8f0] sm:$0xff] }
 0x40f   : > { %10449 = vmatmul.mubr.f32.gmra.mrb[36].mxu0 %v10129_v20  ;;  %7756 = vmatmul.mubr.f32.gmra.mrb[64].mxu1 %v7436_v58  ;;  %v10147_v20 = vrot.slane %v12492_v1, 1  ;;  %v10983_v1 = vld [vmem:[#allocation10 + $0x8e8] sm:$0xff] }
 0x410   : > { %10453 = vmatprep.mubr.f32.mxu0 %v10136_v10  ;;  %7760 = vmatprep.mubr.f32.mxu1 %v7443_v32  ;;  %v7451_v10 = vsel %vm7323_vm8, %v7445_v19, %v7450_v45  ;;  %v12498_v19 = vld [vmem:[%s14846_s30 + $0x1b0] sm:$0xfe]  ;;  %v10154_v45 = vsel %vm6487_vm5, %v10148_v28, %v10153_v54 }
 0x411   : > { %13303 = vmatpush1.bf16.msra.mxu0 %v13302_v23  ;;  %v13997_v23 = vld [vmem:[%s14846_s30 + $0x288] sm:$0xff]  ;;  %v10149_v31 = vsel %vm6487_vm5, %v10147_v20, %v10148_v28  ;;  %v12502_v28 = vld [vmem:[%s14846_s30 + $0x1d0] sm:$0x1] }
 0x412   : > { %13304 = vmatprep.subr.bf16.mxu0 %v18404_v8  ;;  %v7458_v58 = vrot.slane %v13997_v23, 2  ;;  %v12505_v23 = vld [vmem:[%s14846_s30 + $0x1e8] sm:$0xfe] }
 0x413   : > { %10454 = vmatmul.mubr.f32.gmra.mrb[38].mxu0 %v10134_v40  ;;  %7761 = vmatmul.mubr.f32.gmra.mrb[66].mxu1 %v7441_v12  ;;  %v13314_v40 = vpack.c.bf16 %v10979_v22, %v10978_v50  ;;  %v10981_v12 = vld [vmem:[#allocation10 + $0x8d8] sm:$0xff] }
 0x414   : > { %10458 = vmatprep.mubr.f32.mxu0 %v10142_v63  ;;  %7765 = vmatprep.mubr.f32.mxu1 %v7449_v3  ;;  %v7459_v32 = vsel %vm7323_vm8, %v7457_v27, %v7458_v58  ;;  %v10160_v3 = vrot.slane %v12499_v0, 1  ;;  %v7463_v48 = vsel %vm7323_vm8, %v7458_v58, %v7462_v55  ;;  %v13317_v41 = vpack.c.bf16 %v10981_v12, %v10980_v33  ;;  %v7253_v27 = vld [vmem:[%s14846_s30 + $0x2c0] sm:$0x3]  ;;  %v17425_v58 = vld [vmem:[%s14846_s30 + $0x1f8] sm:$0xff] }
 0x415   : > { %13306 = vmatpush1.bf16.msra.mxu0 %v13305_v47  ;;  %v10155_v47 = vrot.slane %v12497_v21, 1  ;;  %v7465_v21 = vrot.slane %v14000_v26, 2  ;;  %v10170_v0 = vrot.slane %v12505_v23, 1  ;;  %v10171_v2 = vrot.slane %v17425_v58, 1 }
 0x416   : > { %13307 = vmatprep.subr.bf16.mxu0 %v18404_v8  ;;  %v10162_v25 = vsel %vm6487_vm5, %v10160_v3, %v10161_v44  ;;  %v10168_v3 = vrot.slane %v17437_v14, 1 }
 0x417   : > { %10459 = vmatmul.mubr.f32.gmra.mrb[40].mxu0 %v10139_v60  ;;  %7766 = vmatmul.mubr.f32.gmra.mrb[68].mxu1 %v7446_v49  ;;  %v10156_v63 = vsel %vm6487_vm5, %v10151_v37, %v10155_v47  ;;  %v7254_v49 = vld [vmem:[%s14846_s30 + $0x2c8] sm:$0x3]  ;;  %v12503_v60 = vld [vmem:[%s14846_s30 + $0x1d8] sm:$0x1]  ;;  %v10982_v37 = vld [vmem:[#allocation10 + $0x8e0] sm:$0xff]  ;;  %v7466_v22 = vsel %vm7323_vm8, %v7464_v51, %v7465_v21 }
 0x418   : > { %10463 = vmatprep.mubr.f32.mxu0 %v10146_v11  ;;  %7770 = vmatprep.mubr.f32.mxu1 %v7453_v17  ;;  %v10157_v11 = vrot.slane %v12498_v19, 1  ;;  %v7461_v17 = vsel %vm7323_vm8, %v7455_v42, %v7460_v59  ;;  %v10165_v20 = vrot.slane %v12503_v60, 1  ;;  %v13320_v50 = vpack.c.bf16 %v10983_v1, %v10982_v37  ;;  %v12504_v42 = vld [vmem:[%s14846_s30 + $0x1e0] sm:$0xfe]  ;;  %v14001_v59 = vld [vmem:[%s14846_s30 + $0x2e8] sm:$0xff] }
 0x419   : > { %13309 = vmatpush1.bf16.msra.mxu0 %v13308_v6  ;;  %v7468_v6 = vrot.slane %v13999_v61, 2  ;;  %v7478_v52 = vrot.slane %v14001_v59, 2  ;;  %v14002_v61 = vld [vmem:[%s14846_s30 + $0x2e0] sm:$0xff]  ;;  %v12511_v60 = vld [vmem:[%s14846_s30 + $0x218] sm:$0xfe] }
 0x41a   : > { %13310 = vmatprep.subr.bf16.mxu0 %v18404_v8  ;;  %v10159_v35 = vsel %vm6487_vm5, %v10157_v11, %v10158_v57  ;;  %v10166_v55 = vsel %vm6487_vm5, %v10161_v44, %v10165_v20  ;;  %v12509_v44 = vld [vmem:[%s14846_s30 + $0x208] sm:$0x1]  ;;  %v12515_v20 = vld [vmem:[%s14846_s30 + $0x238] sm:$0x1] }
 0x41b   : > { %10464 = vmatmul.mubr.f32.gmra.mrb[42].mxu0 %v10144_v18  ;;  %7771 = vmatmul.mubr.f32.gmra.mrb[70].mxu1 %v7451_v10  ;;  %v7469_v46 = vsel %vm7323_vm8, %v7467_v9, %v7468_v6  ;;  %v7256_v18 = vld [vmem:[%s14846_s30 + $0x2d8] sm:$0xfc]  ;;  %v7255_v10 = vld [vmem:[%s14846_s30 + $0x2d0] sm:$0xfc]  ;;  %v10172_v9 = vsel %vm6487_vm5, %v10170_v0, %v10171_v2  ;;  %v10175_v51 = vrot.slane %v12509_v44, 1  ;;  %v12173_v44 = vld [vmem:[%s14846_s30 + $0x68] sm:$0xff] }
 0x41c   : > { %10468 = vmatprep.mubr.f32.mxu0 %v10152_v24  ;;  %7775 = vmatprep.mubr.f32.mxu1 %v7459_v32  ;;  %v10985_v24 = vld [vmem:[#allocation10 + $0x8f8] sm:$0xff]  ;;  %v7470_v32 = vrot.slane %v7253_v27, 2  ;;  %v7477_v38 = vrot.slane %v7256_v18, 2  ;;  %v7474_v12 = vrot.slane %v7255_v10, 2  ;;  %v12517_v10 = vld [vmem:[%s14846_s30 + $0x248] sm:$0xfe] }
 0x41d   : > { %13312 = vmatpush1.bf16.msra.mxu0 %v13311_v53  ;;  %v7472_v53 = vrot.slane %v7254_v49, 2  ;;  %v13323_v33 = vpack.c.bf16 %v10985_v24, %v10984_v15  ;;  %v10176_v1 = vsel %vm6487_vm5, %v10171_v2, %v10175_v51  ;;  %v10185_v15 = vrot.slane %v12515_v20, 1  ;;  %v12514_v24 = vld [vmem:[%s14846_s30 + $0x230] sm:$0x1]  ;;  %v12529_v20 = vld [vmem:[%s14846_s30 + $0x2a8] sm:$0xfe] }
 0x41e   : > { %13313 = vmatprep.subr.bf16.mxu0 %v18404_v8  ;;  %v7471_v19 = vsel %vm7323_vm8, %v7465_v21, %v7470_v32  ;;  %v7479_v54 = vsel %vm7323_vm8, %v7477_v38, %v7478_v52  ;;  %v10190_v2 = vrot.slane %v12517_v10, 1  ;;  %v17482_v38 = vld [vmem:[%s14846_s30 + $0x250] sm:$0xff]  ;;  %v10183_v59 = vrot.slane %v12514_v24, 1 }
 0x41f   : > { %10469 = vmatmul.mubr.f32.gmra.mrb[44].mxu0 %v10149_v31  ;;  %7776 = vmatmul.mubr.f32.gmra.mrb[72].mxu1 %v7456_v7  ;;  %v7473_v47 = vsel %vm7323_vm8, %v7468_v6, %v7472_v53  ;;  %v7258_v31 = vld [vmem:[%s14846_s30 + $0x2f8] sm:$0x3]  ;;  %v7475_v6 = vrot.slane %v14002_v61, 2  ;;  %v12520_v61 = vld [vmem:[%s14846_s30 + $0x260] sm:$0x1]  ;;  %v12176_v24 = vld [vmem:[%s14846_s30 + $0x90] sm:$0xff] }
 0x420   : > { %10473 = vmatprep.mubr.f32.mxu0 %v10156_v63  ;;  %7780 = vmatprep.mubr.f32.mxu1 %v7463_v48  ;;  %v10167_v63 = vrot.slane %v12504_v42, 1  ;;  %v7257_v48 = vld [vmem:[%s14846_s30 + $0x2f0] sm:$0x3]  ;;  %v7482_v49 = vrot.slane %v7258_v31, 2 }
 0x421   : > { %13315 = vmatpush1.bf16.msra.mxu0 %v13314_v40  ;;  %v10163_v40 = vrot.slane %v12502_v28, 1  ;;  %v7476_v11 = vsel %vm7323_vm8, %v7474_v12, %v7475_v6  ;;  %v7480_v37 = vrot.slane %v7257_v48, 2  ;;  %v10188_v12 = vrot.slane %v17482_v38, 1  ;;  %v17495_v48 = vld [vmem:[%s14846_s30 + $0x288] sm:$0xff]  ;;  %v12526_v10 = vld [vmem:[%s14846_s30 + $0x290] sm:$0x1] }
 0x422   : > { %13316 = vmatprep.subr.bf16.mxu0 %v18404_v8  ;;  %v7483_v26 = vsel %vm7323_vm8, %v7478_v52, %v7482_v49  ;;  %v18667_v52 = vld [vmem:[#allocation22_spill] sm:$0xff] }
 0x423   : > { %10474 = vmatmul.mubr.f32.gmra.mrb[46].mxu0 %v10154_v45  ;;  %7781 = vmatmul.mubr.f32.gmra.mrb[74].mxu1 %v7461_v17  ;;  %v10164_v7 = vsel %vm6487_vm5, %v10158_v57, %v10163_v40  ;;  %v12508_v45 = vld [vmem:[%s14846_s30 + $0x200] sm:$0x1]  ;;  %v10169_v57 = vsel %vm6487_vm5, %v10167_v63, %v10168_v3  ;;  %v10180_v17 = vrot.slane %v12511_v60, 1  ;;  %v7481_v28 = vsel %vm7323_vm8, %v7475_v6, %v7480_v37  ;;  %v12171_v40 = vld [vmem:[%s14846_s30 + $0x48] sm:$0xff]  ;;  %v12175_v37 = vld [vmem:[%s14846_s30 + $0x78] sm:$0xff] }
 0x424   : > { %10478 = vmatprep.mubr.f32.mxu0 %v10162_v25  ;;  %7785 = vmatprep.mubr.f32.mxu1 %v7469_v46  ;;  %v12510_v25 = vld [vmem:[%s14846_s30 + $0x210] sm:$0xfe]  ;;  %v17462_v46 = vld [vmem:[%s14846_s30 + $0x220] sm:$0xff]  ;;  %v10173_v21 = vrot.slane %v12508_v45, 1  ;;  %v10201_v45 = vrot.slane %v17495_v48, 1 }
 0x425   : > { %13318 = vmatpush1.bf16.msra.mxu0 %v13317_v41  ;;  %v17453_v41 = vld [vmem:[%s14846_s30 + $0x228] sm:$0xff]  ;;  %v10177_v23 = vrot.slane %v12510_v25, 1  ;;  %v10178_v18 = vrot.slane %v17462_v46, 1  ;;  %v12170_v63 = vld [vmem:[%s14846_s30 + $0x40] sm:$0xff] }
 0x426   : > { %13319 = vmatprep.subr.bf16.mxu0 %v18404_v8  ;;  %v10181_v27 = vrot.slane %v17453_v41, 1  ;;  %v10174_v53 = vsel %vm6487_vm5, %v10168_v3, %v10173_v21  ;;  %v12172_v49 = vld [vmem:[%s14846_s30 + $0x60] sm:$0xff]  ;;  %v12527_v21 = vld [vmem:[%s14846_s30 + $0x298] sm:$0x1] }
 0x427   : > { %10479 = vmatmul.mubr.f32.gmra.mrb[48].mxu0 %v10159_v35  ;;  %7786 = vmatmul.mubr.f32.gmra.mrb[76].mxu1 %v7466_v22  ;;  %v12169_v22 = vld [vmem:[%s14846_s30 + $0x38] sm:$0xff]  ;;  %v10179_v32 = vsel %vm6487_vm5, %v10177_v23, %v10178_v18  ;;  %v10184_v31 = vsel %vm6487_vm5, %v10178_v18, %v10183_v59  ;;  %v18671_v59 = vld [vmem:[#allocation26_spill] sm:$0xff] }
 0x428   : > { %10483 = vmatprep.mubr.f32.mxu0 %v10166_v55  ;;  %7790 = vmatprep.mubr.f32.mxu1 %v7473_v47  ;;  %v17473_v35 = vld [vmem:[%s14846_s30 + $0x258] sm:$0xff]  ;;  %v12168_v55 = vld [vmem:[%s14846_s30 + $0x30] sm:$0xff]  ;;  %v10186_v0 = vsel %vm6487_vm5, %v10181_v27, %v10185_v15  ;;  %v12516_v47 = vld [vmem:[%s14846_s30 + $0x240] sm:$0xfe] }
 0x429   : > { %13321 = vmatpush1.bf16.msra.mxu0 %v13320_v50  ;;  %v10182_v50 = vsel %vm6487_vm5, %v10180_v17, %v10181_v27  ;;  %v10191_v42 = vrot.slane %v17473_v35, 1  ;;  %v18669_v17 = vld [vmem:[#allocation24_spill] sm:$0xff] }
 0x42a   : > { %13322 = vmatprep.subr.bf16.mxu0 %v18404_v8  ;;  %v12177_v18 = vld [vmem:[%s14846_s30 + $0x98] sm:$0xff] }
 0x42b   : > { %10484 = vmatmul.mubr.f32.gmra.mrb[50].mxu0 %v10164_v7  ;;  %7791 = vmatmul.mubr.f32.gmra.mrb[78].mxu1 %v7471_v19  ;;  %v12521_v7 = vld [vmem:[%s14846_s30 + $0x268] sm:$0x1]  ;;  %v10192_v3 = vsel %vm6487_vm5, %v10190_v2, %v10191_v42  ;;  %v12523_v19 = vld [vmem:[%s14846_s30 + $0x278] sm:$0xfe]  ;;  %v12528_v2 = vld [vmem:[%s14846_s30 + $0x2a0] sm:$0xfe] }
 0x42c   : > { %10488 = vmatprep.mubr.f32.mxu0 %v10172_v9  ;;  %7795 = vmatprep.mubr.f32.mxu1 %v7479_v54  ;;  %v18668_v9 = vld [vmem:[#allocation23_spill] sm:$0xff]  ;;  %v10195_v54 = vrot.slane %v12521_v7, 1  ;;  %v10200_v51 = vrot.slane %v12523_v19, 1  ;;  %v12178_v7 = vld [vmem:[%s14846_s30 + $0xa0] sm:$0xff] }
 0x42d   : > { %13324 = vmatpush1.bf16.msra.mxu0 %v13323_v33  ;;  %v10187_v33 = vrot.slane %v12516_v47, 1  ;;  %v12179_v47 = vld [vmem:[%s14846_s30 + $0xa8] sm:$0xff] }
 0x42e   : > { %v10196_v60 = vsel %vm6487_vm5, %v10191_v42, %v10195_v54  ;;  %v10202_v23 = vsel %vm6487_vm5, %v10200_v51, %v10201_v45  ;;  %v17530_v42 = vld [vmem:[%s14846_s30 + $0x2b0] sm:$0xff]  ;;  %v17543_v19 = vld [vmem:[%s14846_s30 + $0x2e8] sm:$0xff]  ;;  %v12532_v54 = vld [vmem:[%s14846_s30 + $0x2c0] sm:$0x1] }
 0x42f   : > { %10489 = vmatmul.mubr.f32.gmra.mrb[52].mxu0 %v10169_v57  ;;  %7796 = vmatmul.mubr.f32.gmra.mrb[80].mxu1 %v7476_v11  ;;  %v10189_v6 = vsel %vm6487_vm5, %v10187_v33, %v10188_v12  ;;  %v12522_v11 = vld [vmem:[%s14846_s30 + $0x270] sm:$0xfe]  ;;  %v17506_v57 = vld [vmem:[%s14846_s30 + $0x280] sm:$0xff]  ;;  %v10208_v33 = vrot.slane %v17530_v42, 1 }
 0x430   : > { %10493 = vmatprep.mubr.f32.mxu0 %v10176_v1  ;;  %7800 = vmatprep.mubr.f32.mxu1 %v7483_v26  ;;  %v10193_v1 = vrot.slane %v12520_v61, 1  ;;  %v10197_v25 = vrot.slane %v12522_v11, 1  ;;  %v10198_v26 = vrot.slane %v17506_v57, 1  ;;  %v18672_v61 = vld [vmem:[#allocation27_spill] sm:$0xff] }
 0x431   : > { %v12534_v11 = vld [vmem:[%s14846_s30 + $0x2d0] sm:$0xfe] }
 0x432   : > { %v10194_v27 = vsel %vm6487_vm5, %v10188_v12, %v10193_v1  ;;  %v10199_v15 = vsel %vm6487_vm5, %v10197_v25, %v10198_v26  ;;  %v12533_v12 = vld [vmem:[%s14846_s30 + $0x2c8] sm:$0x1]  ;;  %v10213_v1 = vrot.slane %v12532_v54, 1  ;;  %v10217_v25 = vrot.slane %v12534_v11, 1  ;;  %v12546_v54 = vld [vmem:[%s14846_s30 + $0x330] sm:$0xfe] }
 0x433   : > { %10494 = vmatmul.mubr.f32.gmra.mrb[54].mxu0 %v10174_v53  ;;  %7801 = vmatmul.mubr.f32.gmra.mrb[82].mxu1 %v7481_v28  ;;  %v12174_v53 = vld [vmem:[%s14846_s30 + $0x70] sm:$0xff]  ;;  %v17519_v28 = vld [vmem:[%s14846_s30 + $0x2b8] sm:$0xff] }
 0x434   : > { %10498 = vmatprep.mubr.f32.mxu0 %v10182_v50  ;;  %7999 = vmatprep.mubr.f32.mxu1 %v12169_v22  ;;  %v18670_v50 = vld [vmem:[#allocation25_spill] sm:$0xff]  ;;  %v10205_v22 = vrot.slane %v12527_v21, 1  ;;  %v12539_v21 = vld [vmem:[%s14846_s30 + $0x2f8] sm:$0x1] }
 0x437   : > { %10499 = vmatmul.mubr.f32.gmra.mrb[56].mxu0 %v10179_v32  ;;  %8000 = vmatmul.mubr.f32.vlgmr.msra.gmra.mrb[20].mxu1 %v12168_v55  ;;  %v10206_v32 = vsel %vm6487_vm5, %v10201_v45, %v10205_v22  ;;  %v10210_v55 = vrot.slane %v12529_v20, 1  ;;  %v10221_v45 = vrot.slane %v17543_v19, 1  ;;  %v10225_v20 = vrot.slane %v12539_v21, 1  ;;  %v18674_v22 = vld [vmem:[#allocation29_spill] sm:$0xff] }
 0x438   : > { %10503 = vmatprep.mubr.f32.mxu0 %v10186_v0  ;;  %8004 = vmatprep.mubr.f32.mxu1 %v12171_v40  ;;  %v10211_v0 = vrot.slane %v17519_v28, 1  ;;  %v10203_v40 = vrot.slane %v12526_v10, 1 }
 0x439   : > { %13341 = vmatpush1.bf16.msra.mxu1 %v18667_v52 }
 0x43a   : > { %13326 = vmatprep.subr.bf16.mxu1 %v18404_v8  ;;  %v10204_v52 = vsel %vm6487_vm5, %v10198_v26, %v10203_v40 }
 0x43b   : > { %10504 = vmatmul.mubr.f32.gmra.mrb[58].mxu0 %v10184_v31  ;;  %8005 = vmatmul.mubr.f32.gmra.mrb[22].mxu1 %v12170_v63  ;;  %v10207_v31 = vrot.slane %v12528_v2, 1  ;;  %v10212_v63 = vsel %vm6487_vm5, %v10210_v55, %v10211_v0  ;;  %v12540_v55 = vld [vmem:[%s14846_s30 + $0x300] sm:$0xfe] }
 0x43c   : > { %10508 = vmatprep.mubr.f32.mxu0 %v10192_v3  ;;  %8009 = vmatprep.mubr.f32.mxu1 %v12173_v44  ;;  %v12181_v3 = vld [vmem:[%s14846_s30 + $0xc8] sm:$0xff]  ;;  %v12535_v44 = vld [vmem:[%s14846_s30 + $0x2d8] sm:$0xfe] }
 0x43d   : > { %13342 = vmatpush1.bf16.msra.mxu1 %v18668_v9  ;;  %v10215_v9 = vrot.slane %v12533_v12, 1  ;;  %v10220_v51 = vrot.slane %v12535_v44, 1  ;;  %v17592_v44 = vld [vmem:[%s14846_s30 + $0x18] sm:$0xff] }
 0x43e   : > { %13327 = vmatprep.subr.bf16.mxu1 %v18404_v8 }
 0x43f   : > { %10509 = vmatmul.mubr.f32.gmra.mrb[60].mxu0 %v10189_v6  ;;  %8010 = vmatmul.mubr.f32.gmra.mrb[24].mxu1 %v12172_v49  ;;  %v10209_v6 = vsel %vm6487_vm5, %v10207_v31, %v10208_v33  ;;  %v12180_v49 = vld [vmem:[%s14846_s30 + $0xc0] sm:$0xff]  ;;  %v12545_v31 = vld [vmem:[%s14846_s30 + $0x328] sm:$0x1] }
 0x440   : > { %10513 = vmatprep.mubr.f32.mxu0 %v10196_v60  ;;  %8014 = vmatprep.mubr.f32.mxu1 %v12175_v37  ;;  %v10216_v60 = vsel %vm6487_vm5, %v10211_v0, %v10215_v9  ;;  %v17554_v37 = vld [vmem:[%s14846_s30 + $0x2e0] sm:$0xff]  ;;  %v17578_v0 = vld [vmem:[%s14846_s30 + $0x310] sm:$0xff]  ;;  %v10241_v9 = vrot.slane %v17592_v44, 1 }
 0x441   : > { %13343 = vmatpush1.bf16.msra.mxu1 %v18669_v17  ;;  %v18673_v17 = vld [vmem:[#allocation28_spill] sm:$0xff]  ;;  %v10218_v26 = vrot.slane %v17554_v37, 1 }
 0x442   : > { %13328 = vmatprep.subr.bf16.mxu1 %v18404_v8 }
 0x443   : > { %10514 = vmatmul.mubr.f32.gmra.mrb[62].mxu0 %v10194_v27  ;;  %8015 = vmatmul.mubr.f32.gmra.mrb[26].mxu1 %v12174_v53  ;;  %v10214_v27 = vsel %vm6487_vm5, %v10208_v33, %v10213_v1  ;;  %v10222_v53 = vsel %vm6487_vm5, %v10220_v51, %v10221_v45  ;;  %v10219_v10 = vsel %vm6487_vm5, %v10217_v25, %v10218_v26  ;;  %v12547_v33 = vld [vmem:[%s14846_s30 + $0x338] sm:$0xfe] }
 0x444   : > { %10518 = vmatprep.mubr.f32.mxu0 %v10202_v23  ;;  %8019 = vmatprep.mubr.f32.mxu1 %v12177_v18  ;;  %v12185_v23 = vld [vmem:[%s14846_s30 + $0xf8] sm:$0xff] }
 0x445   : > { %13344 = vmatpush1.bf16.msra.mxu1 %v18670_v50  ;;  %v17567_v18 = vld [vmem:[%s14846_s30 + $0x318] sm:$0xff]  ;;  %v12538_v50 = vld [vmem:[%s14846_s30 + $0x2f0] sm:$0x1] }
 0x446   : > { %13329 = vmatprep.subr.bf16.mxu1 %v18404_v8  ;;  %v10223_v2 = vrot.slane %v12538_v50, 1 }
 0x447   : > { %10519 = vmatmul.mubr.f32.gmra.mrb[64].mxu0 %v10199_v15  ;;  %8020 = vmatmul.mubr.f32.gmra.mrb[28].mxu1 %v12176_v24  ;;  %v12184_v15 = vld [vmem:[%s14846_s30 + $0xf0] sm:$0xff] }
 0x448   : > { %10523 = vmatprep.mubr.f32.mxu0 %v10206_v32  ;;  %8024 = vmatprep.mubr.f32.mxu1 %v12179_v47  ;;  %v10231_v32 = vrot.slane %v17567_v18, 1  ;;  %v18675_v47 = vld [vmem:[#allocation30_spill] sm:$0xff]  ;;  %v10224_v40 = vsel %vm6487_vm5, %v10218_v26, %v10223_v2  ;;  %v12193_v26 = vld [vmem:[%s14846_s30 + $0x158] sm:$0xff] }
 0x449   : > { %13345 = vmatpush1.bf16.msra.mxu1 %v18671_v59  ;;  %v10227_v59 = vrot.slane %v12540_v55, 1  ;;  %v12555_v2 = vld [vmem:[%s14846_s30 + $0x88] sm:$0x3] }
 0x44a   : > { %13330 = vmatprep.subr.bf16.mxu1 %v18404_v8 }
 0x44b   : > { %10524 = vmatmul.mubr.f32.gmra.mrb[66].mxu0 %v10204_v52  ;;  %8025 = vmatmul.mubr.f32.gmra.mrb[30].mxu1 %v12178_v7  ;;  %v10228_v52 = vrot.slane %v17578_v0, 1  ;;  %v12544_v7 = vld [vmem:[%s14846_s30 + $0x320] sm:$0x1] }
 0x44c   : > { %10528 = vmatprep.mubr.f32.mxu0 %v10212_v63  ;;  %8029 = vmatprep.mubr.f32.mxu1 %v12181_v3  ;;  %v10235_v63 = vrot.slane %v12545_v31, 1  ;;  %v10240_v3 = vrot.slane %v12547_v33, 1  ;;  %v10233_v51 = vrot.slane %v12544_v7, 1  ;;  %v18680_v31 = vld [vmem:[#allocation35_spill] sm:$0xff] }
 0x44d   : > { %13346 = vmatpush1.bf16.msra.mxu1 %v18672_v61  ;;  %v18676_v61 = vld [vmem:[#allocation31_spill] sm:$0xff] }
 0x44e   : > { %13331 = vmatprep.subr.bf16.mxu1 %v18404_v8  ;;  %v10242_v11 = vsel %vm6487_vm5, %v10240_v3, %v10241_v9  ;;  %v10234_v25 = vsel %vm6487_vm5, %v10228_v52, %v10233_v51  ;;  %v14006_v7 = vld [vmem:[%s14846_s30 + $0xa8] sm:$0xff]  ;;  %v12556_v3 = vld [vmem:[%s14846_s30 + $0x90] sm:$0xfc] }
 0x44f   : > { %10529 = vmatmul.mubr.f32.gmra.mrb[68].mxu0 %v10209_v6  ;;  %8030 = vmatmul.mubr.f32.gmra.mrb[32].mxu1 %v12180_v49  ;;  %v10229_v6 = vsel %vm6487_vm5, %v10227_v59, %v10228_v52  ;;  %v12551_v49 = vld [vmem:[%s14846_s30 + $0x358] sm:$0x1]  ;;  %v12557_v59 = vld [vmem:[%s14846_s30 + $0x98] sm:$0xfc]  ;;  %v12554_v52 = vld [vmem:[%s14846_s30 + $0x80] sm:$0x3] }
 0x450   : > { %10533 = vmatprep.mubr.f32.mxu0 %v10216_v60  ;;  %8034 = vmatprep.mubr.f32.mxu1 %v17256_v4  ;;  %v12541_v4 = vld [vmem:[%s14846_s30 + $0x308] sm:$0xfe]  ;;  %v10236_v60 = vsel %vm6487_vm5, %v10231_v32, %v10235_v63  ;;  %v10245_v1 = vrot.slane %v12551_v49, 1  ;;  %v10743_v63 = vrot.slane %v14006_v7, 2  ;;  %v14007_v49 = vld [vmem:[%s14846_s30 + $0xa0] sm:$0xff] }
 0x451   : > { %13347 = vmatpush1.bf16.msra.mxu1 %v18673_v17  ;;  %v10230_v24 = vrot.slane %v12541_v4, 1  ;;  %v12550_v17 = vld [vmem:[%s14846_s30 + $0x350] sm:$0x1]  ;;  %v18678_v4 = vld [vmem:[#allocation33_spill] sm:$0xff]  ;;  %v12567_v7 = vld [vmem:[%s14846_s30 + $0x118] sm:$0x3] }
 0x452   : > { %13332 = vmatprep.subr.bf16.mxu1 %v18404_v8  ;;  %v10243_v21 = vrot.slane %v12550_v17, 1  ;;  %v18682_v17 = vld [vmem:[#allocation37_spill] sm:$0xff] }
 0x453   : > { %10534 = vmatmul.mubr.f32.gmra.mrb[70].mxu0 %v10214_v27  ;;  %8035 = vmatmul.mubr.f32.gmra.mrb[34].mxu1 %v17268_v16  ;;  %v10226_v16 = vsel %vm6487_vm5, %v10221_v45, %v10225_v20  ;;  %v10232_v12 = vsel %vm6487_vm5, %v10230_v24, %v10231_v32  ;;  %v10237_v45 = vrot.slane %v12546_v54, 1  ;;  %v18677_v27 = vld [vmem:[#allocation32_spill] sm:$0xff] }
 0x454   : > { %10538 = vmatprep.mubr.f32.mxu0 %v10222_v53  ;;  %8039 = vmatprep.mubr.f32.mxu1 %v12185_v23  ;;  %v12553_v53 = vld [vmem:[%s14846_s30 + $0x68] sm:$0xfc]  ;;  %v10246_v23 = vsel %vm6487_vm5, %v10241_v9, %v10245_v1  ;;  %v12192_v20 = vld [vmem:[%s14846_s30 + $0x150] sm:$0xff] }
 0x455   : > { %13348 = vmatpush1.bf16.msra.mxu1 %v18674_v22  ;;  %v10732_v50 = vrot.slane %v12553_v53, 2  ;;  %v14004_v22 = vld [vmem:[%s14846_s30 + $0x78] sm:$0xff]  ;;  %v14005_v32 = vld [vmem:[%s14846_s30 + $0x70] sm:$0xff]  ;;  %v12560_v53 = vld [vmem:[%s14846_s30 + $0xc0] sm:$0xfc] }
 0x456   : > { %13333 = vmatprep.subr.bf16.mxu1 %v18404_v8  ;;  %v10730_v55 = vrot.slane %v14005_v32, 2  ;;  %v18681_v54 = vld [vmem:[#allocation36_spill] sm:$0xff]  ;;  %v12558_v1 = vld [vmem:[%s14846_s30 + $0xb0] sm:$0x3]  ;;  %v12562_v32 = vld [vmem:[%s14846_s30 + $0xe0] sm:$0x3] }
 0x457   : > { %10539 = vmatmul.mubr.f32.gmra.mrb[72].mxu0 %v10219_v10  ;;  %8040 = vmatmul.mubr.f32.gmra.mrb[36].mxu1 %v12184_v15  ;;  %v12552_v10 = vld [vmem:[%s14846_s30 + $0x60] sm:$0xfc]  ;;  %v10244_v15 = vsel %vm6487_vm5, %v10241_v9, %v10243_v21 }
 0x458   : > { %10543 = vmatprep.mubr.f32.mxu0 %v10226_v16  ;;  %8044 = vmatprep.mubr.f32.mxu1 %v17285_v29  ;;  %v12189_v29 = vld [vmem:[%s14846_s30 + $0x128] sm:$0xff]  ;;  %v10729_v24 = vrot.slane %v12552_v10, 2 }
 0x459   : > { %13349 = vmatpush1.bf16.msra.mxu1 %v18675_v47  ;;  %v18679_v16 = vld [vmem:[#allocation34_spill] sm:$0xff] }
 0x45a   : > { %13334 = vmatprep.subr.bf16.mxu1 %v18404_v8  ;;  %v10731_v33 = vsel %vm7323_vm8, %v10729_v24, %v10730_v55 }
 0x45b   : > { %10544 = vmatmul.mubr.f32.gmra.mrb[74].mxu0 %v10224_v40  ;;  %8045 = vmatmul.mubr.f32.gmra.mrb[38].mxu1 %v17296_v62  ;;  %v12188_v62 = vld [vmem:[%s14846_s30 + $0x120] sm:$0xff]  ;;  %v12197_v40 = vld [vmem:[%s14846_s30 + $0x188] sm:$0xff] }
 0x45c   : > { %10548 = vmatprep.mubr.f32.mxu0 %v10232_v12  ;;  %8049 = vmatprep.mubr.f32.mxu1 %v12189_v29  ;;  %v12196_v12 = vld [vmem:[%s14846_s30 + $0x180] sm:$0xff] }
 0x45d   : > { %13350 = vmatpush1.bf16.msra.mxu1 %v18676_v61 }
 0x45e   : > { %13335 = vmatprep.subr.bf16.mxu1 %v18404_v8 }
 0x45f   : > { %10549 = vmatmul.mubr.f32.gmra.mrb[76].mxu0 %v10229_v6  ;;  %8050 = vmatmul.mubr.f32.gmra.mrb[40].mxu1 %v12188_v62  ;;  %v10739_v6 = vrot.slane %v12556_v3, 2  ;;  %v10740_v62 = vrot.slane %v14007_v49, 2  ;;  %v12209_v3 = vld [vmem:[%s14846_s30 + $0x218] sm:$0xff]  ;;  %v12208_v49 = vld [vmem:[%s14846_s30 + $0x210] sm:$0xff] }
 0x460   : > { %10553 = vmatprep.mubr.f32.mxu0 %v10236_v60  ;;  %8054 = vmatprep.mubr.f32.mxu1 %v17312_v39  ;;  %v10239_v39 = vsel %vm6487_vm5, %v10237_v45, %v10241_v9  ;;  %v10735_v9 = vrot.slane %v12554_v52, 2  ;;  %v12559_v60 = vld [vmem:[%s14846_s30 + $0xb8] sm:$0x3]  ;;  %v12561_v45 = vld [vmem:[%s14846_s30 + $0xc8] sm:$0xfc] }
 0x461   : > { %13351 = vmatpush1.bf16.msra.mxu1 %v18677_v27  ;;  %v10741_v27 = vsel %vm7323_vm8, %v10739_v6, %v10740_v62  ;;  %v12564_v52 = vld [vmem:[%s14846_s30 + $0xf0] sm:$0xfc] }
 0x462   : > { %13336 = vmatprep.subr.bf16.mxu1 %v18404_v8  ;;  %v10736_v61 = vsel %vm7323_vm8, %v10730_v55, %v10735_v9  ;;  %v12569_v9 = vld [vmem:[%s14846_s30 + $0x128] sm:$0xfc] }
 0x463   : > { %10554 = vmatmul.mubr.f32.gmra.mrb[78].mxu0 %v10234_v25  ;;  %8055 = vmatmul.mubr.f32.gmra.mrb[42].mxu1 %v17325_v5  ;;  %v10733_v5 = vrot.slane %v14004_v22, 2 }
 0x464   : > { %10558 = vmatprep.mubr.f32.mxu0 %v10242_v11  ;;  %8059 = vmatprep.mubr.f32.mxu1 %v12193_v26  ;;  %v10747_v11 = vrot.slane %v12559_v60, 2  ;;  %v10752_v26 = vrot.slane %v12561_v45, 2  ;;  %v10772_v60 = vrot.slane %v12569_v9, 2  ;;  %v12568_v45 = vld [vmem:[%s14846_s30 + $0x120] sm:$0xfc] }
 0x465   : > { %13352 = vmatpush1.bf16.msra.mxu1 %v18678_v4  ;;  %v10734_v47 = vsel %vm7323_vm8, %v10732_v50, %v10733_v5  ;;  %v14009_v50 = vld [vmem:[%s14846_s30 + $0xd0] sm:$0xff] }
 0x466   : > { %13337 = vmatprep.subr.bf16.mxu1 %v18404_v8  ;;  %v10748_v25 = vsel %vm7323_vm8, %v10743_v63, %v10747_v11  ;;  %v10750_v22 = vrot.slane %v14009_v50, 2 }
 0x467   : > { %10559 = vmatmul.mubr.f32.gmra.mrb[80].mxu0 %v10239_v39  ;;  %8060 = vmatmul.mubr.f32.gmra.mrb[44].mxu1 %v12192_v20  ;;  %v14008_v39 = vld [vmem:[%s14846_s30 + $0xd8] sm:$0xff]  ;;  %v10749_v20 = vrot.slane %v12560_v53, 2 }
 0x468   : > { %10563 = vmatprep.mubr.f32.mxu0 %v10246_v23  ;;  %8064 = vmatprep.mubr.f32.mxu1 %v17341_v30  ;;  %v10737_v30 = vrot.slane %v12555_v2, 2  ;;  %v10753_v21 = vrot.slane %v14008_v39, 2  ;;  %v10745_v23 = vrot.slane %v12558_v1, 2  ;;  %v12204_v2 = vld [vmem:[%s14846_s30 + $0x1e0] sm:$0xff]  ;;  %v12213_v39 = vld [vmem:[%s14846_s30 + $0x248] sm:$0xff] }
 0x469   : > { %13353 = vmatpush1.bf16.msra.mxu1 %v18679_v16  ;;  %v12565_v16 = vld [vmem:[%s14846_s30 + $0xf8] sm:$0xfc]  ;;  %v10751_v55 = vsel %vm7323_vm8, %v10749_v20, %v10750_v22  ;;  %v12212_v20 = vld [vmem:[%s14846_s30 + $0x240] sm:$0xff] }
 0x46a   : > { %13338 = vmatprep.subr.bf16.mxu1 %v18404_v8  ;;  %v10738_v29 = vsel %vm7323_vm8, %v10733_v5, %v10737_v30  ;;  %v10746_v4 = vsel %vm7323_vm8, %v10740_v62, %v10745_v23  ;;  %v12563_v5 = vld [vmem:[%s14846_s30 + $0xe8] sm:$0x3]  ;;  %v10754_v10 = vsel %vm7323_vm8, %v10752_v26, %v10753_v21  ;;  %v12570_v23 = vld [vmem:[%s14846_s30 + $0x140] sm:$0x3] }
 0x46b   : > { %10564 = vmatmul.mubr.f32.gmra.mrb[82].mxu0 %v10244_v15  ;;  %8065 = vmatmul.mubr.f32.gmra.mrb[46].mxu1 %v17353_v43  ;;  %v10742_v43 = vrot.slane %v12557_v59, 2  ;;  %v12205_v15 = vld [vmem:[%s14846_s30 + $0x1e8] sm:$0xff]  ;;  %v10757_v24 = vrot.slane %v12563_v5, 2 }
 0x46c   : > { %11050 = vmatprep.mubr.f32.mxu0 %v10734_v47  ;;  %8069 = vmatprep.mubr.f32.mxu1 %v12197_v40  ;;  %v10762_v40 = vrot.slane %v12565_v16, 2  ;;  %v14010_v59 = vld [vmem:[%s14846_s30 + $0x108] sm:$0xff]  ;;  %v10775_v16 = vrot.slane %v12570_v23, 2 }
 0x46d   : > { %13354 = vmatpush1.bf16.msra.mxu1 %v18680_v31  ;;  %v10744_v51 = vsel %vm7323_vm8, %v10742_v43, %v10743_v63  ;;  %v10758_v47 = vsel %vm7323_vm8, %v10753_v21, %v10757_v24  ;;  %v10763_v30 = vrot.slane %v14010_v59, 2  ;;  %v10755_v31 = vrot.slane %v12562_v32, 2  ;;  %v12573_v21 = vld [vmem:[%s14846_s30 + $0x158] sm:$0xfc]  ;;  %v14014_v5 = vld [vmem:[%s14846_s30 + $0x168] sm:$0xff] }
 0x46e   : > { %13339 = vmatprep.subr.bf16.mxu1 %v18404_v8  ;;  %v12217_v59 = vld [vmem:[%s14846_s30 + $0x278] sm:$0xff] }
 0x46f   : > { %11051 = vmatmul.mubr.f32.vlgmr.msra.gmra.mrb[20].mxu0 %v10731_v33  ;;  %8070 = vmatmul.mubr.f32.gmra.mrb[48].mxu1 %v12196_v12  ;;  %v10756_v33 = vsel %vm7323_vm8, %v10750_v22, %v10755_v31  ;;  %v10759_v12 = vrot.slane %v12564_v52, 2  ;;  %v10764_v63 = vsel %vm7323_vm8, %v10762_v40, %v10763_v30  ;;  %v10782_v22 = vrot.slane %v12573_v21, 2  ;;  %v12574_v31 = vld [vmem:[%s14846_s30 + $0x170] sm:$0x3] }
 0x470   : > { %11055 = vmatprep.mubr.f32.mxu0 %v10738_v29  ;;  %8074 = vmatprep.mubr.f32.mxu1 %v17369_v36  ;;  %v12201_v36 = vld [vmem:[%s14846_s30 + $0x1b8] sm:$0xff]  ;;  %v14011_v29 = vld [vmem:[%s14846_s30 + $0x100] sm:$0xff]  ;;  %v10785_v9 = vrot.slane %v12574_v31, 2  ;;  %v10800_v21 = vrot.slane %v17409_v13, 2 }
 0x471   : > { %13355 = vmatpush1.bf16.msra.mxu1 %v18681_v54  ;;  %v10760_v43 = vrot.slane %v14011_v29, 2  ;;  %v10767_v54 = vrot.slane %v12567_v7, 2  ;;  %v14016_v7 = vld [vmem:[%s14846_s30 + $0x198] sm:$0xff]  ;;  %v12586_v31 = vld [vmem:[%s14846_s30 + $0x200] sm:$0x3] }
 0x472   : > { %13340 = vmatprep.subr.bf16.mxu1 %v18404_v8  ;;  %v12200_v8 = vld [vmem:[%s14846_s30 + $0x1b0] sm:$0xff] }
 0x473   : > { %11056 = vmatmul.mubr.f32.gmra.mrb[22].mxu0 %v10736_v61  ;;  %8075 = vmatmul.mubr.f32.gmra.mrb[50].mxu1 %v17380_v34  ;;  %v12566_v61 = vld [vmem:[%s14846_s30 + $0x110] sm:$0x3]  ;;  %v10761_v6 = vsel %vm7323_vm8, %v10759_v12, %v10760_v43  ;;  %v10768_v62 = vsel %vm7323_vm8, %v10763_v30, %v10767_v54  ;;  %v12577_v30 = vld [vmem:[%s14846_s30 + $0x188] sm:$0xfc] }
 0x474   : > { %11060 = vmatprep.mubr.f32.mxu0 %v10744_v51  ;;  %8079 = vmatprep.mubr.f32.mxu1 %v12201_v36  ;;  %v14012_v51 = vld [vmem:[%s14846_s30 + $0x138] sm:$0xff]  ;;  %v10765_v11 = vrot.slane %v12566_v61, 2  ;;  %v12216_v12 = vld [vmem:[%s14846_s30 + $0x270] sm:$0xff] }
 0x475   : > { %13356 = vmatpush1.bf16.msra.mxu1 %v18682_v17  ;;  %v10773_v36 = vrot.slane %v14012_v51, 2  ;;  %v10769_v17 = vrot.slane %v12568_v45, 2  ;;  %v12581_v51 = vld [vmem:[%s14846_s30 + $0x1b8] sm:$0xfc]  ;;  %v12578_v45 = vld [vmem:[%s14846_s30 + $0x1a0] sm:$0x3] }
 0x476   : > { %v10766_v1 = vsel %vm7323_vm8, %v10760_v43, %v10765_v11  ;;  %v10792_v43 = vrot.slane %v12577_v30, 2  ;;  %v12281_v30 = vld [vmem:[%s14846_s30 + $0x1b8] sm:$0xfe] }
 0x477   : > { %11061 = vmatmul.mubr.f32.gmra.mrb[24].mxu0 %v10741_v27  ;;  %8080 = vmatmul.mubr.f32.gmra.mrb[52].mxu1 %v12200_v8  ;;  %v14013_v27 = vld [vmem:[%s14846_s30 + $0x130] sm:$0xff]  ;;  %v10774_v26 = vsel %vm7323_vm8, %v10772_v60, %v10773_v36  ;;  %v12221_v60 = vld [vmem:[%s14846_s30 + $0x2a8] sm:$0xff] }
 0x478   : > { %11065 = vmatprep.mubr.f32.mxu0 %v10748_v25  ;;  %8084 = vmatprep.mubr.f32.mxu1 %v17396_v56  ;;  %v10770_v8 = vrot.slane %v14013_v27, 2  ;;  %v12571_v25 = vld [vmem:[%s14846_s30 + $0x148] sm:$0x3]  ;;  %v10803_v27 = vrot.slane %v17396_v56, 2  ;;  %v12225_v56 = vld [vmem:[%s14846_s30 + $0x2d8] sm:$0xff] }
 0x479   : > { %v10777_v53 = vrot.slane %v12571_v25, 2  ;;  %v10795_v25 = vrot.slane %v12578_v45, 2  ;;  %v12285_v45 = vld [vmem:[%s14846_s30 + $0x1d8] sm:$0x1] }
 0x47a   : > { %v10776_v24 = vsel %vm7323_vm8, %v10770_v8, %v10775_v16  ;;  %v12584_v16 = vld [vmem:[%s14846_s30 + $0x1e0] sm:$0xfc] }
 0x47b   : > { %11066 = vmatmul.mubr.f32.gmra.mrb[26].mxu0 %v10746_v4  ;;  %8085 = vmatmul.mubr.f32.gmra.mrb[54].mxu1 %v17409_v13  ;;  %v10771_v4 = vsel %vm7323_vm8, %v10769_v17, %v10770_v8  ;;  %v10778_v50 = vsel %vm7323_vm8, %v10773_v36, %v10777_v53  ;;  %v10802_v17 = vrot.slane %v12581_v51, 2  ;;  %v12580_v8 = vld [vmem:[%s14846_s30 + $0x1b0] sm:$0xfc]  ;;  %v12583_v53 = vld [vmem:[%s14846_s30 + $0x1d8] sm:$0x3] }
 0x47c   : > { %11070 = vmatprep.mubr.f32.mxu0 %v10754_v10  ;;  %8089 = vmatprep.mubr.f32.mxu1 %v12205_v15  ;;  %v10783_v10 = vrot.slane %v14014_v5, 2  ;;  %v12572_v15 = vld [vmem:[%s14846_s30 + $0x150] sm:$0xfc] }
 0x47d   : > { %v10779_v32 = vrot.slane %v12572_v15, 2  ;;  %v10804_v23 = vsel %vm7323_vm8, %v10802_v17, %v10803_v27  ;;  %v12224_v5 = vld [vmem:[%s14846_s30 + $0x2d0] sm:$0xff]  ;;  %v10813_v15 = vrot.slane %v17425_v58, 2  ;;  %v12287_v17 = vld [vmem:[%s14846_s30 + $0x1e8] sm:$0xfe] }
 0x47e   : > { %v10784_v40 = vsel %vm7323_vm8, %v10782_v22, %v10783_v10 }
 0x47f   : > { %11071 = vmatmul.mubr.f32.gmra.mrb[28].mxu0 %v10751_v55  ;;  %8090 = vmatmul.mubr.f32.gmra.mrb[56].mxu1 %v12204_v2  ;;  %v14015_v55 = vld [vmem:[%s14846_s30 + $0x160] sm:$0xff] }
 0x480   : > { %11075 = vmatprep.mubr.f32.mxu0 %v10758_v47  ;;  %8094 = vmatprep.mubr.f32.mxu1 %v17425_v58  ;;  %v10780_v2 = vrot.slane %v14015_v55, 2  ;;  %v12575_v47 = vld [vmem:[%s14846_s30 + $0x178] sm:$0x3]  ;;  %v10809_v55 = vrot.slane %v12584_v16, 2  ;;  %v12229_v58 = vld [vmem:[%s14846_s30 + $0x308] sm:$0xff] }
 0x481   : > { %v10787_v52 = vrot.slane %v12575_v47, 2  ;;  %v12587_v47 = vld [vmem:[%s14846_s30 + $0x208] sm:$0x3] }
 0x482   : > { %v10786_v54 = vsel %vm7323_vm8, %v10780_v2, %v10785_v9 }
 0x483   : > { %11076 = vmatmul.mubr.f32.gmra.mrb[30].mxu0 %v10756_v33  ;;  %8095 = vmatmul.mubr.f32.gmra.mrb[58].mxu1 %v17437_v14  ;;  %v10781_v33 = vsel %vm7323_vm8, %v10779_v32, %v10780_v2  ;;  %v10788_v29 = vsel %vm7323_vm8, %v10783_v10, %v10787_v52  ;;  %v10810_v2 = vrot.slane %v17437_v14, 2  ;;  %v10817_v52 = vrot.slane %v12587_v47, 2 }
 0x484   : > { %11080 = vmatprep.mubr.f32.mxu0 %v10764_v63  ;;  %8099 = vmatprep.mubr.f32.mxu1 %v12209_v3  ;;  %v10793_v63 = vrot.slane %v14016_v7, 2  ;;  %v12576_v3 = vld [vmem:[%s14846_s30 + $0x180] sm:$0xfc]  ;;  %v12588_v7 = vld [vmem:[%s14846_s30 + $0x210] sm:$0xfc] }
 0x485   : > { %v10789_v61 = vrot.slane %v12576_v3, 2  ;;  %v10818_v14 = vsel %vm7323_vm8, %v10813_v15, %v10817_v52  ;;  %v14017_v3 = vld [vmem:[%s14846_s30 + $0x1c8] sm:$0xff] }
 0x486   : > { %v8468_v9 = vrot.slane %v14017_v3, 1  ;;  %v12596_v3 = vld [vmem:[%s14846_s30 + $0x270] sm:$0xfc] }
 0x487   : > { %11081 = vmatmul.mubr.f32.gmra.mrb[32].mxu0 %v10761_v6  ;;  %8100 = vmatmul.mubr.f32.gmra.mrb[60].mxu1 %v12208_v49  ;;  %v10790_v6 = vrot.slane %v17380_v34, 2  ;;  %v12579_v49 = vld [vmem:[%s14846_s30 + $0x1a8] sm:$0x3] }
 0x488   : > { %11085 = vmatprep.mubr.f32.mxu0 %v10768_v62  ;;  %8104 = vmatprep.mubr.f32.mxu1 %v17453_v41  ;;  %v10794_v62 = vsel %vm7323_vm8, %v10792_v43, %v10793_v63  ;;  %v10797_v36 = vrot.slane %v12579_v49, 2  ;;  %v10823_v43 = vrot.slane %v17453_v41, 2  ;;  %v10819_v49 = vrot.slane %v12588_v7, 2  ;;  %v12591_v41 = vld [vmem:[%s14846_s30 + $0x238] sm:$0x3] }
 0x489   : > { %v10791_v11 = vsel %vm7323_vm8, %v10789_v61, %v10790_v6  ;;  %v10815_v61 = vrot.slane %v12586_v31, 2  ;;  %v12594_v31 = vld [vmem:[%s14846_s30 + $0x260] sm:$0x3] }
 0x48a   : > { %v10798_v34 = vsel %vm7323_vm8, %v10793_v63, %v10797_v36  ;;  %v8467_v63 = vrot.slane %v12281_v30, 1  ;;  %v12597_v30 = vld [vmem:[%s14846_s30 + $0x278] sm:$0xfc] }
 0x48b   : > { %11086 = vmatmul.mubr.f32.gmra.mrb[34].mxu0 %v10766_v1  ;;  %8105 = vmatmul.mubr.f32.gmra.mrb[62].mxu1 %v17462_v46  ;;  %v12220_v1 = vld [vmem:[%s14846_s30 + $0x2a0] sm:$0xff]  ;;  %v10842_v7 = vrot.slane %v12597_v30, 2 }
 0x48c   : > { %11090 = vmatprep.mubr.f32.mxu0 %v10774_v26  ;;  %8109 = vmatprep.mubr.f32.mxu1 %v12213_v39  ;;  %v10796_v26 = vsel %vm7323_vm8, %v10790_v6, %v10795_v25  ;;  %v10799_v39 = vrot.slane %v12580_v8, 2  ;;  %v10816_v6 = vsel %vm7323_vm8, %v10810_v2, %v10815_v61  ;;  %v8472_v8 = vrot.slane %v12285_v45, 1  ;;  %v12284_v25 = vld [vmem:[%s14846_s30 + $0x1d0] sm:$0x1]  ;;  %v14021_v61 = vld [vmem:[%s14846_s30 + $0x228] sm:$0xff] }
 0x48e   : > { %v10801_v22 = vsel %vm7323_vm8, %v10799_v39, %v10800_v21 }
 0x48f   : > { %11091 = vmatmul.mubr.f32.gmra.mrb[36].mxu0 %v10771_v4  ;;  %8110 = vmatmul.mubr.f32.gmra.mrb[64].mxu1 %v12212_v20  ;;  %v12585_v4 = vld [vmem:[%s14846_s30 + $0x1e8] sm:$0xfc]  ;;  %v10807_v20 = vrot.slane %v12583_v53, 2 }
 0x490   : > { %11095 = vmatprep.mubr.f32.mxu0 %v10778_v50  ;;  %8114 = vmatprep.mubr.f32.mxu1 %v17473_v35  ;;  %v12582_v50 = vld [vmem:[%s14846_s30 + $0x1d0] sm:$0x3]  ;;  %v10812_v10 = vrot.slane %v12585_v4, 2  ;;  %v8473_v4 = vsel %vm6487_vm5, %v8468_v9, %v8472_v8  ;;  %v12601_v8 = vld [vmem:[%s14846_s30 + $0x2a8] sm:$0xfc] }
 0x491   : > { %v10808_v13 = vsel %vm7323_vm8, %v10803_v27, %v10807_v20  ;;  %v12590_v27 = vld [vmem:[%s14846_s30 + $0x230] sm:$0x3]  ;;  %v8477_v20 = vrot.slane %v12287_v17, 1  ;;  %v12297_v17 = vld [vmem:[%s14846_s30 + $0x238] sm:$0x1] }
 0x493   : > { %11096 = vmatmul.mubr.f32.gmra.mrb[38].mxu0 %v10776_v24  ;;  %8115 = vmatmul.mubr.f32.gmra.mrb[66].mxu1 %v17482_v38  ;;  %v10805_v24 = vrot.slane %v12582_v50, 2  ;;  %v14019_v50 = vld [vmem:[%s14846_s30 + $0x1f8] sm:$0xff] }
 0x494   : > { %11100 = vmatprep.mubr.f32.mxu0 %v10784_v40  ;;  %8119 = vmatprep.mubr.f32.mxu1 %v12217_v59  ;;  %v10814_v40 = vsel %vm7323_vm8, %v10812_v10, %v10813_v15  ;;  %v12589_v59 = vld [vmem:[%s14846_s30 + $0x218] sm:$0xfc]  ;;  %v8470_v10 = vrot.slane %v12284_v25, 1 }
 0x495   : > { %v10806_v32 = vsel %vm7323_vm8, %v10800_v21, %v10805_v24  ;;  %v12595_v24 = vld [vmem:[%s14846_s30 + $0x268] sm:$0x3] }
 0x496   : > { %v10837_v52 = vrot.slane %v12595_v24, 2 }
 0x497   : > { %11101 = vmatmul.mubr.f32.gmra.mrb[40].mxu0 %v10781_v33  ;;  %8120 = vmatmul.mubr.f32.gmra.mrb[68].mxu1 %v12216_v12  ;;  %v10811_v33 = vsel %vm7323_vm8, %v10809_v55, %v10810_v2  ;;  %v12228_v12 = vld [vmem:[%s14846_s30 + $0x300] sm:$0xff]  ;;  %v14020_v2 = vld [vmem:[%s14846_s30 + $0x1f0] sm:$0xff] }
 0x498   : > { %11105 = vmatprep.mubr.f32.mxu0 %v10788_v29  ;;  %8124 = vmatprep.mubr.f32.mxu1 %v17495_v48  ;;  %v10822_v29 = vrot.slane %v12589_v59, 2  ;;  %v8475_v47 = vrot.slane %v14020_v2, 1 }
 0x49b   : > { %11106 = vmatmul.mubr.f32.gmra.mrb[42].mxu0 %v10786_v54  ;;  %8125 = vmatmul.mubr.f32.gmra.mrb[70].mxu1 %v17506_v57  ;;  %v12280_v54 = vld [vmem:[%s14846_s30 + $0x1b0] sm:$0xfe] }
 0x49c   : > { %11110 = vmatprep.mubr.f32.mxu0 %v10794_v62  ;;  %8129 = vmatprep.mubr.f32.mxu1 %v12221_v60  ;;  %v10820_v62 = vrot.slane %v17462_v46, 2  ;;  %v14018_v60 = vld [vmem:[%s14846_s30 + $0x1c0] sm:$0xff]  ;;  %v8464_v36 = vrot.slane %v12280_v54, 1  ;;  %v10827_v46 = vrot.slane %v12591_v41, 2 }
 0x49d   : > { %v8465_v51 = vrot.slane %v14018_v60, 1 }
 0x49e   : > { %v10828_v21 = vsel %vm7323_vm8, %v10823_v43, %v10827_v46 }
 0x49f   : > { %11111 = vmatmul.mubr.f32.gmra.mrb[44].mxu0 %v10791_v11  ;;  %8130 = vmatmul.mubr.f32.gmra.mrb[72].mxu1 %v12220_v1  ;;  %v10824_v11 = vsel %vm7323_vm8, %v10822_v29, %v10823_v43  ;;  %v8469_v1 = vsel %vm6487_vm5, %v8467_v63, %v8468_v9  ;;  %v8466_v39 = vsel %vm6487_vm5, %v8464_v36, %v8465_v51  ;;  %v10843_v63 = vrot.slane %v17495_v48, 2  ;;  %v12599_v36 = vld [vmem:[%s14846_s30 + $0x298] sm:$0x3] }
 0x4a0   : > { %11115 = vmatprep.mubr.f32.mxu0 %v10798_v34  ;;  %8134 = vmatprep.mubr.f32.mxu1 %v17519_v28  ;;  %v12593_v34 = vld [vmem:[%s14846_s30 + $0x248] sm:$0xfc]  ;;  %v10840_v48 = vrot.slane %v17506_v57, 2  ;;  %v10847_v25 = vrot.slane %v12599_v36, 2  ;;  %v12607_v36 = vld [vmem:[%s14846_s30 + $0x2f8] sm:$0x3] }
 0x4a1   : > { %v10832_v53 = vrot.slane %v12593_v34, 2  ;;  %v10844_v46 = vsel %vm7323_vm8, %v10842_v7, %v10843_v63  ;;  %v12299_v57 = vld [vmem:[%s14846_s30 + $0x248] sm:$0xfe] }
 0x4a3   : > { %11116 = vmatmul.mubr.f32.gmra.mrb[46].mxu0 %v10796_v26  ;;  %8135 = vmatmul.mubr.f32.gmra.mrb[74].mxu1 %v17530_v42  ;;  %v10821_v26 = vsel %vm7323_vm8, %v10819_v49, %v10820_v62  ;;  %v12292_v49 = vld [vmem:[%s14846_s30 + $0x210] sm:$0xfe] }
 0x4a4   : > { %11120 = vmatprep.mubr.f32.mxu0 %v10804_v23  ;;  %8139 = vmatprep.mubr.f32.mxu1 %v12225_v56  ;;  %v10833_v23 = vrot.slane %v17473_v35, 2  ;;  %v12592_v56 = vld [vmem:[%s14846_s30 + $0x240] sm:$0xfc]  ;;  %v10830_v35 = vrot.slane %v17482_v38, 2  ;;  %v12293_v38 = vld [vmem:[%s14846_s30 + $0x218] sm:$0xfe] }
 0x4a5   : > { %v10829_v16 = vrot.slane %v12592_v56, 2  ;;  %v8487_v54 = vrot.slane %v12293_v38, 1  ;;  %v10848_v56 = vsel %vm7323_vm8, %v10843_v63, %v10847_v25  ;;  %v12606_v25 = vld [vmem:[%s14846_s30 + $0x2f0] sm:$0x3] }
 0x4a6   : > { %v10838_v43 = vsel %vm7323_vm8, %v10833_v23, %v10837_v52  ;;  %v12605_v52 = vld [vmem:[%s14846_s30 + $0x2d8] sm:$0xfc] }
 0x4a7   : > { %11121 = vmatmul.mubr.f32.gmra.mrb[48].mxu0 %v10801_v22  ;;  %8140 = vmatmul.mubr.f32.gmra.mrb[76].mxu1 %v12224_v5  ;;  %v8478_v22 = vrot.slane %v14019_v50, 1  ;;  %v12286_v5 = vld [vmem:[%s14846_s30 + $0x1e0] sm:$0xfe]  ;;  %v10862_v63 = vrot.slane %v12605_v52, 2 }
 0x4a8   : > { %11125 = vmatprep.mubr.f32.mxu0 %v10808_v13  ;;  %8144 = vmatprep.mubr.f32.mxu1 %v17543_v19  ;;  %v10825_v13 = vrot.slane %v12590_v27, 2  ;;  %v8474_v55 = vrot.slane %v12286_v5, 1  ;;  %v12600_v50 = vld [vmem:[%s14846_s30 + $0x2a0] sm:$0xfc]  ;;  %v8497_v5 = vrot.slane %v12299_v57, 1  ;;  %v10867_v57 = vrot.slane %v12607_v36, 2 }
 0x4a9   : > { %v8479_v59 = vsel %vm6487_vm5, %v8477_v20, %v8478_v22  ;;  %v10853_v20 = vrot.slane %v17519_v28, 2  ;;  %v10850_v28 = vrot.slane %v17530_v42, 2  ;;  %v12305_v42 = vld [vmem:[%s14846_s30 + $0x278] sm:$0xfe]  ;;  %v12610_v52 = vld [vmem:[%s14846_s30 + $0x320] sm:$0x3] }
 0x4aa   : > { %v10826_v15 = vsel %vm7323_vm8, %v10820_v62, %v10825_v13  ;;  %v8476_v29 = vsel %vm6487_vm5, %v8474_v55, %v8475_v47  ;;  %v10835_v62 = vrot.slane %v12594_v31, 2  ;;  %v14023_v13 = vld [vmem:[%s14846_s30 + $0x258] sm:$0xff]  ;;  %v12603_v55 = vld [vmem:[%s14846_s30 + $0x2c8] sm:$0x3] }
 0x4ab   : > { %11126 = vmatmul.mubr.f32.gmra.mrb[50].mxu0 %v10806_v32  ;;  %8145 = vmatmul.mubr.f32.gmra.mrb[78].mxu1 %v17554_v37  ;;  %v8471_v32 = vsel %vm6487_vm5, %v8465_v51, %v8470_v10  ;;  %v10839_v51 = vrot.slane %v12596_v3, 2  ;;  %v8498_v10 = vrot.slane %v14023_v13, 1  ;;  %v10857_v31 = vrot.slane %v12603_v55, 2  ;;  %v12613_v55 = vld [vmem:[%s14846_s30 + $0x338] sm:$0xfc] }
 0x4ac   : > { %11130 = vmatprep.mubr.f32.mxu0 %v10814_v40  ;;  %8149 = vmatprep.mubr.f32.mxu1 %v12229_v58  ;;  %v12291_v40 = vld [vmem:[%s14846_s30 + $0x208] sm:$0x1]  ;;  %v10834_v58 = vsel %vm7323_vm8, %v10832_v53, %v10833_v23  ;;  %v10836_v60 = vsel %vm7323_vm8, %v10830_v35, %v10835_v62  ;;  %v10863_v3 = vrot.slane %v17543_v19, 2  ;;  %v12304_v62 = vld [vmem:[%s14846_s30 + $0x270] sm:$0xfe]  ;;  %v10860_v19 = vrot.slane %v17554_v37, 2 }
 0x4ad   : > { %v10841_v53 = vsel %vm7323_vm8, %v10839_v51, %v10840_v48  ;;  %v8499_v38 = vsel %vm6487_vm5, %v8497_v5, %v8498_v10  ;;  %v10858_v7 = vsel %vm7323_vm8, %v10853_v20, %v10857_v31  ;;  %v12311_v37 = vld [vmem:[%s14846_s30 + $0x2a8] sm:$0xfe]  ;;  %v12310_v5 = vld [vmem:[%s14846_s30 + $0x2a0] sm:$0xfe]  ;;  %v10865_v13 = vrot.slane %v12606_v25, 2 }
 0x4af   : > { %11131 = vmatmul.mubr.f32.gmra.mrb[52].mxu0 %v10811_v33  ;;  %8150 = vmatmul.mubr.f32.gmra.mrb[80].mxu1 %v12228_v12  ;;  %v8482_v33 = vrot.slane %v12291_v40, 1  ;;  %v12290_v12 = vld [vmem:[%s14846_s30 + $0x200] sm:$0x1]  ;;  %v14024_v40 = vld [vmem:[%s14846_s30 + $0x250] sm:$0xff] }
 0x4b0   : > { %11135 = vmatprep.mubr.f32.mxu0 %v10818_v14  ;;  %8154 = vmatprep.mubr.f32.mxu1 %v17567_v18  ;;  %v10831_v14 = vsel %vm7323_vm8, %v10829_v16, %v10830_v35  ;;  %v8480_v41 = vrot.slane %v12290_v12, 1 }
 0x4b1   : > { %v8483_v9 = vsel %vm6487_vm5, %v8478_v22, %v8482_v33  ;;  %v12602_v33 = vld [vmem:[%s14846_s30 + $0x2c0] sm:$0x3] }
 0x4b2   : > { %v8481_v45 = vsel %vm6487_vm5, %v8475_v47, %v8480_v41  ;;  %v10855_v41 = vrot.slane %v12602_v33, 2  ;;  %v10882_v33 = vrot.slane %v12613_v55, 2 }
 0x4b3   : > { %11136 = vmatmul.mubr.f32.gmra.mrb[54].mxu0 %v10816_v6  ;;  %8155 = vmatmul.mubr.f32.gmra.mrb[82].mxu1 %v17578_v0  ;;  %v8488_v6 = vrot.slane %v14021_v61, 1  ;;  %v8507_v61 = vrot.slane %v12305_v42, 1 }
 0x4b4   : > { %11140 = vmatprep.mubr.f32.mxu0 %v10824_v11  ;;  %8785 = vmatprep.mubr.f32.mxu1 %v8469_v1  ;;  %v8484_v11 = vrot.slane %v12292_v49, 1  ;;  %v14022_v1 = vld [vmem:[%s14846_s30 + $0x220] sm:$0xff]  ;;  %v10856_v51 = vsel %vm7323_vm8, %v10850_v28, %v10855_v41 }
 0x4b5   : > { %v8485_v34 = vrot.slane %v14022_v1, 1  ;;  %v8489_v27 = vsel %vm6487_vm5, %v8487_v54, %v8488_v6  ;;  %v14026_v1 = vld [vmem:[%s14846_s30 + $0x280] sm:$0xff] }
 0x4b7   : > { %11141 = vmatmul.mubr.f32.gmra.mrb[56].mxu0 %v10821_v26  ;;  %8786 = vmatmul.mubr.f32.vlgmr.msra.gmra.mrb[52].mxu1 %v8466_v39  ;;  %v12598_v26 = vld [vmem:[%s14846_s30 + $0x290] sm:$0x3]  ;;  %v8492_v39 = vrot.slane %v12297_v17, 1  ;;  %v8486_v23 = vsel %vm6487_vm5, %v8484_v11, %v8485_v34  ;;  %v8504_v11 = vrot.slane %v12304_v62, 1  ;;  %v12309_v17 = vld [vmem:[%s14846_s30 + $0x298] sm:$0x1] }
 0x4b8   : > { %11145 = vmatprep.mubr.f32.mxu0 %v10828_v21  ;;  %8790 = vmatprep.mubr.f32.mxu1 %v8473_v4  ;;  %v12296_v21 = vld [vmem:[%s14846_s30 + $0x230] sm:$0x1]  ;;  %v10852_v4 = vrot.slane %v12601_v8, 2  ;;  %v10845_v16 = vrot.slane %v12598_v26, 2  ;;  %v12609_v8 = vld [vmem:[%s14846_s30 + $0x308] sm:$0xfc] }
 0x4b9   : > { %v8493_v22 = vsel %vm6487_vm5, %v8488_v6, %v8492_v39  ;;  %v8490_v35 = vrot.slane %v12296_v21, 1  ;;  %v14025_v6 = vld [vmem:[%s14846_s30 + $0x288] sm:$0xff]  ;;  %v8512_v26 = vrot.slane %v12309_v17, 1  ;;  %v12308_v39 = vld [vmem:[%s14846_s30 + $0x290] sm:$0x1] }
 0x4ba   : > { %v10846_v24 = vsel %vm7323_vm8, %v10840_v48, %v10845_v16  ;;  %v10854_v30 = vsel %vm7323_vm8, %v10852_v4, %v10853_v20  ;;  %v8508_v49 = vrot.slane %v14025_v6, 1  ;;  %v10873_v4 = vrot.slane %v17567_v18, 2  ;;  %v12608_v20 = vld [vmem:[%s14846_s30 + $0x300] sm:$0xfc]  ;;  %v12611_v16 = vld [vmem:[%s14846_s30 + $0x328] sm:$0x3] }
 0x4bb   : > { %11146 = vmatmul.mubr.f32.gmra.mrb[58].mxu0 %v10826_v15  ;;  %8791 = vmatmul.mubr.f32.gmra.mrb[54].mxu1 %v8471_v32  ;;  %v12298_v15 = vld [vmem:[%s14846_s30 + $0x240] sm:$0xfe]  ;;  %v10849_v32 = vrot.slane %v12600_v50, 2  ;;  %v8491_v2 = vsel %vm6487_vm5, %v8485_v34, %v8490_v35  ;;  %v8505_v34 = vrot.slane %v14026_v1, 1  ;;  %v14027_v35 = vld [vmem:[%s14846_s30 + $0x2b8] sm:$0xff]  ;;  %v10866_v18 = vsel %vm7323_vm8, %v10860_v19, %v10865_v13 }
 0x4bc   : > { %11150 = vmatprep.mubr.f32.mxu0 %v10834_v58  ;;  %8795 = vmatprep.mubr.f32.mxu1 %v8479_v59  ;;  %v8494_v47 = vrot.slane %v12298_v15, 1  ;;  %v8495_v58 = vrot.slane %v14024_v40, 1  ;;  %v12303_v59 = vld [vmem:[%s14846_s30 + $0x268] sm:$0x1]  ;;  %v8513_v50 = vsel %vm6487_vm5, %v8508_v49, %v8512_v26  ;;  %v12314_v40 = vld [vmem:[%s14846_s30 + $0x2c0] sm:$0x1] }
 0x4bd   : > { %v8502_v12 = vrot.slane %v12303_v59, 1  ;;  %v12315_v15 = vld [vmem:[%s14846_s30 + $0x2c8] sm:$0x1]  ;;  %v10877_v31 = vrot.slane %v12611_v16, 2 }
 0x4bf   : > { %11151 = vmatmul.mubr.f32.gmra.mrb[60].mxu0 %v10831_v14  ;;  %8796 = vmatmul.mubr.f32.gmra.mrb[56].mxu1 %v8476_v29  ;;  %v12302_v14 = vld [vmem:[%s14846_s30 + $0x260] sm:$0x1]  ;;  %v10851_v29 = vsel %vm7323_vm8, %v10849_v32, %v10850_v28  ;;  %v8503_v54 = vsel %vm6487_vm5, %v8498_v10, %v8502_v12  ;;  %v8510_v10 = vrot.slane %v12308_v39, 1  ;;  %v10869_v32 = vrot.slane %v12608_v20, 2 }
 0x4c0   : > { %11155 = vmatprep.mubr.f32.mxu0 %v10838_v43  ;;  %8800 = vmatprep.mubr.f32.mxu1 %v8483_v9  ;;  %v8496_v43 = vsel %vm6487_vm5, %v8494_v47, %v8495_v58  ;;  %v12604_v9 = vld [vmem:[%s14846_s30 + $0x2d0] sm:$0xfc]  ;;  %v10870_v28 = vrot.slane %v17578_v0, 2  ;;  %v8514_v47 = vrot.slane %v12310_v5, 1  ;;  %v10883_v12 = vrot.slane %v17592_v44, 2 }
 0x4c1   : > { %v10859_v48 = vrot.slane %v12604_v9, 2  ;;  %v14028_v0 = vld [vmem:[%s14846_s30 + $0x2b0] sm:$0xff]  ;;  %v10875_v44 = vrot.slane %v12610_v52, 2 }
 0x4c2   : > { %v8515_v42 = vrot.slane %v14028_v0, 1  ;;  %v10884_v62 = vsel %vm7323_vm8, %v10882_v33, %v10883_v12 }
 0x4c3   : > { %11156 = vmatmul.mubr.f32.gmra.mrb[62].mxu0 %v10836_v60  ;;  %8801 = vmatmul.mubr.f32.gmra.mrb[58].mxu1 %v8481_v45  ;;  %v8500_v60 = vrot.slane %v12302_v14, 1  ;;  %v10861_v21 = vsel %vm7323_vm8, %v10859_v48, %v10860_v19  ;;  %v12612_v14 = vld [vmem:[%s14846_s30 + $0x330] sm:$0xfc]  ;;  %v10876_v19 = vsel %vm7323_vm8, %v10870_v28, %v10875_v44 }
 0x4c4   : > { %11160 = vmatprep.mubr.f32.mxu0 %v10844_v46  ;;  %8805 = vmatprep.mubr.f32.mxu1 %v8489_v27  ;;  %v10864_v46 = vsel %vm7323_vm8, %v10862_v63, %v10863_v3  ;;  %v8509_v27 = vsel %vm6487_vm5, %v8507_v61, %v8508_v49  ;;  %v8520_v63 = vrot.slane %v12314_v40, 1  ;;  %v12316_v61 = vld [vmem:[%s14846_s30 + $0x2d0] sm:$0xfe]  ;;  %v10879_v6 = vrot.slane %v12612_v14, 2  ;;  %v12321_v49 = vld [vmem:[%s14846_s30 + $0x2f8] sm:$0x1] }
 0x4c5   : > { %v8501_v45 = vsel %vm6487_vm5, %v8495_v58, %v8500_v60  ;;  %v12614_v60 = vld [vmem:[%s14846_s30 + $0x350] sm:$0x3]  ;;  %v8532_v1 = vrot.slane %v12321_v49, 1 }
 0x4c6   : > { %v8521_v36 = vsel %vm6487_vm5, %v8515_v42, %v8520_v63  ;;  %v10881_v17 = vsel %vm7323_vm8, %v10879_v6, %v10883_v12 }
 0x4c7   : > { %11161 = vmatmul.mubr.f32.gmra.mrb[64].mxu0 %v10841_v53  ;;  %8806 = vmatmul.mubr.f32.gmra.mrb[60].mxu1 %v8486_v23  ;;  %v8506_v53 = vsel %vm6487_vm5, %v8504_v11, %v8505_v34  ;;  %v10868_v23 = vsel %vm7323_vm8, %v10863_v3, %v10867_v57  ;;  %v10878_v3 = vsel %vm7323_vm8, %v10873_v4, %v10877_v31 }
 0x4c8   : > { %11165 = vmatprep.mubr.f32.mxu0 %v10848_v56  ;;  %8810 = vmatprep.mubr.f32.mxu1 %v8493_v22  ;;  %v10872_v56 = vrot.slane %v12609_v8, 2  ;;  %v8517_v22 = vrot.slane %v12311_v37, 1  ;;  %v12323_v37 = vld [vmem:[%s14846_s30 + $0x308] sm:$0xfe] }
 0x4ca   : > { %v10874_v58 = vsel %vm7323_vm8, %v10872_v56, %v10873_v4  ;;  %v12327_v56 = vld [vmem:[%s14846_s30 + $0x328] sm:$0x1]  ;;  %v14031_v4 = vld [vmem:[%s14846_s30 + $0x318] sm:$0xff] }
 0x4cb   : > { %11166 = vmatmul.mubr.f32.gmra.mrb[66].mxu0 %v10846_v24  ;;  %8811 = vmatmul.mubr.f32.gmra.mrb[62].mxu1 %v8491_v2  ;;  %v8518_v24 = vrot.slane %v14027_v35, 1  ;;  %v8511_v2 = vsel %vm6487_vm5, %v8505_v34, %v8510_v10  ;;  %v12320_v34 = vld [vmem:[%s14846_s30 + $0x2f0] sm:$0x1]  ;;  %v8538_v20 = vrot.slane %v14031_v4, 1  ;;  %v8542_v13 = vrot.slane %v12327_v56, 1 }
 0x4cc   : > { %11170 = vmatprep.mubr.f32.mxu0 %v10854_v30  ;;  %8815 = vmatprep.mubr.f32.mxu1 %v8499_v38  ;;  %v8522_v30 = vrot.slane %v12315_v15, 1  ;;  %v12317_v38 = vld [vmem:[%s14846_s30 + $0x2d8] sm:$0xfe]  ;;  %v8530_v26 = vrot.slane %v12320_v34, 1  ;;  %v12326_v10 = vld [vmem:[%s14846_s30 + $0x320] sm:$0x1] }
 0x4cd   : > { %v8519_v59 = vsel %vm6487_vm5, %v8517_v22, %v8518_v24  ;;  %v14032_v15 = vld [vmem:[%s14846_s30 + $0x310] sm:$0xff] }
 0x4ce   : > { %v8523_v9 = vsel %vm6487_vm5, %v8518_v24, %v8522_v30  ;;  %v8535_v16 = vrot.slane %v14032_v15, 1  ;;  %v8540_v24 = vrot.slane %v12326_v10, 1 }
 0x4cf   : > { %11171 = vmatmul.mubr.f32.gmra.mrb[68].mxu0 %v10851_v29  ;;  %8816 = vmatmul.mubr.f32.gmra.mrb[64].mxu1 %v8496_v43  ;;  %v10871_v29 = vsel %vm7323_vm8, %v10869_v32, %v10870_v28  ;;  %v12615_v43 = vld [vmem:[%s14846_s30 + $0x358] sm:$0x3] }
 0x4d0   : > { %11175 = vmatprep.mubr.f32.mxu0 %v10858_v7  ;;  %8820 = vmatprep.mubr.f32.mxu1 %v8503_v54  ;;  %v8516_v7 = vsel %vm6487_vm5, %v8514_v47, %v8515_v42  ;;  %v8527_v54 = vrot.slane %v12317_v38, 1  ;;  %v10887_v41 = vrot.slane %v12615_v43, 2  ;;  %v8541_v32 = vsel %vm6487_vm5, %v8535_v16, %v8540_v24 }
 0x4d2   : > { %v10888_v57 = vsel %vm7323_vm8, %v10883_v12, %v10887_v41 }
 0x4d3   : > { %11176 = vmatmul.mubr.f32.gmra.mrb[70].mxu0 %v10856_v51  ;;  %8821 = vmatmul.mubr.f32.gmra.mrb[66].mxu1 %v8501_v45  ;;  %v14029_v51 = vld [vmem:[%s14846_s30 + $0x2e8] sm:$0xff]  ;;  %v8524_v45 = vrot.slane %v12316_v61, 1 }
 0x4d4   : > { %11180 = vmatprep.mubr.f32.mxu0 %v10864_v46  ;;  %8825 = vmatprep.mubr.f32.mxu1 %v8509_v27  ;;  %v8528_v48 = vrot.slane %v14029_v51, 1  ;;  %v10885_v46 = vrot.slane %v12614_v60, 2  ;;  %v14030_v27 = vld [vmem:[%s14846_s30 + $0x2e0] sm:$0xff] }
 0x4d5   : > { %v8525_v8 = vrot.slane %v14030_v27, 1 }
 0x4d6   : > { %v8529_v11 = vsel %vm6487_vm5, %v8527_v54, %v8528_v48  ;;  %v8533_v39 = vsel %vm6487_vm5, %v8528_v48, %v8532_v1 }
 0x4d7   : > { %11181 = vmatmul.mubr.f32.gmra.mrb[72].mxu0 %v10861_v21  ;;  %8826 = vmatmul.mubr.f32.gmra.mrb[68].mxu1 %v8506_v53  ;;  %v8526_v25 = vsel %vm6487_vm5, %v8524_v45, %v8525_v8  ;;  %v8537_v21 = vrot.slane %v12323_v37, 1  ;;  %v12322_v53 = vld [vmem:[%s14846_s30 + $0x300] sm:$0xfe] }
 0x4d8   : > { %11185 = vmatprep.mubr.f32.mxu0 %v10868_v23  ;;  %8830 = vmatprep.mubr.f32.mxu1 %v8513_v50  ;;  %v10886_v23 = vsel %vm7323_vm8, %v10883_v12, %v10885_v46  ;;  %v8531_v50 = vsel %vm6487_vm5, %v8525_v8, %v8530_v26  ;;  %v8534_v22 = vrot.slane %v12322_v53, 1 }
 0x4d9   : > { %v8539_v5 = vsel %vm6487_vm5, %v8537_v21, %v8538_v20 }
 0x4da   : > { %v8536_v35 = vsel %vm6487_vm5, %v8534_v22, %v8535_v16 }
 0x4db   : > { %11186 = vmatmul.mubr.f32.gmra.mrb[74].mxu0 %v10866_v18  ;;  %8831 = vmatmul.mubr.f32.gmra.mrb[70].mxu1 %v8511_v2  ;;  %v8543_v18 = vsel %vm6487_vm5, %v8538_v20, %v8542_v13 }
 0x4dc   : > { %11190 = vmatprep.mubr.f32.mxu0 %v10874_v58  ;;  %8835 = vmatprep.mubr.f32.mxu1 %v8519_v59 }
 0x4df   : > { %11191 = vmatmul.mubr.f32.gmra.mrb[76].mxu0 %v10871_v29  ;;  %8836 = vmatmul.mubr.f32.gmra.mrb[72].mxu1 %v8516_v7 }
 0x4e0   : > { %11195 = vmatprep.mubr.f32.mxu0 %v10878_v3  ;;  %8840 = vmatprep.mubr.f32.mxu1 %v8523_v9 }
 0x4e3   : > { %11196 = vmatmul.mubr.f32.gmra.mrb[78].mxu0 %v10876_v19  ;;  %8841 = vmatmul.mubr.f32.gmra.mrb[74].mxu1 %v8521_v36 }
 0x4e4   : > { %11200 = vmatprep.mubr.f32.mxu0 %v10884_v62  ;;  %8845 = vmatprep.mubr.f32.mxu1 %v8529_v11 }
 0x4e7   : > { %11201 = vmatmul.mubr.f32.gmra.mrb[80].mxu0 %v10881_v17  ;;  %8846 = vmatmul.mubr.f32.gmra.mrb[76].mxu1 %v8526_v25 }
 0x4e8   : > { %11205 = vmatprep.mubr.f32.mxu0 %v10888_v57  ;;  %8850 = vmatprep.mubr.f32.mxu1 %v8533_v39 }
 0x4eb   : > { %11206 = vmatmul.mubr.f32.gmra.mrb[82].mxu0 %v10886_v23  ;;  %8851 = vmatmul.mubr.f32.gmra.mrb[78].mxu1 %v8531_v50 }
 0x4ec   : > { %8855 = vmatprep.mubr.f32.mxu1 %v8539_v5 }
 0x4ef   : > { %8856 = vmatmul.mubr.f32.gmra.mrb[80].mxu1 %v8536_v35 }
 0x4f0   : > { %8860 = vmatprep.mubr.f32.mxu1 %v8543_v18 }
 0x4f3   : > { %8861 = vmatmul.mubr.f32.gmra.mrb[82].mxu1 %v8541_v32 }
 0x50a   : > { %v8001_v28 = vpop.f32.mrb[20].mxu1 }
 0x50b   : > { %v8003_v55 = vpop.f32.mrb[21].mxu1 }
 0x50e   : > { %v8006_v2 = vpop.f32.mrb[22].mxu1 }
 0x50f   : > { %v8008_v47 = vpop.f32.mrb[23].mxu1 }
 0x512   : > { %v8011_v40 = vpop.f32.mrb[24].mxu1 }
 0x513   : > { %v8013_v58 = vpop.f32.mrb[25].mxu1 }
 0x516   : > { %v8016_v59 = vpop.f32.mrb[26].mxu1 }
 0x517   : > { %v8018_v30 = vpop.f32.mrb[27].mxu1 }
 0x51a   : > { %v8021_v38 = vpop.f32.mrb[28].mxu1 }
 0x51b   : > { %v8023_v52 = vpop.f32.mrb[29].mxu1 }
 0x51e   : > { %v8026_v0 = vpop.f32.mrb[30].mxu1 }
 0x51f   : > { %v8028_v42 = vpop.f32.mrb[31].mxu1 }
 0x522   : > { %v17900_v31 = vpop.f32.mrb[32].mxu1 }
 0x523   : > { %v8033_v33 = vpop.f32.mrb[33].mxu1 }
 0x526   : > { %v17902_v12 = vpop.f32.mrb[34].mxu1 }
 0x527   : > { %v8038_v14 = vpop.f32.mrb[35].mxu1 }
 0x52a   : > { %v17904_v29 = vpop.f32.mrb[36].mxu1 }
 0x52b   : > { %v8043_v43 = vpop.f32.mrb[37].mxu1 }
 0x52e   : > { %v17906_v7 = vpop.f32.mrb[38].mxu1 }
 0x52f   : > { %v8048_v63 = vpop.f32.mrb[39].mxu1 }
 0x532   : > { %v17908_v3 = vpop.f32.mrb[40].mxu1 }
 0x533   : > { %v8053_v9 = vpop.f32.mrb[41].mxu1 }
 0x536   : > { %v17910_v54 = vpop.f32.mrb[42].mxu1 }
 0x537   : > { %v8058_v61 = vpop.f32.mrb[43].mxu1 }
 0x53a   : > { %v17912_v44 = vpop.f32.mrb[44].mxu1 }
 0x53b   : > { %v8063_v6 = vpop.f32.mrb[45].mxu1 }
 0x53e   : > { %v17914_v49 = vpop.f32.mrb[46].mxu1 }
 0x53f   : > { %v8068_v62 = vpop.f32.mrb[47].mxu1 }
 0x542   : > { %v11052_v41 = vpop.f32.mrb[20].mxu0  ;;  %v17917_v60 = vpop.f32.mrb[48].mxu1 }
 0x543   : > { %v13357_v51 = vadd.f32 %v11052_v41, %v8001_v28  ;;  %v11054_v48 = vpop.f32.mrb[21].mxu0  ;;  %v8073_v19 = vpop.f32.mrb[49].mxu1 }
 0x545   : > { %11243 = vst [vmem:[%s17919_s23] sm:$0xff] %v13357_v51  ;;  %v11313_v17 = vmul.f32 %v13357_v51, %v13357_v51 }
 0x546   : > { %v11057_v36 = vpop.f32.mrb[22].mxu0  ;;  %v17922_v45 = vpop.f32.mrb[50].mxu1 }
 0x547   : > { %v13358_v11 = vadd.f32 %v11057_v36, %v8006_v2  ;;  %v11059_v1 = vpop.f32.mrb[23].mxu0  ;;  %v8078_v34 = vpop.f32.mrb[51].mxu1 }
 0x549   : > { %11244 = vst [vmem:[%s17919_s23 + $0x8] sm:$0xff] %v13358_v11  ;;  %v11275_v46 = vadd.f32 %v13358_v11, %v13357_v51  ;;  %v11314_v27 = vmul.f32 %v13358_v11, %v13358_v11 }
 0x54a   : > { %v11062_v8 = vpop.f32.mrb[24].mxu0 }
 0x54b   : > { %v11345_v37 = vadd.f32 %v11314_v27, %v11313_v17  ;;  %v13359_v57 = vadd.f32 %v11062_v8, %v8011_v40  ;;  %v11064_v25 = vpop.f32.mrb[25].mxu0 }
 0x54d   : > { %11245 = vst [vmem:[%s17919_s23 + $0x10] sm:$0xff] %v13359_v57  ;;  %v11276_v26 = vadd.f32 %v13359_v57, %v11275_v46  ;;  %v11315_v39 = vmul.f32 %v13359_v57, %v13359_v57 }
 0x54e   : > { %v11067_v21 = vpop.f32.mrb[26].mxu0 }
 0x54f   : > { %v11346_v53 = vadd.f32 %v11345_v37, %v11315_v39  ;;  %v13360_v23 = vadd.f32 %v11067_v21, %v8016_v59  ;;  %v11069_v56 = vpop.f32.mrb[27].mxu0 }
 0x551   : > { %11246 = vst [vmem:[%s17919_s23 + $0x18] sm:$0xff] %v13360_v23  ;;  %v11277_v4 = vadd.f32 %v13360_v23, %v11276_v26  ;;  %v11316_v20 = vmul.f32 %v13360_v23, %v13360_v23 }
 0x552   : > { %v11072_v50 = vpop.f32.mrb[28].mxu0 }
 0x553   : > { %v11347_v22 = vadd.f32 %v11346_v53, %v11316_v20  ;;  %v13361_v5 = vadd.f32 %v11072_v50, %v8021_v38  ;;  %v11074_v13 = vpop.f32.mrb[29].mxu0 }
 0x555   : > { %11247 = vst [vmem:[%s17919_s23 + $0x20] sm:$0xff] %v13361_v5  ;;  %v11278_v10 = vadd.f32 %v13361_v5, %v11277_v4  ;;  %v11317_v15 = vmul.f32 %v13361_v5, %v13361_v5 }
 0x556   : > { %v11077_v16 = vpop.f32.mrb[30].mxu0 }
 0x557   : > { %v11348_v35 = vadd.f32 %v11347_v22, %v11317_v15  ;;  %v13362_v24 = vadd.f32 %v11077_v16, %v8026_v0  ;;  %v11079_v18 = vpop.f32.mrb[31].mxu0 }
 0x559   : > { %11248 = vst [vmem:[%s17919_s23 + $0x28] sm:$0xff] %v13362_v24  ;;  %v11279_v32 = vadd.f32 %v13362_v24, %v11278_v10  ;;  %v11318_v28 = vmul.f32 %v13362_v24, %v13362_v24 }
 0x55a   : > { %v11082_v55 = vpop.f32.mrb[32].mxu0 }
 0x55b   : > { %v11349_v2 = vadd.f32 %v11348_v35, %v11318_v28  ;;  %v13363_v47 = vadd.f32 %v11082_v55, %v17900_v31  ;;  %v11084_v40 = vpop.f32.mrb[33].mxu0 }
 0x55d   : > { %11249 = vst [vmem:[%s17919_s23 + $0x30] sm:$0xff] %v13363_v47  ;;  %v11280_v58 = vadd.f32 %v13363_v47, %v11279_v32  ;;  %v11319_v59 = vmul.f32 %v13363_v47, %v13363_v47 }
 0x55e   : > { %v11087_v30 = vpop.f32.mrb[34].mxu0 }
 0x55f   : > { %v11350_v38 = vadd.f32 %v11349_v2, %v11319_v59  ;;  %v13364_v52 = vadd.f32 %v11087_v30, %v17902_v12  ;;  %v11089_v0 = vpop.f32.mrb[35].mxu0 }
 0x561   : > { %11250 = vst [vmem:[%s17919_s23 + $0x38] sm:$0xff] %v13364_v52  ;;  %v11281_v42 = vadd.f32 %v13364_v52, %v11280_v58  ;;  %v11320_v33 = vmul.f32 %v13364_v52, %v13364_v52 }
 0x562   : > { %v11092_v14 = vpop.f32.mrb[36].mxu0 }
 0x563   : > { %v11351_v43 = vadd.f32 %v11350_v38, %v11320_v33  ;;  %v13365_v63 = vadd.f32 %v11092_v14, %v17904_v29  ;;  %v11094_v31 = vpop.f32.mrb[37].mxu0 }
 0x565   : > { %11251 = vst [vmem:[%s17919_s23 + $0x40] sm:$0xff] %v13365_v63  ;;  %v11282_v9 = vadd.f32 %v13365_v63, %v11281_v42  ;;  %v11321_v61 = vmul.f32 %v13365_v63, %v13365_v63 }
 0x566   : > { %v11097_v6 = vpop.f32.mrb[38].mxu0 }
 0x567   : > { %v11352_v62 = vadd.f32 %v11351_v43, %v11321_v61  ;;  %v13366_v41 = vadd.f32 %v11097_v6, %v17906_v7  ;;  %v11099_v12 = vpop.f32.mrb[39].mxu0 }
 0x569   : > { %11252 = vst [vmem:[%s17919_s23 + $0x48] sm:$0xff] %v13366_v41  ;;  %v11283_v51 = vadd.f32 %v13366_v41, %v11282_v9  ;;  %v11322_v48 = vmul.f32 %v13366_v41, %v13366_v41 }
 0x56a   : > { %v11102_v19 = vpop.f32.mrb[40].mxu0 }
 0x56b   : > { %v11353_v36 = vadd.f32 %v11352_v62, %v11322_v48  ;;  %v13367_v11 = vadd.f32 %v11102_v19, %v17908_v3  ;;  %v11104_v29 = vpop.f32.mrb[41].mxu0 }
 0x56d   : > { %11253 = vst [vmem:[%s17919_s23 + $0x50] sm:$0xff] %v13367_v11  ;;  %v11284_v1 = vadd.f32 %v13367_v11, %v11283_v51  ;;  %v11323_v34 = vmul.f32 %v13367_v11, %v13367_v11 }
 0x56e   : > { %v11107_v17 = vpop.f32.mrb[42].mxu0 }
 0x56f   : > { %v11354_v46 = vadd.f32 %v11353_v36, %v11323_v34  ;;  %v13368_v27 = vadd.f32 %v11107_v17, %v17910_v54  ;;  %v11109_v7 = vpop.f32.mrb[43].mxu0 }
 0x571   : > { %11254 = vst [vmem:[%s17919_s23 + $0x58] sm:$0xff] %v13368_v27  ;;  %v11285_v8 = vadd.f32 %v13368_v27, %v11284_v1  ;;  %v11324_v37 = vmul.f32 %v13368_v27, %v13368_v27 }
 0x572   : > { %v11112_v57 = vpop.f32.mrb[44].mxu0 }
 0x573   : > { %v11355_v25 = vadd.f32 %v11354_v46, %v11324_v37  ;;  %v13369_v26 = vadd.f32 %v11112_v57, %v17912_v44  ;;  %v11114_v3 = vpop.f32.mrb[45].mxu0 }
 0x575   : > { %11255 = vst [vmem:[%s17919_s23 + $0x60] sm:$0xff] %v13369_v26  ;;  %v11286_v39 = vadd.f32 %v13369_v26, %v11285_v8  ;;  %v11325_v21 = vmul.f32 %v13369_v26, %v13369_v26 }
 0x576   : > { %v11117_v53 = vpop.f32.mrb[46].mxu0 }
 0x577   : > { %v11356_v23 = vadd.f32 %v11355_v25, %v11325_v21  ;;  %v13370_v56 = vadd.f32 %v11117_v53, %v17914_v49  ;;  %v11119_v54 = vpop.f32.mrb[47].mxu0 }
 0x579   : > { %11256 = vst [vmem:[%s17919_s23 + $0x68] sm:$0xff] %v13370_v56  ;;  %v11287_v4 = vadd.f32 %v13370_v56, %v11286_v39  ;;  %v11326_v20 = vmul.f32 %v13370_v56, %v13370_v56 }
 0x57a   : > { %v11122_v50 = vpop.f32.mrb[48].mxu0 }
 0x57b   : > { %v11357_v22 = vadd.f32 %v11356_v23, %v11326_v20  ;;  %v13371_v5 = vadd.f32 %v11122_v50, %v17917_v60  ;;  %v11124_v13 = vpop.f32.mrb[49].mxu0 }
 0x57d   : > { %11257 = vst [vmem:[%s17919_s23 + $0x70] sm:$0xff] %v13371_v5  ;;  %v11288_v44 = vadd.f32 %v13371_v5, %v11287_v4  ;;  %v11327_v10 = vmul.f32 %v13371_v5, %v13371_v5 }
 0x57e   : > { %v11127_v15 = vpop.f32.mrb[50].mxu0 }
 0x57f   : > { %v11358_v16 = vadd.f32 %v11357_v22, %v11327_v10  ;;  %v13372_v35 = vadd.f32 %v11127_v15, %v17922_v45  ;;  %v11129_v24 = vpop.f32.mrb[51].mxu0 }
 0x581   : > { %11258 = vst [vmem:[%s17919_s23 + $0x78] sm:$0xff] %v13372_v35  ;;  %v11289_v49 = vadd.f32 %v13372_v35, %v11288_v44  ;;  %v11328_v18 = vmul.f32 %v13372_v35, %v13372_v35 }
 0x582   : > { %v11132_v32 = vpop.f32.mrb[52].mxu0 }
 0x583   : > { %v11359_v28 = vadd.f32 %v11358_v16, %v11328_v18  ;;  %v11134_v55 = vpop.f32.mrb[53].mxu0 }
 0x586   : > { %v11137_v2 = vpop.f32.mrb[54].mxu0 }
 0x587   : > { %v11139_v47 = vpop.f32.mrb[55].mxu0 }
 0x58a   : > { %v11142_v60 = vpop.f32.mrb[56].mxu0  ;;  %v8787_v40 = vpop.f32.mrb[52].mxu1 }
 0x58b   : > { %v11144_v58 = vpop.f32.mrb[57].mxu0  ;;  %v8789_v59 = vpop.f32.mrb[53].mxu1  ;;  %v13373_v30 = vadd.f32 %v11132_v32, %v8787_v40 }
 0x58d   : > { %11259 = vst [vmem:[%s17919_s23 + $0x80] sm:$0xff] %v13373_v30  ;;  %v11290_v38 = vadd.f32 %v13373_v30, %v11289_v49  ;;  %v11329_v52 = vmul.f32 %v13373_v30, %v13373_v30 }
 0x58e   : > { %v11147_v45 = vpop.f32.mrb[58].mxu0  ;;  %v8792_v0 = vpop.f32.mrb[54].mxu1 }
 0x58f   : > { %v11149_v42 = vpop.f32.mrb[59].mxu0  ;;  %v8794_v33 = vpop.f32.mrb[55].mxu1  ;;  %v11360_v14 = vadd.f32 %v11359_v28, %v11329_v52  ;;  %v13374_v43 = vadd.f32 %v11137_v2, %v8792_v0 }
 0x591   : > { %11260 = vst [vmem:[%s17919_s23 + $0x88] sm:$0xff] %v13374_v43  ;;  %v11291_v63 = vadd.f32 %v13374_v43, %v11290_v38  ;;  %v11330_v31 = vmul.f32 %v13374_v43, %v13374_v43 }
 0x592   : > { %v11152_v9 = vpop.f32.mrb[60].mxu0  ;;  %v8797_v61 = vpop.f32.mrb[56].mxu1 }
 0x593   : > { %v11154_v6 = vpop.f32.mrb[61].mxu0  ;;  %v8799_v62 = vpop.f32.mrb[57].mxu1  ;;  %v11361_v41 = vadd.f32 %v11360_v14, %v11330_v31  ;;  %v13375_v12 = vadd.f32 %v11142_v60, %v8797_v61 }
 0x595   : > { %11261 = vst [vmem:[%s17919_s23 + $0x90] sm:$0xff] %v13375_v12  ;;  %v11292_v51 = vadd.f32 %v13375_v12, %v11291_v63  ;;  %v11331_v48 = vmul.f32 %v13375_v12, %v13375_v12 }
 0x596   : > { %v11157_v19 = vpop.f32.mrb[62].mxu0  ;;  %v8802_v36 = vpop.f32.mrb[58].mxu1 }
 0x597   : > { %v11159_v11 = vpop.f32.mrb[63].mxu0  ;;  %v8804_v29 = vpop.f32.mrb[59].mxu1  ;;  %v11362_v1 = vadd.f32 %v11361_v41, %v11331_v48  ;;  %v13376_v34 = vadd.f32 %v11147_v45, %v8802_v36 }
 0x599   : > { %11262 = vst [vmem:[%s17919_s23 + $0x98] sm:$0xff] %v13376_v34  ;;  %v11293_v17 = vadd.f32 %v13376_v34, %v11292_v51  ;;  %v11332_v46 = vmul.f32 %v13376_v34, %v13376_v34 }
 0x59a   : > { %v11162_v27 = vpop.f32.mrb[64].mxu0  ;;  %v8807_v7 = vpop.f32.mrb[60].mxu1 }
 0x59b   : > { %v11164_v8 = vpop.f32.mrb[65].mxu0  ;;  %v8809_v37 = vpop.f32.mrb[61].mxu1  ;;  %v11363_v57 = vadd.f32 %v11362_v1, %v11332_v46  ;;  %v13377_v25 = vadd.f32 %v11152_v9, %v8807_v7 }
 0x59d   : > { %11263 = vst [vmem:[%s17919_s23 + $0xa0] sm:$0xff] %v13377_v25  ;;  %v11294_v26 = vadd.f32 %v13377_v25, %v11293_v17  ;;  %v11333_v3 = vmul.f32 %v13377_v25, %v13377_v25 }
 0x59e   : > { %v11167_v39 = vpop.f32.mrb[66].mxu0  ;;  %v8812_v21 = vpop.f32.mrb[62].mxu1 }
 0x59f   : > { %v11169_v53 = vpop.f32.mrb[67].mxu0  ;;  %v8814_v23 = vpop.f32.mrb[63].mxu1  ;;  %v11364_v56 = vadd.f32 %v11363_v57, %v11333_v3  ;;  %v13378_v54 = vadd.f32 %v11157_v19, %v8812_v21 }
 0x5a1   : > { %11264 = vst [vmem:[%s17919_s23 + $0xa8] sm:$0xff] %v13378_v54  ;;  %v11295_v4 = vadd.f32 %v13378_v54, %v11294_v26  ;;  %v11334_v20 = vmul.f32 %v13378_v54, %v13378_v54 }
 0x5a2   : > { %v11172_v50 = vpop.f32.mrb[68].mxu0  ;;  %v8817_v22 = vpop.f32.mrb[64].mxu1 }
 0x5a3   : > { %v11174_v5 = vpop.f32.mrb[69].mxu0  ;;  %v8819_v13 = vpop.f32.mrb[65].mxu1  ;;  %v11365_v44 = vadd.f32 %v11364_v56, %v11334_v20  ;;  %v13379_v10 = vadd.f32 %v11162_v27, %v8817_v22 }
 0x5a5   : > { %11265 = vst [vmem:[%s17919_s23 + $0xb0] sm:$0xff] %v13379_v10  ;;  %v11296_v15 = vadd.f32 %v13379_v10, %v11295_v4  ;;  %v11335_v16 = vmul.f32 %v13379_v10, %v13379_v10 }
 0x5a6   : > { %v11177_v35 = vpop.f32.mrb[70].mxu0  ;;  %v8822_v24 = vpop.f32.mrb[66].mxu1 }
 0x5a7   : > { %v11179_v49 = vpop.f32.mrb[71].mxu0  ;;  %v8824_v18 = vpop.f32.mrb[67].mxu1  ;;  %v11366_v32 = vadd.f32 %v11365_v44, %v11335_v16  ;;  %v13380_v28 = vadd.f32 %v11167_v39, %v8822_v24 }
 0x5a9   : > { %11266 = vst [vmem:[%s17919_s23 + $0xb8] sm:$0xff] %v13380_v28  ;;  %v11297_v55 = vadd.f32 %v13380_v28, %v11296_v15  ;;  %v11336_v2 = vmul.f32 %v13380_v28, %v13380_v28 }
 0x5aa   : > { %v11182_v47 = vpop.f32.mrb[72].mxu0  ;;  %v8827_v60 = vpop.f32.mrb[68].mxu1 }
 0x5ab   : > { %v11184_v40 = vpop.f32.mrb[73].mxu0  ;;  %v8829_v58 = vpop.f32.mrb[69].mxu1  ;;  %v11367_v59 = vadd.f32 %v11366_v32, %v11336_v2  ;;  %v13381_v30 = vadd.f32 %v11172_v50, %v8827_v60 }
 0x5ad   : > { %11267 = vst [vmem:[%s17919_s23 + $0xc0] sm:$0xff] %v13381_v30  ;;  %v11298_v38 = vadd.f32 %v13381_v30, %v11297_v55  ;;  %v11337_v52 = vmul.f32 %v13381_v30, %v13381_v30 }
 0x5ae   : > { %v11187_v45 = vpop.f32.mrb[74].mxu0  ;;  %v8832_v0 = vpop.f32.mrb[70].mxu1 }
 0x5af   : > { %v11189_v42 = vpop.f32.mrb[75].mxu0  ;;  %v8834_v33 = vpop.f32.mrb[71].mxu1  ;;  %v11368_v14 = vadd.f32 %v11367_v59, %v11337_v52  ;;  %v13382_v43 = vadd.f32 %v11177_v35, %v8832_v0 }
 0x5b1   : > { %11268 = vst [vmem:[%s17919_s23 + $0xc8] sm:$0xff] %v13382_v43  ;;  %v11299_v63 = vadd.f32 %v13382_v43, %v11298_v38  ;;  %v11338_v31 = vmul.f32 %v13382_v43, %v13382_v43 }
 0x5b2   : > { %v11192_v9 = vpop.f32.mrb[76].mxu0  ;;  %v8837_v61 = vpop.f32.mrb[72].mxu1 }
 0x5b3   : > { %v11194_v6 = vpop.f32.mrb[77].mxu0  ;;  %v8839_v62 = vpop.f32.mrb[73].mxu1  ;;  %v11369_v41 = vadd.f32 %v11368_v14, %v11338_v31  ;;  %v13383_v12 = vadd.f32 %v11182_v47, %v8837_v61 }
 0x5b5   : > { %11269 = vst [vmem:[%s17919_s23 + $0xd0] sm:$0xff] %v13383_v12  ;;  %v11300_v51 = vadd.f32 %v13383_v12, %v11299_v63  ;;  %v11339_v48 = vmul.f32 %v13383_v12, %v13383_v12 }
 0x5b6   : > { %v11197_v19 = vpop.f32.mrb[78].mxu0  ;;  %v8842_v36 = vpop.f32.mrb[74].mxu1 }
 0x5b7   : > { %v11199_v11 = vpop.f32.mrb[79].mxu0  ;;  %v8844_v29 = vpop.f32.mrb[75].mxu1  ;;  %v11370_v1 = vadd.f32 %v11369_v41, %v11339_v48  ;;  %v13384_v34 = vadd.f32 %v11187_v45, %v8842_v36 }
 0x5b9   : > { %11270 = vst [vmem:[%s17919_s23 + $0xd8] sm:$0xff] %v13384_v34  ;;  %v11301_v17 = vadd.f32 %v13384_v34, %v11300_v51  ;;  %v11340_v46 = vmul.f32 %v13384_v34, %v13384_v34 }
 0x5ba   : > { %v11202_v27 = vpop.f32.mrb[80].mxu0  ;;  %v8847_v7 = vpop.f32.mrb[76].mxu1 }
 0x5bb   : > { %v11204_v8 = vpop.f32.mrb[81].mxu0  ;;  %v8849_v37 = vpop.f32.mrb[77].mxu1  ;;  %v11371_v57 = vadd.f32 %v11370_v1, %v11340_v46  ;;  %v13385_v25 = vadd.f32 %v11192_v9, %v8847_v7 }
 0x5bd   : > { %11271 = vst [vmem:[%s17919_s23 + $0xe0] sm:$0xff] %v13385_v25  ;;  %v11302_v26 = vadd.f32 %v13385_v25, %v11301_v17  ;;  %v11341_v3 = vmul.f32 %v13385_v25, %v13385_v25 }
 0x5be   : > { %v11207_v39 = vpop.f32.mrb[82].mxu0  ;;  %v8852_v21 = vpop.f32.mrb[78].mxu1 }
 0x5bf   : > { %v11209_v53 = vpop.f32.mrb[83].mxu0  ;;  %v8854_v23 = vpop.f32.mrb[79].mxu1  ;;  %v11372_v56 = vadd.f32 %v11371_v57, %v11341_v3  ;;  %v13386_v54 = vadd.f32 %v11197_v19, %v8852_v21 }
 0x5c1   : > { %11272 = vst [vmem:[%s17919_s23 + $0xe8] sm:$0xff] %v13386_v54  ;;  %v11303_v4 = vadd.f32 %v13386_v54, %v11302_v26  ;;  %v11342_v20 = vmul.f32 %v13386_v54, %v13386_v54 }
 0x5c2   : > { %v8857_v50 = vpop.f32.mrb[80].mxu1 }
 0x5c3   : > { %v8859_v22 = vpop.f32.mrb[81].mxu1  ;;  %v11373_v5 = vadd.f32 %v11372_v56, %v11342_v20  ;;  %v13387_v13 = vadd.f32 %v11202_v27, %v8857_v50 }
 0x5c5   : > { %11273 = vst [vmem:[%s17919_s23 + $0xf0] sm:$0xff] %v13387_v13  ;;  %v11304_v44 = vadd.f32 %v13387_v13, %v11303_v4  ;;  %v11343_v10 = vmul.f32 %v13387_v13, %v13387_v13 }
 0x5c6   : > { %v8862_v15 = vpop.f32.mrb[82].mxu1 }
 0x5c7   : > { %v8864_v16 = vpop.f32.mrb[83].mxu1  ;;  %v11374_v35 = vadd.f32 %v11373_v5, %v11343_v10  ;;  %v13388_v24 = vadd.f32 %v11207_v39, %v8862_v15 }
 0x5c9   : > { %11274 = vst [vmem:[%s17919_s23 + $0xf8] sm:$0xff] %v13388_v24  ;;  %v11305_v49 = vadd.f32 %v13388_v24, %v11304_v44  ;;  %v11344_v18 = vmul.f32 %v13388_v24, %v13388_v24 }
 0x5ca   : > { %14188 = shalt.err (!%p14185_p9)
}
 0x5cb   : > { %s14189_s26 = scalar_lea.hbm %s17969_s29, 4096  ;;  %s14193_s23 = scalar_lea.hbm %s18094_s8, 8192 }
 0x5cc   : > { %p14190_p0 = scmp.ne.s32.totalorder %s17969_s29, %s14189_s26  ;;  %p14194_p8 = scmp.lt.u32.totalorder %s17969_s29, %s18094_s8 }
 0x5cd   : > { %p14195_p6 = scmp.lt.u32.totalorder %s14193_s23, %s14189_s26  ;;  %p14197_p5 = scmp.lt.u32.totalorder %s14189_s26, %s17969_s29 }
 0x5ce   : > { %p14191_p11 = pnand %p14190_p0, %p14550_p10 }
 0x5cf   : > { %p14196_p3 = por %p14195_p6, %p14194_p8 }
 0x5d0   : > { %p14192_p4 = pneg %p14191_p11 }
 0x5d1   : > { %p14198_p7 = por %p14197_p5, %p14196_p3 }
 0x5d3   : > { %p14199_p12 = pnand %p14198_p7, %p14192_p4 }
 0x5d5   : > { %14202 = shalt.err (!%p14199_p12)
}
 0x5d6   : > { %s14324_s22 = smov 128   ;;  %s14325_s28 = smov 8   ;;  %v11306_v32 = vrot.slane %v11305_v49, 4  ;;  %v11375_v28 = vadd.f32 %v11374_v35, %v11344_v18 }
 0x5d7   : > { %13857 = dma.vmem_to_hbm [thread:$0]  (%p14550_p10), %s17971_s9, 4096, %s17969_s29, %s11389_s27, %s14324_s22, %s14324_s22, %s14325_s28  }
 0x5d8   : > { %v11307_v55 = vadd.f32 %v11306_v32, %v11305_v49  ;;  %v11376_v2 = vrot.slane %v11375_v28, 4  ;;  %s11393_s21 = sand.u32 1, %s14404_s17   ;;  %s12619_s25 = sshll.u32 %s14404_s17, 4 }
 0x5d9   : > { %s467_s13 = scalar_lea.vmem [#allocation12], %s14605_s10  ;;  %s18272_s30 = scalar_lea.vmem [#allocation14], %s14605_s10 }
 0x5da   : > { %v11308_v47 = vrot.slane %v11307_v55, 2  ;;  %v11377_v60 = vadd.f32 %v11376_v2, %v11375_v28  ;;  %s11429_s26 = sshll.u32 %s467_s13, 4  ;;  %s11442_s19 = sshll.u32 %s18272_s30, 4  ;;  %s18009_s26 = int_to_ptr.vmem [resolvable:$true] %s11429_s26  ;;  %s18016_s19 = int_to_ptr.vmem [resolvable:$true] %s11442_s19 }
 0x5db   : > { %s18683_s27 = sld [smem:[#allocation85_spill]]  ;;  %s18684_s24 = sld [smem:[#allocation86_spill]] }
 0x5dc   : > { %v11309_v40 = vadd.f32 %v11308_v47, %v11307_v55  ;;  %v11378_v58 = vrot.slane %v11377_v60, 2  ;;  %s18018_s28 = scalar_lea.sflag [#allocation13], %s11393_s21  ;;  %s14203_s30 = scalar_lea.vmem %s18009_s26, 16 }
 0x5dd   : > { %p14204_p2 = scmp.ne.s32.totalorder %s18009_s26, %s14203_s30  ;;  %s14326_s9 = smov [#allocation12]  }
 0x5de   : > { %v11310_v59 = vrot.slane %v11309_v40, 1  ;;  %v11379_v30 = vadd.f32 %v11378_v58, %v11377_v60  ;;  %s14207_s29 = sshll.u32 %s14326_s9, 4  ;;  %s14208_s29 = int_to_ptr.vmem [resolvable:$false] %s14207_s29 }
 0x5df   : > { %p14205_p1 = pnand %p14204_p2, %p14550_p10  ;;  %s14209_s0 = scalar_lea.vmem %s14208_s29, 32 }
 0x5e0   : > { %v11380_v38 = vrot.slane %v11379_v30, 1  ;;  %v11311_v52 = vadd.f32 %v11310_v59, %v11309_v40  ;;  %p14210_p9 = scmp.lt.s32.totalorder %s18009_s26, %s14208_s29  ;;  %p14211_p0 = scmp.lt.s32.totalorder %s14209_s0, %s14203_s30 }
 0x5e1   : > { %s18007_s23 = scalar_lea.hbm %s18683_s27, %s12619_s25  ;;  %s18014_s22 = scalar_lea.hbm %s18684_s24, %s12619_s25 }
 0x5e2   : > { %11312 = vst [vmem:[%s467_s13] sm:$0x1] %v11311_v52  ;;  %v11381_v45 = vadd.f32 %v11380_v38, %v11379_v30  ;;  %p14206_p13 = pneg %p14205_p1  ;;  %p14212_p11 = por %p14211_p0, %p14210_p9 }
 0x5e4   : > { %p14213_p4 = pnand %p14212_p11, %p14206_p13 }
 0x5e6   : > { %14216 = shalt.err (!%p14213_p4)
}
 0x5e7   : > { %s14217_s21 = scalar_lea.hbm %s18007_s23, 16  ;;  %s14221_s17 = scalar_lea.hbm %s18683_s27, 32 }
 0x5e8   : > { %p14218_p8 = scmp.ne.s32.totalorder %s18007_s23, %s14217_s21  ;;  %p14222_p5 = scmp.lt.u32.totalorder %s18007_s23, %s18683_s27 }
 0x5e9   : > { %p14223_p7 = scmp.lt.u32.totalorder %s14221_s17, %s14217_s21  ;;  %p14225_p2 = scmp.lt.u32.totalorder %s14217_s21, %s18007_s23 }
 0x5ea   : > { %p14219_p6 = pnand %p14218_p8, %p14550_p10 }
 0x5eb   : > { %p14224_p12 = por %p14223_p7, %p14222_p5 }
 0x5ec   : > { %p14220_p3 = pneg %p14219_p6 }
 0x5ed   : > { %p14226_p1 = por %p14225_p2, %p14224_p12 }
 0x5ef   : > { %p14227_p13 = pnand %p14226_p1, %p14220_p3 }
 0x5f1   : > { %14230 = shalt.err (!%p14227_p13)
}
 0x5f2   : > { %13858 = dma.vmem_to_hbm [thread:$0]  (%p14550_p10), %s18009_s26, 16, %s18007_s23, %s18018_s28  }
 0x5f3   : > { %s18685_s0 = scalar_lea.vmem [#allocation14], %s14605_s10  ;;  %s14231_s30 = scalar_lea.vmem %s18016_s19, 16 }
 0x5f4   : > { %11382 = vst [vmem:[%s18685_s0] sm:$0x1] %v11381_v45  ;;  %p14232_p9 = scmp.ne.s32.totalorder %s18016_s19, %s14231_s30  ;;  %s14327_s29 = smov [#allocation14]  }
 0x5f5   : > { %s14235_s21 = sshll.u32 %s14327_s29, 4  ;;  %s14236_s21 = int_to_ptr.vmem [resolvable:$false] %s14235_s21 }
 0x5f6   : > { %p14233_p0 = pnand %p14232_p9, %p14550_p10  ;;  %s14237_s25 = scalar_lea.vmem %s14236_s21, 32 }
 0x5f7   : > { %p14238_p4 = scmp.lt.s32.totalorder %s18016_s19, %s14236_s21  ;;  %p14239_p8 = scmp.lt.s32.totalorder %s14237_s25, %s14231_s30 }
 0x5f8   : > { %p14234_p11 = pneg %p14233_p0 }
 0x5f9   : > { %p14240_p6 = por %p14239_p8, %p14238_p4 }
 0x5fb   : > { %p14241_p3 = pnand %p14240_p6, %p14234_p11 }
 0x5fd   : > { %14244 = shalt.err (!%p14241_p3)
}
 0x5fe   : > { %s14245_s10 = scalar_lea.hbm %s18014_s22, 16  ;;  %s14249_s13 = scalar_lea.hbm %s18684_s24, 32 }
 0x5ff   : > { %p14246_p5 = scmp.ne.s32.totalorder %s18014_s22, %s14245_s10  ;;  %p14250_p2 = scmp.lt.u32.totalorder %s18014_s22, %s18684_s24 }
 0x600   : > { %p14251_p1 = scmp.lt.u32.totalorder %s14249_s13, %s14245_s10  ;;  %p14253_p9 = scmp.lt.u32.totalorder %s14245_s10, %s18014_s22 }
 0x601   : > { %p14247_p7 = pnand %p14246_p5, %p14550_p10 }
 0x602   : > { %p14252_p13 = por %p14251_p1, %p14250_p2 }
 0x603   : > { %p14248_p12 = pneg %p14247_p7 }
 0x604   : > { %p14254_p0 = por %p14253_p9, %p14252_p13 }
 0x606   : > { %p14255_p11 = pnand %p14254_p0, %p14248_p12 }
 0x608   : > { %14258 = shalt.err (!%p14255_p11)
}
 0x609   : > { %13859 = dma.vmem_to_hbm [thread:$0]  (%p14550_p10), %s18016_s19, 16, %s18014_s22, %s18018_s28  }
 0x60a PF: > { %s18686_s9 = sld [smem:[#allocation20_spill]]  ;;  %s18687_s0 = sld [smem:[#allocation21_spill]] }
 0x60b   : > { %p18689_p8 = scmp.ge.s32.totalorder %s14309_s16, 2 }
 0x610   : > { %s11462_s30 = sand.u32 1, %s18686_s9   ;;  %p18688_p4 = scmp.ne.s32.totalorder %s18687_s0, 0 }
 0x611   : > { %s11463_s29 = scalar_lea.sflag [#allocation4], %s11462_s30 }
 0x612   : > { %p13881_p6 = pnand %p18689_p8, %p18688_p4 }
 0x614   : > { %14288 = dma.done.wait (!%p13881_p6), %s11463_s29, 4096  }
 0x615   : > { %14290 = vsyncadd (!%p13881_p6), %s11463_s29, 4294963200  ;;  %s18690_s21 = sadd.s32 4294967294, %s14309_s16  }
 0x616   : > { %s11471_s25 = sand.u32 1, %s18690_s21  }
 0x617   : > { %s11472_s10 = scalar_lea.sflag [#allocation13], %s11471_s25 }
 0x618   : > { %14292 = dma.done.wait (!%p13881_p6), %s11472_s10, 32  }
 0x619   : > { %14294 = vsyncadd (!%p13881_p6), %s11472_s10, 4294967264  ;;  %p29_p10 = scmp.ge.s32.totalorder %s14540_s18, 4   ;;  %s18691_s13 = smov %s14301_s14 }
 0x61a   : > { %s18692_s14 = smov %s14305_s15  ;;  %s18693_s15 = smov %s14556_s12 }
 0x61b   : > { %s18694_s16 = smov %s14540_s18  ;;  %31 = sbr.rel (!%p29_p10) target bundleno = 13 (0xd), region = 220 }
 0x622   :  { %11484 = vsyncpa [#allocation3], 1 }
 0x623   :  { %11486 = vsyncpa [#allocation3 + $0x1], 1 }
 0x624   :  { %11487 = vsyncpa [#allocation6], 1 }
 0x625   :  { %11488 = vsyncpa [#allocation9], 1 }
 0x626   :  { %11489 = vsyncpa [#allocation4], 1 }
 0x627   :  { %11491 = vsyncpa [#allocation4 + $0x1], 1 }
 0x628   :  { %11492 = vsyncpa [#allocation13], 1 }
 0x629   :  { %11494 = vsyncpa [#allocation13 + $0x1], 1 }

</bundles_post_ra>
